<compile_context>
chip_gen: v5e
topology: v5e:2x2
jax: 0.10.0
libtpu: 0.0.40
codegen_flags: <defaults>
</compile_context>

<pallas_src>
import jax
import jax.numpy as jnp
from jax import lax
from jax.experimental import pallas as pl
from jax.experimental.pallas import tpu as pltpu

STATIC_SIZE = 2
DYNAMIC_SIZE = 2


# --------------------------------------------------------------------------
# Single fused kernel: encoders + hoisted projections + critic + decode loop
# --------------------------------------------------------------------------
def _agent_kernel(
        # data
        sx_ref, sy_ref, loads0_ref, demands0_ref, decx0_ref, decy0_ref,
        # pointer-net weights
        esw_ref, esb_ref, dw_ref, db_ref,
        wih_ref, whh_ref, bih_ref, bhh_ref,
        awspw1_ref, awdf_ref, awbf_ref, awr_ref, avt_ref,
        pw2_ref, pvt_ref,
        # critic weights
        csw_ref, csb_ref, cdw_ref, cdb_ref,
        w1a_ref, w1b_ref, b1_ref, w2_ref, b2_ref, w3_ref, b3_ref,
        # outputs
        tours_ref, logp_ref, vals_ref):
    B, S = sx_ref.shape
    H = awr_ref.shape[0]
    n_steps = tours_ref.shape[1]
    f32 = jnp.float32

    sx = sx_ref[...]                                                 # (B,S)
    sy = sy_ref[...]
    loads0 = loads0_ref[...]
    demands0 = demands0_ref[...]

    # ---------------- static 1x1-conv encoder (K=2 VPU FMAs) ---------------
    sh = (sx[:, :, None] * esw_ref[0:1, :]
          + sy[:, :, None] * esw_ref[1:2, :] + esb_ref[...])         # (B,S,H)

    # ---------------- hoisted projections: ONE (B*S,H)@(H,2H) matmul -------
    proj = jnp.dot(sh.reshape(B * S, H), awspw1_ref[...],
                   preferred_element_type=f32).reshape(B, S, 2 * H)
    satt = proj[:, :, 0:H]                                           # (B,S,H)
    sptr = proj[:, :, H:2 * H]                                       # (B,S,H)

    # ---------------- fused StateCritic ------------------------------------
    csh = (sx[:, :, None] * csw_ref[0:1, :]
           + sy[:, :, None] * csw_ref[1:2, :] + csb_ref[...])
    cdh = (loads0[:, :, None] * cdw_ref[0:1, :]
           + demands0[:, :, None] * cdw_ref[1:2, :] + cdb_ref[...])
    o = jax.nn.relu(
        jnp.dot(csh.reshape(B * S, H), w1a_ref[...],
                preferred_element_type=f32)
        + jnp.dot(cdh.reshape(B * S, H), w1b_ref[...],
                  preferred_element_type=f32)
        + b1_ref[...])
    o = jax.nn.relu(jnp.dot(o, w2_ref[...], preferred_element_type=f32)
                    + b2_ref[...])
    osum = jnp.sum(o.reshape(B, S, -1), axis=1)                      # (B,20)
    # fc3 per position then summed over seq == (sum o) . w3 + S * b3
    vals_ref[...] = (jnp.sum(osum * w3_ref[...], axis=1, keepdims=True)
                     + S * b3_ref[...])

    # ---------------- greedy decode: fully unrolled in-kernel loop ---------
    col_iota = lax.broadcasted_iota(jnp.int32, (B, S), 1)
    depot_only = (col_iota == 0).astype(f32)
    col0 = col_iota == 0
    out_iota = lax.broadcasted_iota(jnp.int32, (B, n_steps), 1)

    def step_body(step, carry):
        h, mask, loads, demands, decx, decy, tours, logp_acc = carry

        # decoder 1x1-conv (K=2 FMAs)
        x = decx * dw_ref[0:1, :] + decy * dw_ref[1:2, :] + db_ref[...]

        # fused GRU cell: two (B,H)@(H,3H) matmuls; gates at lanes 0/H/2H
        gi = (jnp.dot(x, wih_ref[...], preferred_element_type=f32)
              + bih_ref[...])
        gh = (jnp.dot(h, whh_ref[...], preferred_element_type=f32)
              + bhh_ref[...])
        r = jax.nn.sigmoid(gi[:, 0:H] + gh[:, 0:H])
        z = jax.nn.sigmoid(gi[:, H:2 * H] + gh[:, H:2 * H])
        n = jnp.tanh(gi[:, 2 * H:3 * H] + r * gh[:, 2 * H:3 * H])
        hnew = (1.0 - z) * n + z * h                                 # (B,H)

        # encoder attention (dynamic encoder folded into awdf/awbf)
        dyn_att = (loads[:, :, None] * awdf_ref[0:1, :]
                   + demands[:, :, None] * awdf_ref[1:2, :] + awbf_ref[...])
        att_pre = satt + dyn_att + jnp.dot(
            hnew, awr_ref[...], preferred_element_type=f32)[:, None, :]
        att_logit = jnp.dot(jnp.tanh(att_pre).reshape(B * S, H), avt_ref[...],
                            preferred_element_type=f32).reshape(B, S)
        att = jax.nn.softmax(att_logit, axis=-1)
        context = jnp.sum(att[:, :, None] * sh, axis=1)              # (B,H)

        # pointer logits (MXU matvec instead of XLU lane reduce)
        e_pre = sptr + jnp.dot(
            context, pw2_ref[...], preferred_element_type=f32)[:, None, :]
        logits = jnp.dot(jnp.tanh(e_pre).reshape(B * S, H), pvt_ref[...],
                         preferred_element_type=f32).reshape(B, S)

        # masked softmax + greedy (first) argmax
        has_any = jnp.sum(mask, axis=1, keepdims=True) > 0.0         # (B,1)
        mask_safe = jnp.where(has_any, mask, depot_only)
        mlogits = jnp.where(mask_safe > 0.0, logits, -1e9)
        probs = jax.nn.softmax(mlogits, axis=-1)
        pmax = jnp.max(probs, axis=1, keepdims=True)                 # (B,1)
        ptrf = jnp.min(jnp.where(probs >= pmax, col_iota.astype(f32), f32(S)),
                       axis=1, keepdims=True)
        ptr = ptrf.astype(jnp.int32)                                 # (B,1)
        logp = jnp.log(pmax)                                         # (B,1)
        onehot = (col_iota == ptr).astype(f32)                       # (B,S)

        # update_dynamic (VRP)
        load_sel = jnp.sum(onehot * loads, axis=1, keepdims=True)
        dem_sel = jnp.sum(onehot * demands, axis=1, keepdims=True)
        new_load = jnp.maximum(load_sel - dem_sel, 0.0)
        new_dem = jnp.maximum(dem_sel - load_sel, 0.0)
        visit = ptr != 0                                             # (B,1)
        visit_demands = demands * (1.0 - onehot) + onehot * new_dem
        visit_demands = jnp.where(col0, new_load - 1.0, visit_demands)
        loads_new = jnp.where(visit, jnp.broadcast_to(new_load, (B, S)), 1.0)
        demands_new = jnp.where(visit, visit_demands,
                                jnp.where(col0, 0.0, demands))

        # finished tours contribute zero log-prob.
        # Per-row all-zero test (max |demand| == 0), NOT sum==0: the depot
        # column holds new_load-1 (negative) after a city visit, so a sum
        # could spuriously hit zero while positive demands remain.
        row_amax = jnp.max(jnp.abs(demands_new), axis=1, keepdims=True)
        is_done = (row_amax == 0.0).astype(f32)
        logp_acc = logp_acc + logp * (1.0 - is_done)

        # update_mask (VRP)
        new_mask = jnp.logical_and(demands_new != 0.0,
                                   demands_new < loads_new).astype(f32)
        new_mask = jnp.where(col0, jnp.where(visit, 1.0, 0.0), new_mask)
        has_no_load = loads_new[:, 0:1] == 0.0
        has_no_demand = jnp.sum(demands_new * (1.0 - depot_only),
                                axis=1, keepdims=True) == 0.0
        combined = jnp.logical_or(has_no_load, has_no_demand)
        new_mask = jnp.where(combined, depot_only, new_mask)
        # global (whole-batch) all-done check mirrors PyTorch loop break
        all_zero = jnp.max(row_amax, axis=0, keepdims=True) == 0.0
        mask_new = jnp.where(all_zero, 0.0, new_mask)

        # record tour + next decoder input
        tours_new = jnp.where(out_iota == step, ptr, tours)
        decx_new = jnp.sum(onehot * sx, axis=1, keepdims=True)
        decy_new = jnp.sum(onehot * sy, axis=1, keepdims=True)
        return (hnew, mask_new, loads_new, demands_new,
                decx_new, decy_new, tours_new, logp_acc)

    carry0 = (jnp.zeros((B, H), f32),                  # hidden
              (demands0 > 0.0).astype(f32),            # mask
              loads0, demands0,                        # dynamic state
              decx0_ref[...], decy0_ref[...],          # decoder input
              jnp.zeros((B, n_steps), jnp.int32),      # tours
              jnp.zeros((B, 1), f32))                  # log-prob accumulator
    carry = lax.fori_loop(0, n_steps, step_body, carry0, unroll=True)

    tours_ref[...] = carry[6]
    logp_ref[...] = carry[7]


# --------------------------------------------------------------------------
# Host-side parameter prep (fold / concat weights once)
# --------------------------------------------------------------------------
def _prepare_params(p):
    H = p['enc_s_w'].shape[1]
    return dict(
        enc_s_w=p['enc_s_w'], enc_s_b=p['enc_s_b'],
        dec_w=p['dec_w'], dec_b=p['dec_b'],
        gru_w_ih=p['gru_w_ih'], gru_w_hh=p['gru_w_hh'],
        gru_b_ih=p['gru_b_ih'], gru_b_hh=p['gru_b_hh'],
        att_ptr_w=jnp.concatenate([p['att_ws'], p['ptr_w1']], axis=1),  # (H,2H)
        att_wd_fold=jnp.dot(p['enc_d_w'], p['att_wd']),                 # (2,H)
        att_wb_fold=jnp.dot(p['enc_d_b'], p['att_wd']),                 # (1,H)
        att_wr=p['att_wr'],
        att_v_t=p['att_v'].T,                                           # (H,1)
        ptr_w2=p['ptr_w2'],
        ptr_v_t=p['ptr_v'].T,                                           # (H,1)
        cr_s_w=p['cr_s_w'], cr_s_b=p['cr_s_b'],
        cr_d_w=p['cr_d_w'], cr_d_b=p['cr_d_b'],
        fc1_wa=p['fc1_w'][:H], fc1_wb=p['fc1_w'][H:], fc1_b=p['fc1_b'],
        fc2_w=p['fc2_w'], fc2_b=p['fc2_b'],
        fc3_w=p['fc3_w'], fc3_b=p['fc3_b'],
    )


# --------------------------------------------------------------------------
# Wrapper: one pallas_call for the whole RLAgent forward
# --------------------------------------------------------------------------
def rl_agent_forward(params, static, dynamic, decoder_input=None,
                     distances=None):
    del distances  # TODO(synk): impl_1's use of `distances` is not public.
    B, C, S = static.shape
    H = params['enc_s_w'].shape[1]
    n_steps = S - 1

    sx, sy = static[:, 0, :], static[:, 1, :]
    loads0, demands0 = dynamic[:, 0, :], dynamic[:, 1, :]
    if decoder_input is None:
        dec0 = jnp.broadcast_to(params['x0'][:, :, 0], (B, C))
    else:
        dec0 = decoder_input[:, :, 0]
    decx0, decy0 = dec0[:, 0:1], dec0[:, 1:2]

    fp = _prepare_params(params)
    args = (sx, sy, loads0, demands0, decx0, decy0,
            fp['enc_s_w'], fp['enc_s_b'], fp['dec_w'], fp['dec_b'],
            fp['gru_w_ih'], fp['gru_w_hh'], fp['gru_b_ih'], fp['gru_b_hh'],
            fp['att_ptr_w'], fp['att_wd_fold'], fp['att_wb_fold'],
            fp['att_wr'], fp['att_v_t'],
            fp['ptr_w2'], fp['ptr_v_t'],
            fp['cr_s_w'], fp['cr_s_b'], fp['cr_d_w'], fp['cr_d_b'],
            fp['fc1_wa'], fp['fc1_wb'], fp['fc1_b'],
            fp['fc2_w'], fp['fc2_b'], fp['fc3_w'], fp['fc3_b'])

    flops = (2 * B * S * H * 2 * H                        # hoisted projections
             + 2 * B * S * (2 * H * 20 + 20 * 20)         # critic
             + n_steps * (2 * B * H * 3 * H * 2           # fused GRU
                          + 2 * B * H * H * 2             # awr / pw2
                          + 2 * B * S * H * 2             # score matvecs
                          + 12 * B * S * H))              # VPU work
    transcendentals = n_steps * (2 * B * S * H + 3 * B * H + 2 * B * S)
    bytes_accessed = 4 * (sum(int(a.size) for a in args) + B * n_steps + 2 * B)

    vmem = pl.BlockSpec(memory_space=pltpu.MemorySpace.VMEM)
    tours, logp, vals = pl.pallas_call(
        _agent_kernel,
        in_specs=[vmem] * len(args),
        out_specs=(vmem, vmem, vmem),
        out_shape=(jax.ShapeDtypeStruct((B, n_steps), jnp.int32),
                   jax.ShapeDtypeStruct((B, 1), jnp.float32),
                   jax.ShapeDtypeStruct((B, 1), jnp.float32)),
        cost_estimate=pl.CostEstimate(flops=flops,
                                      transcendentals=transcendentals,
                                      bytes_accessed=bytes_accessed),
    )(*args)
    return tours, logp[:, 0], vals[:, 0]


# --------------------------------------------------------------------------
# Deterministic parameter init (xavier-uniform, zero biases)
# --------------------------------------------------------------------------
def init_params(key, H):
    ks = jax.random.split(key, 17)

    def xav(k, shape):
        a = (6.0 / (shape[0] + shape[1])) ** 0.5
        return jax.random.uniform(k, shape, jnp.float32, -a, a)

    p = {}
    p['enc_s_w'] = xav(ks[0], (STATIC_SIZE, H));  p['enc_s_b'] = jnp.zeros((1, H), jnp.float32)
    p['enc_d_w'] = xav(ks[1], (DYNAMIC_SIZE, H)); p['enc_d_b'] = jnp.zeros((1, H), jnp.float32)
    p['dec_w'] = xav(ks[2], (STATIC_SIZE, H));    p['dec_b'] = jnp.zeros((1, H), jnp.float32)
    # GRU layout: (H, 3H), gate order r,z,n (transpose of PyTorch (3H,H))
    p['gru_w_ih'] = xav(ks[3], (H, 3 * H));       p['gru_b_ih'] = jnp.zeros((1, 3 * H), jnp.float32)
    p['gru_w_hh'] = xav(ks[4], (H, 3 * H));       p['gru_b_hh'] = jnp.zeros((1, 3 * H), jnp.float32)
    p['att_ws'] = xav(ks[5], (H, H))
    p['att_wd'] = xav(ks[6], (H, H))
    p['att_wr'] = xav(ks[7], (H, H))
    p['att_v'] = xav(ks[8], (1, H))
    p['ptr_w1'] = xav(ks[9], (H, H))
    p['ptr_w2'] = xav(ks[10], (H, H))
    p['ptr_v'] = xav(ks[11], (1, H))
    p['x0'] = jnp.zeros((1, STATIC_SIZE, 1), jnp.float32)
    # critic
    p['cr_s_w'] = xav(ks[12], (STATIC_SIZE, H));  p['cr_s_b'] = jnp.zeros((1, H), jnp.float32)
    p['cr_d_w'] = xav(ks[13], (DYNAMIC_SIZE, H)); p['cr_d_b'] = jnp.zeros((1, H), jnp.float32)
    p['fc1_w'] = xav(ks[14], (2 * H, 20));        p['fc1_b'] = jnp.zeros((1, 20), jnp.float32)
    p['fc2_w'] = xav(ks[15], (20, 20));           p['fc2_b'] = jnp.zeros((1, 20), jnp.float32)
    p['fc3_w'] = xav(ks[16], (1, 20));            p['fc3_b'] = jnp.zeros((1, 1), jnp.float32)
    return p


# --------------------------------------------------------------------------
if __name__ == "__main__":
    key = jax.random.PRNGKey(0)
    B, S, H = 2, 8, 32
    kp, ks, kd = jax.random.split(key, 3)

    params = init_params(kp, H)

    # static: (B, 2, S) coordinates in [0,1]
    static = jax.random.uniform(ks, (B, STATIC_SIZE, S), jnp.float32)
    # dynamic: (B, 2, S) = [loads (all 1), demands (depot demand = 0)]
    loads = jnp.ones((B, 1, S), jnp.float32)
    demands = jax.random.randint(kd, (B, 1, S), 1, 10).astype(jnp.float32) / 20.0
    demands = demands.at[:, :, 0].set(0.0)
    dynamic = jnp.concatenate([loads, demands], axis=1)

    fwd = jax.jit(rl_agent_forward)
    tours, prob_log, vals = fwd(params, static, dynamic)
    jax.block_until_ready((tours, prob_log, vals))

    assert tours.shape == (B, S - 1)
    assert prob_log.shape == (B,)
    assert vals.shape == (B,)
    assert bool(jnp.all((tours >= 0) & (tours < S)))
    assert bool(jnp.all(jnp.isfinite(prob_log))) and bool(jnp.all(jnp.isfinite(vals)))
    print("KERNEL_OK")
</pallas_src>

<mosaic_0001>
module attributes {stable_mosaic.version = 11 : i64} {
  func.func @_agent_kernel(%arg0: memref<2x8xf32, #tpu.memory_space<vmem>>, %arg1: memref<2x8xf32, #tpu.memory_space<vmem>>, %arg2: memref<2x8xf32, #tpu.memory_space<vmem>>, %arg3: memref<2x8xf32, #tpu.memory_space<vmem>>, %arg4: memref<2x1xf32, #tpu.memory_space<vmem>>, %arg5: memref<2x1xf32, #tpu.memory_space<vmem>>, %arg6: memref<2x32xf32, #tpu.memory_space<vmem>>, %arg7: memref<1x32xf32, #tpu.memory_space<vmem>>, %arg8: memref<2x32xf32, #tpu.memory_space<vmem>>, %arg9: memref<1x32xf32, #tpu.memory_space<vmem>>, %arg10: memref<32x96xf32, #tpu.memory_space<vmem>>, %arg11: memref<32x96xf32, #tpu.memory_space<vmem>>, %arg12: memref<1x96xf32, #tpu.memory_space<vmem>>, %arg13: memref<1x96xf32, #tpu.memory_space<vmem>>, %arg14: memref<32x64xf32, #tpu.memory_space<vmem>>, %arg15: memref<2x32xf32, #tpu.memory_space<vmem>>, %arg16: memref<1x32xf32, #tpu.memory_space<vmem>>, %arg17: memref<32x32xf32, #tpu.memory_space<vmem>>, %arg18: memref<32x1xf32, #tpu.memory_space<vmem>>, %arg19: memref<32x32xf32, #tpu.memory_space<vmem>>, %arg20: memref<32x1xf32, #tpu.memory_space<vmem>>, %arg21: memref<2x32xf32, #tpu.memory_space<vmem>>, %arg22: memref<1x32xf32, #tpu.memory_space<vmem>>, %arg23: memref<2x32xf32, #tpu.memory_space<vmem>>, %arg24: memref<1x32xf32, #tpu.memory_space<vmem>>, %arg25: memref<32x20xf32, #tpu.memory_space<vmem>>, %arg26: memref<32x20xf32, #tpu.memory_space<vmem>>, %arg27: memref<1x20xf32, #tpu.memory_space<vmem>>, %arg28: memref<20x20xf32, #tpu.memory_space<vmem>>, %arg29: memref<1x20xf32, #tpu.memory_space<vmem>>, %arg30: memref<1x20xf32, #tpu.memory_space<vmem>>, %arg31: memref<1x1xf32, #tpu.memory_space<vmem>>, %arg32: memref<2x7xi32, #tpu.memory_space<vmem>>, %arg33: memref<2x1xf32, #tpu.memory_space<vmem>>, %arg34: memref<2x1xf32, #tpu.memory_space<vmem>>) attributes {dimension_semantics = [], scalar_prefetch = 0 : i64, scratch_operands = 0 : i64, tpu.core_type = #tpu.core_type<tc>} {
    %c0 = arith.constant 0 : index
    %c0_0 = arith.constant 0 : index
    %0 = vector.load %arg0[%c0, %c0_0] : memref<2x8xf32, #tpu.memory_space<vmem>>, vector<2x8xf32>
    %c0_1 = arith.constant 0 : index
    %c0_2 = arith.constant 0 : index
    %1 = vector.load %arg1[%c0_1, %c0_2] : memref<2x8xf32, #tpu.memory_space<vmem>>, vector<2x8xf32>
    %c0_3 = arith.constant 0 : index
    %c0_4 = arith.constant 0 : index
    %2 = vector.load %arg2[%c0_3, %c0_4] : memref<2x8xf32, #tpu.memory_space<vmem>>, vector<2x8xf32>
    %c0_5 = arith.constant 0 : index
    %c0_6 = arith.constant 0 : index
    %3 = vector.load %arg3[%c0_5, %c0_6] : memref<2x8xf32, #tpu.memory_space<vmem>>, vector<2x8xf32>
    %4 = vector.shape_cast %0 : vector<2x8xf32> to vector<2x8x1xf32>
    %c0_7 = arith.constant 0 : index
    %c0_8 = arith.constant 0 : index
    %5 = vector.load %arg6[%c0_7, %c0_8] : memref<2x32xf32, #tpu.memory_space<vmem>>, vector<1x32xf32>
    %6 = vector.shape_cast %5 : vector<1x32xf32> to vector<1x1x32xf32>
    %7 = vector.broadcast %4 : vector<2x8x1xf32> to vector<2x8x32xf32>
    %8 = vector.broadcast %6 : vector<1x1x32xf32> to vector<2x8x32xf32>
    %9 = arith.mulf %7, %8 : vector<2x8x32xf32>
    %10 = vector.shape_cast %1 : vector<2x8xf32> to vector<2x8x1xf32>
    %c1 = arith.constant 1 : index
    %c0_9 = arith.constant 0 : index
    %11 = vector.load %arg6[%c1, %c0_9] : memref<2x32xf32, #tpu.memory_space<vmem>>, vector<1x32xf32>
    %12 = vector.shape_cast %11 : vector<1x32xf32> to vector<1x1x32xf32>
    %13 = vector.broadcast %10 : vector<2x8x1xf32> to vector<2x8x32xf32>
    %14 = vector.broadcast %12 : vector<1x1x32xf32> to vector<2x8x32xf32>
    %15 = arith.mulf %13, %14 : vector<2x8x32xf32>
    %16 = arith.addf %9, %15 : vector<2x8x32xf32>
    %c0_10 = arith.constant 0 : index
    %c0_11 = arith.constant 0 : index
    %17 = vector.load %arg7[%c0_10, %c0_11] : memref<1x32xf32, #tpu.memory_space<vmem>>, vector<1x32xf32>
    %18 = vector.shape_cast %17 : vector<1x32xf32> to vector<1x1x32xf32>
    %19 = vector.broadcast %18 : vector<1x1x32xf32> to vector<2x8x32xf32>
    %20 = arith.addf %16, %19 : vector<2x8x32xf32>
    %21 = vector.shape_cast %20 : vector<2x8x32xf32> to vector<16x32xf32>
    %c0_12 = arith.constant 0 : index
    %c0_13 = arith.constant 0 : index
    %22 = vector.load %arg14[%c0_12, %c0_13] : memref<32x64xf32, #tpu.memory_space<vmem>>, vector<32x64xf32>
    %cst = arith.constant dense<0.000000e+00> : vector<16x64xf32>
    %23 = tpu.matmul %21, %22, %cst {dimension_numbers = #tpu.dot_dimension_numbers<[1], [0], [0], [1], [0, 0, 1, 1], [], []>} : vector<16x32xf32>, vector<32x64xf32>, vector<16x64xf32> -> vector<16x64xf32>
    %24 = vector.shape_cast %23 : vector<16x64xf32> to vector<2x8x64xf32>
    %25 = vector.extract_strided_slice %24 {offsets = [0, 0, 0], sizes = [2, 8, 32], strides = [1, 1, 1]} : vector<2x8x64xf32> to vector<2x8x32xf32>
    %26 = vector.extract_strided_slice %24 {offsets = [0, 0, 32], sizes = [2, 8, 32], strides = [1, 1, 1]} : vector<2x8x64xf32> to vector<2x8x32xf32>
    %27 = vector.shape_cast %0 : vector<2x8xf32> to vector<2x8x1xf32>
    %c0_14 = arith.constant 0 : index
    %c0_15 = arith.constant 0 : index
    %28 = vector.load %arg21[%c0_14, %c0_15] : memref<2x32xf32, #tpu.memory_space<vmem>>, vector<1x32xf32>
    %29 = vector.shape_cast %28 : vector<1x32xf32> to vector<1x1x32xf32>
    %30 = vector.broadcast %27 : vector<2x8x1xf32> to vector<2x8x32xf32>
    %31 = vector.broadcast %29 : vector<1x1x32xf32> to vector<2x8x32xf32>
    %32 = arith.mulf %30, %31 : vector<2x8x32xf32>
    %33 = vector.shape_cast %1 : vector<2x8xf32> to vector<2x8x1xf32>
    %c1_16 = arith.constant 1 : index
    %c0_17 = arith.constant 0 : index
    %34 = vector.load %arg21[%c1_16, %c0_17] : memref<2x32xf32, #tpu.memory_space<vmem>>, vector<1x32xf32>
    %35 = vector.shape_cast %34 : vector<1x32xf32> to vector<1x1x32xf32>
    %36 = vector.broadcast %33 : vector<2x8x1xf32> to vector<2x8x32xf32>
    %37 = vector.broadcast %35 : vector<1x1x32xf32> to vector<2x8x32xf32>
    %38 = arith.mulf %36, %37 : vector<2x8x32xf32>
    %39 = arith.addf %32, %38 : vector<2x8x32xf32>
    %c0_18 = arith.constant 0 : index
    %c0_19 = arith.constant 0 : index
    %40 = vector.load %arg22[%c0_18, %c0_19] : memref<1x32xf32, #tpu.memory_space<vmem>>, vector<1x32xf32>
    %41 = vector.shape_cast %40 : vector<1x32xf32> to vector<1x1x32xf32>
    %42 = vector.broadcast %41 : vector<1x1x32xf32> to vector<2x8x32xf32>
    %43 = arith.addf %39, %42 : vector<2x8x32xf32>
    %44 = vector.shape_cast %2 : vector<2x8xf32> to vector<2x8x1xf32>
    %c0_20 = arith.constant 0 : index
    %c0_21 = arith.constant 0 : index
    %45 = vector.load %arg23[%c0_20, %c0_21] : memref<2x32xf32, #tpu.memory_space<vmem>>, vector<1x32xf32>
    %46 = vector.shape_cast %45 : vector<1x32xf32> to vector<1x1x32xf32>
    %47 = vector.broadcast %44 : vector<2x8x1xf32> to vector<2x8x32xf32>
    %48 = vector.broadcast %46 : vector<1x1x32xf32> to vector<2x8x32xf32>
    %49 = arith.mulf %47, %48 : vector<2x8x32xf32>
    %50 = vector.shape_cast %3 : vector<2x8xf32> to vector<2x8x1xf32>
    %c1_22 = arith.constant 1 : index
    %c0_23 = arith.constant 0 : index
    %51 = vector.load %arg23[%c1_22, %c0_23] : memref<2x32xf32, #tpu.memory_space<vmem>>, vector<1x32xf32>
    %52 = vector.shape_cast %51 : vector<1x32xf32> to vector<1x1x32xf32>
    %53 = vector.broadcast %50 : vector<2x8x1xf32> to vector<2x8x32xf32>
    %54 = vector.broadcast %52 : vector<1x1x32xf32> to vector<2x8x32xf32>
    %55 = arith.mulf %53, %54 : vector<2x8x32xf32>
    %56 = arith.addf %49, %55 : vector<2x8x32xf32>
    %c0_24 = arith.constant 0 : index
    %c0_25 = arith.constant 0 : index
    %57 = vector.load %arg24[%c0_24, %c0_25] : memref<1x32xf32, #tpu.memory_space<vmem>>, vector<1x32xf32>
    %58 = vector.shape_cast %57 : vector<1x32xf32> to vector<1x1x32xf32>
    %59 = vector.broadcast %58 : vector<1x1x32xf32> to vector<2x8x32xf32>
    %60 = arith.addf %56, %59 : vector<2x8x32xf32>
    %61 = vector.shape_cast %43 : vector<2x8x32xf32> to vector<16x32xf32>
    %c0_26 = arith.constant 0 : index
    %c0_27 = arith.constant 0 : index
    %62 = vector.load %arg25[%c0_26, %c0_27] : memref<32x20xf32, #tpu.memory_space<vmem>>, vector<32x20xf32>
    %cst_28 = arith.constant dense<0.000000e+00> : vector<16x20xf32>
    %63 = tpu.matmul %61, %62, %cst_28 {dimension_numbers = #tpu.dot_dimension_numbers<[1], [0], [0], [1], [0, 0, 1, 1], [], []>} : vector<16x32xf32>, vector<32x20xf32>, vector<16x20xf32> -> vector<16x20xf32>
    %64 = vector.shape_cast %60 : vector<2x8x32xf32> to vector<16x32xf32>
    %c0_29 = arith.constant 0 : index
    %c0_30 = arith.constant 0 : index
    %65 = vector.load %arg26[%c0_29, %c0_30] : memref<32x20xf32, #tpu.memory_space<vmem>>, vector<32x20xf32>
    %cst_31 = arith.constant dense<0.000000e+00> : vector<16x20xf32>
    %66 = tpu.matmul %64, %65, %cst_31 {dimension_numbers = #tpu.dot_dimension_numbers<[1], [0], [0], [1], [0, 0, 1, 1], [], []>} : vector<16x32xf32>, vector<32x20xf32>, vector<16x20xf32> -> vector<16x20xf32>
    %67 = arith.addf %63, %66 : vector<16x20xf32>
    %c0_32 = arith.constant 0 : index
    %c0_33 = arith.constant 0 : index
    %68 = vector.load %arg27[%c0_32, %c0_33] : memref<1x20xf32, #tpu.memory_space<vmem>>, vector<1x20xf32>
    %69 = vector.broadcast %68 : vector<1x20xf32> to vector<16x20xf32>
    %70 = arith.addf %67, %69 : vector<16x20xf32>
    %cst_34 = arith.constant 0.000000e+00 : f32
    %71 = vector.broadcast %cst_34 : f32 to vector<16x20xf32>
    %72 = arith.maximumf %70, %71 : vector<16x20xf32>
    %c0_35 = arith.constant 0 : index
    %c0_36 = arith.constant 0 : index
    %73 = vector.load %arg28[%c0_35, %c0_36] : memref<20x20xf32, #tpu.memory_space<vmem>>, vector<20x20xf32>
    %cst_37 = arith.constant dense<0.000000e+00> : vector<16x20xf32>
    %74 = tpu.matmul %72, %73, %cst_37 {dimension_numbers = #tpu.dot_dimension_numbers<[1], [0], [0], [1], [0, 0, 1, 1], [], []>} : vector<16x20xf32>, vector<20x20xf32>, vector<16x20xf32> -> vector<16x20xf32>
    %c0_38 = arith.constant 0 : index
    %c0_39 = arith.constant 0 : index
    %75 = vector.load %arg29[%c0_38, %c0_39] : memref<1x20xf32, #tpu.memory_space<vmem>>, vector<1x20xf32>
    %76 = vector.broadcast %75 : vector<1x20xf32> to vector<16x20xf32>
    %77 = arith.addf %74, %76 : vector<16x20xf32>
    %cst_40 = arith.constant 0.000000e+00 : f32
    %78 = vector.broadcast %cst_40 : f32 to vector<16x20xf32>
    %79 = arith.maximumf %77, %78 : vector<16x20xf32>
    %80 = vector.shape_cast %79 : vector<16x20xf32> to vector<2x8x20xf32>
    %cst_41 = arith.constant dense<0.000000e+00> : vector<2x20xf32>
    %81 = vector.multi_reduction <add>, %80, %cst_41 [1] : vector<2x8x20xf32> to vector<2x20xf32>
    %c0_42 = arith.constant 0 : index
    %c0_43 = arith.constant 0 : index
    %82 = vector.load %arg30[%c0_42, %c0_43] : memref<1x20xf32, #tpu.memory_space<vmem>>, vector<1x20xf32>
    %83 = vector.broadcast %82 : vector<1x20xf32> to vector<2x20xf32>
    %84 = arith.mulf %81, %83 : vector<2x20xf32>
    %cst_44 = arith.constant dense<0.000000e+00> : vector<2xf32>
    %85 = vector.multi_reduction <add>, %84, %cst_44 [1] : vector<2x20xf32> to vector<2xf32>
    %86 = vector.shape_cast %85 : vector<2xf32> to vector<2x1xf32>
    %c0_45 = arith.constant 0 : index
    %c0_46 = arith.constant 0 : index
    %87 = vector.load %arg31[%c0_45, %c0_46] : memref<1x1xf32, #tpu.memory_space<vmem>>, vector<1x1xf32>
    %cst_47 = arith.constant 8.000000e+00 : f32
    %88 = vector.broadcast %cst_47 : f32 to vector<1x1xf32>
    %89 = arith.mulf %88, %87 : vector<1x1xf32>
    %90 = vector.broadcast %89 : vector<1x1xf32> to vector<2x1xf32>
    %91 = arith.addf %86, %90 : vector<2x1xf32>
    %c0_48 = arith.constant 0 : index
    %c0_49 = arith.constant 0 : index
    %92 = vector.load %arg34[%c0_48, %c0_49] : memref<2x1xf32, #tpu.memory_space<vmem>>, vector<2x1xf32>
    tpu.vector_store %arg34[%c0_48, %c0_49], %91 {strides = array<i32>} : memref<2x1xf32, #tpu.memory_space<vmem>>, vector<2x1xf32>,
    %93 = tpu.iota {dimensions = array<i32: 1>} : vector<2x8xi32>
    %c0_i32 = arith.constant 0 : i32
    %94 = vector.broadcast %c0_i32 : i32 to vector<2x8xi32>
    %95 = arith.cmpi eq, %93, %94 : vector<2x8xi32>
    %96 = arith.extui %95 : vector<2x8xi1> to vector<2x8xi32>
    %97 = arith.sitofp %96 : vector<2x8xi32> to vector<2x8xf32>
    %c0_i32_50 = arith.constant 0 : i32
    %98 = vector.broadcast %c0_i32_50 : i32 to vector<2x8xi32>
    %99 = arith.cmpi eq, %93, %98 : vector<2x8xi32>
    %100 = tpu.iota {dimensions = array<i32: 1>} : vector<2x7xi32>
    %cst_51 = arith.constant 0.000000e+00 : f32
    %101 = vector.broadcast %cst_51 : f32 to vector<2x32xf32>
    %cst_52 = arith.constant 0.000000e+00 : f32
    %102 = vector.broadcast %cst_52 : f32 to vector<2x8xf32>
    %103 = arith.cmpf ogt, %3, %102 : vector<2x8xf32>
    %104 = arith.extui %103 : vector<2x8xi1> to vector<2x8xi32>
    %105 = arith.sitofp %104 : vector<2x8xi32> to vector<2x8xf32>
    %c0_53 = arith.constant 0 : index
    %c0_54 = arith.constant 0 : index
    %106 = vector.load %arg4[%c0_53, %c0_54] : memref<2x1xf32, #tpu.memory_space<vmem>>, vector<2x1xf32>
    %c0_55 = arith.constant 0 : index
    %c0_56 = arith.constant 0 : index
    %107 = vector.load %arg5[%c0_55, %c0_56] : memref<2x1xf32, #tpu.memory_space<vmem>>, vector<2x1xf32>
    %c0_i32_57 = arith.constant 0 : i32
    %108 = vector.broadcast %c0_i32_57 : i32 to vector<2x7xi32>
    %cst_58 = arith.constant 0.000000e+00 : f32
    %109 = vector.broadcast %cst_58 : f32 to vector<2x1xf32>
    %c0_i32_59 = arith.constant 0 : i32
    %c0_60 = arith.constant 0 : index
    %c0_61 = arith.constant 0 : index
    %110 = vector.load %arg8[%c0_60, %c0_61] : memref<2x32xf32, #tpu.memory_space<vmem>>, vector<1x32xf32>
    %111 = vector.broadcast %106 : vector<2x1xf32> to vector<2x32xf32>
    %112 = vector.broadcast %110 : vector<1x32xf32> to vector<2x32xf32>
    %113 = arith.mulf %111, %112 : vector<2x32xf32>
    %c1_62 = arith.constant 1 : index
    %c0_63 = arith.constant 0 : index
    %114 = vector.load %arg8[%c1_62, %c0_63] : memref<2x32xf32, #tpu.memory_space<vmem>>, vector<1x32xf32>
    %115 = vector.broadcast %107 : vector<2x1xf32> to vector<2x32xf32>
    %116 = vector.broadcast %114 : vector<1x32xf32> to vector<2x32xf32>
    %117 = arith.mulf %115, %116 : vector<2x32xf32>
    %118 = arith.addf %113, %117 : vector<2x32xf32>
    %c0_64 = arith.constant 0 : index
    %c0_65 = arith.constant 0 : index
    %119 = vector.load %arg9[%c0_64, %c0_65] : memref<1x32xf32, #tpu.memory_space<vmem>>, vector<1x32xf32>
    %120 = vector.broadcast %119 : vector<1x32xf32> to vector<2x32xf32>
    %121 = arith.addf %118, %120 : vector<2x32xf32>
    %c0_66 = arith.constant 0 : index
    %c0_67 = arith.constant 0 : index
    %122 = vector.load %arg10[%c0_66, %c0_67] : memref<32x96xf32, #tpu.memory_space<vmem>>, vector<32x96xf32>
    %cst_68 = arith.constant dense<0.000000e+00> : vector<2x96xf32>
    %123 = tpu.matmul %121, %122, %cst_68 {dimension_numbers = #tpu.dot_dimension_numbers<[1], [0], [0], [1], [0, 0, 1, 1], [], []>} : vector<2x32xf32>, vector<32x96xf32>, vector<2x96xf32> -> vector<2x96xf32>
    %c0_69 = arith.constant 0 : index
    %c0_70 = arith.constant 0 : index
    %124 = vector.load %arg12[%c0_69, %c0_70] : memref<1x96xf32, #tpu.memory_space<vmem>>, vector<1x96xf32>
    %125 = vector.broadcast %124 : vector<1x96xf32> to vector<2x96xf32>
    %126 = arith.addf %123, %125 : vector<2x96xf32>
    %c0_71 = arith.constant 0 : index
    %c0_72 = arith.constant 0 : index
    %127 = vector.load %arg11[%c0_71, %c0_72] : memref<32x96xf32, #tpu.memory_space<vmem>>, vector<32x96xf32>
    %cst_73 = arith.constant dense<0.000000e+00> : vector<2x96xf32>
    %128 = tpu.matmul %101, %127, %cst_73 {dimension_numbers = #tpu.dot_dimension_numbers<[1], [0], [0], [1], [0, 0, 1, 1], [], []>} : vector<2x32xf32>, vector<32x96xf32>, vector<2x96xf32> -> vector<2x96xf32>
    %c0_74 = arith.constant 0 : index
    %c0_75 = arith.constant 0 : index
    %129 = vector.load %arg13[%c0_74, %c0_75] : memref<1x96xf32, #tpu.memory_space<vmem>>, vector<1x96xf32>
    %130 = vector.broadcast %129 : vector<1x96xf32> to vector<2x96xf32>
    %131 = arith.addf %128, %130 : vector<2x96xf32>
    %132 = vector.extract_strided_slice %126 {offsets = [0, 0], sizes = [2, 32], strides = [1, 1]} : vector<2x96xf32> to vector<2x32xf32>
    %133 = vector.extract_strided_slice %131 {offsets = [0, 0], sizes = [2, 32], strides = [1, 1]} : vector<2x96xf32> to vector<2x32xf32>
    %134 = arith.addf %132, %133 : vector<2x32xf32>
    %135 = arith.negf %134 : vector<2x32xf32>
    %136 = math.exp %135 : vector<2x32xf32>
    %cst_76 = arith.constant 1.000000e+00 : f32
    %137 = vector.broadcast %cst_76 : f32 to vector<2x32xf32>
    %138 = arith.addf %137, %136 : vector<2x32xf32>
    %139 = arith.divf %137, %138 : vector<2x32xf32>
    %140 = vector.extract_strided_slice %126 {offsets = [0, 32], sizes = [2, 32], strides = [1, 1]} : vector<2x96xf32> to vector<2x32xf32>
    %141 = vector.extract_strided_slice %131 {offsets = [0, 32], sizes = [2, 32], strides = [1, 1]} : vector<2x96xf32> to vector<2x32xf32>
    %142 = arith.addf %140, %141 : vector<2x32xf32>
    %143 = arith.negf %142 : vector<2x32xf32>
    %144 = math.exp %143 : vector<2x32xf32>
    %cst_77 = arith.constant 1.000000e+00 : f32
    %145 = vector.broadcast %cst_77 : f32 to vector<2x32xf32>
    %146 = arith.addf %145, %144 : vector<2x32xf32>
    %147 = arith.divf %145, %146 : vector<2x32xf32>
    %148 = vector.extract_strided_slice %126 {offsets = [0, 64], sizes = [2, 32], strides = [1, 1]} : vector<2x96xf32> to vector<2x32xf32>
    %149 = vector.extract_strided_slice %131 {offsets = [0, 64], sizes = [2, 32], strides = [1, 1]} : vector<2x96xf32> to vector<2x32xf32>
    %150 = arith.mulf %139, %149 : vector<2x32xf32>
    %151 = arith.addf %148, %150 : vector<2x32xf32>
    %152 = math.tanh %151 : vector<2x32xf32>
    %cst_78 = arith.constant 1.000000e+00 : f32
    %153 = vector.broadcast %cst_78 : f32 to vector<2x32xf32>
    %154 = arith.subf %153, %147 : vector<2x32xf32>
    %155 = arith.mulf %154, %152 : vector<2x32xf32>
    %156 = arith.mulf %147, %101 : vector<2x32xf32>
    %157 = arith.addf %155, %156 : vector<2x32xf32>
    %158 = vector.shape_cast %2 : vector<2x8xf32> to vector<2x8x1xf32>
    %c0_79 = arith.constant 0 : index
    %c0_80 = arith.constant 0 : index
    %159 = vector.load %arg15[%c0_79, %c0_80] : memref<2x32xf32, #tpu.memory_space<vmem>>, vector<1x32xf32>
    %160 = vector.shape_cast %159 : vector<1x32xf32> to vector<1x1x32xf32>
    %161 = vector.broadcast %158 : vector<2x8x1xf32> to vector<2x8x32xf32>
    %162 = vector.broadcast %160 : vector<1x1x32xf32> to vector<2x8x32xf32>
    %163 = arith.mulf %161, %162 : vector<2x8x32xf32>
    %164 = vector.shape_cast %3 : vector<2x8xf32> to vector<2x8x1xf32>
    %c1_81 = arith.constant 1 : index
    %c0_82 = arith.constant 0 : index
    %165 = vector.load %arg15[%c1_81, %c0_82] : memref<2x32xf32, #tpu.memory_space<vmem>>, vector<1x32xf32>
    %166 = vector.shape_cast %165 : vector<1x32xf32> to vector<1x1x32xf32>
    %167 = vector.broadcast %164 : vector<2x8x1xf32> to vector<2x8x32xf32>
    %168 = vector.broadcast %166 : vector<1x1x32xf32> to vector<2x8x32xf32>
    %169 = arith.mulf %167, %168 : vector<2x8x32xf32>
    %170 = arith.addf %163, %169 : vector<2x8x32xf32>
    %c0_83 = arith.constant 0 : index
    %c0_84 = arith.constant 0 : index
    %171 = vector.load %arg16[%c0_83, %c0_84] : memref<1x32xf32, #tpu.memory_space<vmem>>, vector<1x32xf32>
    %172 = vector.shape_cast %171 : vector<1x32xf32> to vector<1x1x32xf32>
    %173 = vector.broadcast %172 : vector<1x1x32xf32> to vector<2x8x32xf32>
    %174 = arith.addf %170, %173 : vector<2x8x32xf32>
    %175 = arith.addf %25, %174 : vector<2x8x32xf32>
    %c0_85 = arith.constant 0 : index
    %c0_86 = arith.constant 0 : index
    %176 = vector.load %arg17[%c0_85, %c0_86] : memref<32x32xf32, #tpu.memory_space<vmem>>, vector<32x32xf32>
    %cst_87 = arith.constant dense<0.000000e+00> : vector<2x32xf32>
    %177 = tpu.matmul %157, %176, %cst_87 {dimension_numbers = #tpu.dot_dimension_numbers<[1], [0], [0], [1], [0, 0, 1, 1], [], []>} : vector<2x32xf32>, vector<32x32xf32>, vector<2x32xf32> -> vector<2x32xf32>
    %178 = vector.shape_cast %177 : vector<2x32xf32> to vector<2x1x32xf32>
    %179 = vector.broadcast %178 : vector<2x1x32xf32> to vector<2x8x32xf32>
    %180 = arith.addf %175, %179 : vector<2x8x32xf32>
    %181 = math.tanh %180 : vector<2x8x32xf32>
    %182 = vector.shape_cast %181 : vector<2x8x32xf32> to vector<16x32xf32>
    %c0_88 = arith.constant 0 : index
    %c0_89 = arith.constant 0 : index
    %183 = vector.load %arg18[%c0_88, %c0_89] : memref<32x1xf32, #tpu.memory_space<vmem>>, vector<32x1xf32>
    %cst_90 = arith.constant dense<0.000000e+00> : vector<16x1xf32>
    %184 = tpu.matmul %182, %183, %cst_90 {dimension_numbers = #tpu.dot_dimension_numbers<[1], [0], [0], [1], [0, 0, 1, 1], [], []>} : vector<16x32xf32>, vector<32x1xf32>, vector<16x1xf32> -> vector<16x1xf32>
    %185 = vector.shape_cast %184 : vector<16x1xf32> to vector<2x8xf32>
    %cst_91 = arith.constant dense<0xFF800000> : vector<2xf32>
    %186 = vector.multi_reduction <maximumf>, %185, %cst_91 [1] : vector<2x8xf32> to vector<2xf32>
    %cst_92 = arith.constant 0xFF800000 : f32
    %187 = vector.broadcast %cst_92 : f32 to vector<2xf32>
    %188 = arith.maximumf %187, %186 : vector<2xf32>
    %189 = vector.shape_cast %188 : vector<2xf32> to vector<2x1xf32>
    %190 = vector.broadcast %189 : vector<2x1xf32> to vector<2x8xf32>
    %191 = arith.subf %185, %190 : vector<2x8xf32>
    %192 = math.exp %191 : vector<2x8xf32>
    %cst_93 = arith.constant dense<0.000000e+00> : vector<2xf32>
    %193 = vector.multi_reduction <add>, %192, %cst_93 [1] : vector<2x8xf32> to vector<2xf32>
    %194 = vector.shape_cast %193 : vector<2xf32> to vector<2x1xf32>
    %195 = vector.broadcast %194 : vector<2x1xf32> to vector<2x8xf32>
    %196 = arith.divf %192, %195 : vector<2x8xf32>
    %197 = vector.shape_cast %196 : vector<2x8xf32> to vector<2x8x1xf32>
    %198 = vector.broadcast %197 : vector<2x8x1xf32> to vector<2x8x32xf32>
    %199 = arith.mulf %198, %20 : vector<2x8x32xf32>
    %cst_94 = arith.constant dense<0.000000e+00> : vector<2x32xf32>
    %200 = vector.multi_reduction <add>, %199, %cst_94 [1] : vector<2x8x32xf32> to vector<2x32xf32>
    %c0_95 = arith.constant 0 : index
    %c0_96 = arith.constant 0 : index
    %201 = vector.load %arg19[%c0_95, %c0_96] : memref<32x32xf32, #tpu.memory_space<vmem>>, vector<32x32xf32>
    %cst_97 = arith.constant dense<0.000000e+00> : vector<2x32xf32>
    %202 = tpu.matmul %200, %201, %cst_97 {dimension_numbers = #tpu.dot_dimension_numbers<[1], [0], [0], [1], [0, 0, 1, 1], [], []>} : vector<2x32xf32>, vector<32x32xf32>, vector<2x32xf32> -> vector<2x32xf32>
    %203 = vector.shape_cast %202 : vector<2x32xf32> to vector<2x1x32xf32>
    %204 = vector.broadcast %203 : vector<2x1x32xf32> to vector<2x8x32xf32>
    %205 = arith.addf %26, %204 : vector<2x8x32xf32>
    %206 = math.tanh %205 : vector<2x8x32xf32>
    %207 = vector.shape_cast %206 : vector<2x8x32xf32> to vector<16x32xf32>
    %c0_98 = arith.constant 0 : index
    %c0_99 = arith.constant 0 : index
    %208 = vector.load %arg20[%c0_98, %c0_99] : memref<32x1xf32, #tpu.memory_space<vmem>>, vector<32x1xf32>
    %cst_100 = arith.constant dense<0.000000e+00> : vector<16x1xf32>
    %209 = tpu.matmul %207, %208, %cst_100 {dimension_numbers = #tpu.dot_dimension_numbers<[1], [0], [0], [1], [0, 0, 1, 1], [], []>} : vector<16x32xf32>, vector<32x1xf32>, vector<16x1xf32> -> vector<16x1xf32>
    %210 = vector.shape_cast %209 : vector<16x1xf32> to vector<2x8xf32>
    %cst_101 = arith.constant dense<0.000000e+00> : vector<2xf32>
    %211 = vector.multi_reduction <add>, %105, %cst_101 [1] : vector<2x8xf32> to vector<2xf32>
    %212 = vector.shape_cast %211 : vector<2xf32> to vector<2x1xf32>
    %cst_102 = arith.constant 0.000000e+00 : f32
    %213 = vector.broadcast %cst_102 : f32 to vector<2x1xf32>
    %214 = arith.cmpf ogt, %212, %213 : vector<2x1xf32>
    %215 = vector.shape_cast %214 : vector<2x1xi1> to vector<2x1xi1>
    %216 = vector.broadcast %215 : vector<2x1xi1> to vector<2x8xi1>
    %217 = arith.select %216, %105, %97 : vector<2x8xi1>, vector<2x8xf32>
    %cst_103 = arith.constant 0.000000e+00 : f32
    %218 = vector.broadcast %cst_103 : f32 to vector<2x8xf32>
    %219 = arith.cmpf ogt, %217, %218 : vector<2x8xf32>
    %cst_104 = arith.constant -1.000000e+09 : f32
    %220 = vector.broadcast %cst_104 : f32 to vector<2x8xf32>
    %221 = arith.select %219, %210, %220 : vector<2x8xi1>, vector<2x8xf32>
    %cst_105 = arith.constant dense<0xFF800000> : vector<2xf32>
    %222 = vector.multi_reduction <maximumf>, %221, %cst_105 [1] : vector<2x8xf32> to vector<2xf32>
    %cst_106 = arith.constant 0xFF800000 : f32
    %223 = vector.broadcast %cst_106 : f32 to vector<2xf32>
    %224 = arith.maximumf %223, %222 : vector<2xf32>
    %225 = vector.shape_cast %224 : vector<2xf32> to vector<2x1xf32>
    %226 = vector.broadcast %225 : vector<2x1xf32> to vector<2x8xf32>
    %227 = arith.subf %221, %226 : vector<2x8xf32>
    %228 = math.exp %227 : vector<2x8xf32>
    %cst_107 = arith.constant dense<0.000000e+00> : vector<2xf32>
    %229 = vector.multi_reduction <add>, %228, %cst_107 [1] : vector<2x8xf32> to vector<2xf32>
    %230 = vector.shape_cast %229 : vector<2xf32> to vector<2x1xf32>
    %231 = vector.broadcast %230 : vector<2x1xf32> to vector<2x8xf32>
    %232 = arith.divf %228, %231 : vector<2x8xf32>
    %cst_108 = arith.constant dense<0xFF800000> : vector<2xf32>
    %233 = vector.multi_reduction <maximumf>, %232, %cst_108 [1] : vector<2x8xf32> to vector<2xf32>
    %234 = vector.shape_cast %233 : vector<2xf32> to vector<2x1xf32>
    %235 = vector.broadcast %234 : vector<2x1xf32> to vector<2x8xf32>
    %236 = arith.cmpf oge, %232, %235 : vector<2x8xf32>
    %237 = arith.sitofp %93 : vector<2x8xi32> to vector<2x8xf32>
    %cst_109 = arith.constant 8.000000e+00 : f32
    %238 = vector.broadcast %cst_109 : f32 to vector<2x8xf32>
    %239 = arith.select %236, %237, %238 : vector<2x8xi1>, vector<2x8xf32>
    %cst_110 = arith.constant dense<0x7F800000> : vector<2xf32>
    %240 = vector.multi_reduction <minimumf>, %239, %cst_110 [1] : vector<2x8xf32> to vector<2xf32>
    %241 = vector.shape_cast %240 : vector<2xf32> to vector<2x1xf32>
    %242 = arith.fptosi %241 : vector<2x1xf32> to vector<2x1xi32>
    %243 = math.log %234 : vector<2x1xf32>
    %244 = vector.broadcast %242 : vector<2x1xi32> to vector<2x8xi32>
    %245 = arith.cmpi eq, %93, %244 : vector<2x8xi32>
    %246 = arith.extui %245 : vector<2x8xi1> to vector<2x8xi32>
    %247 = arith.sitofp %246 : vector<2x8xi32> to vector<2x8xf32>
    %248 = arith.mulf %247, %2 : vector<2x8xf32>
    %cst_111 = arith.constant dense<0.000000e+00> : vector<2xf32>
    %249 = vector.multi_reduction <add>, %248, %cst_111 [1] : vector<2x8xf32> to vector<2xf32>
    %250 = vector.shape_cast %249 : vector<2xf32> to vector<2x1xf32>
    %251 = arith.mulf %247, %3 : vector<2x8xf32>
    %cst_112 = arith.constant dense<0.000000e+00> : vector<2xf32>
    %252 = vector.multi_reduction <add>, %251, %cst_112 [1] : vector<2x8xf32> to vector<2xf32>
    %253 = vector.shape_cast %252 : vector<2xf32> to vector<2x1xf32>
    %254 = arith.subf %250, %253 : vector<2x1xf32>
    %cst_113 = arith.constant 0.000000e+00 : f32
    %255 = vector.broadcast %cst_113 : f32 to vector<2x1xf32>
    %256 = arith.maximumf %254, %255 : vector<2x1xf32>
    %257 = arith.subf %253, %250 : vector<2x1xf32>
    %cst_114 = arith.constant 0.000000e+00 : f32
    %258 = vector.broadcast %cst_114 : f32 to vector<2x1xf32>
    %259 = arith.maximumf %257, %258 : vector<2x1xf32>
    %c0_i32_115 = arith.constant 0 : i32
    %260 = vector.broadcast %c0_i32_115 : i32 to vector<2x1xi32>
    %261 = arith.cmpi ne, %242, %260 : vector<2x1xi32>
    %cst_116 = arith.constant 1.000000e+00 : f32
    %262 = vector.broadcast %cst_116 : f32 to vector<2x8xf32>
    %263 = arith.subf %262, %247 : vector<2x8xf32>
    %264 = arith.mulf %3, %263 : vector<2x8xf32>
    %265 = vector.broadcast %259 : vector<2x1xf32> to vector<2x8xf32>
    %266 = arith.mulf %247, %265 : vector<2x8xf32>
    %267 = arith.addf %264, %266 : vector<2x8xf32>
    %cst_117 = arith.constant 1.000000e+00 : f32
    %268 = vector.broadcast %cst_117 : f32 to vector<2x1xf32>
    %269 = arith.subf %256, %268 : vector<2x1xf32>
    %270 = vector.shape_cast %269 : vector<2x1xf32> to vector<2x1xf32>
    %271 = vector.broadcast %270 : vector<2x1xf32> to vector<2x8xf32>
    %272 = arith.select %99, %271, %267 : vector<2x8xi1>, vector<2x8xf32>
    %273 = vector.shape_cast %256 : vector<2x1xf32> to vector<2x1xf32>
    %274 = vector.broadcast %273 : vector<2x1xf32> to vector<2x8xf32>
    %cst_118 = arith.constant 1.000000e+00 : f32
    %275 = vector.shape_cast %261 : vector<2x1xi1> to vector<2x1xi1>
    %276 = vector.broadcast %275 : vector<2x1xi1> to vector<2x8xi1>
    %277 = vector.broadcast %cst_118 : f32 to vector<2x8xf32>
    %278 = arith.select %276, %274, %277 : vector<2x8xi1>, vector<2x8xf32>
    %cst_119 = arith.constant 0.000000e+00 : f32
    %279 = vector.broadcast %cst_119 : f32 to vector<2x8xf32>
    %280 = arith.select %99, %279, %3 : vector<2x8xi1>, vector<2x8xf32>
    %281 = vector.shape_cast %261 : vector<2x1xi1> to vector<2x1xi1>
    %282 = vector.broadcast %281 : vector<2x1xi1> to vector<2x8xi1>
    %283 = arith.select %282, %272, %280 : vector<2x8xi1>, vector<2x8xf32>
    %284 = math.absf %283 : vector<2x8xf32>
    %cst_120 = arith.constant dense<0xFF800000> : vector<2xf32>
    %285 = vector.multi_reduction <maximumf>, %284, %cst_120 [1] : vector<2x8xf32> to vector<2xf32>
    %286 = vector.shape_cast %285 : vector<2xf32> to vector<2x1xf32>
    %cst_121 = arith.constant 0.000000e+00 : f32
    %287 = vector.broadcast %cst_121 : f32 to vector<2x1xf32>
    %288 = arith.cmpf oeq, %286, %287 : vector<2x1xf32>
    %289 = arith.extui %288 : vector<2x1xi1> to vector<2x1xi32>
    %290 = arith.sitofp %289 : vector<2x1xi32> to vector<2x1xf32>
    %cst_122 = arith.constant 1.000000e+00 : f32
    %291 = vector.broadcast %cst_122 : f32 to vector<2x1xf32>
    %292 = arith.subf %291, %290 : vector<2x1xf32>
    %293 = arith.mulf %243, %292 : vector<2x1xf32>
    %294 = arith.addf %109, %293 : vector<2x1xf32>
    %cst_123 = arith.constant 0.000000e+00 : f32
    %295 = vector.broadcast %cst_123 : f32 to vector<2x8xf32>
    %296 = arith.cmpf one, %283, %295 : vector<2x8xf32>
    %297 = arith.cmpf olt, %283, %278 : vector<2x8xf32>
    %298 = arith.andi %296, %297 : vector<2x8xi1>
    %299 = arith.extui %298 : vector<2x8xi1> to vector<2x8xi32>
    %300 = arith.sitofp %299 : vector<2x8xi32> to vector<2x8xf32>
    %cst_124 = arith.constant 1.000000e+00 : f32
    %cst_125 = arith.constant 0.000000e+00 : f32
    %301 = vector.broadcast %cst_124 : f32 to vector<2x1xf32>
    %302 = vector.broadcast %cst_125 : f32 to vector<2x1xf32>
    %303 = arith.select %261, %301, %302 : vector<2x1xi1>, vector<2x1xf32>
    %304 = vector.shape_cast %303 : vector<2x1xf32> to vector<2x1xf32>
    %305 = vector.broadcast %304 : vector<2x1xf32> to vector<2x8xf32>
    %306 = arith.select %99, %305, %300 : vector<2x8xi1>, vector<2x8xf32>
    %307 = vector.extract_strided_slice %278 {offsets = [0, 0], sizes = [2, 1], strides = [1, 1]} : vector<2x8xf32> to vector<2x1xf32>
    %cst_126 = arith.constant 0.000000e+00 : f32
    %308 = vector.broadcast %cst_126 : f32 to vector<2x1xf32>
    %309 = arith.cmpf oeq, %307, %308 : vector<2x1xf32>
    %cst_127 = arith.constant 1.000000e+00 : f32
    %310 = vector.broadcast %cst_127 : f32 to vector<2x8xf32>
    %311 = arith.subf %310, %97 : vector<2x8xf32>
    %312 = arith.mulf %283, %311 : vector<2x8xf32>
    %cst_128 = arith.constant dense<0.000000e+00> : vector<2xf32>
    %313 = vector.multi_reduction <add>, %312, %cst_128 [1] : vector<2x8xf32> to vector<2xf32>
    %314 = vector.shape_cast %313 : vector<2xf32> to vector<2x1xf32>
    %cst_129 = arith.constant 0.000000e+00 : f32
    %315 = vector.broadcast %cst_129 : f32 to vector<2x1xf32>
    %316 = arith.cmpf oeq, %314, %315 : vector<2x1xf32>
    %317 = arith.ori %309, %316 : vector<2x1xi1>
    %318 = vector.shape_cast %317 : vector<2x1xi1> to vector<2x1xi1>
    %319 = vector.broadcast %318 : vector<2x1xi1> to vector<2x8xi1>
    %320 = arith.select %319, %97, %306 : vector<2x8xi1>, vector<2x8xf32>
    %cst_130 = arith.constant dense<0xFF800000> : vector<1xf32>
    %321 = vector.multi_reduction <maximumf>, %286, %cst_130 [0] : vector<2x1xf32> to vector<1xf32>
    %322 = vector.shape_cast %321 : vector<1xf32> to vector<1x1xf32>
    %cst_131 = arith.constant 0.000000e+00 : f32
    %323 = vector.broadcast %cst_131 : f32 to vector<1x1xf32>
    %324 = arith.cmpf oeq, %322, %323 : vector<1x1xf32>
    %cst_132 = arith.constant 0.000000e+00 : f32
    %325 = vector.shape_cast %324 : vector<1x1xi1> to vector<1x1xi1>
    %326 = vector.broadcast %325 : vector<1x1xi1> to vector<2x8xi1>
    %327 = vector.broadcast %cst_132 : f32 to vector<2x8xf32>
    %328 = arith.select %326, %327, %320 : vector<2x8xi1>, vector<2x8xf32>
    %329 = vector.broadcast %c0_i32_59 : i32 to vector<2x7xi32>
    %330 = arith.cmpi eq, %100, %329 : vector<2x7xi32>
    %331 = vector.shape_cast %242 : vector<2x1xi32> to vector<2x1xi32>
    %332 = vector.broadcast %331 : vector<2x1xi32> to vector<2x7xi32>
    %333 = arith.select %330, %332, %108 : vector<2x7xi1>, vector<2x7xi32>
    %334 = arith.mulf %247, %0 : vector<2x8xf32>
    %cst_133 = arith.constant dense<0.000000e+00> : vector<2xf32>
    %335 = vector.multi_reduction <add>, %334, %cst_133 [1] : vector<2x8xf32> to vector<2xf32>
    %336 = vector.shape_cast %335 : vector<2xf32> to vector<2x1xf32>
    %337 = arith.mulf %247, %1 : vector<2x8xf32>
    %cst_134 = arith.constant dense<0.000000e+00> : vector<2xf32>
    %338 = vector.multi_reduction <add>, %337, %cst_134 [1] : vector<2x8xf32> to vector<2xf32>
    %339 = vector.shape_cast %338 : vector<2xf32> to vector<2x1xf32>
    %c1_i32 = arith.constant 1 : i32
    %c0_135 = arith.constant 0 : index
    %c0_136 = arith.constant 0 : index
    %340 = vector.load %arg8[%c0_135, %c0_136] : memref<2x32xf32, #tpu.memory_space<vmem>>, vector<1x32xf32>
    %341 = vector.broadcast %336 : vector<2x1xf32> to vector<2x32xf32>
    %342 = vector.broadcast %340 : vector<1x32xf32> to vector<2x32xf32>
    %343 = arith.mulf %341, %342 : vector<2x32xf32>
    %c1_137 = arith.constant 1 : index
    %c0_138 = arith.constant 0 : index
    %344 = vector.load %arg8[%c1_137, %c0_138] : memref<2x32xf32, #tpu.memory_space<vmem>>, vector<1x32xf32>
    %345 = vector.broadcast %339 : vector<2x1xf32> to vector<2x32xf32>
    %346 = vector.broadcast %344 : vector<1x32xf32> to vector<2x32xf32>
    %347 = arith.mulf %345, %346 : vector<2x32xf32>
    %348 = arith.addf %343, %347 : vector<2x32xf32>
    %c0_139 = arith.constant 0 : index
    %c0_140 = arith.constant 0 : index
    %349 = vector.load %arg9[%c0_139, %c0_140] : memref<1x32xf32, #tpu.memory_space<vmem>>, vector<1x32xf32>
    %350 = vector.broadcast %349 : vector<1x32xf32> to vector<2x32xf32>
    %351 = arith.addf %348, %350 : vector<2x32xf32>
    %c0_141 = arith.constant 0 : index
    %c0_142 = arith.constant 0 : index
    %352 = vector.load %arg10[%c0_141, %c0_142] : memref<32x96xf32, #tpu.memory_space<vmem>>, vector<32x96xf32>
    %cst_143 = arith.constant dense<0.000000e+00> : vector<2x96xf32>
    %353 = tpu.matmul %351, %352, %cst_143 {dimension_numbers = #tpu.dot_dimension_numbers<[1], [0], [0], [1], [0, 0, 1, 1], [], []>} : vector<2x32xf32>, vector<32x96xf32>, vector<2x96xf32> -> vector<2x96xf32>
    %c0_144 = arith.constant 0 : index
    %c0_145 = arith.constant 0 : index
    %354 = vector.load %arg12[%c0_144, %c0_145] : memref<1x96xf32, #tpu.memory_space<vmem>>, vector<1x96xf32>
    %355 = vector.broadcast %354 : vector<1x96xf32> to vector<2x96xf32>
    %356 = arith.addf %353, %355 : vector<2x96xf32>
    %c0_146 = arith.constant 0 : index
    %c0_147 = arith.constant 0 : index
    %357 = vector.load %arg11[%c0_146, %c0_147] : memref<32x96xf32, #tpu.memory_space<vmem>>, vector<32x96xf32>
    %cst_148 = arith.constant dense<0.000000e+00> : vector<2x96xf32>
    %358 = tpu.matmul %157, %357, %cst_148 {dimension_numbers = #tpu.dot_dimension_numbers<[1], [0], [0], [1], [0, 0, 1, 1], [], []>} : vector<2x32xf32>, vector<32x96xf32>, vector<2x96xf32> -> vector<2x96xf32>
    %c0_149 = arith.constant 0 : index
    %c0_150 = arith.constant 0 : index
    %359 = vector.load %arg13[%c0_149, %c0_150] : memref<1x96xf32, #tpu.memory_space<vmem>>, vector<1x96xf32>
    %360 = vector.broadcast %359 : vector<1x96xf32> to vector<2x96xf32>
    %361 = arith.addf %358, %360 : vector<2x96xf32>
    %362 = vector.extract_strided_slice %356 {offsets = [0, 0], sizes = [2, 32], strides = [1, 1]} : vector<2x96xf32> to vector<2x32xf32>
    %363 = vector.extract_strided_slice %361 {offsets = [0, 0], sizes = [2, 32], strides = [1, 1]} : vector<2x96xf32> to vector<2x32xf32>
    %364 = arith.addf %362, %363 : vector<2x32xf32>
    %365 = arith.negf %364 : vector<2x32xf32>
    %366 = math.exp %365 : vector<2x32xf32>
    %cst_151 = arith.constant 1.000000e+00 : f32
    %367 = vector.broadcast %cst_151 : f32 to vector<2x32xf32>
    %368 = arith.addf %367, %366 : vector<2x32xf32>
    %369 = arith.divf %367, %368 : vector<2x32xf32>
    %370 = vector.extract_strided_slice %356 {offsets = [0, 32], sizes = [2, 32], strides = [1, 1]} : vector<2x96xf32> to vector<2x32xf32>
    %371 = vector.extract_strided_slice %361 {offsets = [0, 32], sizes = [2, 32], strides = [1, 1]} : vector<2x96xf32> to vector<2x32xf32>
    %372 = arith.addf %370, %371 : vector<2x32xf32>
    %373 = arith.negf %372 : vector<2x32xf32>
    %374 = math.exp %373 : vector<2x32xf32>
    %cst_152 = arith.constant 1.000000e+00 : f32
    %375 = vector.broadcast %cst_152 : f32 to vector<2x32xf32>
    %376 = arith.addf %375, %374 : vector<2x32xf32>
    %377 = arith.divf %375, %376 : vector<2x32xf32>
    %378 = vector.extract_strided_slice %356 {offsets = [0, 64], sizes = [2, 32], strides = [1, 1]} : vector<2x96xf32> to vector<2x32xf32>
    %379 = vector.extract_strided_slice %361 {offsets = [0, 64], sizes = [2, 32], strides = [1, 1]} : vector<2x96xf32> to vector<2x32xf32>
    %380 = arith.mulf %369, %379 : vector<2x32xf32>
    %381 = arith.addf %378, %380 : vector<2x32xf32>
    %382 = math.tanh %381 : vector<2x32xf32>
    %cst_153 = arith.constant 1.000000e+00 : f32
    %383 = vector.broadcast %cst_153 : f32 to vector<2x32xf32>
    %384 = arith.subf %383, %377 : vector<2x32xf32>
    %385 = arith.mulf %384, %382 : vector<2x32xf32>
    %386 = arith.mulf %377, %157 : vector<2x32xf32>
    %387 = arith.addf %385, %386 : vector<2x32xf32>
    %388 = vector.shape_cast %278 : vector<2x8xf32> to vector<2x8x1xf32>
    %c0_154 = arith.constant 0 : index
    %c0_155 = arith.constant 0 : index
    %389 = vector.load %arg15[%c0_154, %c0_155] : memref<2x32xf32, #tpu.memory_space<vmem>>, vector<1x32xf32>
    %390 = vector.shape_cast %389 : vector<1x32xf32> to vector<1x1x32xf32>
    %391 = vector.broadcast %388 : vector<2x8x1xf32> to vector<2x8x32xf32>
    %392 = vector.broadcast %390 : vector<1x1x32xf32> to vector<2x8x32xf32>
    %393 = arith.mulf %391, %392 : vector<2x8x32xf32>
    %394 = vector.shape_cast %283 : vector<2x8xf32> to vector<2x8x1xf32>
    %c1_156 = arith.constant 1 : index
    %c0_157 = arith.constant 0 : index
    %395 = vector.load %arg15[%c1_156, %c0_157] : memref<2x32xf32, #tpu.memory_space<vmem>>, vector<1x32xf32>
    %396 = vector.shape_cast %395 : vector<1x32xf32> to vector<1x1x32xf32>
    %397 = vector.broadcast %394 : vector<2x8x1xf32> to vector<2x8x32xf32>
    %398 = vector.broadcast %396 : vector<1x1x32xf32> to vector<2x8x32xf32>
    %399 = arith.mulf %397, %398 : vector<2x8x32xf32>
    %400 = arith.addf %393, %399 : vector<2x8x32xf32>
    %c0_158 = arith.constant 0 : index
    %c0_159 = arith.constant 0 : index
    %401 = vector.load %arg16[%c0_158, %c0_159] : memref<1x32xf32, #tpu.memory_space<vmem>>, vector<1x32xf32>
    %402 = vector.shape_cast %401 : vector<1x32xf32> to vector<1x1x32xf32>
    %403 = vector.broadcast %402 : vector<1x1x32xf32> to vector<2x8x32xf32>
    %404 = arith.addf %400, %403 : vector<2x8x32xf32>
    %405 = arith.addf %25, %404 : vector<2x8x32xf32>
    %c0_160 = arith.constant 0 : index
    %c0_161 = arith.constant 0 : index
    %406 = vector.load %arg17[%c0_160, %c0_161] : memref<32x32xf32, #tpu.memory_space<vmem>>, vector<32x32xf32>
    %cst_162 = arith.constant dense<0.000000e+00> : vector<2x32xf32>
    %407 = tpu.matmul %387, %406, %cst_162 {dimension_numbers = #tpu.dot_dimension_numbers<[1], [0], [0], [1], [0, 0, 1, 1], [], []>} : vector<2x32xf32>, vector<32x32xf32>, vector<2x32xf32> -> vector<2x32xf32>
    %408 = vector.shape_cast %407 : vector<2x32xf32> to vector<2x1x32xf32>
    %409 = vector.broadcast %408 : vector<2x1x32xf32> to vector<2x8x32xf32>
    %410 = arith.addf %405, %409 : vector<2x8x32xf32>
    %411 = math.tanh %410 : vector<2x8x32xf32>
    %412 = vector.shape_cast %411 : vector<2x8x32xf32> to vector<16x32xf32>
    %c0_163 = arith.constant 0 : index
    %c0_164 = arith.constant 0 : index
    %413 = vector.load %arg18[%c0_163, %c0_164] : memref<32x1xf32, #tpu.memory_space<vmem>>, vector<32x1xf32>
    %cst_165 = arith.constant dense<0.000000e+00> : vector<16x1xf32>
    %414 = tpu.matmul %412, %413, %cst_165 {dimension_numbers = #tpu.dot_dimension_numbers<[1], [0], [0], [1], [0, 0, 1, 1], [], []>} : vector<16x32xf32>, vector<32x1xf32>, vector<16x1xf32> -> vector<16x1xf32>
    %415 = vector.shape_cast %414 : vector<16x1xf32> to vector<2x8xf32>
    %cst_166 = arith.constant dense<0xFF800000> : vector<2xf32>
    %416 = vector.multi_reduction <maximumf>, %415, %cst_166 [1] : vector<2x8xf32> to vector<2xf32>
    %cst_167 = arith.constant 0xFF800000 : f32
    %417 = vector.broadcast %cst_167 : f32 to vector<2xf32>
    %418 = arith.maximumf %417, %416 : vector<2xf32>
    %419 = vector.shape_cast %418 : vector<2xf32> to vector<2x1xf32>
    %420 = vector.broadcast %419 : vector<2x1xf32> to vector<2x8xf32>
    %421 = arith.subf %415, %420 : vector<2x8xf32>
    %422 = math.exp %421 : vector<2x8xf32>
    %cst_168 = arith.constant dense<0.000000e+00> : vector<2xf32>
    %423 = vector.multi_reduction <add>, %422, %cst_168 [1] : vector<2x8xf32> to vector<2xf32>
    %424 = vector.shape_cast %423 : vector<2xf32> to vector<2x1xf32>
    %425 = vector.broadcast %424 : vector<2x1xf32> to vector<2x8xf32>
    %426 = arith.divf %422, %425 : vector<2x8xf32>
    %427 = vector.shape_cast %426 : vector<2x8xf32> to vector<2x8x1xf32>
    %428 = vector.broadcast %427 : vector<2x8x1xf32> to vector<2x8x32xf32>
    %429 = arith.mulf %428, %20 : vector<2x8x32xf32>
    %cst_169 = arith.constant dense<0.000000e+00> : vector<2x32xf32>
    %430 = vector.multi_reduction <add>, %429, %cst_169 [1] : vector<2x8x32xf32> to vector<2x32xf32>
    %c0_170 = arith.constant 0 : index
    %c0_171 = arith.constant 0 : index
    %431 = vector.load %arg19[%c0_170, %c0_171] : memref<32x32xf32, #tpu.memory_space<vmem>>, vector<32x32xf32>
    %cst_172 = arith.constant dense<0.000000e+00> : vector<2x32xf32>
    %432 = tpu.matmul %430, %431, %cst_172 {dimension_numbers = #tpu.dot_dimension_numbers<[1], [0], [0], [1], [0, 0, 1, 1], [], []>} : vector<2x32xf32>, vector<32x32xf32>, vector<2x32xf32> -> vector<2x32xf32>
    %433 = vector.shape_cast %432 : vector<2x32xf32> to vector<2x1x32xf32>
    %434 = vector.broadcast %433 : vector<2x1x32xf32> to vector<2x8x32xf32>
    %435 = arith.addf %26, %434 : vector<2x8x32xf32>
    %436 = math.tanh %435 : vector<2x8x32xf32>
    %437 = vector.shape_cast %436 : vector<2x8x32xf32> to vector<16x32xf32>
    %c0_173 = arith.constant 0 : index
    %c0_174 = arith.constant 0 : index
    %438 = vector.load %arg20[%c0_173, %c0_174] : memref<32x1xf32, #tpu.memory_space<vmem>>, vector<32x1xf32>
    %cst_175 = arith.constant dense<0.000000e+00> : vector<16x1xf32>
    %439 = tpu.matmul %437, %438, %cst_175 {dimension_numbers = #tpu.dot_dimension_numbers<[1], [0], [0], [1], [0, 0, 1, 1], [], []>} : vector<16x32xf32>, vector<32x1xf32>, vector<16x1xf32> -> vector<16x1xf32>
    %440 = vector.shape_cast %439 : vector<16x1xf32> to vector<2x8xf32>
    %cst_176 = arith.constant dense<0.000000e+00> : vector<2xf32>
    %441 = vector.multi_reduction <add>, %328, %cst_176 [1] : vector<2x8xf32> to vector<2xf32>
    %442 = vector.shape_cast %441 : vector<2xf32> to vector<2x1xf32>
    %cst_177 = arith.constant 0.000000e+00 : f32
    %443 = vector.broadcast %cst_177 : f32 to vector<2x1xf32>
    %444 = arith.cmpf ogt, %442, %443 : vector<2x1xf32>
    %445 = vector.shape_cast %444 : vector<2x1xi1> to vector<2x1xi1>
    %446 = vector.broadcast %445 : vector<2x1xi1> to vector<2x8xi1>
    %447 = arith.select %446, %328, %97 : vector<2x8xi1>, vector<2x8xf32>
    %cst_178 = arith.constant 0.000000e+00 : f32
    %448 = vector.broadcast %cst_178 : f32 to vector<2x8xf32>
    %449 = arith.cmpf ogt, %447, %448 : vector<2x8xf32>
    %cst_179 = arith.constant -1.000000e+09 : f32
    %450 = vector.broadcast %cst_179 : f32 to vector<2x8xf32>
    %451 = arith.select %449, %440, %450 : vector<2x8xi1>, vector<2x8xf32>
    %cst_180 = arith.constant dense<0xFF800000> : vector<2xf32>
    %452 = vector.multi_reduction <maximumf>, %451, %cst_180 [1] : vector<2x8xf32> to vector<2xf32>
    %cst_181 = arith.constant 0xFF800000 : f32
    %453 = vector.broadcast %cst_181 : f32 to vector<2xf32>
    %454 = arith.maximumf %453, %452 : vector<2xf32>
    %455 = vector.shape_cast %454 : vector<2xf32> to vector<2x1xf32>
    %456 = vector.broadcast %455 : vector<2x1xf32> to vector<2x8xf32>
    %457 = arith.subf %451, %456 : vector<2x8xf32>
    %458 = math.exp %457 : vector<2x8xf32>
    %cst_182 = arith.constant dense<0.000000e+00> : vector<2xf32>
    %459 = vector.multi_reduction <add>, %458, %cst_182 [1] : vector<2x8xf32> to vector<2xf32>
    %460 = vector.shape_cast %459 : vector<2xf32> to vector<2x1xf32>
    %461 = vector.broadcast %460 : vector<2x1xf32> to vector<2x8xf32>
    %462 = arith.divf %458, %461 : vector<2x8xf32>
    %cst_183 = arith.constant dense<0xFF800000> : vector<2xf32>
    %463 = vector.multi_reduction <maximumf>, %462, %cst_183 [1] : vector<2x8xf32> to vector<2xf32>
    %464 = vector.shape_cast %463 : vector<2xf32> to vector<2x1xf32>
    %465 = vector.broadcast %464 : vector<2x1xf32> to vector<2x8xf32>
    %466 = arith.cmpf oge, %462, %465 : vector<2x8xf32>
    %467 = arith.sitofp %93 : vector<2x8xi32> to vector<2x8xf32>
    %cst_184 = arith.constant 8.000000e+00 : f32
    %468 = vector.broadcast %cst_184 : f32 to vector<2x8xf32>
    %469 = arith.select %466, %467, %468 : vector<2x8xi1>, vector<2x8xf32>
    %cst_185 = arith.constant dense<0x7F800000> : vector<2xf32>
    %470 = vector.multi_reduction <minimumf>, %469, %cst_185 [1] : vector<2x8xf32> to vector<2xf32>
    %471 = vector.shape_cast %470 : vector<2xf32> to vector<2x1xf32>
    %472 = arith.fptosi %471 : vector<2x1xf32> to vector<2x1xi32>
    %473 = math.log %464 : vector<2x1xf32>
    %474 = vector.broadcast %472 : vector<2x1xi32> to vector<2x8xi32>
    %475 = arith.cmpi eq, %93, %474 : vector<2x8xi32>
    %476 = arith.extui %475 : vector<2x8xi1> to vector<2x8xi32>
    %477 = arith.sitofp %476 : vector<2x8xi32> to vector<2x8xf32>
    %478 = arith.mulf %477, %278 : vector<2x8xf32>
    %cst_186 = arith.constant dense<0.000000e+00> : vector<2xf32>
    %479 = vector.multi_reduction <add>, %478, %cst_186 [1] : vector<2x8xf32> to vector<2xf32>
    %480 = vector.shape_cast %479 : vector<2xf32> to vector<2x1xf32>
    %481 = arith.mulf %477, %283 : vector<2x8xf32>
    %cst_187 = arith.constant dense<0.000000e+00> : vector<2xf32>
    %482 = vector.multi_reduction <add>, %481, %cst_187 [1] : vector<2x8xf32> to vector<2xf32>
    %483 = vector.shape_cast %482 : vector<2xf32> to vector<2x1xf32>
    %484 = arith.subf %480, %483 : vector<2x1xf32>
    %cst_188 = arith.constant 0.000000e+00 : f32
    %485 = vector.broadcast %cst_188 : f32 to vector<2x1xf32>
    %486 = arith.maximumf %484, %485 : vector<2x1xf32>
    %487 = arith.subf %483, %480 : vector<2x1xf32>
    %cst_189 = arith.constant 0.000000e+00 : f32
    %488 = vector.broadcast %cst_189 : f32 to vector<2x1xf32>
    %489 = arith.maximumf %487, %488 : vector<2x1xf32>
    %c0_i32_190 = arith.constant 0 : i32
    %490 = vector.broadcast %c0_i32_190 : i32 to vector<2x1xi32>
    %491 = arith.cmpi ne, %472, %490 : vector<2x1xi32>
    %cst_191 = arith.constant 1.000000e+00 : f32
    %492 = vector.broadcast %cst_191 : f32 to vector<2x8xf32>
    %493 = arith.subf %492, %477 : vector<2x8xf32>
    %494 = arith.mulf %283, %493 : vector<2x8xf32>
    %495 = vector.broadcast %489 : vector<2x1xf32> to vector<2x8xf32>
    %496 = arith.mulf %477, %495 : vector<2x8xf32>
    %497 = arith.addf %494, %496 : vector<2x8xf32>
    %cst_192 = arith.constant 1.000000e+00 : f32
    %498 = vector.broadcast %cst_192 : f32 to vector<2x1xf32>
    %499 = arith.subf %486, %498 : vector<2x1xf32>
    %500 = vector.shape_cast %499 : vector<2x1xf32> to vector<2x1xf32>
    %501 = vector.broadcast %500 : vector<2x1xf32> to vector<2x8xf32>
    %502 = arith.select %99, %501, %497 : vector<2x8xi1>, vector<2x8xf32>
    %503 = vector.shape_cast %486 : vector<2x1xf32> to vector<2x1xf32>
    %504 = vector.broadcast %503 : vector<2x1xf32> to vector<2x8xf32>
    %cst_193 = arith.constant 1.000000e+00 : f32
    %505 = vector.shape_cast %491 : vector<2x1xi1> to vector<2x1xi1>
    %506 = vector.broadcast %505 : vector<2x1xi1> to vector<2x8xi1>
    %507 = vector.broadcast %cst_193 : f32 to vector<2x8xf32>
    %508 = arith.select %506, %504, %507 : vector<2x8xi1>, vector<2x8xf32>
    %cst_194 = arith.constant 0.000000e+00 : f32
    %509 = vector.broadcast %cst_194 : f32 to vector<2x8xf32>
    %510 = arith.select %99, %509, %283 : vector<2x8xi1>, vector<2x8xf32>
    %511 = vector.shape_cast %491 : vector<2x1xi1> to vector<2x1xi1>
    %512 = vector.broadcast %511 : vector<2x1xi1> to vector<2x8xi1>
    %513 = arith.select %512, %502, %510 : vector<2x8xi1>, vector<2x8xf32>
    %514 = math.absf %513 : vector<2x8xf32>
    %cst_195 = arith.constant dense<0xFF800000> : vector<2xf32>
    %515 = vector.multi_reduction <maximumf>, %514, %cst_195 [1] : vector<2x8xf32> to vector<2xf32>
    %516 = vector.shape_cast %515 : vector<2xf32> to vector<2x1xf32>
    %cst_196 = arith.constant 0.000000e+00 : f32
    %517 = vector.broadcast %cst_196 : f32 to vector<2x1xf32>
    %518 = arith.cmpf oeq, %516, %517 : vector<2x1xf32>
    %519 = arith.extui %518 : vector<2x1xi1> to vector<2x1xi32>
    %520 = arith.sitofp %519 : vector<2x1xi32> to vector<2x1xf32>
    %cst_197 = arith.constant 1.000000e+00 : f32
    %521 = vector.broadcast %cst_197 : f32 to vector<2x1xf32>
    %522 = arith.subf %521, %520 : vector<2x1xf32>
    %523 = arith.mulf %473, %522 : vector<2x1xf32>
    %524 = arith.addf %294, %523 : vector<2x1xf32>
    %cst_198 = arith.constant 0.000000e+00 : f32
    %525 = vector.broadcast %cst_198 : f32 to vector<2x8xf32>
    %526 = arith.cmpf one, %513, %525 : vector<2x8xf32>
    %527 = arith.cmpf olt, %513, %508 : vector<2x8xf32>
    %528 = arith.andi %526, %527 : vector<2x8xi1>
    %529 = arith.extui %528 : vector<2x8xi1> to vector<2x8xi32>
    %530 = arith.sitofp %529 : vector<2x8xi32> to vector<2x8xf32>
    %cst_199 = arith.constant 1.000000e+00 : f32
    %cst_200 = arith.constant 0.000000e+00 : f32
    %531 = vector.broadcast %cst_199 : f32 to vector<2x1xf32>
    %532 = vector.broadcast %cst_200 : f32 to vector<2x1xf32>
    %533 = arith.select %491, %531, %532 : vector<2x1xi1>, vector<2x1xf32>
    %534 = vector.shape_cast %533 : vector<2x1xf32> to vector<2x1xf32>
    %535 = vector.broadcast %534 : vector<2x1xf32> to vector<2x8xf32>
    %536 = arith.select %99, %535, %530 : vector<2x8xi1>, vector<2x8xf32>
    %537 = vector.extract_strided_slice %508 {offsets = [0, 0], sizes = [2, 1], strides = [1, 1]} : vector<2x8xf32> to vector<2x1xf32>
    %cst_201 = arith.constant 0.000000e+00 : f32
    %538 = vector.broadcast %cst_201 : f32 to vector<2x1xf32>
    %539 = arith.cmpf oeq, %537, %538 : vector<2x1xf32>
    %cst_202 = arith.constant 1.000000e+00 : f32
    %540 = vector.broadcast %cst_202 : f32 to vector<2x8xf32>
    %541 = arith.subf %540, %97 : vector<2x8xf32>
    %542 = arith.mulf %513, %541 : vector<2x8xf32>
    %cst_203 = arith.constant dense<0.000000e+00> : vector<2xf32>
    %543 = vector.multi_reduction <add>, %542, %cst_203 [1] : vector<2x8xf32> to vector<2xf32>
    %544 = vector.shape_cast %543 : vector<2xf32> to vector<2x1xf32>
    %cst_204 = arith.constant 0.000000e+00 : f32
    %545 = vector.broadcast %cst_204 : f32 to vector<2x1xf32>
    %546 = arith.cmpf oeq, %544, %545 : vector<2x1xf32>
    %547 = arith.ori %539, %546 : vector<2x1xi1>
    %548 = vector.shape_cast %547 : vector<2x1xi1> to vector<2x1xi1>
    %549 = vector.broadcast %548 : vector<2x1xi1> to vector<2x8xi1>
    %550 = arith.select %549, %97, %536 : vector<2x8xi1>, vector<2x8xf32>
    %cst_205 = arith.constant dense<0xFF800000> : vector<1xf32>
    %551 = vector.multi_reduction <maximumf>, %516, %cst_205 [0] : vector<2x1xf32> to vector<1xf32>
    %552 = vector.shape_cast %551 : vector<1xf32> to vector<1x1xf32>
    %cst_206 = arith.constant 0.000000e+00 : f32
    %553 = vector.broadcast %cst_206 : f32 to vector<1x1xf32>
    %554 = arith.cmpf oeq, %552, %553 : vector<1x1xf32>
    %cst_207 = arith.constant 0.000000e+00 : f32
    %555 = vector.shape_cast %554 : vector<1x1xi1> to vector<1x1xi1>
    %556 = vector.broadcast %555 : vector<1x1xi1> to vector<2x8xi1>
    %557 = vector.broadcast %cst_207 : f32 to vector<2x8xf32>
    %558 = arith.select %556, %557, %550 : vector<2x8xi1>, vector<2x8xf32>
    %559 = vector.broadcast %c1_i32 : i32 to vector<2x7xi32>
    %560 = arith.cmpi eq, %100, %559 : vector<2x7xi32>
    %561 = vector.shape_cast %472 : vector<2x1xi32> to vector<2x1xi32>
    %562 = vector.broadcast %561 : vector<2x1xi32> to vector<2x7xi32>
    %563 = arith.select %560, %562, %333 : vector<2x7xi1>, vector<2x7xi32>
    %564 = arith.mulf %477, %0 : vector<2x8xf32>
    %cst_208 = arith.constant dense<0.000000e+00> : vector<2xf32>
    %565 = vector.multi_reduction <add>, %564, %cst_208 [1] : vector<2x8xf32> to vector<2xf32>
    %566 = vector.shape_cast %565 : vector<2xf32> to vector<2x1xf32>
    %567 = arith.mulf %477, %1 : vector<2x8xf32>
    %cst_209 = arith.constant dense<0.000000e+00> : vector<2xf32>
    %568 = vector.multi_reduction <add>, %567, %cst_209 [1] : vector<2x8xf32> to vector<2xf32>
    %569 = vector.shape_cast %568 : vector<2xf32> to vector<2x1xf32>
    %c2_i32 = arith.constant 2 : i32
    %c0_210 = arith.constant 0 : index
    %c0_211 = arith.constant 0 : index
    %570 = vector.load %arg8[%c0_210, %c0_211] : memref<2x32xf32, #tpu.memory_space<vmem>>, vector<1x32xf32>
    %571 = vector.broadcast %566 : vector<2x1xf32> to vector<2x32xf32>
    %572 = vector.broadcast %570 : vector<1x32xf32> to vector<2x32xf32>
    %573 = arith.mulf %571, %572 : vector<2x32xf32>
    %c1_212 = arith.constant 1 : index
    %c0_213 = arith.constant 0 : index
    %574 = vector.load %arg8[%c1_212, %c0_213] : memref<2x32xf32, #tpu.memory_space<vmem>>, vector<1x32xf32>
    %575 = vector.broadcast %569 : vector<2x1xf32> to vector<2x32xf32>
    %576 = vector.broadcast %574 : vector<1x32xf32> to vector<2x32xf32>
    %577 = arith.mulf %575, %576 : vector<2x32xf32>
    %578 = arith.addf %573, %577 : vector<2x32xf32>
    %c0_214 = arith.constant 0 : index
    %c0_215 = arith.constant 0 : index
    %579 = vector.load %arg9[%c0_214, %c0_215] : memref<1x32xf32, #tpu.memory_space<vmem>>, vector<1x32xf32>
    %580 = vector.broadcast %579 : vector<1x32xf32> to vector<2x32xf32>
    %581 = arith.addf %578, %580 : vector<2x32xf32>
    %c0_216 = arith.constant 0 : index
    %c0_217 = arith.constant 0 : index
    %582 = vector.load %arg10[%c0_216, %c0_217] : memref<32x96xf32, #tpu.memory_space<vmem>>, vector<32x96xf32>
    %cst_218 = arith.constant dense<0.000000e+00> : vector<2x96xf32>
    %583 = tpu.matmul %581, %582, %cst_218 {dimension_numbers = #tpu.dot_dimension_numbers<[1], [0], [0], [1], [0, 0, 1, 1], [], []>} : vector<2x32xf32>, vector<32x96xf32>, vector<2x96xf32> -> vector<2x96xf32>
    %c0_219 = arith.constant 0 : index
    %c0_220 = arith.constant 0 : index
    %584 = vector.load %arg12[%c0_219, %c0_220] : memref<1x96xf32, #tpu.memory_space<vmem>>, vector<1x96xf32>
    %585 = vector.broadcast %584 : vector<1x96xf32> to vector<2x96xf32>
    %586 = arith.addf %583, %585 : vector<2x96xf32>
    %c0_221 = arith.constant 0 : index
    %c0_222 = arith.constant 0 : index
    %587 = vector.load %arg11[%c0_221, %c0_222] : memref<32x96xf32, #tpu.memory_space<vmem>>, vector<32x96xf32>
    %cst_223 = arith.constant dense<0.000000e+00> : vector<2x96xf32>
    %588 = tpu.matmul %387, %587, %cst_223 {dimension_numbers = #tpu.dot_dimension_numbers<[1], [0], [0], [1], [0, 0, 1, 1], [], []>} : vector<2x32xf32>, vector<32x96xf32>, vector<2x96xf32> -> vector<2x96xf32>
    %c0_224 = arith.constant 0 : index
    %c0_225 = arith.constant 0 : index
    %589 = vector.load %arg13[%c0_224, %c0_225] : memref<1x96xf32, #tpu.memory_space<vmem>>, vector<1x96xf32>
    %590 = vector.broadcast %589 : vector<1x96xf32> to vector<2x96xf32>
    %591 = arith.addf %588, %590 : vector<2x96xf32>
    %592 = vector.extract_strided_slice %586 {offsets = [0, 0], sizes = [2, 32], strides = [1, 1]} : vector<2x96xf32> to vector<2x32xf32>
    %593 = vector.extract_strided_slice %591 {offsets = [0, 0], sizes = [2, 32], strides = [1, 1]} : vector<2x96xf32> to vector<2x32xf32>
    %594 = arith.addf %592, %593 : vector<2x32xf32>
    %595 = arith.negf %594 : vector<2x32xf32>
    %596 = math.exp %595 : vector<2x32xf32>
    %cst_226 = arith.constant 1.000000e+00 : f32
    %597 = vector.broadcast %cst_226 : f32 to vector<2x32xf32>
    %598 = arith.addf %597, %596 : vector<2x32xf32>
    %599 = arith.divf %597, %598 : vector<2x32xf32>
    %600 = vector.extract_strided_slice %586 {offsets = [0, 32], sizes = [2, 32], strides = [1, 1]} : vector<2x96xf32> to vector<2x32xf32>
    %601 = vector.extract_strided_slice %591 {offsets = [0, 32], sizes = [2, 32], strides = [1, 1]} : vector<2x96xf32> to vector<2x32xf32>
    %602 = arith.addf %600, %601 : vector<2x32xf32>
    %603 = arith.negf %602 : vector<2x32xf32>
    %604 = math.exp %603 : vector<2x32xf32>
    %cst_227 = arith.constant 1.000000e+00 : f32
    %605 = vector.broadcast %cst_227 : f32 to vector<2x32xf32>
    %606 = arith.addf %605, %604 : vector<2x32xf32>
    %607 = arith.divf %605, %606 : vector<2x32xf32>
    %608 = vector.extract_strided_slice %586 {offsets = [0, 64], sizes = [2, 32], strides = [1, 1]} : vector<2x96xf32> to vector<2x32xf32>
    %609 = vector.extract_strided_slice %591 {offsets = [0, 64], sizes = [2, 32], strides = [1, 1]} : vector<2x96xf32> to vector<2x32xf32>
    %610 = arith.mulf %599, %609 : vector<2x32xf32>
    %611 = arith.addf %608, %610 : vector<2x32xf32>
    %612 = math.tanh %611 : vector<2x32xf32>
    %cst_228 = arith.constant 1.000000e+00 : f32
    %613 = vector.broadcast %cst_228 : f32 to vector<2x32xf32>
    %614 = arith.subf %613, %607 : vector<2x32xf32>
    %615 = arith.mulf %614, %612 : vector<2x32xf32>
    %616 = arith.mulf %607, %387 : vector<2x32xf32>
    %617 = arith.addf %615, %616 : vector<2x32xf32>
    %618 = vector.shape_cast %508 : vector<2x8xf32> to vector<2x8x1xf32>
    %c0_229 = arith.constant 0 : index
    %c0_230 = arith.constant 0 : index
    %619 = vector.load %arg15[%c0_229, %c0_230] : memref<2x32xf32, #tpu.memory_space<vmem>>, vector<1x32xf32>
    %620 = vector.shape_cast %619 : vector<1x32xf32> to vector<1x1x32xf32>
    %621 = vector.broadcast %618 : vector<2x8x1xf32> to vector<2x8x32xf32>
    %622 = vector.broadcast %620 : vector<1x1x32xf32> to vector<2x8x32xf32>
    %623 = arith.mulf %621, %622 : vector<2x8x32xf32>
    %624 = vector.shape_cast %513 : vector<2x8xf32> to vector<2x8x1xf32>
    %c1_231 = arith.constant 1 : index
    %c0_232 = arith.constant 0 : index
    %625 = vector.load %arg15[%c1_231, %c0_232] : memref<2x32xf32, #tpu.memory_space<vmem>>, vector<1x32xf32>
    %626 = vector.shape_cast %625 : vector<1x32xf32> to vector<1x1x32xf32>
    %627 = vector.broadcast %624 : vector<2x8x1xf32> to vector<2x8x32xf32>
    %628 = vector.broadcast %626 : vector<1x1x32xf32> to vector<2x8x32xf32>
    %629 = arith.mulf %627, %628 : vector<2x8x32xf32>
    %630 = arith.addf %623, %629 : vector<2x8x32xf32>
    %c0_233 = arith.constant 0 : index
    %c0_234 = arith.constant 0 : index
    %631 = vector.load %arg16[%c0_233, %c0_234] : memref<1x32xf32, #tpu.memory_space<vmem>>, vector<1x32xf32>
    %632 = vector.shape_cast %631 : vector<1x32xf32> to vector<1x1x32xf32>
    %633 = vector.broadcast %632 : vector<1x1x32xf32> to vector<2x8x32xf32>
    %634 = arith.addf %630, %633 : vector<2x8x32xf32>
    %635 = arith.addf %25, %634 : vector<2x8x32xf32>
    %c0_235 = arith.constant 0 : index
    %c0_236 = arith.constant 0 : index
    %636 = vector.load %arg17[%c0_235, %c0_236] : memref<32x32xf32, #tpu.memory_space<vmem>>, vector<32x32xf32>
    %cst_237 = arith.constant dense<0.000000e+00> : vector<2x32xf32>
    %637 = tpu.matmul %617, %636, %cst_237 {dimension_numbers = #tpu.dot_dimension_numbers<[1], [0], [0], [1], [0, 0, 1, 1], [], []>} : vector<2x32xf32>, vector<32x32xf32>, vector<2x32xf32> -> vector<2x32xf32>
    %638 = vector.shape_cast %637 : vector<2x32xf32> to vector<2x1x32xf32>
    %639 = vector.broadcast %638 : vector<2x1x32xf32> to vector<2x8x32xf32>
    %640 = arith.addf %635, %639 : vector<2x8x32xf32>
    %641 = math.tanh %640 : vector<2x8x32xf32>
    %642 = vector.shape_cast %641 : vector<2x8x32xf32> to vector<16x32xf32>
    %c0_238 = arith.constant 0 : index
    %c0_239 = arith.constant 0 : index
    %643 = vector.load %arg18[%c0_238, %c0_239] : memref<32x1xf32, #tpu.memory_space<vmem>>, vector<32x1xf32>
    %cst_240 = arith.constant dense<0.000000e+00> : vector<16x1xf32>
    %644 = tpu.matmul %642, %643, %cst_240 {dimension_numbers = #tpu.dot_dimension_numbers<[1], [0], [0], [1], [0, 0, 1, 1], [], []>} : vector<16x32xf32>, vector<32x1xf32>, vector<16x1xf32> -> vector<16x1xf32>
    %645 = vector.shape_cast %644 : vector<16x1xf32> to vector<2x8xf32>
    %cst_241 = arith.constant dense<0xFF800000> : vector<2xf32>
    %646 = vector.multi_reduction <maximumf>, %645, %cst_241 [1] : vector<2x8xf32> to vector<2xf32>
    %cst_242 = arith.constant 0xFF800000 : f32
    %647 = vector.broadcast %cst_242 : f32 to vector<2xf32>
    %648 = arith.maximumf %647, %646 : vector<2xf32>
    %649 = vector.shape_cast %648 : vector<2xf32> to vector<2x1xf32>
    %650 = vector.broadcast %649 : vector<2x1xf32> to vector<2x8xf32>
    %651 = arith.subf %645, %650 : vector<2x8xf32>
    %652 = math.exp %651 : vector<2x8xf32>
    %cst_243 = arith.constant dense<0.000000e+00> : vector<2xf32>
    %653 = vector.multi_reduction <add>, %652, %cst_243 [1] : vector<2x8xf32> to vector<2xf32>
    %654 = vector.shape_cast %653 : vector<2xf32> to vector<2x1xf32>
    %655 = vector.broadcast %654 : vector<2x1xf32> to vector<2x8xf32>
    %656 = arith.divf %652, %655 : vector<2x8xf32>
    %657 = vector.shape_cast %656 : vector<2x8xf32> to vector<2x8x1xf32>
    %658 = vector.broadcast %657 : vector<2x8x1xf32> to vector<2x8x32xf32>
    %659 = arith.mulf %658, %20 : vector<2x8x32xf32>
    %cst_244 = arith.constant dense<0.000000e+00> : vector<2x32xf32>
    %660 = vector.multi_reduction <add>, %659, %cst_244 [1] : vector<2x8x32xf32> to vector<2x32xf32>
    %c0_245 = arith.constant 0 : index
    %c0_246 = arith.constant 0 : index
    %661 = vector.load %arg19[%c0_245, %c0_246] : memref<32x32xf32, #tpu.memory_space<vmem>>, vector<32x32xf32>
    %cst_247 = arith.constant dense<0.000000e+00> : vector<2x32xf32>
    %662 = tpu.matmul %660, %661, %cst_247 {dimension_numbers = #tpu.dot_dimension_numbers<[1], [0], [0], [1], [0, 0, 1, 1], [], []>} : vector<2x32xf32>, vector<32x32xf32>, vector<2x32xf32> -> vector<2x32xf32>
    %663 = vector.shape_cast %662 : vector<2x32xf32> to vector<2x1x32xf32>
    %664 = vector.broadcast %663 : vector<2x1x32xf32> to vector<2x8x32xf32>
    %665 = arith.addf %26, %664 : vector<2x8x32xf32>
    %666 = math.tanh %665 : vector<2x8x32xf32>
    %667 = vector.shape_cast %666 : vector<2x8x32xf32> to vector<16x32xf32>
    %c0_248 = arith.constant 0 : index
    %c0_249 = arith.constant 0 : index
    %668 = vector.load %arg20[%c0_248, %c0_249] : memref<32x1xf32, #tpu.memory_space<vmem>>, vector<32x1xf32>
    %cst_250 = arith.constant dense<0.000000e+00> : vector<16x1xf32>
    %669 = tpu.matmul %667, %668, %cst_250 {dimension_numbers = #tpu.dot_dimension_numbers<[1], [0], [0], [1], [0, 0, 1, 1], [], []>} : vector<16x32xf32>, vector<32x1xf32>, vector<16x1xf32> -> vector<16x1xf32>
    %670 = vector.shape_cast %669 : vector<16x1xf32> to vector<2x8xf32>
    %cst_251 = arith.constant dense<0.000000e+00> : vector<2xf32>
    %671 = vector.multi_reduction <add>, %558, %cst_251 [1] : vector<2x8xf32> to vector<2xf32>
    %672 = vector.shape_cast %671 : vector<2xf32> to vector<2x1xf32>
    %cst_252 = arith.constant 0.000000e+00 : f32
    %673 = vector.broadcast %cst_252 : f32 to vector<2x1xf32>
    %674 = arith.cmpf ogt, %672, %673 : vector<2x1xf32>
    %675 = vector.shape_cast %674 : vector<2x1xi1> to vector<2x1xi1>
    %676 = vector.broadcast %675 : vector<2x1xi1> to vector<2x8xi1>
    %677 = arith.select %676, %558, %97 : vector<2x8xi1>, vector<2x8xf32>
    %cst_253 = arith.constant 0.000000e+00 : f32
    %678 = vector.broadcast %cst_253 : f32 to vector<2x8xf32>
    %679 = arith.cmpf ogt, %677, %678 : vector<2x8xf32>
    %cst_254 = arith.constant -1.000000e+09 : f32
    %680 = vector.broadcast %cst_254 : f32 to vector<2x8xf32>
    %681 = arith.select %679, %670, %680 : vector<2x8xi1>, vector<2x8xf32>
    %cst_255 = arith.constant dense<0xFF800000> : vector<2xf32>
    %682 = vector.multi_reduction <maximumf>, %681, %cst_255 [1] : vector<2x8xf32> to vector<2xf32>
    %cst_256 = arith.constant 0xFF800000 : f32
    %683 = vector.broadcast %cst_256 : f32 to vector<2xf32>
    %684 = arith.maximumf %683, %682 : vector<2xf32>
    %685 = vector.shape_cast %684 : vector<2xf32> to vector<2x1xf32>
    %686 = vector.broadcast %685 : vector<2x1xf32> to vector<2x8xf32>
    %687 = arith.subf %681, %686 : vector<2x8xf32>
    %688 = math.exp %687 : vector<2x8xf32>
    %cst_257 = arith.constant dense<0.000000e+00> : vector<2xf32>
    %689 = vector.multi_reduction <add>, %688, %cst_257 [1] : vector<2x8xf32> to vector<2xf32>
    %690 = vector.shape_cast %689 : vector<2xf32> to vector<2x1xf32>
    %691 = vector.broadcast %690 : vector<2x1xf32> to vector<2x8xf32>
    %692 = arith.divf %688, %691 : vector<2x8xf32>
    %cst_258 = arith.constant dense<0xFF800000> : vector<2xf32>
    %693 = vector.multi_reduction <maximumf>, %692, %cst_258 [1] : vector<2x8xf32> to vector<2xf32>
    %694 = vector.shape_cast %693 : vector<2xf32> to vector<2x1xf32>
    %695 = vector.broadcast %694 : vector<2x1xf32> to vector<2x8xf32>
    %696 = arith.cmpf oge, %692, %695 : vector<2x8xf32>
    %697 = arith.sitofp %93 : vector<2x8xi32> to vector<2x8xf32>
    %cst_259 = arith.constant 8.000000e+00 : f32
    %698 = vector.broadcast %cst_259 : f32 to vector<2x8xf32>
    %699 = arith.select %696, %697, %698 : vector<2x8xi1>, vector<2x8xf32>
    %cst_260 = arith.constant dense<0x7F800000> : vector<2xf32>
    %700 = vector.multi_reduction <minimumf>, %699, %cst_260 [1] : vector<2x8xf32> to vector<2xf32>
    %701 = vector.shape_cast %700 : vector<2xf32> to vector<2x1xf32>
    %702 = arith.fptosi %701 : vector<2x1xf32> to vector<2x1xi32>
    %703 = math.log %694 : vector<2x1xf32>
    %704 = vector.broadcast %702 : vector<2x1xi32> to vector<2x8xi32>
    %705 = arith.cmpi eq, %93, %704 : vector<2x8xi32>
    %706 = arith.extui %705 : vector<2x8xi1> to vector<2x8xi32>
    %707 = arith.sitofp %706 : vector<2x8xi32> to vector<2x8xf32>
    %708 = arith.mulf %707, %508 : vector<2x8xf32>
    %cst_261 = arith.constant dense<0.000000e+00> : vector<2xf32>
    %709 = vector.multi_reduction <add>, %708, %cst_261 [1] : vector<2x8xf32> to vector<2xf32>
    %710 = vector.shape_cast %709 : vector<2xf32> to vector<2x1xf32>
    %711 = arith.mulf %707, %513 : vector<2x8xf32>
    %cst_262 = arith.constant dense<0.000000e+00> : vector<2xf32>
    %712 = vector.multi_reduction <add>, %711, %cst_262 [1] : vector<2x8xf32> to vector<2xf32>
    %713 = vector.shape_cast %712 : vector<2xf32> to vector<2x1xf32>
    %714 = arith.subf %710, %713 : vector<2x1xf32>
    %cst_263 = arith.constant 0.000000e+00 : f32
    %715 = vector.broadcast %cst_263 : f32 to vector<2x1xf32>
    %716 = arith.maximumf %714, %715 : vector<2x1xf32>
    %717 = arith.subf %713, %710 : vector<2x1xf32>
    %cst_264 = arith.constant 0.000000e+00 : f32
    %718 = vector.broadcast %cst_264 : f32 to vector<2x1xf32>
    %719 = arith.maximumf %717, %718 : vector<2x1xf32>
    %c0_i32_265 = arith.constant 0 : i32
    %720 = vector.broadcast %c0_i32_265 : i32 to vector<2x1xi32>
    %721 = arith.cmpi ne, %702, %720 : vector<2x1xi32>
    %cst_266 = arith.constant 1.000000e+00 : f32
    %722 = vector.broadcast %cst_266 : f32 to vector<2x8xf32>
    %723 = arith.subf %722, %707 : vector<2x8xf32>
    %724 = arith.mulf %513, %723 : vector<2x8xf32>
    %725 = vector.broadcast %719 : vector<2x1xf32> to vector<2x8xf32>
    %726 = arith.mulf %707, %725 : vector<2x8xf32>
    %727 = arith.addf %724, %726 : vector<2x8xf32>
    %cst_267 = arith.constant 1.000000e+00 : f32
    %728 = vector.broadcast %cst_267 : f32 to vector<2x1xf32>
    %729 = arith.subf %716, %728 : vector<2x1xf32>
    %730 = vector.shape_cast %729 : vector<2x1xf32> to vector<2x1xf32>
    %731 = vector.broadcast %730 : vector<2x1xf32> to vector<2x8xf32>
    %732 = arith.select %99, %731, %727 : vector<2x8xi1>, vector<2x8xf32>
    %733 = vector.shape_cast %716 : vector<2x1xf32> to vector<2x1xf32>
    %734 = vector.broadcast %733 : vector<2x1xf32> to vector<2x8xf32>
    %cst_268 = arith.constant 1.000000e+00 : f32
    %735 = vector.shape_cast %721 : vector<2x1xi1> to vector<2x1xi1>
    %736 = vector.broadcast %735 : vector<2x1xi1> to vector<2x8xi1>
    %737 = vector.broadcast %cst_268 : f32 to vector<2x8xf32>
    %738 = arith.select %736, %734, %737 : vector<2x8xi1>, vector<2x8xf32>
    %cst_269 = arith.constant 0.000000e+00 : f32
    %739 = vector.broadcast %cst_269 : f32 to vector<2x8xf32>
    %740 = arith.select %99, %739, %513 : vector<2x8xi1>, vector<2x8xf32>
    %741 = vector.shape_cast %721 : vector<2x1xi1> to vector<2x1xi1>
    %742 = vector.broadcast %741 : vector<2x1xi1> to vector<2x8xi1>
    %743 = arith.select %742, %732, %740 : vector<2x8xi1>, vector<2x8xf32>
    %744 = math.absf %743 : vector<2x8xf32>
    %cst_270 = arith.constant dense<0xFF800000> : vector<2xf32>
    %745 = vector.multi_reduction <maximumf>, %744, %cst_270 [1] : vector<2x8xf32> to vector<2xf32>
    %746 = vector.shape_cast %745 : vector<2xf32> to vector<2x1xf32>
    %cst_271 = arith.constant 0.000000e+00 : f32
    %747 = vector.broadcast %cst_271 : f32 to vector<2x1xf32>
    %748 = arith.cmpf oeq, %746, %747 : vector<2x1xf32>
    %749 = arith.extui %748 : vector<2x1xi1> to vector<2x1xi32>
    %750 = arith.sitofp %749 : vector<2x1xi32> to vector<2x1xf32>
    %cst_272 = arith.constant 1.000000e+00 : f32
    %751 = vector.broadcast %cst_272 : f32 to vector<2x1xf32>
    %752 = arith.subf %751, %750 : vector<2x1xf32>
    %753 = arith.mulf %703, %752 : vector<2x1xf32>
    %754 = arith.addf %524, %753 : vector<2x1xf32>
    %cst_273 = arith.constant 0.000000e+00 : f32
    %755 = vector.broadcast %cst_273 : f32 to vector<2x8xf32>
    %756 = arith.cmpf one, %743, %755 : vector<2x8xf32>
    %757 = arith.cmpf olt, %743, %738 : vector<2x8xf32>
    %758 = arith.andi %756, %757 : vector<2x8xi1>
    %759 = arith.extui %758 : vector<2x8xi1> to vector<2x8xi32>
    %760 = arith.sitofp %759 : vector<2x8xi32> to vector<2x8xf32>
    %cst_274 = arith.constant 1.000000e+00 : f32
    %cst_275 = arith.constant 0.000000e+00 : f32
    %761 = vector.broadcast %cst_274 : f32 to vector<2x1xf32>
    %762 = vector.broadcast %cst_275 : f32 to vector<2x1xf32>
    %763 = arith.select %721, %761, %762 : vector<2x1xi1>, vector<2x1xf32>
    %764 = vector.shape_cast %763 : vector<2x1xf32> to vector<2x1xf32>
    %765 = vector.broadcast %764 : vector<2x1xf32> to vector<2x8xf32>
    %766 = arith.select %99, %765, %760 : vector<2x8xi1>, vector<2x8xf32>
    %767 = vector.extract_strided_slice %738 {offsets = [0, 0], sizes = [2, 1], strides = [1, 1]} : vector<2x8xf32> to vector<2x1xf32>
    %cst_276 = arith.constant 0.000000e+00 : f32
    %768 = vector.broadcast %cst_276 : f32 to vector<2x1xf32>
    %769 = arith.cmpf oeq, %767, %768 : vector<2x1xf32>
    %cst_277 = arith.constant 1.000000e+00 : f32
    %770 = vector.broadcast %cst_277 : f32 to vector<2x8xf32>
    %771 = arith.subf %770, %97 : vector<2x8xf32>
    %772 = arith.mulf %743, %771 : vector<2x8xf32>
    %cst_278 = arith.constant dense<0.000000e+00> : vector<2xf32>
    %773 = vector.multi_reduction <add>, %772, %cst_278 [1] : vector<2x8xf32> to vector<2xf32>
    %774 = vector.shape_cast %773 : vector<2xf32> to vector<2x1xf32>
    %cst_279 = arith.constant 0.000000e+00 : f32
    %775 = vector.broadcast %cst_279 : f32 to vector<2x1xf32>
    %776 = arith.cmpf oeq, %774, %775 : vector<2x1xf32>
    %777 = arith.ori %769, %776 : vector<2x1xi1>
    %778 = vector.shape_cast %777 : vector<2x1xi1> to vector<2x1xi1>
    %779 = vector.broadcast %778 : vector<2x1xi1> to vector<2x8xi1>
    %780 = arith.select %779, %97, %766 : vector<2x8xi1>, vector<2x8xf32>
    %cst_280 = arith.constant dense<0xFF800000> : vector<1xf32>
    %781 = vector.multi_reduction <maximumf>, %746, %cst_280 [0] : vector<2x1xf32> to vector<1xf32>
    %782 = vector.shape_cast %781 : vector<1xf32> to vector<1x1xf32>
    %cst_281 = arith.constant 0.000000e+00 : f32
    %783 = vector.broadcast %cst_281 : f32 to vector<1x1xf32>
    %784 = arith.cmpf oeq, %782, %783 : vector<1x1xf32>
    %cst_282 = arith.constant 0.000000e+00 : f32
    %785 = vector.shape_cast %784 : vector<1x1xi1> to vector<1x1xi1>
    %786 = vector.broadcast %785 : vector<1x1xi1> to vector<2x8xi1>
    %787 = vector.broadcast %cst_282 : f32 to vector<2x8xf32>
    %788 = arith.select %786, %787, %780 : vector<2x8xi1>, vector<2x8xf32>
    %789 = vector.broadcast %c2_i32 : i32 to vector<2x7xi32>
    %790 = arith.cmpi eq, %100, %789 : vector<2x7xi32>
    %791 = vector.shape_cast %702 : vector<2x1xi32> to vector<2x1xi32>
    %792 = vector.broadcast %791 : vector<2x1xi32> to vector<2x7xi32>
    %793 = arith.select %790, %792, %563 : vector<2x7xi1>, vector<2x7xi32>
    %794 = arith.mulf %707, %0 : vector<2x8xf32>
    %cst_283 = arith.constant dense<0.000000e+00> : vector<2xf32>
    %795 = vector.multi_reduction <add>, %794, %cst_283 [1] : vector<2x8xf32> to vector<2xf32>
    %796 = vector.shape_cast %795 : vector<2xf32> to vector<2x1xf32>
    %797 = arith.mulf %707, %1 : vector<2x8xf32>
    %cst_284 = arith.constant dense<0.000000e+00> : vector<2xf32>
    %798 = vector.multi_reduction <add>, %797, %cst_284 [1] : vector<2x8xf32> to vector<2xf32>
    %799 = vector.shape_cast %798 : vector<2xf32> to vector<2x1xf32>
    %c3_i32 = arith.constant 3 : i32
    %c0_285 = arith.constant 0 : index
    %c0_286 = arith.constant 0 : index
    %800 = vector.load %arg8[%c0_285, %c0_286] : memref<2x32xf32, #tpu.memory_space<vmem>>, vector<1x32xf32>
    %801 = vector.broadcast %796 : vector<2x1xf32> to vector<2x32xf32>
    %802 = vector.broadcast %800 : vector<1x32xf32> to vector<2x32xf32>
    %803 = arith.mulf %801, %802 : vector<2x32xf32>
    %c1_287 = arith.constant 1 : index
    %c0_288 = arith.constant 0 : index
    %804 = vector.load %arg8[%c1_287, %c0_288] : memref<2x32xf32, #tpu.memory_space<vmem>>, vector<1x32xf32>
    %805 = vector.broadcast %799 : vector<2x1xf32> to vector<2x32xf32>
    %806 = vector.broadcast %804 : vector<1x32xf32> to vector<2x32xf32>
    %807 = arith.mulf %805, %806 : vector<2x32xf32>
    %808 = arith.addf %803, %807 : vector<2x32xf32>
    %c0_289 = arith.constant 0 : index
    %c0_290 = arith.constant 0 : index
    %809 = vector.load %arg9[%c0_289, %c0_290] : memref<1x32xf32, #tpu.memory_space<vmem>>, vector<1x32xf32>
    %810 = vector.broadcast %809 : vector<1x32xf32> to vector<2x32xf32>
    %811 = arith.addf %808, %810 : vector<2x32xf32>
    %c0_291 = arith.constant 0 : index
    %c0_292 = arith.constant 0 : index
    %812 = vector.load %arg10[%c0_291, %c0_292] : memref<32x96xf32, #tpu.memory_space<vmem>>, vector<32x96xf32>
    %cst_293 = arith.constant dense<0.000000e+00> : vector<2x96xf32>
    %813 = tpu.matmul %811, %812, %cst_293 {dimension_numbers = #tpu.dot_dimension_numbers<[1], [0], [0], [1], [0, 0, 1, 1], [], []>} : vector<2x32xf32>, vector<32x96xf32>, vector<2x96xf32> -> vector<2x96xf32>
    %c0_294 = arith.constant 0 : index
    %c0_295 = arith.constant 0 : index
    %814 = vector.load %arg12[%c0_294, %c0_295] : memref<1x96xf32, #tpu.memory_space<vmem>>, vector<1x96xf32>
    %815 = vector.broadcast %814 : vector<1x96xf32> to vector<2x96xf32>
    %816 = arith.addf %813, %815 : vector<2x96xf32>
    %c0_296 = arith.constant 0 : index
    %c0_297 = arith.constant 0 : index
    %817 = vector.load %arg11[%c0_296, %c0_297] : memref<32x96xf32, #tpu.memory_space<vmem>>, vector<32x96xf32>
    %cst_298 = arith.constant dense<0.000000e+00> : vector<2x96xf32>
    %818 = tpu.matmul %617, %817, %cst_298 {dimension_numbers = #tpu.dot_dimension_numbers<[1], [0], [0], [1], [0, 0, 1, 1], [], []>} : vector<2x32xf32>, vector<32x96xf32>, vector<2x96xf32> -> vector<2x96xf32>
    %c0_299 = arith.constant 0 : index
    %c0_300 = arith.constant 0 : index
    %819 = vector.load %arg13[%c0_299, %c0_300] : memref<1x96xf32, #tpu.memory_space<vmem>>, vector<1x96xf32>
    %820 = vector.broadcast %819 : vector<1x96xf32> to vector<2x96xf32>
    %821 = arith.addf %818, %820 : vector<2x96xf32>
    %822 = vector.extract_strided_slice %816 {offsets = [0, 0], sizes = [2, 32], strides = [1, 1]} : vector<2x96xf32> to vector<2x32xf32>
    %823 = vector.extract_strided_slice %821 {offsets = [0, 0], sizes = [2, 32], strides = [1, 1]} : vector<2x96xf32> to vector<2x32xf32>
    %824 = arith.addf %822, %823 : vector<2x32xf32>
    %825 = arith.negf %824 : vector<2x32xf32>
    %826 = math.exp %825 : vector<2x32xf32>
    %cst_301 = arith.constant 1.000000e+00 : f32
    %827 = vector.broadcast %cst_301 : f32 to vector<2x32xf32>
    %828 = arith.addf %827, %826 : vector<2x32xf32>
    %829 = arith.divf %827, %828 : vector<2x32xf32>
    %830 = vector.extract_strided_slice %816 {offsets = [0, 32], sizes = [2, 32], strides = [1, 1]} : vector<2x96xf32> to vector<2x32xf32>
    %831 = vector.extract_strided_slice %821 {offsets = [0, 32], sizes = [2, 32], strides = [1, 1]} : vector<2x96xf32> to vector<2x32xf32>
    %832 = arith.addf %830, %831 : vector<2x32xf32>
    %833 = arith.negf %832 : vector<2x32xf32>
    %834 = math.exp %833 : vector<2x32xf32>
    %cst_302 = arith.constant 1.000000e+00 : f32
    %835 = vector.broadcast %cst_302 : f32 to vector<2x32xf32>
    %836 = arith.addf %835, %834 : vector<2x32xf32>
    %837 = arith.divf %835, %836 : vector<2x32xf32>
    %838 = vector.extract_strided_slice %816 {offsets = [0, 64], sizes = [2, 32], strides = [1, 1]} : vector<2x96xf32> to vector<2x32xf32>
    %839 = vector.extract_strided_slice %821 {offsets = [0, 64], sizes = [2, 32], strides = [1, 1]} : vector<2x96xf32> to vector<2x32xf32>
    %840 = arith.mulf %829, %839 : vector<2x32xf32>
    %841 = arith.addf %838, %840 : vector<2x32xf32>
    %842 = math.tanh %841 : vector<2x32xf32>
    %cst_303 = arith.constant 1.000000e+00 : f32
    %843 = vector.broadcast %cst_303 : f32 to vector<2x32xf32>
    %844 = arith.subf %843, %837 : vector<2x32xf32>
    %845 = arith.mulf %844, %842 : vector<2x32xf32>
    %846 = arith.mulf %837, %617 : vector<2x32xf32>
    %847 = arith.addf %845, %846 : vector<2x32xf32>
    %848 = vector.shape_cast %738 : vector<2x8xf32> to vector<2x8x1xf32>
    %c0_304 = arith.constant 0 : index
    %c0_305 = arith.constant 0 : index
    %849 = vector.load %arg15[%c0_304, %c0_305] : memref<2x32xf32, #tpu.memory_space<vmem>>, vector<1x32xf32>
    %850 = vector.shape_cast %849 : vector<1x32xf32> to vector<1x1x32xf32>
    %851 = vector.broadcast %848 : vector<2x8x1xf32> to vector<2x8x32xf32>
    %852 = vector.broadcast %850 : vector<1x1x32xf32> to vector<2x8x32xf32>
    %853 = arith.mulf %851, %852 : vector<2x8x32xf32>
    %854 = vector.shape_cast %743 : vector<2x8xf32> to vector<2x8x1xf32>
    %c1_306 = arith.constant 1 : index
    %c0_307 = arith.constant 0 : index
    %855 = vector.load %arg15[%c1_306, %c0_307] : memref<2x32xf32, #tpu.memory_space<vmem>>, vector<1x32xf32>
    %856 = vector.shape_cast %855 : vector<1x32xf32> to vector<1x1x32xf32>
    %857 = vector.broadcast %854 : vector<2x8x1xf32> to vector<2x8x32xf32>
    %858 = vector.broadcast %856 : vector<1x1x32xf32> to vector<2x8x32xf32>
    %859 = arith.mulf %857, %858 : vector<2x8x32xf32>
    %860 = arith.addf %853, %859 : vector<2x8x32xf32>
    %c0_308 = arith.constant 0 : index
    %c0_309 = arith.constant 0 : index
    %861 = vector.load %arg16[%c0_308, %c0_309] : memref<1x32xf32, #tpu.memory_space<vmem>>, vector<1x32xf32>
    %862 = vector.shape_cast %861 : vector<1x32xf32> to vector<1x1x32xf32>
    %863 = vector.broadcast %862 : vector<1x1x32xf32> to vector<2x8x32xf32>
    %864 = arith.addf %860, %863 : vector<2x8x32xf32>
    %865 = arith.addf %25, %864 : vector<2x8x32xf32>
    %c0_310 = arith.constant 0 : index
    %c0_311 = arith.constant 0 : index
    %866 = vector.load %arg17[%c0_310, %c0_311] : memref<32x32xf32, #tpu.memory_space<vmem>>, vector<32x32xf32>
    %cst_312 = arith.constant dense<0.000000e+00> : vector<2x32xf32>
    %867 = tpu.matmul %847, %866, %cst_312 {dimension_numbers = #tpu.dot_dimension_numbers<[1], [0], [0], [1], [0, 0, 1, 1], [], []>} : vector<2x32xf32>, vector<32x32xf32>, vector<2x32xf32> -> vector<2x32xf32>
    %868 = vector.shape_cast %867 : vector<2x32xf32> to vector<2x1x32xf32>
    %869 = vector.broadcast %868 : vector<2x1x32xf32> to vector<2x8x32xf32>
    %870 = arith.addf %865, %869 : vector<2x8x32xf32>
    %871 = math.tanh %870 : vector<2x8x32xf32>
    %872 = vector.shape_cast %871 : vector<2x8x32xf32> to vector<16x32xf32>
    %c0_313 = arith.constant 0 : index
    %c0_314 = arith.constant 0 : index
    %873 = vector.load %arg18[%c0_313, %c0_314] : memref<32x1xf32, #tpu.memory_space<vmem>>, vector<32x1xf32>
    %cst_315 = arith.constant dense<0.000000e+00> : vector<16x1xf32>
    %874 = tpu.matmul %872, %873, %cst_315 {dimension_numbers = #tpu.dot_dimension_numbers<[1], [0], [0], [1], [0, 0, 1, 1], [], []>} : vector<16x32xf32>, vector<32x1xf32>, vector<16x1xf32> -> vector<16x1xf32>
    %875 = vector.shape_cast %874 : vector<16x1xf32> to vector<2x8xf32>
    %cst_316 = arith.constant dense<0xFF800000> : vector<2xf32>
    %876 = vector.multi_reduction <maximumf>, %875, %cst_316 [1] : vector<2x8xf32> to vector<2xf32>
    %cst_317 = arith.constant 0xFF800000 : f32
    %877 = vector.broadcast %cst_317 : f32 to vector<2xf32>
    %878 = arith.maximumf %877, %876 : vector<2xf32>
    %879 = vector.shape_cast %878 : vector<2xf32> to vector<2x1xf32>
    %880 = vector.broadcast %879 : vector<2x1xf32> to vector<2x8xf32>
    %881 = arith.subf %875, %880 : vector<2x8xf32>
    %882 = math.exp %881 : vector<2x8xf32>
    %cst_318 = arith.constant dense<0.000000e+00> : vector<2xf32>
    %883 = vector.multi_reduction <add>, %882, %cst_318 [1] : vector<2x8xf32> to vector<2xf32>
    %884 = vector.shape_cast %883 : vector<2xf32> to vector<2x1xf32>
    %885 = vector.broadcast %884 : vector<2x1xf32> to vector<2x8xf32>
    %886 = arith.divf %882, %885 : vector<2x8xf32>
    %887 = vector.shape_cast %886 : vector<2x8xf32> to vector<2x8x1xf32>
    %888 = vector.broadcast %887 : vector<2x8x1xf32> to vector<2x8x32xf32>
    %889 = arith.mulf %888, %20 : vector<2x8x32xf32>
    %cst_319 = arith.constant dense<0.000000e+00> : vector<2x32xf32>
    %890 = vector.multi_reduction <add>, %889, %cst_319 [1] : vector<2x8x32xf32> to vector<2x32xf32>
    %c0_320 = arith.constant 0 : index
    %c0_321 = arith.constant 0 : index
    %891 = vector.load %arg19[%c0_320, %c0_321] : memref<32x32xf32, #tpu.memory_space<vmem>>, vector<32x32xf32>
    %cst_322 = arith.constant dense<0.000000e+00> : vector<2x32xf32>
    %892 = tpu.matmul %890, %891, %cst_322 {dimension_numbers = #tpu.dot_dimension_numbers<[1], [0], [0], [1], [0, 0, 1, 1], [], []>} : vector<2x32xf32>, vector<32x32xf32>, vector<2x32xf32> -> vector<2x32xf32>
    %893 = vector.shape_cast %892 : vector<2x32xf32> to vector<2x1x32xf32>
    %894 = vector.broadcast %893 : vector<2x1x32xf32> to vector<2x8x32xf32>
    %895 = arith.addf %26, %894 : vector<2x8x32xf32>
    %896 = math.tanh %895 : vector<2x8x32xf32>
    %897 = vector.shape_cast %896 : vector<2x8x32xf32> to vector<16x32xf32>
    %c0_323 = arith.constant 0 : index
    %c0_324 = arith.constant 0 : index
    %898 = vector.load %arg20[%c0_323, %c0_324] : memref<32x1xf32, #tpu.memory_space<vmem>>, vector<32x1xf32>
    %cst_325 = arith.constant dense<0.000000e+00> : vector<16x1xf32>
    %899 = tpu.matmul %897, %898, %cst_325 {dimension_numbers = #tpu.dot_dimension_numbers<[1], [0], [0], [1], [0, 0, 1, 1], [], []>} : vector<16x32xf32>, vector<32x1xf32>, vector<16x1xf32> -> vector<16x1xf32>
    %900 = vector.shape_cast %899 : vector<16x1xf32> to vector<2x8xf32>
    %cst_326 = arith.constant dense<0.000000e+00> : vector<2xf32>
    %901 = vector.multi_reduction <add>, %788, %cst_326 [1] : vector<2x8xf32> to vector<2xf32>
    %902 = vector.shape_cast %901 : vector<2xf32> to vector<2x1xf32>
    %cst_327 = arith.constant 0.000000e+00 : f32
    %903 = vector.broadcast %cst_327 : f32 to vector<2x1xf32>
    %904 = arith.cmpf ogt, %902, %903 : vector<2x1xf32>
    %905 = vector.shape_cast %904 : vector<2x1xi1> to vector<2x1xi1>
    %906 = vector.broadcast %905 : vector<2x1xi1> to vector<2x8xi1>
    %907 = arith.select %906, %788, %97 : vector<2x8xi1>, vector<2x8xf32>
    %cst_328 = arith.constant 0.000000e+00 : f32
    %908 = vector.broadcast %cst_328 : f32 to vector<2x8xf32>
    %909 = arith.cmpf ogt, %907, %908 : vector<2x8xf32>
    %cst_329 = arith.constant -1.000000e+09 : f32
    %910 = vector.broadcast %cst_329 : f32 to vector<2x8xf32>
    %911 = arith.select %909, %900, %910 : vector<2x8xi1>, vector<2x8xf32>
    %cst_330 = arith.constant dense<0xFF800000> : vector<2xf32>
    %912 = vector.multi_reduction <maximumf>, %911, %cst_330 [1] : vector<2x8xf32> to vector<2xf32>
    %cst_331 = arith.constant 0xFF800000 : f32
    %913 = vector.broadcast %cst_331 : f32 to vector<2xf32>
    %914 = arith.maximumf %913, %912 : vector<2xf32>
    %915 = vector.shape_cast %914 : vector<2xf32> to vector<2x1xf32>
    %916 = vector.broadcast %915 : vector<2x1xf32> to vector<2x8xf32>
    %917 = arith.subf %911, %916 : vector<2x8xf32>
    %918 = math.exp %917 : vector<2x8xf32>
    %cst_332 = arith.constant dense<0.000000e+00> : vector<2xf32>
    %919 = vector.multi_reduction <add>, %918, %cst_332 [1] : vector<2x8xf32> to vector<2xf32>
    %920 = vector.shape_cast %919 : vector<2xf32> to vector<2x1xf32>
    %921 = vector.broadcast %920 : vector<2x1xf32> to vector<2x8xf32>
    %922 = arith.divf %918, %921 : vector<2x8xf32>
    %cst_333 = arith.constant dense<0xFF800000> : vector<2xf32>
    %923 = vector.multi_reduction <maximumf>, %922, %cst_333 [1] : vector<2x8xf32> to vector<2xf32>
    %924 = vector.shape_cast %923 : vector<2xf32> to vector<2x1xf32>
    %925 = vector.broadcast %924 : vector<2x1xf32> to vector<2x8xf32>
    %926 = arith.cmpf oge, %922, %925 : vector<2x8xf32>
    %927 = arith.sitofp %93 : vector<2x8xi32> to vector<2x8xf32>
    %cst_334 = arith.constant 8.000000e+00 : f32
    %928 = vector.broadcast %cst_334 : f32 to vector<2x8xf32>
    %929 = arith.select %926, %927, %928 : vector<2x8xi1>, vector<2x8xf32>
    %cst_335 = arith.constant dense<0x7F800000> : vector<2xf32>
    %930 = vector.multi_reduction <minimumf>, %929, %cst_335 [1] : vector<2x8xf32> to vector<2xf32>
    %931 = vector.shape_cast %930 : vector<2xf32> to vector<2x1xf32>
    %932 = arith.fptosi %931 : vector<2x1xf32> to vector<2x1xi32>
    %933 = math.log %924 : vector<2x1xf32>
    %934 = vector.broadcast %932 : vector<2x1xi32> to vector<2x8xi32>
    %935 = arith.cmpi eq, %93, %934 : vector<2x8xi32>
    %936 = arith.extui %935 : vector<2x8xi1> to vector<2x8xi32>
    %937 = arith.sitofp %936 : vector<2x8xi32> to vector<2x8xf32>
    %938 = arith.mulf %937, %738 : vector<2x8xf32>
    %cst_336 = arith.constant dense<0.000000e+00> : vector<2xf32>
    %939 = vector.multi_reduction <add>, %938, %cst_336 [1] : vector<2x8xf32> to vector<2xf32>
    %940 = vector.shape_cast %939 : vector<2xf32> to vector<2x1xf32>
    %941 = arith.mulf %937, %743 : vector<2x8xf32>
    %cst_337 = arith.constant dense<0.000000e+00> : vector<2xf32>
    %942 = vector.multi_reduction <add>, %941, %cst_337 [1] : vector<2x8xf32> to vector<2xf32>
    %943 = vector.shape_cast %942 : vector<2xf32> to vector<2x1xf32>
    %944 = arith.subf %940, %943 : vector<2x1xf32>
    %cst_338 = arith.constant 0.000000e+00 : f32
    %945 = vector.broadcast %cst_338 : f32 to vector<2x1xf32>
    %946 = arith.maximumf %944, %945 : vector<2x1xf32>
    %947 = arith.subf %943, %940 : vector<2x1xf32>
    %cst_339 = arith.constant 0.000000e+00 : f32
    %948 = vector.broadcast %cst_339 : f32 to vector<2x1xf32>
    %949 = arith.maximumf %947, %948 : vector<2x1xf32>
    %c0_i32_340 = arith.constant 0 : i32
    %950 = vector.broadcast %c0_i32_340 : i32 to vector<2x1xi32>
    %951 = arith.cmpi ne, %932, %950 : vector<2x1xi32>
    %cst_341 = arith.constant 1.000000e+00 : f32
    %952 = vector.broadcast %cst_341 : f32 to vector<2x8xf32>
    %953 = arith.subf %952, %937 : vector<2x8xf32>
    %954 = arith.mulf %743, %953 : vector<2x8xf32>
    %955 = vector.broadcast %949 : vector<2x1xf32> to vector<2x8xf32>
    %956 = arith.mulf %937, %955 : vector<2x8xf32>
    %957 = arith.addf %954, %956 : vector<2x8xf32>
    %cst_342 = arith.constant 1.000000e+00 : f32
    %958 = vector.broadcast %cst_342 : f32 to vector<2x1xf32>
    %959 = arith.subf %946, %958 : vector<2x1xf32>
    %960 = vector.shape_cast %959 : vector<2x1xf32> to vector<2x1xf32>
    %961 = vector.broadcast %960 : vector<2x1xf32> to vector<2x8xf32>
    %962 = arith.select %99, %961, %957 : vector<2x8xi1>, vector<2x8xf32>
    %963 = vector.shape_cast %946 : vector<2x1xf32> to vector<2x1xf32>
    %964 = vector.broadcast %963 : vector<2x1xf32> to vector<2x8xf32>
    %cst_343 = arith.constant 1.000000e+00 : f32
    %965 = vector.shape_cast %951 : vector<2x1xi1> to vector<2x1xi1>
    %966 = vector.broadcast %965 : vector<2x1xi1> to vector<2x8xi1>
    %967 = vector.broadcast %cst_343 : f32 to vector<2x8xf32>
    %968 = arith.select %966, %964, %967 : vector<2x8xi1>, vector<2x8xf32>
    %cst_344 = arith.constant 0.000000e+00 : f32
    %969 = vector.broadcast %cst_344 : f32 to vector<2x8xf32>
    %970 = arith.select %99, %969, %743 : vector<2x8xi1>, vector<2x8xf32>
    %971 = vector.shape_cast %951 : vector<2x1xi1> to vector<2x1xi1>
    %972 = vector.broadcast %971 : vector<2x1xi1> to vector<2x8xi1>
    %973 = arith.select %972, %962, %970 : vector<2x8xi1>, vector<2x8xf32>
    %974 = math.absf %973 : vector<2x8xf32>
    %cst_345 = arith.constant dense<0xFF800000> : vector<2xf32>
    %975 = vector.multi_reduction <maximumf>, %974, %cst_345 [1] : vector<2x8xf32> to vector<2xf32>
    %976 = vector.shape_cast %975 : vector<2xf32> to vector<2x1xf32>
    %cst_346 = arith.constant 0.000000e+00 : f32
    %977 = vector.broadcast %cst_346 : f32 to vector<2x1xf32>
    %978 = arith.cmpf oeq, %976, %977 : vector<2x1xf32>
    %979 = arith.extui %978 : vector<2x1xi1> to vector<2x1xi32>
    %980 = arith.sitofp %979 : vector<2x1xi32> to vector<2x1xf32>
    %cst_347 = arith.constant 1.000000e+00 : f32
    %981 = vector.broadcast %cst_347 : f32 to vector<2x1xf32>
    %982 = arith.subf %981, %980 : vector<2x1xf32>
    %983 = arith.mulf %933, %982 : vector<2x1xf32>
    %984 = arith.addf %754, %983 : vector<2x1xf32>
    %cst_348 = arith.constant 0.000000e+00 : f32
    %985 = vector.broadcast %cst_348 : f32 to vector<2x8xf32>
    %986 = arith.cmpf one, %973, %985 : vector<2x8xf32>
    %987 = arith.cmpf olt, %973, %968 : vector<2x8xf32>
    %988 = arith.andi %986, %987 : vector<2x8xi1>
    %989 = arith.extui %988 : vector<2x8xi1> to vector<2x8xi32>
    %990 = arith.sitofp %989 : vector<2x8xi32> to vector<2x8xf32>
    %cst_349 = arith.constant 1.000000e+00 : f32
    %cst_350 = arith.constant 0.000000e+00 : f32
    %991 = vector.broadcast %cst_349 : f32 to vector<2x1xf32>
    %992 = vector.broadcast %cst_350 : f32 to vector<2x1xf32>
    %993 = arith.select %951, %991, %992 : vector<2x1xi1>, vector<2x1xf32>
    %994 = vector.shape_cast %993 : vector<2x1xf32> to vector<2x1xf32>
    %995 = vector.broadcast %994 : vector<2x1xf32> to vector<2x8xf32>
    %996 = arith.select %99, %995, %990 : vector<2x8xi1>, vector<2x8xf32>
    %997 = vector.extract_strided_slice %968 {offsets = [0, 0], sizes = [2, 1], strides = [1, 1]} : vector<2x8xf32> to vector<2x1xf32>
    %cst_351 = arith.constant 0.000000e+00 : f32
    %998 = vector.broadcast %cst_351 : f32 to vector<2x1xf32>
    %999 = arith.cmpf oeq, %997, %998 : vector<2x1xf32>
    %cst_352 = arith.constant 1.000000e+00 : f32
    %1000 = vector.broadcast %cst_352 : f32 to vector<2x8xf32>
    %1001 = arith.subf %1000, %97 : vector<2x8xf32>
    %1002 = arith.mulf %973, %1001 : vector<2x8xf32>
    %cst_353 = arith.constant dense<0.000000e+00> : vector<2xf32>
    %1003 = vector.multi_reduction <add>, %1002, %cst_353 [1] : vector<2x8xf32> to vector<2xf32>
    %1004 = vector.shape_cast %1003 : vector<2xf32> to vector<2x1xf32>
    %cst_354 = arith.constant 0.000000e+00 : f32
    %1005 = vector.broadcast %cst_354 : f32 to vector<2x1xf32>
    %1006 = arith.cmpf oeq, %1004, %1005 : vector<2x1xf32>
    %1007 = arith.ori %999, %1006 : vector<2x1xi1>
    %1008 = vector.shape_cast %1007 : vector<2x1xi1> to vector<2x1xi1>
    %1009 = vector.broadcast %1008 : vector<2x1xi1> to vector<2x8xi1>
    %1010 = arith.select %1009, %97, %996 : vector<2x8xi1>, vector<2x8xf32>
    %cst_355 = arith.constant dense<0xFF800000> : vector<1xf32>
    %1011 = vector.multi_reduction <maximumf>, %976, %cst_355 [0] : vector<2x1xf32> to vector<1xf32>
    %1012 = vector.shape_cast %1011 : vector<1xf32> to vector<1x1xf32>
    %cst_356 = arith.constant 0.000000e+00 : f32
    %1013 = vector.broadcast %cst_356 : f32 to vector<1x1xf32>
    %1014 = arith.cmpf oeq, %1012, %1013 : vector<1x1xf32>
    %cst_357 = arith.constant 0.000000e+00 : f32
    %1015 = vector.shape_cast %1014 : vector<1x1xi1> to vector<1x1xi1>
    %1016 = vector.broadcast %1015 : vector<1x1xi1> to vector<2x8xi1>
    %1017 = vector.broadcast %cst_357 : f32 to vector<2x8xf32>
    %1018 = arith.select %1016, %1017, %1010 : vector<2x8xi1>, vector<2x8xf32>
    %1019 = vector.broadcast %c3_i32 : i32 to vector<2x7xi32>
    %1020 = arith.cmpi eq, %100, %1019 : vector<2x7xi32>
    %1021 = vector.shape_cast %932 : vector<2x1xi32> to vector<2x1xi32>
    %1022 = vector.broadcast %1021 : vector<2x1xi32> to vector<2x7xi32>
    %1023 = arith.select %1020, %1022, %793 : vector<2x7xi1>, vector<2x7xi32>
    %1024 = arith.mulf %937, %0 : vector<2x8xf32>
    %cst_358 = arith.constant dense<0.000000e+00> : vector<2xf32>
    %1025 = vector.multi_reduction <add>, %1024, %cst_358 [1] : vector<2x8xf32> to vector<2xf32>
    %1026 = vector.shape_cast %1025 : vector<2xf32> to vector<2x1xf32>
    %1027 = arith.mulf %937, %1 : vector<2x8xf32>
    %cst_359 = arith.constant dense<0.000000e+00> : vector<2xf32>
    %1028 = vector.multi_reduction <add>, %1027, %cst_359 [1] : vector<2x8xf32> to vector<2xf32>
    %1029 = vector.shape_cast %1028 : vector<2xf32> to vector<2x1xf32>
    %c4_i32 = arith.constant 4 : i32
    %c0_360 = arith.constant 0 : index
    %c0_361 = arith.constant 0 : index
    %1030 = vector.load %arg8[%c0_360, %c0_361] : memref<2x32xf32, #tpu.memory_space<vmem>>, vector<1x32xf32>
    %1031 = vector.broadcast %1026 : vector<2x1xf32> to vector<2x32xf32>
    %1032 = vector.broadcast %1030 : vector<1x32xf32> to vector<2x32xf32>
    %1033 = arith.mulf %1031, %1032 : vector<2x32xf32>
    %c1_362 = arith.constant 1 : index
    %c0_363 = arith.constant 0 : index
    %1034 = vector.load %arg8[%c1_362, %c0_363] : memref<2x32xf32, #tpu.memory_space<vmem>>, vector<1x32xf32>
    %1035 = vector.broadcast %1029 : vector<2x1xf32> to vector<2x32xf32>
    %1036 = vector.broadcast %1034 : vector<1x32xf32> to vector<2x32xf32>
    %1037 = arith.mulf %1035, %1036 : vector<2x32xf32>
    %1038 = arith.addf %1033, %1037 : vector<2x32xf32>
    %c0_364 = arith.constant 0 : index
    %c0_365 = arith.constant 0 : index
    %1039 = vector.load %arg9[%c0_364, %c0_365] : memref<1x32xf32, #tpu.memory_space<vmem>>, vector<1x32xf32>
    %1040 = vector.broadcast %1039 : vector<1x32xf32> to vector<2x32xf32>
    %1041 = arith.addf %1038, %1040 : vector<2x32xf32>
    %c0_366 = arith.constant 0 : index
    %c0_367 = arith.constant 0 : index
    %1042 = vector.load %arg10[%c0_366, %c0_367] : memref<32x96xf32, #tpu.memory_space<vmem>>, vector<32x96xf32>
    %cst_368 = arith.constant dense<0.000000e+00> : vector<2x96xf32>
    %1043 = tpu.matmul %1041, %1042, %cst_368 {dimension_numbers = #tpu.dot_dimension_numbers<[1], [0], [0], [1], [0, 0, 1, 1], [], []>} : vector<2x32xf32>, vector<32x96xf32>, vector<2x96xf32> -> vector<2x96xf32>
    %c0_369 = arith.constant 0 : index
    %c0_370 = arith.constant 0 : index
    %1044 = vector.load %arg12[%c0_369, %c0_370] : memref<1x96xf32, #tpu.memory_space<vmem>>, vector<1x96xf32>
    %1045 = vector.broadcast %1044 : vector<1x96xf32> to vector<2x96xf32>
    %1046 = arith.addf %1043, %1045 : vector<2x96xf32>
    %c0_371 = arith.constant 0 : index
    %c0_372 = arith.constant 0 : index
    %1047 = vector.load %arg11[%c0_371, %c0_372] : memref<32x96xf32, #tpu.memory_space<vmem>>, vector<32x96xf32>
    %cst_373 = arith.constant dense<0.000000e+00> : vector<2x96xf32>
    %1048 = tpu.matmul %847, %1047, %cst_373 {dimension_numbers = #tpu.dot_dimension_numbers<[1], [0], [0], [1], [0, 0, 1, 1], [], []>} : vector<2x32xf32>, vector<32x96xf32>, vector<2x96xf32> -> vector<2x96xf32>
    %c0_374 = arith.constant 0 : index
    %c0_375 = arith.constant 0 : index
    %1049 = vector.load %arg13[%c0_374, %c0_375] : memref<1x96xf32, #tpu.memory_space<vmem>>, vector<1x96xf32>
    %1050 = vector.broadcast %1049 : vector<1x96xf32> to vector<2x96xf32>
    %1051 = arith.addf %1048, %1050 : vector<2x96xf32>
    %1052 = vector.extract_strided_slice %1046 {offsets = [0, 0], sizes = [2, 32], strides = [1, 1]} : vector<2x96xf32> to vector<2x32xf32>
    %1053 = vector.extract_strided_slice %1051 {offsets = [0, 0], sizes = [2, 32], strides = [1, 1]} : vector<2x96xf32> to vector<2x32xf32>
    %1054 = arith.addf %1052, %1053 : vector<2x32xf32>
    %1055 = arith.negf %1054 : vector<2x32xf32>
    %1056 = math.exp %1055 : vector<2x32xf32>
    %cst_376 = arith.constant 1.000000e+00 : f32
    %1057 = vector.broadcast %cst_376 : f32 to vector<2x32xf32>
    %1058 = arith.addf %1057, %1056 : vector<2x32xf32>
    %1059 = arith.divf %1057, %1058 : vector<2x32xf32>
    %1060 = vector.extract_strided_slice %1046 {offsets = [0, 32], sizes = [2, 32], strides = [1, 1]} : vector<2x96xf32> to vector<2x32xf32>
    %1061 = vector.extract_strided_slice %1051 {offsets = [0, 32], sizes = [2, 32], strides = [1, 1]} : vector<2x96xf32> to vector<2x32xf32>
    %1062 = arith.addf %1060, %1061 : vector<2x32xf32>
    %1063 = arith.negf %1062 : vector<2x32xf32>
    %1064 = math.exp %1063 : vector<2x32xf32>
    %cst_377 = arith.constant 1.000000e+00 : f32
    %1065 = vector.broadcast %cst_377 : f32 to vector<2x32xf32>
    %1066 = arith.addf %1065, %1064 : vector<2x32xf32>
    %1067 = arith.divf %1065, %1066 : vector<2x32xf32>
    %1068 = vector.extract_strided_slice %1046 {offsets = [0, 64], sizes = [2, 32], strides = [1, 1]} : vector<2x96xf32> to vector<2x32xf32>
    %1069 = vector.extract_strided_slice %1051 {offsets = [0, 64], sizes = [2, 32], strides = [1, 1]} : vector<2x96xf32> to vector<2x32xf32>
    %1070 = arith.mulf %1059, %1069 : vector<2x32xf32>
    %1071 = arith.addf %1068, %1070 : vector<2x32xf32>
    %1072 = math.tanh %1071 : vector<2x32xf32>
    %cst_378 = arith.constant 1.000000e+00 : f32
    %1073 = vector.broadcast %cst_378 : f32 to vector<2x32xf32>
    %1074 = arith.subf %1073, %1067 : vector<2x32xf32>
    %1075 = arith.mulf %1074, %1072 : vector<2x32xf32>
    %1076 = arith.mulf %1067, %847 : vector<2x32xf32>
    %1077 = arith.addf %1075, %1076 : vector<2x32xf32>
    %1078 = vector.shape_cast %968 : vector<2x8xf32> to vector<2x8x1xf32>
    %c0_379 = arith.constant 0 : index
    %c0_380 = arith.constant 0 : index
    %1079 = vector.load %arg15[%c0_379, %c0_380] : memref<2x32xf32, #tpu.memory_space<vmem>>, vector<1x32xf32>
    %1080 = vector.shape_cast %1079 : vector<1x32xf32> to vector<1x1x32xf32>
    %1081 = vector.broadcast %1078 : vector<2x8x1xf32> to vector<2x8x32xf32>
    %1082 = vector.broadcast %1080 : vector<1x1x32xf32> to vector<2x8x32xf32>
    %1083 = arith.mulf %1081, %1082 : vector<2x8x32xf32>
    %1084 = vector.shape_cast %973 : vector<2x8xf32> to vector<2x8x1xf32>
    %c1_381 = arith.constant 1 : index
    %c0_382 = arith.constant 0 : index
    %1085 = vector.load %arg15[%c1_381, %c0_382] : memref<2x32xf32, #tpu.memory_space<vmem>>, vector<1x32xf32>
    %1086 = vector.shape_cast %1085 : vector<1x32xf32> to vector<1x1x32xf32>
    %1087 = vector.broadcast %1084 : vector<2x8x1xf32> to vector<2x8x32xf32>
    %1088 = vector.broadcast %1086 : vector<1x1x32xf32> to vector<2x8x32xf32>
    %1089 = arith.mulf %1087, %1088 : vector<2x8x32xf32>
    %1090 = arith.addf %1083, %1089 : vector<2x8x32xf32>
    %c0_383 = arith.constant 0 : index
    %c0_384 = arith.constant 0 : index
    %1091 = vector.load %arg16[%c0_383, %c0_384] : memref<1x32xf32, #tpu.memory_space<vmem>>, vector<1x32xf32>
    %1092 = vector.shape_cast %1091 : vector<1x32xf32> to vector<1x1x32xf32>
    %1093 = vector.broadcast %1092 : vector<1x1x32xf32> to vector<2x8x32xf32>
    %1094 = arith.addf %1090, %1093 : vector<2x8x32xf32>
    %1095 = arith.addf %25, %1094 : vector<2x8x32xf32>
    %c0_385 = arith.constant 0 : index
    %c0_386 = arith.constant 0 : index
    %1096 = vector.load %arg17[%c0_385, %c0_386] : memref<32x32xf32, #tpu.memory_space<vmem>>, vector<32x32xf32>
    %cst_387 = arith.constant dense<0.000000e+00> : vector<2x32xf32>
    %1097 = tpu.matmul %1077, %1096, %cst_387 {dimension_numbers = #tpu.dot_dimension_numbers<[1], [0], [0], [1], [0, 0, 1, 1], [], []>} : vector<2x32xf32>, vector<32x32xf32>, vector<2x32xf32> -> vector<2x32xf32>
    %1098 = vector.shape_cast %1097 : vector<2x32xf32> to vector<2x1x32xf32>
    %1099 = vector.broadcast %1098 : vector<2x1x32xf32> to vector<2x8x32xf32>
    %1100 = arith.addf %1095, %1099 : vector<2x8x32xf32>
    %1101 = math.tanh %1100 : vector<2x8x32xf32>
    %1102 = vector.shape_cast %1101 : vector<2x8x32xf32> to vector<16x32xf32>
    %c0_388 = arith.constant 0 : index
    %c0_389 = arith.constant 0 : index
    %1103 = vector.load %arg18[%c0_388, %c0_389] : memref<32x1xf32, #tpu.memory_space<vmem>>, vector<32x1xf32>
    %cst_390 = arith.constant dense<0.000000e+00> : vector<16x1xf32>
    %1104 = tpu.matmul %1102, %1103, %cst_390 {dimension_numbers = #tpu.dot_dimension_numbers<[1], [0], [0], [1], [0, 0, 1, 1], [], []>} : vector<16x32xf32>, vector<32x1xf32>, vector<16x1xf32> -> vector<16x1xf32>
    %1105 = vector.shape_cast %1104 : vector<16x1xf32> to vector<2x8xf32>
    %cst_391 = arith.constant dense<0xFF800000> : vector<2xf32>
    %1106 = vector.multi_reduction <maximumf>, %1105, %cst_391 [1] : vector<2x8xf32> to vector<2xf32>
    %cst_392 = arith.constant 0xFF800000 : f32
    %1107 = vector.broadcast %cst_392 : f32 to vector<2xf32>
    %1108 = arith.maximumf %1107, %1106 : vector<2xf32>
    %1109 = vector.shape_cast %1108 : vector<2xf32> to vector<2x1xf32>
    %1110 = vector.broadcast %1109 : vector<2x1xf32> to vector<2x8xf32>
    %1111 = arith.subf %1105, %1110 : vector<2x8xf32>
    %1112 = math.exp %1111 : vector<2x8xf32>
    %cst_393 = arith.constant dense<0.000000e+00> : vector<2xf32>
    %1113 = vector.multi_reduction <add>, %1112, %cst_393 [1] : vector<2x8xf32> to vector<2xf32>
    %1114 = vector.shape_cast %1113 : vector<2xf32> to vector<2x1xf32>
    %1115 = vector.broadcast %1114 : vector<2x1xf32> to vector<2x8xf32>
    %1116 = arith.divf %1112, %1115 : vector<2x8xf32>
    %1117 = vector.shape_cast %1116 : vector<2x8xf32> to vector<2x8x1xf32>
    %1118 = vector.broadcast %1117 : vector<2x8x1xf32> to vector<2x8x32xf32>
    %1119 = arith.mulf %1118, %20 : vector<2x8x32xf32>
    %cst_394 = arith.constant dense<0.000000e+00> : vector<2x32xf32>
    %1120 = vector.multi_reduction <add>, %1119, %cst_394 [1] : vector<2x8x32xf32> to vector<2x32xf32>
    %c0_395 = arith.constant 0 : index
    %c0_396 = arith.constant 0 : index
    %1121 = vector.load %arg19[%c0_395, %c0_396] : memref<32x32xf32, #tpu.memory_space<vmem>>, vector<32x32xf32>
    %cst_397 = arith.constant dense<0.000000e+00> : vector<2x32xf32>
    %1122 = tpu.matmul %1120, %1121, %cst_397 {dimension_numbers = #tpu.dot_dimension_numbers<[1], [0], [0], [1], [0, 0, 1, 1], [], []>} : vector<2x32xf32>, vector<32x32xf32>, vector<2x32xf32> -> vector<2x32xf32>
    %1123 = vector.shape_cast %1122 : vector<2x32xf32> to vector<2x1x32xf32>
    %1124 = vector.broadcast %1123 : vector<2x1x32xf32> to vector<2x8x32xf32>
    %1125 = arith.addf %26, %1124 : vector<2x8x32xf32>
    %1126 = math.tanh %1125 : vector<2x8x32xf32>
    %1127 = vector.shape_cast %1126 : vector<2x8x32xf32> to vector<16x32xf32>
    %c0_398 = arith.constant 0 : index
    %c0_399 = arith.constant 0 : index
    %1128 = vector.load %arg20[%c0_398, %c0_399] : memref<32x1xf32, #tpu.memory_space<vmem>>, vector<32x1xf32>
    %cst_400 = arith.constant dense<0.000000e+00> : vector<16x1xf32>
    %1129 = tpu.matmul %1127, %1128, %cst_400 {dimension_numbers = #tpu.dot_dimension_numbers<[1], [0], [0], [1], [0, 0, 1, 1], [], []>} : vector<16x32xf32>, vector<32x1xf32>, vector<16x1xf32> -> vector<16x1xf32>
    %1130 = vector.shape_cast %1129 : vector<16x1xf32> to vector<2x8xf32>
    %cst_401 = arith.constant dense<0.000000e+00> : vector<2xf32>
    %1131 = vector.multi_reduction <add>, %1018, %cst_401 [1] : vector<2x8xf32> to vector<2xf32>
    %1132 = vector.shape_cast %1131 : vector<2xf32> to vector<2x1xf32>
    %cst_402 = arith.constant 0.000000e+00 : f32
    %1133 = vector.broadcast %cst_402 : f32 to vector<2x1xf32>
    %1134 = arith.cmpf ogt, %1132, %1133 : vector<2x1xf32>
    %1135 = vector.shape_cast %1134 : vector<2x1xi1> to vector<2x1xi1>
    %1136 = vector.broadcast %1135 : vector<2x1xi1> to vector<2x8xi1>
    %1137 = arith.select %1136, %1018, %97 : vector<2x8xi1>, vector<2x8xf32>
    %cst_403 = arith.constant 0.000000e+00 : f32
    %1138 = vector.broadcast %cst_403 : f32 to vector<2x8xf32>
    %1139 = arith.cmpf ogt, %1137, %1138 : vector<2x8xf32>
    %cst_404 = arith.constant -1.000000e+09 : f32
    %1140 = vector.broadcast %cst_404 : f32 to vector<2x8xf32>
    %1141 = arith.select %1139, %1130, %1140 : vector<2x8xi1>, vector<2x8xf32>
    %cst_405 = arith.constant dense<0xFF800000> : vector<2xf32>
    %1142 = vector.multi_reduction <maximumf>, %1141, %cst_405 [1] : vector<2x8xf32> to vector<2xf32>
    %cst_406 = arith.constant 0xFF800000 : f32
    %1143 = vector.broadcast %cst_406 : f32 to vector<2xf32>
    %1144 = arith.maximumf %1143, %1142 : vector<2xf32>
    %1145 = vector.shape_cast %1144 : vector<2xf32> to vector<2x1xf32>
    %1146 = vector.broadcast %1145 : vector<2x1xf32> to vector<2x8xf32>
    %1147 = arith.subf %1141, %1146 : vector<2x8xf32>
    %1148 = math.exp %1147 : vector<2x8xf32>
    %cst_407 = arith.constant dense<0.000000e+00> : vector<2xf32>
    %1149 = vector.multi_reduction <add>, %1148, %cst_407 [1] : vector<2x8xf32> to vector<2xf32>
    %1150 = vector.shape_cast %1149 : vector<2xf32> to vector<2x1xf32>
    %1151 = vector.broadcast %1150 : vector<2x1xf32> to vector<2x8xf32>
    %1152 = arith.divf %1148, %1151 : vector<2x8xf32>
    %cst_408 = arith.constant dense<0xFF800000> : vector<2xf32>
    %1153 = vector.multi_reduction <maximumf>, %1152, %cst_408 [1] : vector<2x8xf32> to vector<2xf32>
    %1154 = vector.shape_cast %1153 : vector<2xf32> to vector<2x1xf32>
    %1155 = vector.broadcast %1154 : vector<2x1xf32> to vector<2x8xf32>
    %1156 = arith.cmpf oge, %1152, %1155 : vector<2x8xf32>
    %1157 = arith.sitofp %93 : vector<2x8xi32> to vector<2x8xf32>
    %cst_409 = arith.constant 8.000000e+00 : f32
    %1158 = vector.broadcast %cst_409 : f32 to vector<2x8xf32>
    %1159 = arith.select %1156, %1157, %1158 : vector<2x8xi1>, vector<2x8xf32>
    %cst_410 = arith.constant dense<0x7F800000> : vector<2xf32>
    %1160 = vector.multi_reduction <minimumf>, %1159, %cst_410 [1] : vector<2x8xf32> to vector<2xf32>
    %1161 = vector.shape_cast %1160 : vector<2xf32> to vector<2x1xf32>
    %1162 = arith.fptosi %1161 : vector<2x1xf32> to vector<2x1xi32>
    %1163 = math.log %1154 : vector<2x1xf32>
    %1164 = vector.broadcast %1162 : vector<2x1xi32> to vector<2x8xi32>
    %1165 = arith.cmpi eq, %93, %1164 : vector<2x8xi32>
    %1166 = arith.extui %1165 : vector<2x8xi1> to vector<2x8xi32>
    %1167 = arith.sitofp %1166 : vector<2x8xi32> to vector<2x8xf32>
    %1168 = arith.mulf %1167, %968 : vector<2x8xf32>
    %cst_411 = arith.constant dense<0.000000e+00> : vector<2xf32>
    %1169 = vector.multi_reduction <add>, %1168, %cst_411 [1] : vector<2x8xf32> to vector<2xf32>
    %1170 = vector.shape_cast %1169 : vector<2xf32> to vector<2x1xf32>
    %1171 = arith.mulf %1167, %973 : vector<2x8xf32>
    %cst_412 = arith.constant dense<0.000000e+00> : vector<2xf32>
    %1172 = vector.multi_reduction <add>, %1171, %cst_412 [1] : vector<2x8xf32> to vector<2xf32>
    %1173 = vector.shape_cast %1172 : vector<2xf32> to vector<2x1xf32>
    %1174 = arith.subf %1170, %1173 : vector<2x1xf32>
    %cst_413 = arith.constant 0.000000e+00 : f32
    %1175 = vector.broadcast %cst_413 : f32 to vector<2x1xf32>
    %1176 = arith.maximumf %1174, %1175 : vector<2x1xf32>
    %1177 = arith.subf %1173, %1170 : vector<2x1xf32>
    %cst_414 = arith.constant 0.000000e+00 : f32
    %1178 = vector.broadcast %cst_414 : f32 to vector<2x1xf32>
    %1179 = arith.maximumf %1177, %1178 : vector<2x1xf32>
    %c0_i32_415 = arith.constant 0 : i32
    %1180 = vector.broadcast %c0_i32_415 : i32 to vector<2x1xi32>
    %1181 = arith.cmpi ne, %1162, %1180 : vector<2x1xi32>
    %cst_416 = arith.constant 1.000000e+00 : f32
    %1182 = vector.broadcast %cst_416 : f32 to vector<2x8xf32>
    %1183 = arith.subf %1182, %1167 : vector<2x8xf32>
    %1184 = arith.mulf %973, %1183 : vector<2x8xf32>
    %1185 = vector.broadcast %1179 : vector<2x1xf32> to vector<2x8xf32>
    %1186 = arith.mulf %1167, %1185 : vector<2x8xf32>
    %1187 = arith.addf %1184, %1186 : vector<2x8xf32>
    %cst_417 = arith.constant 1.000000e+00 : f32
    %1188 = vector.broadcast %cst_417 : f32 to vector<2x1xf32>
    %1189 = arith.subf %1176, %1188 : vector<2x1xf32>
    %1190 = vector.shape_cast %1189 : vector<2x1xf32> to vector<2x1xf32>
    %1191 = vector.broadcast %1190 : vector<2x1xf32> to vector<2x8xf32>
    %1192 = arith.select %99, %1191, %1187 : vector<2x8xi1>, vector<2x8xf32>
    %1193 = vector.shape_cast %1176 : vector<2x1xf32> to vector<2x1xf32>
    %1194 = vector.broadcast %1193 : vector<2x1xf32> to vector<2x8xf32>
    %cst_418 = arith.constant 1.000000e+00 : f32
    %1195 = vector.shape_cast %1181 : vector<2x1xi1> to vector<2x1xi1>
    %1196 = vector.broadcast %1195 : vector<2x1xi1> to vector<2x8xi1>
    %1197 = vector.broadcast %cst_418 : f32 to vector<2x8xf32>
    %1198 = arith.select %1196, %1194, %1197 : vector<2x8xi1>, vector<2x8xf32>
    %cst_419 = arith.constant 0.000000e+00 : f32
    %1199 = vector.broadcast %cst_419 : f32 to vector<2x8xf32>
    %1200 = arith.select %99, %1199, %973 : vector<2x8xi1>, vector<2x8xf32>
    %1201 = vector.shape_cast %1181 : vector<2x1xi1> to vector<2x1xi1>
    %1202 = vector.broadcast %1201 : vector<2x1xi1> to vector<2x8xi1>
    %1203 = arith.select %1202, %1192, %1200 : vector<2x8xi1>, vector<2x8xf32>
    %1204 = math.absf %1203 : vector<2x8xf32>
    %cst_420 = arith.constant dense<0xFF800000> : vector<2xf32>
    %1205 = vector.multi_reduction <maximumf>, %1204, %cst_420 [1] : vector<2x8xf32> to vector<2xf32>
    %1206 = vector.shape_cast %1205 : vector<2xf32> to vector<2x1xf32>
    %cst_421 = arith.constant 0.000000e+00 : f32
    %1207 = vector.broadcast %cst_421 : f32 to vector<2x1xf32>
    %1208 = arith.cmpf oeq, %1206, %1207 : vector<2x1xf32>
    %1209 = arith.extui %1208 : vector<2x1xi1> to vector<2x1xi32>
    %1210 = arith.sitofp %1209 : vector<2x1xi32> to vector<2x1xf32>
    %cst_422 = arith.constant 1.000000e+00 : f32
    %1211 = vector.broadcast %cst_422 : f32 to vector<2x1xf32>
    %1212 = arith.subf %1211, %1210 : vector<2x1xf32>
    %1213 = arith.mulf %1163, %1212 : vector<2x1xf32>
    %1214 = arith.addf %984, %1213 : vector<2x1xf32>
    %cst_423 = arith.constant 0.000000e+00 : f32
    %1215 = vector.broadcast %cst_423 : f32 to vector<2x8xf32>
    %1216 = arith.cmpf one, %1203, %1215 : vector<2x8xf32>
    %1217 = arith.cmpf olt, %1203, %1198 : vector<2x8xf32>
    %1218 = arith.andi %1216, %1217 : vector<2x8xi1>
    %1219 = arith.extui %1218 : vector<2x8xi1> to vector<2x8xi32>
    %1220 = arith.sitofp %1219 : vector<2x8xi32> to vector<2x8xf32>
    %cst_424 = arith.constant 1.000000e+00 : f32
    %cst_425 = arith.constant 0.000000e+00 : f32
    %1221 = vector.broadcast %cst_424 : f32 to vector<2x1xf32>
    %1222 = vector.broadcast %cst_425 : f32 to vector<2x1xf32>
    %1223 = arith.select %1181, %1221, %1222 : vector<2x1xi1>, vector<2x1xf32>
    %1224 = vector.shape_cast %1223 : vector<2x1xf32> to vector<2x1xf32>
    %1225 = vector.broadcast %1224 : vector<2x1xf32> to vector<2x8xf32>
    %1226 = arith.select %99, %1225, %1220 : vector<2x8xi1>, vector<2x8xf32>
    %1227 = vector.extract_strided_slice %1198 {offsets = [0, 0], sizes = [2, 1], strides = [1, 1]} : vector<2x8xf32> to vector<2x1xf32>
    %cst_426 = arith.constant 0.000000e+00 : f32
    %1228 = vector.broadcast %cst_426 : f32 to vector<2x1xf32>
    %1229 = arith.cmpf oeq, %1227, %1228 : vector<2x1xf32>
    %cst_427 = arith.constant 1.000000e+00 : f32
    %1230 = vector.broadcast %cst_427 : f32 to vector<2x8xf32>
    %1231 = arith.subf %1230, %97 : vector<2x8xf32>
    %1232 = arith.mulf %1203, %1231 : vector<2x8xf32>
    %cst_428 = arith.constant dense<0.000000e+00> : vector<2xf32>
    %1233 = vector.multi_reduction <add>, %1232, %cst_428 [1] : vector<2x8xf32> to vector<2xf32>
    %1234 = vector.shape_cast %1233 : vector<2xf32> to vector<2x1xf32>
    %cst_429 = arith.constant 0.000000e+00 : f32
    %1235 = vector.broadcast %cst_429 : f32 to vector<2x1xf32>
    %1236 = arith.cmpf oeq, %1234, %1235 : vector<2x1xf32>
    %1237 = arith.ori %1229, %1236 : vector<2x1xi1>
    %1238 = vector.shape_cast %1237 : vector<2x1xi1> to vector<2x1xi1>
    %1239 = vector.broadcast %1238 : vector<2x1xi1> to vector<2x8xi1>
    %1240 = arith.select %1239, %97, %1226 : vector<2x8xi1>, vector<2x8xf32>
    %cst_430 = arith.constant dense<0xFF800000> : vector<1xf32>
    %1241 = vector.multi_reduction <maximumf>, %1206, %cst_430 [0] : vector<2x1xf32> to vector<1xf32>
    %1242 = vector.shape_cast %1241 : vector<1xf32> to vector<1x1xf32>
    %cst_431 = arith.constant 0.000000e+00 : f32
    %1243 = vector.broadcast %cst_431 : f32 to vector<1x1xf32>
    %1244 = arith.cmpf oeq, %1242, %1243 : vector<1x1xf32>
    %cst_432 = arith.constant 0.000000e+00 : f32
    %1245 = vector.shape_cast %1244 : vector<1x1xi1> to vector<1x1xi1>
    %1246 = vector.broadcast %1245 : vector<1x1xi1> to vector<2x8xi1>
    %1247 = vector.broadcast %cst_432 : f32 to vector<2x8xf32>
    %1248 = arith.select %1246, %1247, %1240 : vector<2x8xi1>, vector<2x8xf32>
    %1249 = vector.broadcast %c4_i32 : i32 to vector<2x7xi32>
    %1250 = arith.cmpi eq, %100, %1249 : vector<2x7xi32>
    %1251 = vector.shape_cast %1162 : vector<2x1xi32> to vector<2x1xi32>
    %1252 = vector.broadcast %1251 : vector<2x1xi32> to vector<2x7xi32>
    %1253 = arith.select %1250, %1252, %1023 : vector<2x7xi1>, vector<2x7xi32>
    %1254 = arith.mulf %1167, %0 : vector<2x8xf32>
    %cst_433 = arith.constant dense<0.000000e+00> : vector<2xf32>
    %1255 = vector.multi_reduction <add>, %1254, %cst_433 [1] : vector<2x8xf32> to vector<2xf32>
    %1256 = vector.shape_cast %1255 : vector<2xf32> to vector<2x1xf32>
    %1257 = arith.mulf %1167, %1 : vector<2x8xf32>
    %cst_434 = arith.constant dense<0.000000e+00> : vector<2xf32>
    %1258 = vector.multi_reduction <add>, %1257, %cst_434 [1] : vector<2x8xf32> to vector<2xf32>
    %1259 = vector.shape_cast %1258 : vector<2xf32> to vector<2x1xf32>
    %c5_i32 = arith.constant 5 : i32
    %c0_435 = arith.constant 0 : index
    %c0_436 = arith.constant 0 : index
    %1260 = vector.load %arg8[%c0_435, %c0_436] : memref<2x32xf32, #tpu.memory_space<vmem>>, vector<1x32xf32>
    %1261 = vector.broadcast %1256 : vector<2x1xf32> to vector<2x32xf32>
    %1262 = vector.broadcast %1260 : vector<1x32xf32> to vector<2x32xf32>
    %1263 = arith.mulf %1261, %1262 : vector<2x32xf32>
    %c1_437 = arith.constant 1 : index
    %c0_438 = arith.constant 0 : index
    %1264 = vector.load %arg8[%c1_437, %c0_438] : memref<2x32xf32, #tpu.memory_space<vmem>>, vector<1x32xf32>
    %1265 = vector.broadcast %1259 : vector<2x1xf32> to vector<2x32xf32>
    %1266 = vector.broadcast %1264 : vector<1x32xf32> to vector<2x32xf32>
    %1267 = arith.mulf %1265, %1266 : vector<2x32xf32>
    %1268 = arith.addf %1263, %1267 : vector<2x32xf32>
    %c0_439 = arith.constant 0 : index
    %c0_440 = arith.constant 0 : index
    %1269 = vector.load %arg9[%c0_439, %c0_440] : memref<1x32xf32, #tpu.memory_space<vmem>>, vector<1x32xf32>
    %1270 = vector.broadcast %1269 : vector<1x32xf32> to vector<2x32xf32>
    %1271 = arith.addf %1268, %1270 : vector<2x32xf32>
    %c0_441 = arith.constant 0 : index
    %c0_442 = arith.constant 0 : index
    %1272 = vector.load %arg10[%c0_441, %c0_442] : memref<32x96xf32, #tpu.memory_space<vmem>>, vector<32x96xf32>
    %cst_443 = arith.constant dense<0.000000e+00> : vector<2x96xf32>
    %1273 = tpu.matmul %1271, %1272, %cst_443 {dimension_numbers = #tpu.dot_dimension_numbers<[1], [0], [0], [1], [0, 0, 1, 1], [], []>} : vector<2x32xf32>, vector<32x96xf32>, vector<2x96xf32> -> vector<2x96xf32>
    %c0_444 = arith.constant 0 : index
    %c0_445 = arith.constant 0 : index
    %1274 = vector.load %arg12[%c0_444, %c0_445] : memref<1x96xf32, #tpu.memory_space<vmem>>, vector<1x96xf32>
    %1275 = vector.broadcast %1274 : vector<1x96xf32> to vector<2x96xf32>
    %1276 = arith.addf %1273, %1275 : vector<2x96xf32>
    %c0_446 = arith.constant 0 : index
    %c0_447 = arith.constant 0 : index
    %1277 = vector.load %arg11[%c0_446, %c0_447] : memref<32x96xf32, #tpu.memory_space<vmem>>, vector<32x96xf32>
    %cst_448 = arith.constant dense<0.000000e+00> : vector<2x96xf32>
    %1278 = tpu.matmul %1077, %1277, %cst_448 {dimension_numbers = #tpu.dot_dimension_numbers<[1], [0], [0], [1], [0, 0, 1, 1], [], []>} : vector<2x32xf32>, vector<32x96xf32>, vector<2x96xf32> -> vector<2x96xf32>
    %c0_449 = arith.constant 0 : index
    %c0_450 = arith.constant 0 : index
    %1279 = vector.load %arg13[%c0_449, %c0_450] : memref<1x96xf32, #tpu.memory_space<vmem>>, vector<1x96xf32>
    %1280 = vector.broadcast %1279 : vector<1x96xf32> to vector<2x96xf32>
    %1281 = arith.addf %1278, %1280 : vector<2x96xf32>
    %1282 = vector.extract_strided_slice %1276 {offsets = [0, 0], sizes = [2, 32], strides = [1, 1]} : vector<2x96xf32> to vector<2x32xf32>
    %1283 = vector.extract_strided_slice %1281 {offsets = [0, 0], sizes = [2, 32], strides = [1, 1]} : vector<2x96xf32> to vector<2x32xf32>
    %1284 = arith.addf %1282, %1283 : vector<2x32xf32>
    %1285 = arith.negf %1284 : vector<2x32xf32>
    %1286 = math.exp %1285 : vector<2x32xf32>
    %cst_451 = arith.constant 1.000000e+00 : f32
    %1287 = vector.broadcast %cst_451 : f32 to vector<2x32xf32>
    %1288 = arith.addf %1287, %1286 : vector<2x32xf32>
    %1289 = arith.divf %1287, %1288 : vector<2x32xf32>
    %1290 = vector.extract_strided_slice %1276 {offsets = [0, 32], sizes = [2, 32], strides = [1, 1]} : vector<2x96xf32> to vector<2x32xf32>
    %1291 = vector.extract_strided_slice %1281 {offsets = [0, 32], sizes = [2, 32], strides = [1, 1]} : vector<2x96xf32> to vector<2x32xf32>
    %1292 = arith.addf %1290, %1291 : vector<2x32xf32>
    %1293 = arith.negf %1292 : vector<2x32xf32>
    %1294 = math.exp %1293 : vector<2x32xf32>
    %cst_452 = arith.constant 1.000000e+00 : f32
    %1295 = vector.broadcast %cst_452 : f32 to vector<2x32xf32>
    %1296 = arith.addf %1295, %1294 : vector<2x32xf32>
    %1297 = arith.divf %1295, %1296 : vector<2x32xf32>
    %1298 = vector.extract_strided_slice %1276 {offsets = [0, 64], sizes = [2, 32], strides = [1, 1]} : vector<2x96xf32> to vector<2x32xf32>
    %1299 = vector.extract_strided_slice %1281 {offsets = [0, 64], sizes = [2, 32], strides = [1, 1]} : vector<2x96xf32> to vector<2x32xf32>
    %1300 = arith.mulf %1289, %1299 : vector<2x32xf32>
    %1301 = arith.addf %1298, %1300 : vector<2x32xf32>
    %1302 = math.tanh %1301 : vector<2x32xf32>
    %cst_453 = arith.constant 1.000000e+00 : f32
    %1303 = vector.broadcast %cst_453 : f32 to vector<2x32xf32>
    %1304 = arith.subf %1303, %1297 : vector<2x32xf32>
    %1305 = arith.mulf %1304, %1302 : vector<2x32xf32>
    %1306 = arith.mulf %1297, %1077 : vector<2x32xf32>
    %1307 = arith.addf %1305, %1306 : vector<2x32xf32>
    %1308 = vector.shape_cast %1198 : vector<2x8xf32> to vector<2x8x1xf32>
    %c0_454 = arith.constant 0 : index
    %c0_455 = arith.constant 0 : index
    %1309 = vector.load %arg15[%c0_454, %c0_455] : memref<2x32xf32, #tpu.memory_space<vmem>>, vector<1x32xf32>
    %1310 = vector.shape_cast %1309 : vector<1x32xf32> to vector<1x1x32xf32>
    %1311 = vector.broadcast %1308 : vector<2x8x1xf32> to vector<2x8x32xf32>
    %1312 = vector.broadcast %1310 : vector<1x1x32xf32> to vector<2x8x32xf32>
    %1313 = arith.mulf %1311, %1312 : vector<2x8x32xf32>
    %1314 = vector.shape_cast %1203 : vector<2x8xf32> to vector<2x8x1xf32>
    %c1_456 = arith.constant 1 : index
    %c0_457 = arith.constant 0 : index
    %1315 = vector.load %arg15[%c1_456, %c0_457] : memref<2x32xf32, #tpu.memory_space<vmem>>, vector<1x32xf32>
    %1316 = vector.shape_cast %1315 : vector<1x32xf32> to vector<1x1x32xf32>
    %1317 = vector.broadcast %1314 : vector<2x8x1xf32> to vector<2x8x32xf32>
    %1318 = vector.broadcast %1316 : vector<1x1x32xf32> to vector<2x8x32xf32>
    %1319 = arith.mulf %1317, %1318 : vector<2x8x32xf32>
    %1320 = arith.addf %1313, %1319 : vector<2x8x32xf32>
    %c0_458 = arith.constant 0 : index
    %c0_459 = arith.constant 0 : index
    %1321 = vector.load %arg16[%c0_458, %c0_459] : memref<1x32xf32, #tpu.memory_space<vmem>>, vector<1x32xf32>
    %1322 = vector.shape_cast %1321 : vector<1x32xf32> to vector<1x1x32xf32>
    %1323 = vector.broadcast %1322 : vector<1x1x32xf32> to vector<2x8x32xf32>
    %1324 = arith.addf %1320, %1323 : vector<2x8x32xf32>
    %1325 = arith.addf %25, %1324 : vector<2x8x32xf32>
    %c0_460 = arith.constant 0 : index
    %c0_461 = arith.constant 0 : index
    %1326 = vector.load %arg17[%c0_460, %c0_461] : memref<32x32xf32, #tpu.memory_space<vmem>>, vector<32x32xf32>
    %cst_462 = arith.constant dense<0.000000e+00> : vector<2x32xf32>
    %1327 = tpu.matmul %1307, %1326, %cst_462 {dimension_numbers = #tpu.dot_dimension_numbers<[1], [0], [0], [1], [0, 0, 1, 1], [], []>} : vector<2x32xf32>, vector<32x32xf32>, vector<2x32xf32> -> vector<2x32xf32>
    %1328 = vector.shape_cast %1327 : vector<2x32xf32> to vector<2x1x32xf32>
    %1329 = vector.broadcast %1328 : vector<2x1x32xf32> to vector<2x8x32xf32>
    %1330 = arith.addf %1325, %1329 : vector<2x8x32xf32>
    %1331 = math.tanh %1330 : vector<2x8x32xf32>
    %1332 = vector.shape_cast %1331 : vector<2x8x32xf32> to vector<16x32xf32>
    %c0_463 = arith.constant 0 : index
    %c0_464 = arith.constant 0 : index
    %1333 = vector.load %arg18[%c0_463, %c0_464] : memref<32x1xf32, #tpu.memory_space<vmem>>, vector<32x1xf32>
    %cst_465 = arith.constant dense<0.000000e+00> : vector<16x1xf32>
    %1334 = tpu.matmul %1332, %1333, %cst_465 {dimension_numbers = #tpu.dot_dimension_numbers<[1], [0], [0], [1], [0, 0, 1, 1], [], []>} : vector<16x32xf32>, vector<32x1xf32>, vector<16x1xf32> -> vector<16x1xf32>
    %1335 = vector.shape_cast %1334 : vector<16x1xf32> to vector<2x8xf32>
    %cst_466 = arith.constant dense<0xFF800000> : vector<2xf32>
    %1336 = vector.multi_reduction <maximumf>, %1335, %cst_466 [1] : vector<2x8xf32> to vector<2xf32>
    %cst_467 = arith.constant 0xFF800000 : f32
    %1337 = vector.broadcast %cst_467 : f32 to vector<2xf32>
    %1338 = arith.maximumf %1337, %1336 : vector<2xf32>
    %1339 = vector.shape_cast %1338 : vector<2xf32> to vector<2x1xf32>
    %1340 = vector.broadcast %1339 : vector<2x1xf32> to vector<2x8xf32>
    %1341 = arith.subf %1335, %1340 : vector<2x8xf32>
    %1342 = math.exp %1341 : vector<2x8xf32>
    %cst_468 = arith.constant dense<0.000000e+00> : vector<2xf32>
    %1343 = vector.multi_reduction <add>, %1342, %cst_468 [1] : vector<2x8xf32> to vector<2xf32>
    %1344 = vector.shape_cast %1343 : vector<2xf32> to vector<2x1xf32>
    %1345 = vector.broadcast %1344 : vector<2x1xf32> to vector<2x8xf32>
    %1346 = arith.divf %1342, %1345 : vector<2x8xf32>
    %1347 = vector.shape_cast %1346 : vector<2x8xf32> to vector<2x8x1xf32>
    %1348 = vector.broadcast %1347 : vector<2x8x1xf32> to vector<2x8x32xf32>
    %1349 = arith.mulf %1348, %20 : vector<2x8x32xf32>
    %cst_469 = arith.constant dense<0.000000e+00> : vector<2x32xf32>
    %1350 = vector.multi_reduction <add>, %1349, %cst_469 [1] : vector<2x8x32xf32> to vector<2x32xf32>
    %c0_470 = arith.constant 0 : index
    %c0_471 = arith.constant 0 : index
    %1351 = vector.load %arg19[%c0_470, %c0_471] : memref<32x32xf32, #tpu.memory_space<vmem>>, vector<32x32xf32>
    %cst_472 = arith.constant dense<0.000000e+00> : vector<2x32xf32>
    %1352 = tpu.matmul %1350, %1351, %cst_472 {dimension_numbers = #tpu.dot_dimension_numbers<[1], [0], [0], [1], [0, 0, 1, 1], [], []>} : vector<2x32xf32>, vector<32x32xf32>, vector<2x32xf32> -> vector<2x32xf32>
    %1353 = vector.shape_cast %1352 : vector<2x32xf32> to vector<2x1x32xf32>
    %1354 = vector.broadcast %1353 : vector<2x1x32xf32> to vector<2x8x32xf32>
    %1355 = arith.addf %26, %1354 : vector<2x8x32xf32>
    %1356 = math.tanh %1355 : vector<2x8x32xf32>
    %1357 = vector.shape_cast %1356 : vector<2x8x32xf32> to vector<16x32xf32>
    %c0_473 = arith.constant 0 : index
    %c0_474 = arith.constant 0 : index
    %1358 = vector.load %arg20[%c0_473, %c0_474] : memref<32x1xf32, #tpu.memory_space<vmem>>, vector<32x1xf32>
    %cst_475 = arith.constant dense<0.000000e+00> : vector<16x1xf32>
    %1359 = tpu.matmul %1357, %1358, %cst_475 {dimension_numbers = #tpu.dot_dimension_numbers<[1], [0], [0], [1], [0, 0, 1, 1], [], []>} : vector<16x32xf32>, vector<32x1xf32>, vector<16x1xf32> -> vector<16x1xf32>
    %1360 = vector.shape_cast %1359 : vector<16x1xf32> to vector<2x8xf32>
    %cst_476 = arith.constant dense<0.000000e+00> : vector<2xf32>
    %1361 = vector.multi_reduction <add>, %1248, %cst_476 [1] : vector<2x8xf32> to vector<2xf32>
    %1362 = vector.shape_cast %1361 : vector<2xf32> to vector<2x1xf32>
    %cst_477 = arith.constant 0.000000e+00 : f32
    %1363 = vector.broadcast %cst_477 : f32 to vector<2x1xf32>
    %1364 = arith.cmpf ogt, %1362, %1363 : vector<2x1xf32>
    %1365 = vector.shape_cast %1364 : vector<2x1xi1> to vector<2x1xi1>
    %1366 = vector.broadcast %1365 : vector<2x1xi1> to vector<2x8xi1>
    %1367 = arith.select %1366, %1248, %97 : vector<2x8xi1>, vector<2x8xf32>
    %cst_478 = arith.constant 0.000000e+00 : f32
    %1368 = vector.broadcast %cst_478 : f32 to vector<2x8xf32>
    %1369 = arith.cmpf ogt, %1367, %1368 : vector<2x8xf32>
    %cst_479 = arith.constant -1.000000e+09 : f32
    %1370 = vector.broadcast %cst_479 : f32 to vector<2x8xf32>
    %1371 = arith.select %1369, %1360, %1370 : vector<2x8xi1>, vector<2x8xf32>
    %cst_480 = arith.constant dense<0xFF800000> : vector<2xf32>
    %1372 = vector.multi_reduction <maximumf>, %1371, %cst_480 [1] : vector<2x8xf32> to vector<2xf32>
    %cst_481 = arith.constant 0xFF800000 : f32
    %1373 = vector.broadcast %cst_481 : f32 to vector<2xf32>
    %1374 = arith.maximumf %1373, %1372 : vector<2xf32>
    %1375 = vector.shape_cast %1374 : vector<2xf32> to vector<2x1xf32>
    %1376 = vector.broadcast %1375 : vector<2x1xf32> to vector<2x8xf32>
    %1377 = arith.subf %1371, %1376 : vector<2x8xf32>
    %1378 = math.exp %1377 : vector<2x8xf32>
    %cst_482 = arith.constant dense<0.000000e+00> : vector<2xf32>
    %1379 = vector.multi_reduction <add>, %1378, %cst_482 [1] : vector<2x8xf32> to vector<2xf32>
    %1380 = vector.shape_cast %1379 : vector<2xf32> to vector<2x1xf32>
    %1381 = vector.broadcast %1380 : vector<2x1xf32> to vector<2x8xf32>
    %1382 = arith.divf %1378, %1381 : vector<2x8xf32>
    %cst_483 = arith.constant dense<0xFF800000> : vector<2xf32>
    %1383 = vector.multi_reduction <maximumf>, %1382, %cst_483 [1] : vector<2x8xf32> to vector<2xf32>
    %1384 = vector.shape_cast %1383 : vector<2xf32> to vector<2x1xf32>
    %1385 = vector.broadcast %1384 : vector<2x1xf32> to vector<2x8xf32>
    %1386 = arith.cmpf oge, %1382, %1385 : vector<2x8xf32>
    %1387 = arith.sitofp %93 : vector<2x8xi32> to vector<2x8xf32>
    %cst_484 = arith.constant 8.000000e+00 : f32
    %1388 = vector.broadcast %cst_484 : f32 to vector<2x8xf32>
    %1389 = arith.select %1386, %1387, %1388 : vector<2x8xi1>, vector<2x8xf32>
    %cst_485 = arith.constant dense<0x7F800000> : vector<2xf32>
    %1390 = vector.multi_reduction <minimumf>, %1389, %cst_485 [1] : vector<2x8xf32> to vector<2xf32>
    %1391 = vector.shape_cast %1390 : vector<2xf32> to vector<2x1xf32>
    %1392 = arith.fptosi %1391 : vector<2x1xf32> to vector<2x1xi32>
    %1393 = math.log %1384 : vector<2x1xf32>
    %1394 = vector.broadcast %1392 : vector<2x1xi32> to vector<2x8xi32>
    %1395 = arith.cmpi eq, %93, %1394 : vector<2x8xi32>
    %1396 = arith.extui %1395 : vector<2x8xi1> to vector<2x8xi32>
    %1397 = arith.sitofp %1396 : vector<2x8xi32> to vector<2x8xf32>
    %1398 = arith.mulf %1397, %1198 : vector<2x8xf32>
    %cst_486 = arith.constant dense<0.000000e+00> : vector<2xf32>
    %1399 = vector.multi_reduction <add>, %1398, %cst_486 [1] : vector<2x8xf32> to vector<2xf32>
    %1400 = vector.shape_cast %1399 : vector<2xf32> to vector<2x1xf32>
    %1401 = arith.mulf %1397, %1203 : vector<2x8xf32>
    %cst_487 = arith.constant dense<0.000000e+00> : vector<2xf32>
    %1402 = vector.multi_reduction <add>, %1401, %cst_487 [1] : vector<2x8xf32> to vector<2xf32>
    %1403 = vector.shape_cast %1402 : vector<2xf32> to vector<2x1xf32>
    %1404 = arith.subf %1400, %1403 : vector<2x1xf32>
    %cst_488 = arith.constant 0.000000e+00 : f32
    %1405 = vector.broadcast %cst_488 : f32 to vector<2x1xf32>
    %1406 = arith.maximumf %1404, %1405 : vector<2x1xf32>
    %1407 = arith.subf %1403, %1400 : vector<2x1xf32>
    %cst_489 = arith.constant 0.000000e+00 : f32
    %1408 = vector.broadcast %cst_489 : f32 to vector<2x1xf32>
    %1409 = arith.maximumf %1407, %1408 : vector<2x1xf32>
    %c0_i32_490 = arith.constant 0 : i32
    %1410 = vector.broadcast %c0_i32_490 : i32 to vector<2x1xi32>
    %1411 = arith.cmpi ne, %1392, %1410 : vector<2x1xi32>
    %cst_491 = arith.constant 1.000000e+00 : f32
    %1412 = vector.broadcast %cst_491 : f32 to vector<2x8xf32>
    %1413 = arith.subf %1412, %1397 : vector<2x8xf32>
    %1414 = arith.mulf %1203, %1413 : vector<2x8xf32>
    %1415 = vector.broadcast %1409 : vector<2x1xf32> to vector<2x8xf32>
    %1416 = arith.mulf %1397, %1415 : vector<2x8xf32>
    %1417 = arith.addf %1414, %1416 : vector<2x8xf32>
    %cst_492 = arith.constant 1.000000e+00 : f32
    %1418 = vector.broadcast %cst_492 : f32 to vector<2x1xf32>
    %1419 = arith.subf %1406, %1418 : vector<2x1xf32>
    %1420 = vector.shape_cast %1419 : vector<2x1xf32> to vector<2x1xf32>
    %1421 = vector.broadcast %1420 : vector<2x1xf32> to vector<2x8xf32>
    %1422 = arith.select %99, %1421, %1417 : vector<2x8xi1>, vector<2x8xf32>
    %1423 = vector.shape_cast %1406 : vector<2x1xf32> to vector<2x1xf32>
    %1424 = vector.broadcast %1423 : vector<2x1xf32> to vector<2x8xf32>
    %cst_493 = arith.constant 1.000000e+00 : f32
    %1425 = vector.shape_cast %1411 : vector<2x1xi1> to vector<2x1xi1>
    %1426 = vector.broadcast %1425 : vector<2x1xi1> to vector<2x8xi1>
    %1427 = vector.broadcast %cst_493 : f32 to vector<2x8xf32>
    %1428 = arith.select %1426, %1424, %1427 : vector<2x8xi1>, vector<2x8xf32>
    %cst_494 = arith.constant 0.000000e+00 : f32
    %1429 = vector.broadcast %cst_494 : f32 to vector<2x8xf32>
    %1430 = arith.select %99, %1429, %1203 : vector<2x8xi1>, vector<2x8xf32>
    %1431 = vector.shape_cast %1411 : vector<2x1xi1> to vector<2x1xi1>
    %1432 = vector.broadcast %1431 : vector<2x1xi1> to vector<2x8xi1>
    %1433 = arith.select %1432, %1422, %1430 : vector<2x8xi1>, vector<2x8xf32>
    %1434 = math.absf %1433 : vector<2x8xf32>
    %cst_495 = arith.constant dense<0xFF800000> : vector<2xf32>
    %1435 = vector.multi_reduction <maximumf>, %1434, %cst_495 [1] : vector<2x8xf32> to vector<2xf32>
    %1436 = vector.shape_cast %1435 : vector<2xf32> to vector<2x1xf32>
    %cst_496 = arith.constant 0.000000e+00 : f32
    %1437 = vector.broadcast %cst_496 : f32 to vector<2x1xf32>
    %1438 = arith.cmpf oeq, %1436, %1437 : vector<2x1xf32>
    %1439 = arith.extui %1438 : vector<2x1xi1> to vector<2x1xi32>
    %1440 = arith.sitofp %1439 : vector<2x1xi32> to vector<2x1xf32>
    %cst_497 = arith.constant 1.000000e+00 : f32
    %1441 = vector.broadcast %cst_497 : f32 to vector<2x1xf32>
    %1442 = arith.subf %1441, %1440 : vector<2x1xf32>
    %1443 = arith.mulf %1393, %1442 : vector<2x1xf32>
    %1444 = arith.addf %1214, %1443 : vector<2x1xf32>
    %cst_498 = arith.constant 0.000000e+00 : f32
    %1445 = vector.broadcast %cst_498 : f32 to vector<2x8xf32>
    %1446 = arith.cmpf one, %1433, %1445 : vector<2x8xf32>
    %1447 = arith.cmpf olt, %1433, %1428 : vector<2x8xf32>
    %1448 = arith.andi %1446, %1447 : vector<2x8xi1>
    %1449 = arith.extui %1448 : vector<2x8xi1> to vector<2x8xi32>
    %1450 = arith.sitofp %1449 : vector<2x8xi32> to vector<2x8xf32>
    %cst_499 = arith.constant 1.000000e+00 : f32
    %cst_500 = arith.constant 0.000000e+00 : f32
    %1451 = vector.broadcast %cst_499 : f32 to vector<2x1xf32>
    %1452 = vector.broadcast %cst_500 : f32 to vector<2x1xf32>
    %1453 = arith.select %1411, %1451, %1452 : vector<2x1xi1>, vector<2x1xf32>
    %1454 = vector.shape_cast %1453 : vector<2x1xf32> to vector<2x1xf32>
    %1455 = vector.broadcast %1454 : vector<2x1xf32> to vector<2x8xf32>
    %1456 = arith.select %99, %1455, %1450 : vector<2x8xi1>, vector<2x8xf32>
    %1457 = vector.extract_strided_slice %1428 {offsets = [0, 0], sizes = [2, 1], strides = [1, 1]} : vector<2x8xf32> to vector<2x1xf32>
    %cst_501 = arith.constant 0.000000e+00 : f32
    %1458 = vector.broadcast %cst_501 : f32 to vector<2x1xf32>
    %1459 = arith.cmpf oeq, %1457, %1458 : vector<2x1xf32>
    %cst_502 = arith.constant 1.000000e+00 : f32
    %1460 = vector.broadcast %cst_502 : f32 to vector<2x8xf32>
    %1461 = arith.subf %1460, %97 : vector<2x8xf32>
    %1462 = arith.mulf %1433, %1461 : vector<2x8xf32>
    %cst_503 = arith.constant dense<0.000000e+00> : vector<2xf32>
    %1463 = vector.multi_reduction <add>, %1462, %cst_503 [1] : vector<2x8xf32> to vector<2xf32>
    %1464 = vector.shape_cast %1463 : vector<2xf32> to vector<2x1xf32>
    %cst_504 = arith.constant 0.000000e+00 : f32
    %1465 = vector.broadcast %cst_504 : f32 to vector<2x1xf32>
    %1466 = arith.cmpf oeq, %1464, %1465 : vector<2x1xf32>
    %1467 = arith.ori %1459, %1466 : vector<2x1xi1>
    %1468 = vector.shape_cast %1467 : vector<2x1xi1> to vector<2x1xi1>
    %1469 = vector.broadcast %1468 : vector<2x1xi1> to vector<2x8xi1>
    %1470 = arith.select %1469, %97, %1456 : vector<2x8xi1>, vector<2x8xf32>
    %cst_505 = arith.constant dense<0xFF800000> : vector<1xf32>
    %1471 = vector.multi_reduction <maximumf>, %1436, %cst_505 [0] : vector<2x1xf32> to vector<1xf32>
    %1472 = vector.shape_cast %1471 : vector<1xf32> to vector<1x1xf32>
    %cst_506 = arith.constant 0.000000e+00 : f32
    %1473 = vector.broadcast %cst_506 : f32 to vector<1x1xf32>
    %1474 = arith.cmpf oeq, %1472, %1473 : vector<1x1xf32>
    %cst_507 = arith.constant 0.000000e+00 : f32
    %1475 = vector.shape_cast %1474 : vector<1x1xi1> to vector<1x1xi1>
    %1476 = vector.broadcast %1475 : vector<1x1xi1> to vector<2x8xi1>
    %1477 = vector.broadcast %cst_507 : f32 to vector<2x8xf32>
    %1478 = arith.select %1476, %1477, %1470 : vector<2x8xi1>, vector<2x8xf32>
    %1479 = vector.broadcast %c5_i32 : i32 to vector<2x7xi32>
    %1480 = arith.cmpi eq, %100, %1479 : vector<2x7xi32>
    %1481 = vector.shape_cast %1392 : vector<2x1xi32> to vector<2x1xi32>
    %1482 = vector.broadcast %1481 : vector<2x1xi32> to vector<2x7xi32>
    %1483 = arith.select %1480, %1482, %1253 : vector<2x7xi1>, vector<2x7xi32>
    %1484 = arith.mulf %1397, %0 : vector<2x8xf32>
    %cst_508 = arith.constant dense<0.000000e+00> : vector<2xf32>
    %1485 = vector.multi_reduction <add>, %1484, %cst_508 [1] : vector<2x8xf32> to vector<2xf32>
    %1486 = vector.shape_cast %1485 : vector<2xf32> to vector<2x1xf32>
    %1487 = arith.mulf %1397, %1 : vector<2x8xf32>
    %cst_509 = arith.constant dense<0.000000e+00> : vector<2xf32>
    %1488 = vector.multi_reduction <add>, %1487, %cst_509 [1] : vector<2x8xf32> to vector<2xf32>
    %1489 = vector.shape_cast %1488 : vector<2xf32> to vector<2x1xf32>
    %c6_i32 = arith.constant 6 : i32
    %c0_510 = arith.constant 0 : index
    %c0_511 = arith.constant 0 : index
    %1490 = vector.load %arg8[%c0_510, %c0_511] : memref<2x32xf32, #tpu.memory_space<vmem>>, vector<1x32xf32>
    %1491 = vector.broadcast %1486 : vector<2x1xf32> to vector<2x32xf32>
    %1492 = vector.broadcast %1490 : vector<1x32xf32> to vector<2x32xf32>
    %1493 = arith.mulf %1491, %1492 : vector<2x32xf32>
    %c1_512 = arith.constant 1 : index
    %c0_513 = arith.constant 0 : index
    %1494 = vector.load %arg8[%c1_512, %c0_513] : memref<2x32xf32, #tpu.memory_space<vmem>>, vector<1x32xf32>
    %1495 = vector.broadcast %1489 : vector<2x1xf32> to vector<2x32xf32>
    %1496 = vector.broadcast %1494 : vector<1x32xf32> to vector<2x32xf32>
    %1497 = arith.mulf %1495, %1496 : vector<2x32xf32>
    %1498 = arith.addf %1493, %1497 : vector<2x32xf32>
    %c0_514 = arith.constant 0 : index
    %c0_515 = arith.constant 0 : index
    %1499 = vector.load %arg9[%c0_514, %c0_515] : memref<1x32xf32, #tpu.memory_space<vmem>>, vector<1x32xf32>
    %1500 = vector.broadcast %1499 : vector<1x32xf32> to vector<2x32xf32>
    %1501 = arith.addf %1498, %1500 : vector<2x32xf32>
    %c0_516 = arith.constant 0 : index
    %c0_517 = arith.constant 0 : index
    %1502 = vector.load %arg10[%c0_516, %c0_517] : memref<32x96xf32, #tpu.memory_space<vmem>>, vector<32x96xf32>
    %cst_518 = arith.constant dense<0.000000e+00> : vector<2x96xf32>
    %1503 = tpu.matmul %1501, %1502, %cst_518 {dimension_numbers = #tpu.dot_dimension_numbers<[1], [0], [0], [1], [0, 0, 1, 1], [], []>} : vector<2x32xf32>, vector<32x96xf32>, vector<2x96xf32> -> vector<2x96xf32>
    %c0_519 = arith.constant 0 : index
    %c0_520 = arith.constant 0 : index
    %1504 = vector.load %arg12[%c0_519, %c0_520] : memref<1x96xf32, #tpu.memory_space<vmem>>, vector<1x96xf32>
    %1505 = vector.broadcast %1504 : vector<1x96xf32> to vector<2x96xf32>
    %1506 = arith.addf %1503, %1505 : vector<2x96xf32>
    %c0_521 = arith.constant 0 : index
    %c0_522 = arith.constant 0 : index
    %1507 = vector.load %arg11[%c0_521, %c0_522] : memref<32x96xf32, #tpu.memory_space<vmem>>, vector<32x96xf32>
    %cst_523 = arith.constant dense<0.000000e+00> : vector<2x96xf32>
    %1508 = tpu.matmul %1307, %1507, %cst_523 {dimension_numbers = #tpu.dot_dimension_numbers<[1], [0], [0], [1], [0, 0, 1, 1], [], []>} : vector<2x32xf32>, vector<32x96xf32>, vector<2x96xf32> -> vector<2x96xf32>
    %c0_524 = arith.constant 0 : index
    %c0_525 = arith.constant 0 : index
    %1509 = vector.load %arg13[%c0_524, %c0_525] : memref<1x96xf32, #tpu.memory_space<vmem>>, vector<1x96xf32>
    %1510 = vector.broadcast %1509 : vector<1x96xf32> to vector<2x96xf32>
    %1511 = arith.addf %1508, %1510 : vector<2x96xf32>
    %1512 = vector.extract_strided_slice %1506 {offsets = [0, 0], sizes = [2, 32], strides = [1, 1]} : vector<2x96xf32> to vector<2x32xf32>
    %1513 = vector.extract_strided_slice %1511 {offsets = [0, 0], sizes = [2, 32], strides = [1, 1]} : vector<2x96xf32> to vector<2x32xf32>
    %1514 = arith.addf %1512, %1513 : vector<2x32xf32>
    %1515 = arith.negf %1514 : vector<2x32xf32>
    %1516 = math.exp %1515 : vector<2x32xf32>
    %cst_526 = arith.constant 1.000000e+00 : f32
    %1517 = vector.broadcast %cst_526 : f32 to vector<2x32xf32>
    %1518 = arith.addf %1517, %1516 : vector<2x32xf32>
    %1519 = arith.divf %1517, %1518 : vector<2x32xf32>
    %1520 = vector.extract_strided_slice %1506 {offsets = [0, 32], sizes = [2, 32], strides = [1, 1]} : vector<2x96xf32> to vector<2x32xf32>
    %1521 = vector.extract_strided_slice %1511 {offsets = [0, 32], sizes = [2, 32], strides = [1, 1]} : vector<2x96xf32> to vector<2x32xf32>
    %1522 = arith.addf %1520, %1521 : vector<2x32xf32>
    %1523 = arith.negf %1522 : vector<2x32xf32>
    %1524 = math.exp %1523 : vector<2x32xf32>
    %cst_527 = arith.constant 1.000000e+00 : f32
    %1525 = vector.broadcast %cst_527 : f32 to vector<2x32xf32>
    %1526 = arith.addf %1525, %1524 : vector<2x32xf32>
    %1527 = arith.divf %1525, %1526 : vector<2x32xf32>
    %1528 = vector.extract_strided_slice %1506 {offsets = [0, 64], sizes = [2, 32], strides = [1, 1]} : vector<2x96xf32> to vector<2x32xf32>
    %1529 = vector.extract_strided_slice %1511 {offsets = [0, 64], sizes = [2, 32], strides = [1, 1]} : vector<2x96xf32> to vector<2x32xf32>
    %1530 = arith.mulf %1519, %1529 : vector<2x32xf32>
    %1531 = arith.addf %1528, %1530 : vector<2x32xf32>
    %1532 = math.tanh %1531 : vector<2x32xf32>
    %cst_528 = arith.constant 1.000000e+00 : f32
    %1533 = vector.broadcast %cst_528 : f32 to vector<2x32xf32>
    %1534 = arith.subf %1533, %1527 : vector<2x32xf32>
    %1535 = arith.mulf %1534, %1532 : vector<2x32xf32>
    %1536 = arith.mulf %1527, %1307 : vector<2x32xf32>
    %1537 = arith.addf %1535, %1536 : vector<2x32xf32>
    %1538 = vector.shape_cast %1428 : vector<2x8xf32> to vector<2x8x1xf32>
    %c0_529 = arith.constant 0 : index
    %c0_530 = arith.constant 0 : index
    %1539 = vector.load %arg15[%c0_529, %c0_530] : memref<2x32xf32, #tpu.memory_space<vmem>>, vector<1x32xf32>
    %1540 = vector.shape_cast %1539 : vector<1x32xf32> to vector<1x1x32xf32>
    %1541 = vector.broadcast %1538 : vector<2x8x1xf32> to vector<2x8x32xf32>
    %1542 = vector.broadcast %1540 : vector<1x1x32xf32> to vector<2x8x32xf32>
    %1543 = arith.mulf %1541, %1542 : vector<2x8x32xf32>
    %1544 = vector.shape_cast %1433 : vector<2x8xf32> to vector<2x8x1xf32>
    %c1_531 = arith.constant 1 : index
    %c0_532 = arith.constant 0 : index
    %1545 = vector.load %arg15[%c1_531, %c0_532] : memref<2x32xf32, #tpu.memory_space<vmem>>, vector<1x32xf32>
    %1546 = vector.shape_cast %1545 : vector<1x32xf32> to vector<1x1x32xf32>
    %1547 = vector.broadcast %1544 : vector<2x8x1xf32> to vector<2x8x32xf32>
    %1548 = vector.broadcast %1546 : vector<1x1x32xf32> to vector<2x8x32xf32>
    %1549 = arith.mulf %1547, %1548 : vector<2x8x32xf32>
    %1550 = arith.addf %1543, %1549 : vector<2x8x32xf32>
    %c0_533 = arith.constant 0 : index
    %c0_534 = arith.constant 0 : index
    %1551 = vector.load %arg16[%c0_533, %c0_534] : memref<1x32xf32, #tpu.memory_space<vmem>>, vector<1x32xf32>
    %1552 = vector.shape_cast %1551 : vector<1x32xf32> to vector<1x1x32xf32>
    %1553 = vector.broadcast %1552 : vector<1x1x32xf32> to vector<2x8x32xf32>
    %1554 = arith.addf %1550, %1553 : vector<2x8x32xf32>
    %1555 = arith.addf %25, %1554 : vector<2x8x32xf32>
    %c0_535 = arith.constant 0 : index
    %c0_536 = arith.constant 0 : index
    %1556 = vector.load %arg17[%c0_535, %c0_536] : memref<32x32xf32, #tpu.memory_space<vmem>>, vector<32x32xf32>
    %cst_537 = arith.constant dense<0.000000e+00> : vector<2x32xf32>
    %1557 = tpu.matmul %1537, %1556, %cst_537 {dimension_numbers = #tpu.dot_dimension_numbers<[1], [0], [0], [1], [0, 0, 1, 1], [], []>} : vector<2x32xf32>, vector<32x32xf32>, vector<2x32xf32> -> vector<2x32xf32>
    %1558 = vector.shape_cast %1557 : vector<2x32xf32> to vector<2x1x32xf32>
    %1559 = vector.broadcast %1558 : vector<2x1x32xf32> to vector<2x8x32xf32>
    %1560 = arith.addf %1555, %1559 : vector<2x8x32xf32>
    %1561 = math.tanh %1560 : vector<2x8x32xf32>
    %1562 = vector.shape_cast %1561 : vector<2x8x32xf32> to vector<16x32xf32>
    %c0_538 = arith.constant 0 : index
    %c0_539 = arith.constant 0 : index
    %1563 = vector.load %arg18[%c0_538, %c0_539] : memref<32x1xf32, #tpu.memory_space<vmem>>, vector<32x1xf32>
    %cst_540 = arith.constant dense<0.000000e+00> : vector<16x1xf32>
    %1564 = tpu.matmul %1562, %1563, %cst_540 {dimension_numbers = #tpu.dot_dimension_numbers<[1], [0], [0], [1], [0, 0, 1, 1], [], []>} : vector<16x32xf32>, vector<32x1xf32>, vector<16x1xf32> -> vector<16x1xf32>
    %1565 = vector.shape_cast %1564 : vector<16x1xf32> to vector<2x8xf32>
    %cst_541 = arith.constant dense<0xFF800000> : vector<2xf32>
    %1566 = vector.multi_reduction <maximumf>, %1565, %cst_541 [1] : vector<2x8xf32> to vector<2xf32>
    %cst_542 = arith.constant 0xFF800000 : f32
    %1567 = vector.broadcast %cst_542 : f32 to vector<2xf32>
    %1568 = arith.maximumf %1567, %1566 : vector<2xf32>
    %1569 = vector.shape_cast %1568 : vector<2xf32> to vector<2x1xf32>
    %1570 = vector.broadcast %1569 : vector<2x1xf32> to vector<2x8xf32>
    %1571 = arith.subf %1565, %1570 : vector<2x8xf32>
    %1572 = math.exp %1571 : vector<2x8xf32>
    %cst_543 = arith.constant dense<0.000000e+00> : vector<2xf32>
    %1573 = vector.multi_reduction <add>, %1572, %cst_543 [1] : vector<2x8xf32> to vector<2xf32>
    %1574 = vector.shape_cast %1573 : vector<2xf32> to vector<2x1xf32>
    %1575 = vector.broadcast %1574 : vector<2x1xf32> to vector<2x8xf32>
    %1576 = arith.divf %1572, %1575 : vector<2x8xf32>
    %1577 = vector.shape_cast %1576 : vector<2x8xf32> to vector<2x8x1xf32>
    %1578 = vector.broadcast %1577 : vector<2x8x1xf32> to vector<2x8x32xf32>
    %1579 = arith.mulf %1578, %20 : vector<2x8x32xf32>
    %cst_544 = arith.constant dense<0.000000e+00> : vector<2x32xf32>
    %1580 = vector.multi_reduction <add>, %1579, %cst_544 [1] : vector<2x8x32xf32> to vector<2x32xf32>
    %c0_545 = arith.constant 0 : index
    %c0_546 = arith.constant 0 : index
    %1581 = vector.load %arg19[%c0_545, %c0_546] : memref<32x32xf32, #tpu.memory_space<vmem>>, vector<32x32xf32>
    %cst_547 = arith.constant dense<0.000000e+00> : vector<2x32xf32>
    %1582 = tpu.matmul %1580, %1581, %cst_547 {dimension_numbers = #tpu.dot_dimension_numbers<[1], [0], [0], [1], [0, 0, 1, 1], [], []>} : vector<2x32xf32>, vector<32x32xf32>, vector<2x32xf32> -> vector<2x32xf32>
    %1583 = vector.shape_cast %1582 : vector<2x32xf32> to vector<2x1x32xf32>
    %1584 = vector.broadcast %1583 : vector<2x1x32xf32> to vector<2x8x32xf32>
    %1585 = arith.addf %26, %1584 : vector<2x8x32xf32>
    %1586 = math.tanh %1585 : vector<2x8x32xf32>
    %1587 = vector.shape_cast %1586 : vector<2x8x32xf32> to vector<16x32xf32>
    %c0_548 = arith.constant 0 : index
    %c0_549 = arith.constant 0 : index
    %1588 = vector.load %arg20[%c0_548, %c0_549] : memref<32x1xf32, #tpu.memory_space<vmem>>, vector<32x1xf32>
    %cst_550 = arith.constant dense<0.000000e+00> : vector<16x1xf32>
    %1589 = tpu.matmul %1587, %1588, %cst_550 {dimension_numbers = #tpu.dot_dimension_numbers<[1], [0], [0], [1], [0, 0, 1, 1], [], []>} : vector<16x32xf32>, vector<32x1xf32>, vector<16x1xf32> -> vector<16x1xf32>
    %1590 = vector.shape_cast %1589 : vector<16x1xf32> to vector<2x8xf32>
    %cst_551 = arith.constant dense<0.000000e+00> : vector<2xf32>
    %1591 = vector.multi_reduction <add>, %1478, %cst_551 [1] : vector<2x8xf32> to vector<2xf32>
    %1592 = vector.shape_cast %1591 : vector<2xf32> to vector<2x1xf32>
    %cst_552 = arith.constant 0.000000e+00 : f32
    %1593 = vector.broadcast %cst_552 : f32 to vector<2x1xf32>
    %1594 = arith.cmpf ogt, %1592, %1593 : vector<2x1xf32>
    %1595 = vector.shape_cast %1594 : vector<2x1xi1> to vector<2x1xi1>
    %1596 = vector.broadcast %1595 : vector<2x1xi1> to vector<2x8xi1>
    %1597 = arith.select %1596, %1478, %97 : vector<2x8xi1>, vector<2x8xf32>
    %cst_553 = arith.constant 0.000000e+00 : f32
    %1598 = vector.broadcast %cst_553 : f32 to vector<2x8xf32>
    %1599 = arith.cmpf ogt, %1597, %1598 : vector<2x8xf32>
    %cst_554 = arith.constant -1.000000e+09 : f32
    %1600 = vector.broadcast %cst_554 : f32 to vector<2x8xf32>
    %1601 = arith.select %1599, %1590, %1600 : vector<2x8xi1>, vector<2x8xf32>
    %cst_555 = arith.constant dense<0xFF800000> : vector<2xf32>
    %1602 = vector.multi_reduction <maximumf>, %1601, %cst_555 [1] : vector<2x8xf32> to vector<2xf32>
    %cst_556 = arith.constant 0xFF800000 : f32
    %1603 = vector.broadcast %cst_556 : f32 to vector<2xf32>
    %1604 = arith.maximumf %1603, %1602 : vector<2xf32>
    %1605 = vector.shape_cast %1604 : vector<2xf32> to vector<2x1xf32>
    %1606 = vector.broadcast %1605 : vector<2x1xf32> to vector<2x8xf32>
    %1607 = arith.subf %1601, %1606 : vector<2x8xf32>
    %1608 = math.exp %1607 : vector<2x8xf32>
    %cst_557 = arith.constant dense<0.000000e+00> : vector<2xf32>
    %1609 = vector.multi_reduction <add>, %1608, %cst_557 [1] : vector<2x8xf32> to vector<2xf32>
    %1610 = vector.shape_cast %1609 : vector<2xf32> to vector<2x1xf32>
    %1611 = vector.broadcast %1610 : vector<2x1xf32> to vector<2x8xf32>
    %1612 = arith.divf %1608, %1611 : vector<2x8xf32>
    %cst_558 = arith.constant dense<0xFF800000> : vector<2xf32>
    %1613 = vector.multi_reduction <maximumf>, %1612, %cst_558 [1] : vector<2x8xf32> to vector<2xf32>
    %1614 = vector.shape_cast %1613 : vector<2xf32> to vector<2x1xf32>
    %1615 = vector.broadcast %1614 : vector<2x1xf32> to vector<2x8xf32>
    %1616 = arith.cmpf oge, %1612, %1615 : vector<2x8xf32>
    %1617 = arith.sitofp %93 : vector<2x8xi32> to vector<2x8xf32>
    %cst_559 = arith.constant 8.000000e+00 : f32
    %1618 = vector.broadcast %cst_559 : f32 to vector<2x8xf32>
    %1619 = arith.select %1616, %1617, %1618 : vector<2x8xi1>, vector<2x8xf32>
    %cst_560 = arith.constant dense<0x7F800000> : vector<2xf32>
    %1620 = vector.multi_reduction <minimumf>, %1619, %cst_560 [1] : vector<2x8xf32> to vector<2xf32>
    %1621 = vector.shape_cast %1620 : vector<2xf32> to vector<2x1xf32>
    %1622 = arith.fptosi %1621 : vector<2x1xf32> to vector<2x1xi32>
    %1623 = math.log %1614 : vector<2x1xf32>
    %1624 = vector.broadcast %1622 : vector<2x1xi32> to vector<2x8xi32>
    %1625 = arith.cmpi eq, %93, %1624 : vector<2x8xi32>
    %1626 = arith.extui %1625 : vector<2x8xi1> to vector<2x8xi32>
    %1627 = arith.sitofp %1626 : vector<2x8xi32> to vector<2x8xf32>
    %1628 = arith.mulf %1627, %1428 : vector<2x8xf32>
    %cst_561 = arith.constant dense<0.000000e+00> : vector<2xf32>
    %1629 = vector.multi_reduction <add>, %1628, %cst_561 [1] : vector<2x8xf32> to vector<2xf32>
    %1630 = vector.shape_cast %1629 : vector<2xf32> to vector<2x1xf32>
    %1631 = arith.mulf %1627, %1433 : vector<2x8xf32>
    %cst_562 = arith.constant dense<0.000000e+00> : vector<2xf32>
    %1632 = vector.multi_reduction <add>, %1631, %cst_562 [1] : vector<2x8xf32> to vector<2xf32>
    %1633 = vector.shape_cast %1632 : vector<2xf32> to vector<2x1xf32>
    %1634 = arith.subf %1630, %1633 : vector<2x1xf32>
    %cst_563 = arith.constant 0.000000e+00 : f32
    %1635 = vector.broadcast %cst_563 : f32 to vector<2x1xf32>
    %1636 = arith.maximumf %1634, %1635 : vector<2x1xf32>
    %1637 = arith.subf %1633, %1630 : vector<2x1xf32>
    %cst_564 = arith.constant 0.000000e+00 : f32
    %1638 = vector.broadcast %cst_564 : f32 to vector<2x1xf32>
    %1639 = arith.maximumf %1637, %1638 : vector<2x1xf32>
    %c0_i32_565 = arith.constant 0 : i32
    %1640 = vector.broadcast %c0_i32_565 : i32 to vector<2x1xi32>
    %1641 = arith.cmpi ne, %1622, %1640 : vector<2x1xi32>
    %cst_566 = arith.constant 1.000000e+00 : f32
    %1642 = vector.broadcast %cst_566 : f32 to vector<2x8xf32>
    %1643 = arith.subf %1642, %1627 : vector<2x8xf32>
    %1644 = arith.mulf %1433, %1643 : vector<2x8xf32>
    %1645 = vector.broadcast %1639 : vector<2x1xf32> to vector<2x8xf32>
    %1646 = arith.mulf %1627, %1645 : vector<2x8xf32>
    %1647 = arith.addf %1644, %1646 : vector<2x8xf32>
    %cst_567 = arith.constant 1.000000e+00 : f32
    %1648 = vector.broadcast %cst_567 : f32 to vector<2x1xf32>
    %1649 = arith.subf %1636, %1648 : vector<2x1xf32>
    %1650 = vector.shape_cast %1649 : vector<2x1xf32> to vector<2x1xf32>
    %1651 = vector.broadcast %1650 : vector<2x1xf32> to vector<2x8xf32>
    %1652 = arith.select %99, %1651, %1647 : vector<2x8xi1>, vector<2x8xf32>
    %1653 = vector.shape_cast %1636 : vector<2x1xf32> to vector<2x1xf32>
    %1654 = vector.broadcast %1653 : vector<2x1xf32> to vector<2x8xf32>
    %cst_568 = arith.constant 1.000000e+00 : f32
    %1655 = vector.shape_cast %1641 : vector<2x1xi1> to vector<2x1xi1>
    %1656 = vector.broadcast %1655 : vector<2x1xi1> to vector<2x8xi1>
    %1657 = vector.broadcast %cst_568 : f32 to vector<2x8xf32>
    %1658 = arith.select %1656, %1654, %1657 : vector<2x8xi1>, vector<2x8xf32>
    %cst_569 = arith.constant 0.000000e+00 : f32
    %1659 = vector.broadcast %cst_569 : f32 to vector<2x8xf32>
    %1660 = arith.select %99, %1659, %1433 : vector<2x8xi1>, vector<2x8xf32>
    %1661 = vector.shape_cast %1641 : vector<2x1xi1> to vector<2x1xi1>
    %1662 = vector.broadcast %1661 : vector<2x1xi1> to vector<2x8xi1>
    %1663 = arith.select %1662, %1652, %1660 : vector<2x8xi1>, vector<2x8xf32>
    %1664 = math.absf %1663 : vector<2x8xf32>
    %cst_570 = arith.constant dense<0xFF800000> : vector<2xf32>
    %1665 = vector.multi_reduction <maximumf>, %1664, %cst_570 [1] : vector<2x8xf32> to vector<2xf32>
    %1666 = vector.shape_cast %1665 : vector<2xf32> to vector<2x1xf32>
    %cst_571 = arith.constant 0.000000e+00 : f32
    %1667 = vector.broadcast %cst_571 : f32 to vector<2x1xf32>
    %1668 = arith.cmpf oeq, %1666, %1667 : vector<2x1xf32>
    %1669 = arith.extui %1668 : vector<2x1xi1> to vector<2x1xi32>
    %1670 = arith.sitofp %1669 : vector<2x1xi32> to vector<2x1xf32>
    %cst_572 = arith.constant 1.000000e+00 : f32
    %1671 = vector.broadcast %cst_572 : f32 to vector<2x1xf32>
    %1672 = arith.subf %1671, %1670 : vector<2x1xf32>
    %1673 = arith.mulf %1623, %1672 : vector<2x1xf32>
    %1674 = arith.addf %1444, %1673 : vector<2x1xf32>
    %cst_573 = arith.constant 0.000000e+00 : f32
    %1675 = vector.broadcast %cst_573 : f32 to vector<2x8xf32>
    %1676 = arith.cmpf one, %1663, %1675 : vector<2x8xf32>
    %1677 = arith.cmpf olt, %1663, %1658 : vector<2x8xf32>
    %1678 = arith.andi %1676, %1677 : vector<2x8xi1>
    %1679 = arith.extui %1678 : vector<2x8xi1> to vector<2x8xi32>
    %1680 = arith.sitofp %1679 : vector<2x8xi32> to vector<2x8xf32>
    %cst_574 = arith.constant 1.000000e+00 : f32
    %cst_575 = arith.constant 0.000000e+00 : f32
    %1681 = vector.broadcast %cst_574 : f32 to vector<2x1xf32>
    %1682 = vector.broadcast %cst_575 : f32 to vector<2x1xf32>
    %1683 = arith.select %1641, %1681, %1682 : vector<2x1xi1>, vector<2x1xf32>
    %1684 = vector.shape_cast %1683 : vector<2x1xf32> to vector<2x1xf32>
    %1685 = vector.broadcast %1684 : vector<2x1xf32> to vector<2x8xf32>
    %1686 = arith.select %99, %1685, %1680 : vector<2x8xi1>, vector<2x8xf32>
    %1687 = vector.extract_strided_slice %1658 {offsets = [0, 0], sizes = [2, 1], strides = [1, 1]} : vector<2x8xf32> to vector<2x1xf32>
    %cst_576 = arith.constant 0.000000e+00 : f32
    %1688 = vector.broadcast %cst_576 : f32 to vector<2x1xf32>
    %1689 = arith.cmpf oeq, %1687, %1688 : vector<2x1xf32>
    %cst_577 = arith.constant 1.000000e+00 : f32
    %1690 = vector.broadcast %cst_577 : f32 to vector<2x8xf32>
    %1691 = arith.subf %1690, %97 : vector<2x8xf32>
    %1692 = arith.mulf %1663, %1691 : vector<2x8xf32>
    %cst_578 = arith.constant dense<0.000000e+00> : vector<2xf32>
    %1693 = vector.multi_reduction <add>, %1692, %cst_578 [1] : vector<2x8xf32> to vector<2xf32>
    %1694 = vector.shape_cast %1693 : vector<2xf32> to vector<2x1xf32>
    %cst_579 = arith.constant 0.000000e+00 : f32
    %1695 = vector.broadcast %cst_579 : f32 to vector<2x1xf32>
    %1696 = arith.cmpf oeq, %1694, %1695 : vector<2x1xf32>
    %1697 = arith.ori %1689, %1696 : vector<2x1xi1>
    %1698 = vector.shape_cast %1697 : vector<2x1xi1> to vector<2x1xi1>
    %1699 = vector.broadcast %1698 : vector<2x1xi1> to vector<2x8xi1>
    %1700 = arith.select %1699, %97, %1686 : vector<2x8xi1>, vector<2x8xf32>
    %cst_580 = arith.constant dense<0xFF800000> : vector<1xf32>
    %1701 = vector.multi_reduction <maximumf>, %1666, %cst_580 [0] : vector<2x1xf32> to vector<1xf32>
    %1702 = vector.shape_cast %1701 : vector<1xf32> to vector<1x1xf32>
    %cst_581 = arith.constant 0.000000e+00 : f32
    %1703 = vector.broadcast %cst_581 : f32 to vector<1x1xf32>
    %1704 = arith.cmpf oeq, %1702, %1703 : vector<1x1xf32>
    %cst_582 = arith.constant 0.000000e+00 : f32
    %1705 = vector.shape_cast %1704 : vector<1x1xi1> to vector<1x1xi1>
    %1706 = vector.broadcast %1705 : vector<1x1xi1> to vector<2x8xi1>
    %1707 = vector.broadcast %cst_582 : f32 to vector<2x8xf32>
    %1708 = arith.select %1706, %1707, %1700 : vector<2x8xi1>, vector<2x8xf32>
    %1709 = vector.broadcast %c6_i32 : i32 to vector<2x7xi32>
    %1710 = arith.cmpi eq, %100, %1709 : vector<2x7xi32>
    %1711 = vector.shape_cast %1622 : vector<2x1xi32> to vector<2x1xi32>
    %1712 = vector.broadcast %1711 : vector<2x1xi32> to vector<2x7xi32>
    %1713 = arith.select %1710, %1712, %1483 : vector<2x7xi1>, vector<2x7xi32>
    %1714 = arith.mulf %1627, %0 : vector<2x8xf32>
    %cst_583 = arith.constant dense<0.000000e+00> : vector<2xf32>
    %1715 = vector.multi_reduction <add>, %1714, %cst_583 [1] : vector<2x8xf32> to vector<2xf32>
    %1716 = vector.shape_cast %1715 : vector<2xf32> to vector<2x1xf32>
    %1717 = arith.mulf %1627, %1 : vector<2x8xf32>
    %cst_584 = arith.constant dense<0.000000e+00> : vector<2xf32>
    %1718 = vector.multi_reduction <add>, %1717, %cst_584 [1] : vector<2x8xf32> to vector<2xf32>
    %1719 = vector.shape_cast %1718 : vector<2xf32> to vector<2x1xf32>
    %c7_i32 = arith.constant 7 : i32
    %c0_585 = arith.constant 0 : index
    %c0_586 = arith.constant 0 : index
    %1720 = vector.load %arg32[%c0_585, %c0_586] : memref<2x7xi32, #tpu.memory_space<vmem>>, vector<2x7xi32>
    tpu.vector_store %arg32[%c0_585, %c0_586], %1713 {strides = array<i32>} : memref<2x7xi32, #tpu.memory_space<vmem>>, vector<2x7xi32>,
    %c0_587 = arith.constant 0 : index
    %c0_588 = arith.constant 0 : index
    %1721 = vector.load %arg33[%c0_587, %c0_588] : memref<2x1xf32, #tpu.memory_space<vmem>>, vector<2x1xf32>
    tpu.vector_store %arg33[%c0_587, %c0_588], %1674 {strides = array<i32>} : memref<2x1xf32, #tpu.memory_space<vmem>>, vector<2x1xf32>,
    return
  }
}

</mosaic_0001>

<bundles_post_ra>
// kernel: rl_agent_forward.1
= control target key start
LH: loop header
LB: loop body
LE: loop exit
PB: predicated region body
PF: predicated region fallthrough
CT: control target
= control target key end

     0   :  { %s4411_s6 = smov 1   ;;  %s4412_s10 = smov 2   ;;  %s6068_s0 = inlined_call_operand.smem [shape: u32[35], index: -1, kind: input, shape index: {}] }
   0x1   :  { %s4459_s5 = sld [smem:[%s6068_s0]]   ;;  %s4413_s14 = smov 3  }
   0x2   :  { %s4464_s9 = sld [smem:[%s6068_s0 + %s4411_s6]]   ;;  %s4414_s18 = smov 4  }
   0x3   :  { %s4469_s13 = sld [smem:[%s6068_s0 + %s4412_s10]]   ;;  %s4415_s22 = smov 5  }
   0x4   :  { %s4474_s17 = sld [smem:[%s6068_s0 + %s4413_s14]]   ;;  %s4416_s26 = smov 6  }
   0x5   :  { %s4479_s21 = sld [smem:[%s6068_s0 + %s4414_s18]]   ;;  %s4417_s30 = smov 7  }
   0x6   :  { %s4484_s25 = sld [smem:[%s6068_s0 + %s4415_s22]]   ;;  %s4418_s4 = smov 8  }
   0x7   :  { %s4489_s29 = sld [smem:[%s6068_s0 + %s4416_s26]]   ;;  %s4419_s10 = smov 9  }
   0x8   :  { %s4494_s3 = sld [smem:[%s6068_s0 + %s4417_s30]]   ;;  %s4420_s15 = smov 10  }
   0x9   :  { %s4499_s8 = sld [smem:[%s6068_s0 + %s4418_s4]]   ;;  %s4421_s20 = smov 11  }
   0xa   :  { %s4504_s14 = sld [smem:[%s6068_s0 + %s4419_s10]]   ;;  %s4422_s26 = smov 12  }
   0xb   :  { %s4509_s19 = sld [smem:[%s6068_s0 + %s4420_s15]]   ;;  %s4423_s1 = smov 13  }
   0xc   :  { %s4514_s24 = sld [smem:[%s6068_s0 + %s4421_s20]]   ;;  %s4424_s7 = smov 14  }
   0xd   :  { %s4519_s30 = sld [smem:[%s6068_s0 + %s4422_s26]]   ;;  %s4425_s15 = smov 15  }
   0xe   :  { %s4524_s6 = sld [smem:[%s6068_s0 + %s4423_s1]]   ;;  %s4426_s22 = smov 16  }
   0xf   :  { %6089 = sst [smem:[#allocation6_spill]] %s4499_s8  ;;  %s4427_s28 = smov 17  }
  0x10   :  { %6090 = sst [smem:[#allocation7_spill]] %s4504_s14  ;;  %s4442_s23 = smov 32  }
  0x11   :  { %6091 = sst [smem:[#allocation8_spill]] %s4509_s19  ;;  %s4443_s1 = smov 33  }
  0x12   :  { %s4529_s12 = sld [smem:[%s6068_s0 + %s4424_s7]]   ;;  %s4428_s7 = smov 18  }
  0x13   :  { %6092 = sst [smem:[#allocation9_spill]] %s4519_s30  ;;  %s4444_s10 = smov 34  }
  0x14   :  { %6093 = sst [smem:[#allocation10_spill]] %s4524_s6 }
  0x15   :  { %s4534_s20 = sld [smem:[%s6068_s0 + %s4425_s15]]   ;;  %s4429_s15 = smov 19  }
  0x16   :  { %s4539_s27 = sld [smem:[%s6068_s0 + %s4426_s22]]   ;;  %s4430_s22 = smov 20  }
  0x17   :  { %s4544_s4 = sld [smem:[%s6068_s0 + %s4427_s28]]   ;;  %s4431_s28 = smov 21  }
  0x18   :  { %s4549_s30 = sld [smem:[%s6068_s0 + %s4428_s7]]   ;;  %s4432_s7 = smov 22  }
  0x1b   :  { %6094 = sst [smem:[#allocation11_spill]] %s4534_s20 }
  0x1c   :  { %6095 = sst [smem:[#allocation12_spill]] %s4539_s27 }
  0x1d   :  { %6096 = sst [smem:[#allocation13_spill]] %s4544_s4 }
  0x1e   :  { %6097 = sst [smem:[#allocation14_spill]] %s4549_s30 }
  0x1f   :  { %s4554_s20 = sld [smem:[%s6068_s0 + %s4429_s15]]   ;;  %s4433_s15 = smov 23  }
  0x20   :  { %s4559_s27 = sld [smem:[%s6068_s0 + %s4430_s22]]   ;;  %s4434_s22 = smov 24  }
  0x21   :  { %s4564_s4 = sld [smem:[%s6068_s0 + %s4431_s28]]   ;;  %s4435_s28 = smov 25  }
  0x22   :  { %s4569_s30 = sld [smem:[%s6068_s0 + %s4432_s7]]   ;;  %s4436_s7 = smov 26  }
  0x23   :  { %s4584_s14 = sld [smem:[%s6068_s0 + %s4435_s28]]   ;;  %s4439_s28 = smov 29  }
  0x24   :  { %s4589_s8 = sld [smem:[%s6068_s0 + %s4436_s7]]   ;;  %s4440_s7 = smov 30  }
  0x25   :  { %6098 = sst [smem:[#allocation15_spill]] %s4554_s20 }
  0x26   :  { %6099 = sst [smem:[#allocation16_spill]] %s4559_s27 }
  0x27   :  { %s4574_s20 = sld [smem:[%s6068_s0 + %s4433_s15]]   ;;  %s4437_s15 = smov 27  }
  0x28   :  { %6100 = sst [smem:[#allocation17_spill]] %s4569_s30 }
  0x29   :  { %s4579_s27 = sld [smem:[%s6068_s0 + %s4434_s22]]   ;;  %s4438_s22 = smov 28  }
  0x2a   :  { %s4594_s6 = sld [smem:[%s6068_s0 + %s4437_s15]]   ;;  %s4441_s15 = smov 31  }
  0x2b   :  { %s4599_s19 = sld [smem:[%s6068_s0 + %s4438_s22]]  }
  0x2c   :  { %s4609_s30 = sld [smem:[%s6068_s0 + %s4440_s7]]  }
  0x2f   :  { %6101 = sst [smem:[#allocation18_spill]] %s4579_s27 }
  0x30   :  { %6102 = sst [smem:[#allocation19_spill]] %s4594_s6 }
  0x31   :  { %6103 = sst [smem:[#allocation20_spill]] %s4599_s19 }
  0x32   :  { %s4604_s27 = sld [smem:[%s6068_s0 + %s4439_s28]]  }
  0x33   :  { %6105 = sst [smem:[#allocation22_spill]] %s4609_s30 }
  0x34   :  { %s3884_s6 = sld [smem:[%s6068_s0 + %s4441_s15]]  }
  0x35   :  { %s4617_s19 = sld [smem:[%s6068_s0 + %s4442_s23]]  }
  0x36   :  { %s4627_s30 = sld [smem:[%s6068_s0 + %s4444_s10]]  }
  0x38   :  { %6104 = sst [smem:[#allocation21_spill]] %s4604_s27 }
  0x39   :  { %s4622_s27 = sld [smem:[%s6068_s0 + %s4443_s1]]  }
  0x3a   :  { %v75_v0 = vstv %s3884_s6 }
  0x3b   :  { %76 = vst [vmem:[#allocation2] sm:$0x1] %v75_v0 }
  0x3c   :  { %v147_v1 = vlaneseq  ;;  %v142_v2 = vld [vmem:[%s4459_s5] sm:$0x3] }
  0x3d   :  { %v153_v4 = vperm.slane %v142_v2, 1  ;;  %v144_v5 = vld [vmem:[%s4469_s13] sm:$0x3]  ;;  %v146_v6 = vperm.slane %v142_v2, 0 }
  0x3e   :  { %v4631_v3 = vshrl.u32 %v147_v1, 7  ;;  %v240_v7 = vperm.slane %v144_v5, 0 }
  0x40   :  { %4068 = vset.pattern.permute.xlu1 %v4631_v3  ;;  %4067 = vset.pattern.permute.xlu0 %v4631_v3 }
  0x41   :  { %4069 = vset.pattern.permute.xlu2 %v4631_v3 }
  0x42   :  { %77 = vsyncpa [#allocation4], 0  ;;  %v4638_v8 = vld [vmem:[%s4464_s9] sm:$0x3]  ;;  %v247_v13 = vperm.slane %v144_v5, 1  ;;  %v193_v15 = vld [vmem:[%s4529_s12 + $0x18] sm:$0xff] }
  0x43   :  { %v171_v9 = vperm.slane %v4638_v8, 1  ;;  %v164_v10 = vperm.slane %v4638_v8, 0  ;;  %v4643_v11 = vld [vmem:[%s4474_s17] sm:$0x3]  ;;  %v287_v16 = vld [vmem:[%s4584_s14 + $0x18] sm:$0xff]  ;;  %213 = vmatpush.msra.mxu0 %v193_v15  ;;  %3988 = vmatpush.msra.mxu1 %v193_v15  ;;  %v192_v17 = vld [vmem:[%s4529_s12 + $0x10] sm:$0xff] }
  0x44   :  { %v258_v12 = vperm.slane %v4643_v11, 0  ;;  %v265_v14 = vperm.slane %v4643_v11, 1  ;;  %339 = vmatpush.msra.mxu2 %v287_v16  ;;  %v286_v18 = vld [vmem:[%s4584_s14 + $0x10] sm:$0xff]  ;;  %v191_v19 = vld [vmem:[%s4529_s12 + $0x8] sm:$0xff]  ;;  %v190_v21 = vld [vmem:[%s4529_s12] sm:$0xff]  ;;  %v6081_v33 = vmov 0  }
  0x45   :  { %214 = vmatpush.msra.mxu0 %v192_v17  ;;  %3989 = vmatpush.msra.mxu1 %v192_v17  ;;  %v285_v20 = vld [vmem:[%s4584_s14 + $0x8] sm:$0xff]  ;;  %v284_v22 = vld [vmem:[%s4584_s14] sm:$0xff]  ;;  %v291_v23 = vld [vmem:[%s4589_s8 + $0x18] sm:$0xff]  ;;  %s6106_s0 = sld [smem:[#allocation17_spill]]  ;;  %vm194_vm0 = vcmask 261120   ;;  %vm372_vm1 = vcmask 1043456  }
  0x46   :  { %340 = vmatpush.msra.mxu2 %v286_v18  ;;  %v290_v24 = vld [vmem:[%s4589_s8 + $0x10] sm:$0xff]  ;;  %v289_v25 = vld [vmem:[%s4589_s8 + $0x8] sm:$0xff]  ;;  %v288_v26 = vld [vmem:[%s4589_s8] sm:$0xff]  ;;  %s6111_s8 = sld [smem:[#allocation19_spill]]  ;;  %s4447_s6 = smov 64   ;;  %vm365_vm2 = vcmask 162816  }
  0x47   :  { %215 = vmatpush.msra.mxu0 %v191_v19  ;;  %3990 = vmatpush.msra.mxu1 %v191_v19  ;;  %v448_v28 = vld [vmem:[%s4484_s25] sm:$0x3]  ;;  %v4664_v30 = vld [vmem:[%s4514_s24 + $0x18] sm:$0xff]  ;;  %v4669_v34 = vld [vmem:[%s4514_s24 + $0x10] sm:$0xff]  ;;  %s6108_s25 = sld [smem:[#allocation20_spill]]  ;;  %vm424_vm3 = vcmask 1041409  }
  0x48   :  { %158 = vperm.xlu0 %4067, %v153_v4   ;;  %151 = vperm.xlu1 %4068, %v146_v6   ;;  %v447_v29 = vld [vmem:[%s4479_s21] sm:$0x3]  ;;  %v4673_v35 = vld [vmem:[%s4514_s24 + $0x8] sm:$0xff]  ;;  %s6107_s21 = sld [smem:[#allocation18_spill]]  ;;  %s4448_s18 = smov 96   ;;  %vm674_vm8 = vcmask 58368  }
  0x49   :  { %245 = vperm.xlu2 %4069, %v240_v7   ;;  %341 = vmatpush.msra.mxu2 %v285_v20  ;;  %v4091_v36 = vld [vmem:[%s4489_s29] ss:$0 sm:$0xff]  ;;  %v4096_v37 = vld [vmem:[%s4489_s29 + $0x1] ss:$0 sm:$0xff]  ;;  %s6109_s29 = sld [smem:[#allocation8_spill]]  ;;  %s4449_s2 = smov 32  }
  0x4a   :  { %216 = vmatpush.msra.mxu0 %v190_v21  ;;  %3991 = vmatpush.msra.mxu1 %v190_v21  ;;  %v4098_v38 = vld [vmem:[%s4564_s4 + $0x1] ss:$0 sm:$0xff]  ;;  %v4092_v40 = vld [vmem:[%s4564_s4] ss:$0 sm:$0xff]  ;;  %s6112_s14 = sld [smem:[#allocation6_spill]]  ;;  %s4401_s10 = scalar_lea.hbm %s4617_s19, 2 }
  0x4b   :  { %342 = vmatpush.msra.mxu2 %v284_v22  ;;  %v4681_v39 = vld [vmem:[%s4514_s24] sm:$0xff]  ;;  %s6113_s12 = sld [smem:[#allocation7_spill]] }
  0x4c   :  { %310 = vmatpush.msrb.mxu1 %v291_v23  ;;  %525 = vmatpush.msrb.mxu0 %v4664_v30  ;;  %v4089_v41 = vld [vmem:[%s4574_s20] ss:$0 sm:$0xff]  ;;  %v4093_v47 = vld [vmem:[%s4574_s20 + $0x1] ss:$0 sm:$0xff]  ;;  %s6114_s20 = sld [smem:[#allocation21_spill]] }
  0x4d   :  { %v4097_v48 = vld [vmem:[%s4494_s3] ss:$0 sm:$0xff]  ;;  %v360_v16 = vld [vmem:[%s6108_s25 + $0x10] sm:$0xf]  ;;  %s6110_s3 = sld [smem:[#allocation10_spill]]  ;;  %v359_v17 = vld [vmem:[%s6108_s25 + $0x8] sm:$0xff] }
  0x4e   :  { %311 = vmatpush.msrb.mxu1 %v290_v24  ;;  %526 = vmatpush.msrb.mxu0 %v4669_v34  ;;  %v4099_v52 = vld [vmem:[%s6106_s0] ss:$0 sm:$0xff]  ;;  %s6115_s4 = sld [smem:[#allocation9_spill]] }
  0x4f   :  { %v4100_v2 = vld [vmem:[%s6107_s21] ss:$0 sm:$0xff]  ;;  %3894 = vmatpush.msk.msra.mxu3 %vm372_vm1, %v360_v16  ;;  %v4718_v19 = vld [vmem:[%s6109_s29 + $0x18] sm:$0xff]  ;;  %v4722_v20 = vld [vmem:[%s6109_s29 + $0x10] sm:$0xff]  ;;  %s6116_s15 = sld [smem:[#allocation22_spill]] }
  0x50   :  { %176 = vperm.xlu0 %4067, %v171_v9   ;;  %169 = vperm.xlu1 %4068, %v164_v10   ;;  %v358_v18 = vld [vmem:[%s6108_s25] sm:$0xff]  ;;  %v4726_v21 = vld [vmem:[%s6109_s29 + $0x8] sm:$0xff]  ;;  %s6117_s16 = sld [smem:[#allocation13_spill]] }
  0x51   :  { %263 = vperm.xlu2 %4069, %v258_v12   ;;  %312 = vmatpush.msrb.mxu1 %v289_v25  ;;  %v4730_v22 = vld [vmem:[%s6109_s29] sm:$0xff]  ;;  %s6118_s23 = sld [smem:[#allocation14_spill]] }
  0x52   :  { %527 = vmatpush.msrb.mxu0 %v4673_v35  ;;  %390 = vmatpush.msra.mxu3 %v359_v17  ;;  %s6119_s22 = sld [smem:[#allocation11_spill]] }
  0x53   :  { %313 = vmatpush.msrb.mxu1 %v288_v26  ;;  %v4738_v25 = vld [vmem:[%s6110_s3] ss:$0 sm:$0xff]  ;;  %s6120_s26 = sld [smem:[#allocation12_spill]] }
  0x54   :  { %528 = vmatpush.msrb.mxu0 %v4681_v39  ;;  %391 = vmatpush.msra.mxu3 %v358_v18  ;;  %s6121_s1 = sld [smem:[#allocation15_spill]] }
  0x55   :  { %s6122_s28 = sld [smem:[#allocation16_spill]] }
  0x56   :  { %494 = vmatpush.msrb.mxu3 %v4718_v19 }
  0x58   :  { %252 = vperm.xlu0 %4067, %v247_v13   ;;  %270 = vperm.xlu1 %4068, %v265_v14   ;;  %v6083_v13 = vmov 0.0  }
  0x59   :  { %4070 = vset.pattern.permute.xlu2 %v6081_v33  ;;  %495 = vmatpush.msrb.mxu3 %v4722_v20 }
  0x5a   :  { %452 = vperm.xlu2 %4070, %v447_v29  }
  0x5b   :  { %496 = vmatpush.msrb.mxu3 %v4726_v21 }
  0x5d   :  { %497 = vmatpush.msrb.mxu3 %v4730_v22 }
  0x60   :  { %4071 = vset.pattern.permute.xlu0 %v6081_v33  ;;  %4072 = vset.pattern.permute.xlu1 %v6081_v33 }
  0x61   :  { %460 = vperm.xlu0 %4071, %v448_v28   ;;  %v4101_v28 = vld [vmem:[%s6111_s8] ss:$0 sm:$0xff] }
  0xa3   :  { %v4659_v27 = vpop.permute.xlu2 %245 }
  0xa4   :  { %v256_v57 = vmul.f32 %v4089_v41, %v4659_v27 }
  0xab   :  { %v4690_v53 = vpop.permute.xlu2 %263 }
  0xac   :  { %v274_v58 = vmul.f32 %v4093_v47, %v4690_v53 }
  0xae   :  { %v276_v0 = vadd.f32 %v274_v58, %v256_v57 }
  0xb0   :  { %v282_v10 = vadd.f32 %v4100_v2, %v276_v0 }
  0xba   :  { %v159_v31 = vpop.permute.xlu0 %158  ;;  %v152_v32 = vpop.permute.xlu1 %151 }
  0xbb   :  { %v163_v42 = vmul.f32 %v4091_v36, %v159_v31  ;;  %v162_v43 = vmul.f32 %v4091_v36, %v152_v32  ;;  %v226_v46 = vmul.f32 %v4092_v40, %v152_v32  ;;  %v227_v63 = vmul.f32 %v4092_v40, %v159_v31  ;;  %v4745_v40 = vld [vmem:[%s6112_s14] ss:$0 sm:$0xff] }
  0xc2   :  { %v177_v44 = vpop.permute.xlu0 %176  ;;  %v170_v45 = vpop.permute.xlu1 %169 }
  0xc3   :  { %v181_v49 = vmul.f32 %v4096_v37, %v177_v44  ;;  %v180_v50 = vmul.f32 %v4096_v37, %v170_v45  ;;  %v230_v51 = vmul.f32 %v4098_v38, %v170_v45  ;;  %v231_v62 = vmul.f32 %v4098_v38, %v177_v44 }
  0xc5   :  { %v183_v54 = vadd.f32 %v181_v49, %v163_v42  ;;  %v182_v55 = vadd.f32 %v180_v50, %v162_v43  ;;  %v232_v56 = vadd.f32 %v230_v51, %v226_v46  ;;  %v233_v4 = vadd.f32 %v231_v62, %v227_v63  ;;  %v4748_v42 = vld [vmem:[%s6112_s14 + $0x1] ss:$0 sm:$0xff]  ;;  %v4754_v51 = vld [vmem:[%s6113_s12] ss:$0 sm:$0xff] }
  0xc7   :  { %v4694_v59 = vadd.f32 %v4097_v48, %v183_v54  ;;  %v4696_v60 = vadd.f32 %v4097_v48, %v182_v55  ;;  %v238_v61 = vadd.f32 %v4099_v52, %v232_v56  ;;  %v239_v12 = vadd.f32 %v4099_v52, %v233_v4  ;;  %v4106_v55 = vld [vmem:[%s6114_s20] ss:$0 sm:$0xff] }
  0xc9   :  { %3888 = vmatmul.msk.f32.vlgmr.msra.gmra.mxu0 %vm194_vm0, %v4696_v60  ;;  %3889 = vmatmul.msk.f32.vlgmr.msra.gmra.mxu1 %vm194_vm0, %v4694_v59 }
  0xca   :  { %3892 = vmatmul.msk.f32.vlgmr.msra.gmra.mxu2 %vm194_vm0, %v238_v61  ;;  %v4704_v5 = vpop.permute.xlu0 %252  ;;  %v4706_v6 = vpop.permute.xlu1 %270 }
  0xcb   :  { %v257_v7 = vmul.f32 %v4089_v41, %v4704_v5  ;;  %v275_v9 = vmul.f32 %v4093_v47, %v4706_v6  ;;  %v453_v41 = vpop.permute.xlu2 %452 }
  0xcc   :  { %v456_v48 = vmul.f32 %v4745_v40, %v453_v41  ;;  %v4108_v41 = vld [vmem:[%s6116_s15] ss:$0 sm:$0xff] }
  0xcd   :  { %v277_v14 = vadd.f32 %v275_v9, %v257_v7 }
  0xcf   :  { %v283_v15 = vadd.f32 %v4100_v2, %v277_v14 }
  0xd1   :  { %3890 = vmatmul.msk.f32.vlgmr.msrb.gmra.mxu1 %vm194_vm0, %v282_v10  ;;  %529 = vmatmul.f32.vlgmr.msrb.gmra.mxu0 %v6083_v13  ;;  %v4762_v10 = vld [vmem:[%s6115_s4] ss:$0 sm:$0xff] }
  0xd2   :  { %3893 = vmatmul.msk.f32.gmra.mxu2 %vm194_vm0, %v239_v12 }
  0xd3   :  { %v461_v43 = vpop.permute.xlu0 %460 }
  0xd4   :  { %v464_v49 = vmul.f32 %v4748_v42, %v461_v43 }
  0xd6   :  { %v465_v52 = vadd.f32 %v464_v49, %v456_v48 }
  0xd8   :  { %v470_v54 = vadd.f32 %v4754_v51, %v465_v52 }
  0xd9   :  { %3891 = vmatmul.msk.f32.gmra.mxu1 %vm194_vm0, %v283_v15 }
 0x146   :  { %v4733_v23 = vpop.f32.mrf.mxu0  ;;  %v4735_v24 = vpop.f32.mrf.mxu1 }
 0x14d   :  { %v344_v26 = vpop.f32.mrf.mxu2 }
 0x14e   :  { %v315_v29 = vpop.f32.mrf.mxu1  ;;  %v530_v31 = vpop.f32.mrf.mxu0 }
 0x14f   :  { %v345_v32 = vadd.f32 %v344_v26, %v315_v29  ;;  %v531_v36 = vadd.f32 %v4738_v25, %v530_v31 }
 0x151   :  { %v354_v37 = vadd.f32 %v4101_v28, %v345_v32  ;;  %554 = vrot.lane.b32.xlu1 %v531_v36, %s4447_s6 }
 0x153   :  { %v356_v38 = vmax.f32 %v354_v37, 0.0 }
 0x155   :  { %3895 = vmatmul.msk.f32.vlgmr.msra.gmra.mxu3 %vm365_vm2, %v356_v38  ;;  %v347_v44 = vpop.f32.mrf.mxu2 }
 0x156   :  { %v318_v45 = vpop.f32.mrf.mxu1 }
 0x157   :  { %v348_v46 = vadd.f32 %v347_v44, %v318_v45 }
 0x159   :  { %v355_v47 = vadd.f32 %v4101_v28, %v348_v46 }
 0x15b   :  { %v357_v50 = vmax.f32 %v355_v47, 0.0 }
 0x15d   :  { %3896 = vmatmul.msk.f32.gmra.mxu3 %vm365_vm2, %v357_v50 }
 0x165   :  { %3899 = vmatmul.msk.f32.vlgmr.msrb.gmra.mxu3 %vm194_vm0, %v470_v54 }
 0x1d8   :  { %v393_v56 = vpop.f32.mrf.mxu3 }
 0x1d9   :  { %v394_v57 = vadd.f32 %v4106_v55, %v393_v56 }
 0x1db   :  { %v399_v58 = vmax.f32 %v394_v57, 0.0 }
 0x1dd   :  { %v401_v61 = vsel %vm365_vm2, %v399_v58, 0.0  ;;  %v555_v58 = vpop.permute.xlu1 %554 }
 0x1de   :  { %v402_v62 = vrot.slane %v401_v61, 4 }
 0x1e0   :  { %v403_v63 = vadd.f32 %v402_v62, %v401_v61  ;;  %v396_v0 = vpop.f32.mrf.mxu3 }
 0x1e1   :  { %v397_v2 = vadd.f32 %v4106_v55, %v396_v0 }
 0x1e2   :  { %v404_v7 = vrot.slane %v403_v63, 2 }
 0x1e3   :  { %v400_v4 = vmax.f32 %v397_v2, 0.0 }
 0x1e4   :  { %v405_v14 = vadd.f32 %v404_v7, %v403_v63  ;;  %v4772_v7 = vld [vmem:[%s6117_s16 + $0x18] sm:$0xff] }
 0x1e5   :  { %v408_v9 = vsel %vm365_vm2, %v400_v4, 0.0  ;;  %611 = vmatpush.msra.mxu1 %v4772_v7  ;;  %vm444_vm2 = vcmp.gt.f32.partialorder %v4643_v11, 0.0 }
 0x1e6   :  { %v409_v12 = vrot.slane %v408_v9, 4  ;;  %v406_v28 = vrot.slane %v405_v14, 1 }
 0x1e8   :  { %v410_v15 = vadd.f32 %v409_v12, %v408_v9  ;;  %v499_v16 = vpop.f32.mrf.mxu3  ;;  %v407_v37 = vadd.f32 %v406_v28, %v405_v14  ;;  %v4775_v9 = vld [vmem:[%s6117_s16 + $0x10] sm:$0xff]  ;;  %v4779_v12 = vld [vmem:[%s6117_s16 + $0x8] sm:$0xff]  ;;  %v4783_v14 = vld [vmem:[%s6117_s16] sm:$0xff] }
 0x1e9   :  { %v500_v17 = vadd.f32 %v4762_v10, %v499_v16  ;;  %612 = vmatpush.msra.mxu1 %v4775_v9  ;;  %v4796_v28 = vld [vmem:[%s6118_s23 + $0x18] sm:$0xff] }
 0x1ea   :  { %v411_v18 = vrot.slane %v410_v15, 2  ;;  %v419_v44 = vmul.f32 %v4108_v41, %v407_v37  ;;  %651 = vmatpush.msrb.mxu2 %v4796_v28  ;;  %v4815_v37 = vld [vmem:[%s6118_s23] sm:$0xff] }
 0x1eb   :  { %v533_v26 = vadd.f32 %v531_v36, %v500_v17  ;;  %613 = vmatpush.msra.mxu1 %v4779_v12 }
 0x1ec   :  { %v412_v29 = vadd.f32 %v411_v18, %v410_v15 }
 0x1ed   :  { %v3900_v31 = vmul.f32 -1.442695, %v533_v26  ;;  %614 = vmatpush.msra.mxu1 %v4783_v14 }
 0x1ee   :  { %v413_v32 = vrot.slane %v412_v29, 1 }
 0x1ef   :  { %4109 = vpow2.f32 %v3900_v31  ;;  %997 = vmatpush.msrb.mxu1 %v4718_v19  ;;  %v4808_v31 = vld [vmem:[%s6118_s23 + $0x10] sm:$0xff] }
 0x1f0   :  { %v414_v38 = vadd.f32 %v413_v32, %v412_v29  ;;  %v4811_v32 = vld [vmem:[%s6118_s23 + $0x8] sm:$0xff]  ;;  %652 = vmatpush.msrb.mxu2 %v4808_v31 }
 0x1f1   :  { %998 = vmatpush.msrb.mxu1 %v4722_v20 }
 0x1f2   :  { %v420_v43 = vmul.f32 %v4108_v41, %v414_v38  ;;  %653 = vmatpush.msrb.mxu2 %v4811_v32  ;;  %v4823_v38 = vld [vmem:[%s6119_s22] ss:$0 sm:$0xff]  ;;  %v4826_v41 = vld [vmem:[%s6119_s22 + $0x1] ss:$0 sm:$0xff] }
 0x1f3   :  { %999 = vmatpush.msrb.mxu1 %v4726_v21 }
 0x1f4   :  { %v423_v45 = vrot.slane %v420_v43, 7  ;;  %654 = vmatpush.msrb.mxu2 %v4815_v37  ;;  %v574_v43 = vmul.f32 %v4823_v38, %v4659_v27 }
 0x1f5   :  { %v4110_v46 = vpop.eup %4109  ;;  %1000 = vmatpush.msrb.mxu1 %v4730_v22 }
 0x1f6   :  { %v537_v47 = vadd.f32 1.0, %v4110_v46  ;;  %v4767_v48 = vsel %vm424_vm3, %v423_v45, %v419_v44  ;;  %1143 = vmatpush.msra.mxu2 %v4796_v28  ;;  %v578_v44 = vmul.f32 %v4826_v41, %v4690_v53  ;;  %v4834_v45 = vld [vmem:[%s6120_s26] ss:$0 sm:$0xff] }
 0x1f8   :  { %4111 = vrcp.f32 %v537_v47  ;;  %v549_v52 = vand.u32 2147483648, %v537_v47  ;;  %v547_v55 = vand.u32 2147483647, %v537_v47  ;;  %vm543_vm5 = vweird.f32 %v537_v47  ;;  %1144 = vmatpush.msra.mxu2 %v4808_v31 }
 0x1f9   :  { %v580_v46 = vadd.f32 %v578_v44, %v574_v43 }
 0x1fa   :  { %v550_v57 = vor.u32 1.1754944e-38, %v549_v52  ;;  %vm548_vm7 = vcmp.eq.f32.partialorder %v547_v55, 8.507059e+37  ;;  %1145 = vmatpush.msra.mxu2 %v4811_v32 }
 0x1fc   :  { %1146 = vmatpush.msra.mxu2 %v4815_v37 }
 0x1fe   :  { %v4112_v49 = vpop.eup %4111 }
 0x1ff   :  { %v539_v36 = vmul.f32 %v4112_v49, %v537_v47  ;;  %vm544_vm4 = vweird.f32 %v4112_v49  ;;  %v575_v47 = vmul.f32 %v4823_v38, %v4704_v5 }
 0x200   :  { %vm545_vm6 = vmor %vm543_vm5, %vm544_vm4 }
 0x201   :  { %v540_v50 = vsub.f32 1.0, %v539_v36  ;;  %v586_v36 = vadd.f32 %v4834_v45, %v580_v46 }
 0x203   :  { %v541_v54 = vmul.f32 %v4112_v49, %v540_v50 }
 0x205   :  { %v542_v56 = vadd.f32 %v4112_v49, %v541_v54  ;;  %v588_v54 = vadd.f32 %v586_v36, %v4733_v23 }
 0x207   :  { %v546_v61 = vsel %vm545_vm6, %v4112_v49, %v542_v56  ;;  %v579_v49 = vmul.f32 %v4826_v41, %v4706_v6 }
 0x208   :  { %v551_v62 = vsel %vm548_vm7, %v550_v57, %v546_v61 }
 0x209   :  { %v557_v63 = vmul.f32 %v555_v58, %v551_v62  ;;  %v564_v15 = vsub.f32 1.0, %v551_v62  ;;  %v581_v52 = vadd.f32 %v579_v49, %v575_v47 }
 0x20b   :  { %559 = vrot.lane.b32.xlu2 %v557_v63, %s4447_s6  ;;  %v587_v53 = vadd.f32 %v4834_v45, %v581_v52 }
 0x20d   :  { %v589_v58 = vadd.f32 %v587_v53, %v4735_v24 }
 0x265   :  { %v560_v0 = vpop.permute.xlu2 %559 }
 0x266   :  { %v562_v2 = vadd.f32 %v560_v0, %v500_v17  ;;  %v570_v17 = vmul.f32 0.0, %v551_v62  ;;  %v4851_v0 = vand.u32 127, %v147_v1 }
 0x268   :  { %4113 = vtanh.f32 %v562_v2  ;;  %vm441_vm4 = vcmp.eq.s32.totalorder %v4851_v0, 0 }
 0x26e   :  { %v4114_v4 = vpop.eup %4113 }
 0x26f   :  { %566 = vrot.lane.b32.xlu1 %v4114_v4, %s4448_s18 }
 0x2e1   :  { %v567_v16 = vpop.permute.xlu1 %566 }
 0x2e2   :  { %v569_v18 = vmul.f32 %v567_v16, %v564_v15 }
 0x2e4   :  { %v4791_v26 = vadd.f32 %v570_v17, %v569_v18 }
 0x2e6   :  { %595 = vrot.lane.b32.xlu2 %v4791_v26, %s4448_s18 }
 0x340   :  { %v4799_v29 = vpop.permute.xlu2 %595 }
 0x341   :  { %3901 = vmatmul.msk.f32.vlgmr.msra.gmra.mxu1 %vm194_vm0, %v4799_v29 }
 0x342   :  { %1107 = vmatpush.msra.mxu1 %v4772_v7 }
 0x344   :  { %1108 = vmatpush.msra.mxu1 %v4775_v9 }
 0x346   :  { %1109 = vmatpush.msra.mxu1 %v4779_v12 }
 0x348   :  { %1110 = vmatpush.msra.mxu1 %v4783_v14 }
 0x3be   :  { %v616_v50 = vpop.f32.mrf.mxu1 }
 0x3bf   :  { %v620_v55 = vrot.slane %v616_v50, 1  ;;  %v621_v27 = vperm.slane %v616_v50, 0 }
 0x3c1   :  { %v625_v56 = vadd.f32 %v621_v27, %v588_v54  ;;  %v622_v57 = vperm.slane %v620_v55, 0 }
 0x3c3   :  { %4115 = vtanh.f32 %v625_v56  ;;  %v626_v61 = vadd.f32 %v622_v57, %v589_v58 }
 0x3c5   :  { %4117 = vtanh.f32 %v626_v61 }
 0x3c9   :  { %v4116_v5 = vpop.eup %4115 }
 0x3ca   :  { %3902 = vmatmul.msk.f32.vlgmr.msrb.gmra.mxu2 %vm194_vm0, %v4116_v5 }
 0x3cb   :  { %1624 = vmatpush.msrb.mxu2 %v4796_v28  ;;  %v4118_v6 = vpop.eup %4117 }
 0x3cd   :  { %1625 = vmatpush.msrb.mxu2 %v4808_v31 }
 0x3cf   :  { %1626 = vmatpush.msrb.mxu2 %v4811_v32 }
 0x3d1   :  { %1627 = vmatpush.msrb.mxu2 %v4815_v37 }
 0x3d2   :  { %3903 = vmatmul.msk.f32.gmra.mxu2 %vm194_vm0, %v4118_v6 }
 0x44d   :  { %v656_v62 = vpop.f32.mrf.mxu2 }
 0x44e   :  { %665 = vperm.xlu0 %4071, %v656_v62  }
 0x455   :  { %v659_v63 = vpop.f32.mrf.mxu2 }
 0x456   :  { %668 = vperm.xlu1 %4072, %v659_v63  }
 0x4c0   :  { %v666_v2 = vpop.permute.xlu0 %665 }
 0x4c1   :  { %v670_v15 = vperm.slane %v666_v2, %v4851_v0 }
 0x4c8   :  { %v669_v4 = vpop.permute.xlu1 %668 }
 0x4c9   :  { %v671_v16 = vperm.slane %v669_v4, %v4851_v0 }
 0x4cb   :  { %v672_v17 = vsel %vm424_vm3, %v671_v16, %v670_v15 }
 0x4cc   :  { %v675_v18 = vsel %vm674_vm8, %v672_v17, -inf }
 0x4cd   :  { %676 = vmax.xlane.f32.xlu2 %v675_v18 }
 0x540   :  { %v677_v43 = vpop.xlane.xlu2 %676 }
 0x541   :  { %v679_v44 = vperm.slane %v677_v43, 0  ;;  %v680_v46 = vperm.slane %v677_v43, 1 }
 0x543   :  { %v683_v47 = vsub.f32 %v656_v62, %v679_v44  ;;  %v684_v49 = vsub.f32 %v659_v63, %v680_v46 }
 0x545   :  { %v685_v36 = vmul.f32 1.442695, %v683_v47  ;;  %v687_v1 = vmul.f32 1.442695, %v684_v49 }
 0x547   :  { %4119 = vpow2.f32 %v685_v36 }
 0x548   :  { %4121 = vpow2.f32 %v687_v1 }
 0x54d   :  { %v4120_v50 = vpop.eup %4119 }
 0x54e   :  { %v4122_v52 = vpop.eup %4121  ;;  %692 = vperm.xlu0 %4071, %v4120_v50  }
 0x54f   :  { %695 = vperm.xlu1 %4072, %v4122_v52  }
 0x5c0   :  { %v693_v54 = vpop.permute.xlu0 %692 }
 0x5c1   :  { %v696_v55 = vpop.permute.xlu1 %695  ;;  %v697_v27 = vperm.slane %v693_v54, %v4851_v0 }
 0x5c2   :  { %v698_v56 = vperm.slane %v696_v55, %v4851_v0 }
 0x5c4   :  { %v699_v53 = vsel %vm424_vm3, %v698_v56, %v697_v27 }
 0x5c5   :  { %v701_v57 = vsel %vm674_vm8, %v699_v53, 0.0 }
 0x5c6   :  { %702 = vadd.xlane.f32.xlu0 %v701_v57 }
 0x639   :  { %v703_v58 = vpop.xlane.xlu0 %702 }
 0x63a   :  { %v705_v61 = vperm.slane %v703_v58, 0  ;;  %v706_v5 = vperm.slane %v703_v58, 1  ;;  %v4862_v58 = vld [vmem:[%s6121_s1 + $0x18] sm:$0xff] }
 0x63b   :  { %786 = vmatpush.msra.mxu3 %v4862_v58 }
 0x63c   :  { %4123 = vrcp.f32 %v705_v61  ;;  %v720_v15 = vand.u32 2147483648, %v705_v61  ;;  %v718_v18 = vand.u32 2147483647, %v705_v61  ;;  %vm714_vm10 = vweird.f32 %v705_v61 }
 0x63d   :  { %4125 = vrcp.f32 %v706_v5  ;;  %v735_v1 = vand.u32 2147483648, %v706_v5  ;;  %vm729_vm14 = vweird.f32 %v706_v5  ;;  %v733_v55 = vand.u32 2147483647, %v706_v5 }
 0x63e   :  { %v721_v46 = vor.u32 1.1754944e-38, %v720_v15  ;;  %vm719_vm12 = vcmp.eq.f32.partialorder %v718_v18, 8.507059e+37 }
 0x63f   :  { %v736_v56 = vor.u32 1.1754944e-38, %v735_v1  ;;  %vm734_vm1 = vcmp.eq.f32.partialorder %v733_v55, 8.507059e+37 }
 0x642   :  { %v4124_v6 = vpop.eup %4123 }
 0x643   :  { %v4126_v62 = vpop.eup %4125  ;;  %v710_v63 = vmul.f32 %v4124_v6, %v705_v61  ;;  %vm715_vm9 = vweird.f32 %v4124_v6  ;;  %v4866_v61 = vld [vmem:[%s6121_s1 + $0x10] sm:$0xff] }
 0x644   :  { %v725_v2 = vmul.f32 %v4126_v62, %v706_v5  ;;  %vm716_vm11 = vmor %vm714_vm10, %vm715_vm9  ;;  %vm730_vm13 = vweird.f32 %v4126_v62  ;;  %787 = vmatpush.msra.mxu3 %v4866_v61 }
 0x645   :  { %v711_v4 = vsub.f32 1.0, %v710_v63  ;;  %vm731_vm15 = vmor %vm729_vm14, %vm730_vm13 }
 0x646   :  { %v726_v16 = vsub.f32 1.0, %v725_v2 }
 0x647   :  { %v712_v17 = vmul.f32 %v4124_v6, %v711_v4 }
 0x648   :  { %v727_v43 = vmul.f32 %v4126_v62, %v726_v16 }
 0x649   :  { %v713_v44 = vadd.f32 %v4124_v6, %v712_v17 }
 0x64a   :  { %v728_v49 = vadd.f32 %v4126_v62, %v727_v43 }
 0x64b   :  { %v717_v47 = vsel %vm716_vm11, %v4124_v6, %v713_v44  ;;  %v4873_v6 = vld [vmem:[%s6121_s1] sm:$0xff] }
 0x64c   :  { %v722_v36 = vsel %vm719_vm12, %v721_v46, %v717_v47  ;;  %v732_v27 = vsel %vm731_vm15, %v4126_v62, %v728_v49 }
 0x64d   :  { %v723_v54 = vmul.f32 %v4120_v50, %v722_v36  ;;  %v737_v53 = vsel %vm734_vm1, %v736_v56, %v732_v27  ;;  %v4870_v50 = vld [vmem:[%s6121_s1 + $0x8] sm:$0xff] }
 0x64e   :  { %v738_v57 = vmul.f32 %v4122_v52, %v737_v53  ;;  %788 = vmatpush.msra.mxu3 %v4870_v50 }
 0x64f   :  { %741 = vperm.xlu1 %4072, %v723_v54  }
 0x650   :  { %789 = vmatpush.msra.mxu3 %v4873_v6 }
 0x652   :  { %1017 = vmatpush.msrb.mxu3 %v4664_v30 }
 0x654   :  { %1018 = vmatpush.msrb.mxu3 %v4669_v34 }
 0x656   :  { %1019 = vmatpush.msrb.mxu3 %v4673_v35 }
 0x657   :  { %746 = vperm.xlu1 %4072, %v738_v57  }
 0x658   :  { %1020 = vmatpush.msrb.mxu3 %v4681_v39 }
 0x6c1   :  { %v742_v52 = vpop.permute.xlu1 %741 }
 0x6c2   :  { %v749_v5 = vmul.f32 %v742_v52, %v4696_v60  ;;  %v4900_v52 = vld [vmem:[%s6122_s28 + $0x18] sm:$0xff] }
 0x6c3   :  { %834 = vmatpush.msra.mxu0 %v4900_v52 }
 0x6c4   :  { %v751_v62 = vsel %vm194_vm0, %v749_v5, 0.0 }
 0x6c5   :  { %v752_v63 = vrot.slane %v751_v62, 4 }
 0x6c7   :  { %v753_v2 = vadd.f32 %v752_v63, %v751_v62 }
 0x6c9   :  { %v747_v4 = vpop.permute.xlu1 %746  ;;  %v754_v16 = vrot.slane %v753_v2, 2 }
 0x6ca   :  { %v750_v15 = vmul.f32 %v747_v4, %v4694_v59 }
 0x6cb   :  { %v755_v43 = vadd.f32 %v754_v16, %v753_v2  ;;  %v3898_v16 = vsel %vm444_vm2, 1.0, %v6083_v13 }
 0x6cc   :  { %v758_v17 = vsel %vm194_vm0, %v750_v15, 0.0 }
 0x6cd   :  { %v759_v18 = vrot.slane %v758_v17, 4  ;;  %v756_v47 = vrot.slane %v755_v43, 1 }
 0x6cf   :  { %v760_v44 = vadd.f32 %v759_v18, %v758_v17  ;;  %v757_v1 = vadd.f32 %v756_v47, %v755_v43  ;;  %v845_v17 = vsel %vm674_vm8, %v3898_v16, 0.0 }
 0x6d1   :  { %v761_v46 = vrot.slane %v760_v44, 2 }
 0x6d3   :  { %v762_v49 = vadd.f32 %v761_v46, %v760_v44  ;;  %v4937_v46 = vsel %vm441_vm4, 1.0, %v6083_v13 }
 0x6d5   :  { %v763_v36 = vrot.slane %v762_v49, 1 }
 0x6d7   :  { %v764_v54 = vadd.f32 %v763_v36, %v762_v49 }
 0x6d9   :  { %v771_v55 = vsel %vm424_vm3, %v764_v54, %v757_v1 }
 0x6da   :  { %3904 = vmatmul.msk.f32.vlgmr.msra.gmra.mxu3 %vm194_vm0, %v771_v55 }
 0x6db   :  { %1273 = vmatpush.msra.mxu3 %v4862_v58 }
 0x6dd   :  { %1274 = vmatpush.msra.mxu3 %v4866_v61 }
 0x6df   :  { %1275 = vmatpush.msra.mxu3 %v4870_v50 }
 0x6e1   :  { %1276 = vmatpush.msra.mxu3 %v4873_v6 }
 0x6e2   :  { %3912 = vmatmul.msk.f32.vlgmr.msrb.gmra.mxu3 %vm194_vm0, %v4799_v29  ;;  %v4903_v29 = vld [vmem:[%s6122_s28 + $0x10] sm:$0xff] }
 0x6e3   :  { %1498 = vmatpush.msrb.mxu3 %v4664_v30  ;;  %v4907_v30 = vld [vmem:[%s6122_s28 + $0x8] sm:$0xff]  ;;  %835 = vmatpush.msra.mxu0 %v4903_v29 }
 0x6e5   :  { %1499 = vmatpush.msrb.mxu3 %v4669_v34  ;;  %v4911_v34 = vld [vmem:[%s6122_s28] sm:$0xff]  ;;  %836 = vmatpush.msra.mxu0 %v4907_v30 }
 0x6e7   :  { %1500 = vmatpush.msrb.mxu3 %v4673_v35  ;;  %837 = vmatpush.msra.mxu0 %v4911_v34 }
 0x6e9   :  { %1501 = vmatpush.msrb.mxu3 %v4681_v39  ;;  %1317 = vmatpush.msrb.mxu0 %v4900_v52 }
 0x6eb   :  { %1318 = vmatpush.msrb.mxu0 %v4903_v29 }
 0x6ed   :  { %1319 = vmatpush.msrb.mxu0 %v4907_v30 }
 0x6ef   :  { %1320 = vmatpush.msrb.mxu0 %v4911_v34 }
 0x75d   :  { %v791_v27 = vpop.f32.mrf.mxu3 }
 0x75e   :  { %v796_v56 = vperm.slane %v791_v27, 0  ;;  %v795_v53 = vrot.slane %v791_v27, 1 }
 0x760   :  { %798 = vrot.lane.b32.xlu1 %v796_v56, %s4449_s2  ;;  %v797_v57 = vperm.slane %v795_v53, 0 }
 0x768   :  { %800 = vrot.lane.b32.xlu1 %v797_v57, %s4449_s2 }
 0x7d2   :  { %v799_v35 = vpop.permute.xlu1 %798 }
 0x7d3   :  { %v804_v39 = vadd.f32 %v799_v35, %v4733_v23 }
 0x7d5   :  { %4127 = vtanh.f32 %v804_v39 }
 0x7da   :  { %v801_v5 = vpop.permute.xlu1 %800 }
 0x7db   :  { %v4128_v62 = vpop.eup %4127  ;;  %v805_v63 = vadd.f32 %v801_v5, %v4735_v24  ;;  %v1022_v5 = vpop.f32.mrf.mxu3 }
 0x7dc   :  { %814 = vrot.lane.b32.xlu2 %v4128_v62, %s4448_s18  ;;  %v1023_v62 = vadd.f32 %v4738_v25, %v1022_v5 }
 0x7dd   :  { %4129 = vtanh.f32 %v805_v63 }
 0x7e3   :  { %v4130_v2 = vpop.eup %4129 }
 0x7e4   :  { %816 = vrot.lane.b32.xlu1 %v4130_v2, %s4448_s18 }
 0x80e   :  { %846 = vadd.xlane.f32.xlu1 %v845_v17 }
 0x836   :  { %v815_v4 = vpop.permute.xlu2 %814 }
 0x837   :  { %3905 = vmatmul.msk.f32.vlgmr.msra.gmra.mxu0 %vm194_vm0, %v815_v4 }
 0x838   :  { %1798 = vmatpush.msra.mxu0 %v4900_v52 }
 0x83a   :  { %1799 = vmatpush.msra.mxu0 %v4903_v29 }
 0x83c   :  { %1800 = vmatpush.msra.mxu0 %v4907_v30 }
 0x83e   :  { %1801 = vmatpush.msra.mxu0 %v4911_v34 }
 0x856   :  { %v817_v15 = vpop.permute.xlu1 %816 }
 0x857   :  { %3906 = vmatmul.msk.f32.gmra.mxu0 %vm194_vm0, %v817_v15 }
 0x881   :  { %v847_v44 = vpop.xlane.xlu1 %846 }
 0x882   :  { %vm848_vm5 = vcmp.gt.f32.partialorder %v847_v44, 0.0 }
 0x883   :  { %v851_v47 = vsel %vm848_vm5, %v3898_v16, %v4937_v46 }
 0x884   :  { %vm852_vm6 = vcmp.gt.f32.partialorder %v851_v47, 0.0 }
 0x8b4   :  { %v839_v18 = vpop.f32.mrf.mxu0 }
 0x8b5   :  { %856 = vperm.xlu0 %4071, %v839_v18  }
 0x8bd   :  { %4073 = vset.pattern.permute.xlu0 %v4631_v3 }
 0x8d4   :  { %v842_v43 = vpop.f32.mrf.mxu0 }
 0x8d5   :  { %859 = vperm.xlu2 %4070, %v842_v43  }
 0x927   :  { %v857_v11 = vpop.permute.xlu0 %856 }
 0x928   :  { %v861_v36 = vperm.slane %v857_v11, %v4851_v0 }
 0x92f   :  { %v860_v49 = vpop.permute.xlu2 %859 }
 0x930   :  { %v862_v1 = vperm.slane %v860_v49, %v4851_v0 }
 0x932   :  { %v863_v54 = vsel %vm424_vm3, %v862_v1, %v861_v36  ;;  %v4949_v36 = vcvt.s32.f32 %v4851_v0 }
 0x933   :  { %v865_v55 = vsel %vm852_vm6, %v863_v54, -1e+09 }
 0x934   :  { %v866_v27 = vsel %vm674_vm8, %v865_v55, -inf }
 0x935   :  { %867 = vmax.xlane.f32.xlu2 %v866_v27 }
 0x9a8   :  { %v868_v56 = vpop.xlane.xlu2 %867 }
 0x9a9   :  { %v869_v53 = vsub.f32 %v865_v55, %v868_v56 }
 0x9ab   :  { %v870_v57 = vmul.f32 1.442695, %v869_v53 }
 0x9ad   :  { %4131 = vpow2.f32 %v870_v57 }
 0x9b3   :  { %v4132_v35 = vpop.eup %4131 }
 0x9b4   :  { %v872_v39 = vsel %vm674_vm8, %v4132_v35, 0.0 }
 0x9b5   :  { %873 = vadd.xlane.f32.xlu0 %v872_v39 }
 0x9c9   :  { %1046 = vrot.lane.b32.xlu0 %v1023_v62, %s4447_s6 }
 0xa28   :  { %v874_v63 = vpop.xlane.xlu0 %873 }
 0xa29   :  { %4133 = vrcp.f32 %v874_v63  ;;  %v886_v16 = vand.u32 2147483648, %v874_v63  ;;  %v884_v18 = vand.u32 2147483647, %v874_v63  ;;  %vm880_vm9 = vweird.f32 %v874_v63 }
 0xa2b   :  { %v887_v44 = vor.u32 1.1754944e-38, %v886_v16  ;;  %vm885_vm11 = vcmp.eq.f32.partialorder %v884_v18, 8.507059e+37 }
 0xa2f   :  { %v4134_v2 = vpop.eup %4133 }
 0xa30   :  { %v876_v4 = vmul.f32 %v4134_v2, %v874_v63  ;;  %vm881_vm7 = vweird.f32 %v4134_v2  ;;  %v4966_v63 = vld [vmem:[%s4459_s5] sm:$0x3] }
 0xa31   :  { %vm882_vm10 = vmor %vm880_vm9, %vm881_vm7 }
 0xa32   :  { %v877_v15 = vsub.f32 1.0, %v876_v4 }
 0xa34   :  { %v878_v17 = vmul.f32 %v4134_v2, %v877_v15 }
 0xa36   :  { %v879_v43 = vadd.f32 %v4134_v2, %v878_v17 }
 0xa38   :  { %v883_v11 = vsel %vm882_vm10, %v4134_v2, %v879_v43 }
 0xa39   :  { %v888_v47 = vsel %vm885_vm11, %v887_v44, %v883_v11 }
 0xa3a   :  { %v889_v49 = vmul.f32 %v4132_v35, %v888_v47 }
 0xa3c   :  { %v890_v25 = vsel %vm674_vm8, %v889_v49, -inf }
 0xa3d   :  { %891 = vmax.xlane.f32.xlu1 %v890_v25 }
 0xab0   :  { %v4951_v1 = vpop.xlane.xlu1 %891 }
 0xab1   :  { %6123 = vst [vmem:[#allocation23_spill] sm:$0xff] %v4951_v1  ;;  %vm893_vm12 = vcmp.ge.f32.partialorder %v889_v49, %v4951_v1 }
 0xab2   :  { %v895_v54 = vsel %vm893_vm12, %v4949_v36, 8.0 }
 0xab3   :  { %v896_v55 = vsel %vm674_vm8, %v895_v54, inf }
 0xab4   :  { %897 = vmin.xlane.f32.xlu1 %v896_v55 }
 0xb27   :  { %v898_v27 = vpop.xlane.xlu1 %897 }
 0xb28   :  { %vm3992_vm13 = vcmp.lt.s32.totalorder %v898_v27, 0  ;;  %v3993_v56 = vceil.f32 %v898_v27  ;;  %v3994_v53 = vfloor.f32 %v898_v27 }
 0xb2a   :  { %v3995_v57 = vsel %vm3992_vm13, %v3993_v56, %v3994_v53 }
 0xb2b   :  { %v4956_v35 = vcvt.f32.s32 %v3995_v57  ;;  %v4306_v57 = vld [vmem:[%s4474_s17] sm:$0x3] }
 0xb2d   :  { %vm902_vm14 = vcmp.eq.s32.totalorder %v4851_v0, %v4956_v35  ;;  %vm917_vm6 = vcmp.ne.s32.totalorder %v4956_v35, 0 }
 0xb2e   :  { %v4961_v39 = vsel %vm902_vm14, 1.0, %v6083_v13 }
 0xb2f   :  { %v974_v5 = vmul.f32 %v4961_v39, %v4638_v8  ;;  %v970_v2 = vmul.f32 %v4966_v63, %v4961_v39 }
 0xb31   :  { %v975_v4 = vsel %vm674_vm8, %v974_v5, 0.0  ;;  %v971_v15 = vsel %vm674_vm8, %v970_v2, 0.0  ;;  %v909_v5 = vmul.f32 %v4306_v57, %v4961_v39 }
 0xb32   :  { %976 = vadd.xlane.f32.xlu2 %v975_v4  ;;  %972 = vadd.xlane.f32.xlu1 %v971_v15 }
 0xb33   :  { %v910_v2 = vsel %vm674_vm8, %v909_v5, 0.0 }
 0xba5   :  { %v977_v16 = vpop.xlane.xlu2 %976  ;;  %v973_v17 = vpop.xlane.xlu1 %972 }
 0xba6   :  { %v979_v18 = vmul.f32 %v4748_v42, %v977_v16  ;;  %v978_v43 = vmul.f32 %v4745_v40, %v973_v17  ;;  %v4307_v17 = vld [vmem:[%s4469_s13] sm:$0x3]  ;;  %s3837_s13 = sshll.u32 %s4617_s19, 4  ;;  %s3838_s13 = int_to_ptr.hbm [resolvable:$true] %s3837_s13 }
 0xba7   :  { %s4397_s17 = sshra.s32 %s3838_s13, 4  ;;  %s4398_s17 = int_to_ptr.hbm [resolvable:$true] %s4397_s17 }
 0xba8   :  { %v980_v44 = vadd.f32 %v979_v18, %v978_v43  ;;  %v905_v18 = vmul.f32 %v4307_v17, %v4961_v39  ;;  %p4402_p1 = scmp.lt.s32.totalorder %s4398_s17, %s4617_s19 }
 0xbaa   :  { %v981_v8 = vadd.f32 %v4754_v51, %v980_v44  ;;  %v906_v43 = vsel %vm674_vm8, %v905_v18, 0.0 }
 0xbac   :  { %3911 = vmatmul.msk.f32.vlgmr.msrb.gmra.mxu1 %vm194_vm0, %v981_v8 }
 0xbad   :  { %1478 = vmatpush.msrb.mxu1 %v4718_v19 }
 0xbaf   :  { %1479 = vmatpush.msrb.mxu1 %v4722_v20 }
 0xbb1   :  { %1480 = vmatpush.msrb.mxu1 %v4726_v21 }
 0xbb3   :  { %1481 = vmatpush.msrb.mxu1 %v4730_v22 }
 0xc29   :  { %v1002_v11 = vpop.f32.mrf.mxu1 }
 0xc2a   :  { %v1003_v47 = vadd.f32 %v4762_v10, %v1002_v11 }
 0xc2c   :  { %v1025_v49 = vadd.f32 %v1023_v62, %v1003_v47  ;;  %v1047_v62 = vpop.permute.xlu0 %1046 }
 0xc2e   :  { %v3913_v42 = vmul.f32 -1.442695, %v1025_v49 }
 0xc30   :  { %4135 = vpow2.f32 %v3913_v42 }
 0xc36   :  { %v4136_v40 = vpop.eup %4135 }
 0xc37   :  { %v1029_v25 = vadd.f32 1.0, %v4136_v40 }
 0xc39   :  { %4137 = vrcp.f32 %v1029_v25  ;;  %v1041_v19 = vand.u32 2147483648, %v1029_v25  ;;  %v1039_v20 = vand.u32 2147483647, %v1029_v25  ;;  %vm1035_vm1 = vweird.f32 %v1029_v25 }
 0xc3b   :  { %v1042_v22 = vor.u32 1.1754944e-38, %v1041_v19  ;;  %vm1040_vm5 = vcmp.eq.f32.partialorder %v1039_v20, 8.507059e+37 }
 0xc3f   :  { %v4138_v51 = vpop.eup %4137 }
 0xc40   :  { %v1031_v54 = vmul.f32 %v4138_v51, %v1029_v25  ;;  %vm1036_vm15 = vweird.f32 %v4138_v51  ;;  %v918_v25 = vsub.f32 1.0, %v4961_v39 }
 0xc41   :  { %vm1037_vm2 = vmor %vm1035_vm1, %vm1036_vm15  ;;  %vm957_vm1 = vcmask 1041408  }
 0xc42   :  { %v1032_v55 = vsub.f32 1.0, %v1031_v54 }
 0xc44   :  { %v1033_v27 = vmul.f32 %v4138_v51, %v1032_v55 }
 0xc46   :  { %v1034_v21 = vadd.f32 %v4138_v51, %v1033_v27  ;;  %v919_v27 = vmul.f32 %v4306_v57, %v918_v25 }
 0xc48   :  { %v1038_v10 = vsel %vm1037_vm2, %v4138_v51, %v1034_v21 }
 0xc49   :  { %v1043_v56 = vsel %vm1040_vm5, %v1042_v22, %v1038_v10 }
 0xc4a   :  { %v1049_v53 = vmul.f32 %v1047_v62, %v1043_v56  ;;  %v1056_v44 = vsub.f32 1.0, %v1043_v56  ;;  %v1062_v11 = vmul.f32 %v1043_v56, %v4791_v26  ;;  %v927_v26 = vsel %vm441_vm4, 0.0, %v4306_v57 }
 0xc4c   :  { %1051 = vrot.lane.b32.xlu1 %v1049_v53, %s4447_s6 }
 0xc76   :  { %911 = vadd.xlane.f32.xlu1 %v910_v2 }
 0xcbe   :  { %v1052_v4 = vpop.permute.xlu1 %1051 }
 0xcbf   :  { %v1054_v15 = vadd.f32 %v1052_v4, %v1003_v47 }
 0xcc1   :  { %4139 = vtanh.f32 %v1054_v15 }
 0xcc7   :  { %v4140_v16 = vpop.eup %4139 }
 0xcc8   :  { %1058 = vrot.lane.b32.xlu2 %v4140_v16, %s4448_s18 }
 0xce9   :  { %v912_v47 = vpop.xlane.xlu1 %911 }
 0xcf1   :  { %907 = vadd.xlane.f32.xlu2 %v906_v43 }
 0xd22   :  { %v1059_v8 = vpop.permute.xlu2 %1058 }
 0xd23   :  { %v1061_v49 = vmul.f32 %v1059_v8, %v1056_v44 }
 0xd25   :  { %v4990_v42 = vadd.f32 %v1062_v11, %v1061_v49 }
 0xd27   :  { %1091 = vrot.lane.b32.xlu0 %v4990_v42, %s4448_s18 }
 0xd64   :  { %v908_v40 = vpop.xlane.xlu2 %907 }
 0xd65   :  { %v913_v51 = vsub.f32 %v908_v40, %v912_v47  ;;  %v915_v54 = vsub.f32 %v912_v47, %v908_v40 }
 0xd67   :  { %v914_v55 = vmax.f32 %v913_v51, 0.0  ;;  %v916_v19 = vmax.f32 %v915_v54, 0.0 }
 0xd69   :  { %v920_v20 = vmul.f32 %v4961_v39, %v916_v19  ;;  %v3908_v22 = vadd.f32 -1.0, %v914_v55  ;;  %v5018_v5 = vsel %vm917_vm6, %v914_v55, 1.0 }
 0xd6a   :  { %v1064_v2 = vperm.slane %v5018_v5, 0 }
 0xd6b   :  { %v921_v21 = vadd.f32 %v920_v20, %v919_v27 }
 0xd6c   :  { %v1066_v15 = vmul.f32 %v4823_v38, %v1064_v2 }
 0xd6d   :  { %v923_v10 = vsel %vm441_vm4, %v3908_v22, %v921_v21 }
 0xd6e   :  { %v5003_v62 = vsel %vm917_vm6, %v923_v10, %v927_v26 }
 0xd6f   :  { %v1068_v56 = vperm.slane %v5003_v62, 0  ;;  %v1075_v53 = vperm.slane %v5003_v62, 1  ;;  %vm939_vm2 = vcmp.ne.f32.partialorder %v5003_v62, 0.0  ;;  %vm940_vm5 = vcmp.lt.f32.partialorder %v5003_v62, %v5018_v5 }
 0xd71   :  { %1073 = vperm.xlu0 %4073, %v1068_v56  }
 0xd79   :  { %1080 = vperm.xlu0 %4073, %v1075_v53  }
 0xd81   :  { %4074 = vset.pattern.permute.xlu0 %v6081_v33 }
 0xd99   :  { %v5008_v39 = vpop.permute.xlu0 %1091 }
 0xd9a   :  { %3914 = vmatmul.msk.f32.vlgmr.msra.gmra.mxu1 %vm194_vm0, %v5008_v39 }
 0xd9b   :  { %1588 = vmatpush.msra.mxu1 %v4772_v7  ;;  %v1065_v7 = vperm.slane %v5018_v5, 1 }
 0xd9d   :  { %1589 = vmatpush.msra.mxu1 %v4775_v9 }
 0xd9f   :  { %1590 = vmatpush.msra.mxu1 %v4779_v12 }
 0xda1   :  { %1591 = vmatpush.msra.mxu1 %v4783_v14  ;;  %v1067_v14 = vmul.f32 %v4823_v38, %v1065_v7 }
 0xde3   :  { %v1074_v57 = vpop.permute.xlu0 %1073 }
 0xde4   :  { %v1082_v4 = vmul.f32 %v4826_v41, %v1074_v57 }
 0xde6   :  { %v1084_v17 = vadd.f32 %v1082_v4, %v1066_v15 }
 0xde8   :  { %v1086_v12 = vadd.f32 %v4834_v45, %v1084_v17 }
 0xdea   :  { %v1088_v44 = vadd.f32 %v1086_v12, %v4733_v23 }
 0xdeb   :  { %v1081_v16 = vpop.permute.xlu0 %1080 }
 0xdec   :  { %v1083_v9 = vmul.f32 %v4826_v41, %v1081_v16 }
 0xdee   :  { %v1085_v18 = vadd.f32 %v1083_v9, %v1067_v14  ;;  %v5045_v9 = vsub.f32 1.0, %v4937_v46 }
 0xdf0   :  { %v1087_v49 = vadd.f32 %v4834_v45, %v1085_v18  ;;  %v948_v12 = vmul.f32 %v5045_v9, %v5003_v62 }
 0xdf2   :  { %v1089_v25 = vadd.f32 %v1087_v49, %v4735_v24  ;;  %v949_v14 = vsel %vm674_vm8, %v948_v12, 0.0 }
 0xe17   :  { %v1112_v43 = vpop.f32.mrf.mxu1 }
 0xe18   :  { %v1116_v8 = vrot.slane %v1112_v43, 1  ;;  %v1117_v11 = vperm.slane %v1112_v43, 0 }
 0xe1a   :  { %v1121_v47 = vadd.f32 %v1117_v11, %v1088_v44  ;;  %v1118_v40 = vperm.slane %v1116_v8, 0 }
 0xe1c   :  { %4141 = vtanh.f32 %v1121_v47  ;;  %v1122_v51 = vadd.f32 %v1118_v40, %v1089_v25 }
 0xe1e   :  { %4143 = vtanh.f32 %v1122_v51 }
 0xe22   :  { %v4142_v54 = vpop.eup %4141 }
 0xe23   :  { %3915 = vmatmul.msk.f32.vlgmr.msra.gmra.mxu2 %vm194_vm0, %v4142_v54 }
 0xe24   :  { %2105 = vmatpush.msra.mxu2 %v4796_v28  ;;  %v4144_v38 = vpop.eup %4143 }
 0xe26   :  { %2106 = vmatpush.msra.mxu2 %v4808_v31 }
 0xe28   :  { %2107 = vmatpush.msra.mxu2 %v4811_v32 }
 0xe2a   :  { %2108 = vmatpush.msra.mxu2 %v4815_v37 }
 0xe2b   :  { %3916 = vmatmul.msk.f32.gmra.mxu2 %vm194_vm0, %v4144_v38 }
 0xea6   :  { %v1148_v41 = vpop.f32.mrf.mxu2 }
 0xea7   :  { %1157 = vperm.xlu0 %4074, %v1148_v41  }
 0xeae   :  { %v1151_v45 = vpop.f32.mrf.mxu2 }
 0xeaf   :  { %1160 = vperm.xlu2 %4070, %v1151_v45  }
 0xf09   :  { %v1161_v55 = vpop.permute.xlu2 %1160 }
 0xf0a   :  { %v1163_v27 = vperm.slane %v1161_v55, %v4851_v0 }
 0xf19   :  { %v1158_v19 = vpop.permute.xlu0 %1157 }
 0xf1a   :  { %v1162_v20 = vperm.slane %v1158_v19, %v4851_v0 }
 0xf1c   :  { %v1164_v28 = vsel %vm424_vm3, %v1163_v27, %v1162_v20 }
 0xf1d   :  { %v1166_v31 = vsel %vm674_vm8, %v1164_v28, -inf }
 0xf1e   :  { %1167 = vmax.xlane.f32.xlu0 %v1166_v31 }
 0xf91   :  { %v1168_v32 = vpop.xlane.xlu0 %1167 }
 0xf92   :  { %v1170_v26 = vperm.slane %v1168_v32, 0  ;;  %v1171_v37 = vperm.slane %v1168_v32, 1 }
 0xf94   :  { %v1174_v21 = vsub.f32 %v1148_v41, %v1170_v26  ;;  %v1175_v22 = vsub.f32 %v1151_v45, %v1171_v37 }
 0xf96   :  { %v1176_v10 = vmul.f32 1.442695, %v1174_v21  ;;  %v1178_v56 = vmul.f32 1.442695, %v1175_v22 }
 0xf98   :  { %4145 = vpow2.f32 %v1176_v10 }
 0xf99   :  { %4147 = vpow2.f32 %v1178_v56 }
 0xf9e   :  { %v4146_v53 = vpop.eup %4145 }
 0xf9f   :  { %v4148_v57 = vpop.eup %4147  ;;  %1183 = vperm.xlu1 %4072, %v4146_v53  }
 0xfa0   :  { %1186 = vperm.xlu2 %4070, %v4148_v57  }
 0xffa   :  { %v1187_v2 = vpop.permute.xlu2 %1186 }
 0xffb   :  { %v1189_v15 = vperm.slane %v1187_v2, %v4851_v0 }
0x1011   :  { %v1184_v4 = vpop.permute.xlu1 %1183 }
0x1012   :  { %v1188_v16 = vperm.slane %v1184_v4, %v4851_v0 }
0x1014   :  { %v1190_v17 = vsel %vm424_vm3, %v1189_v15, %v1188_v16 }
0x1015   :  { %v1192_v7 = vsel %vm674_vm8, %v1190_v17, 0.0 }
0x1016   :  { %1193 = vadd.xlane.f32.xlu1 %v1192_v7 }
0x101e   :  { %950 = vadd.xlane.f32.xlu1 %v949_v14 }
0x1089   :  { %v1194_v18 = vpop.xlane.xlu1 %1193 }
0x108a   :  { %v1196_v43 = vperm.slane %v1194_v18, 0  ;;  %v1197_v44 = vperm.slane %v1194_v18, 1 }
0x108c   :  { %4149 = vrcp.f32 %v1196_v43  ;;  %v1211_v25 = vand.u32 2147483648, %v1196_v43  ;;  %v1209_v38 = vand.u32 2147483647, %v1196_v43  ;;  %vm1205_vm9 = vweird.f32 %v1196_v43 }
0x108d   :  { %4151 = vrcp.f32 %v1197_v44  ;;  %v1226_v28 = vand.u32 2147483648, %v1197_v44  ;;  %vm1220_vm13 = vweird.f32 %v1197_v44  ;;  %v1224_v32 = vand.u32 2147483647, %v1197_v44 }
0x108e   :  { %v1212_v55 = vor.u32 1.1754944e-38, %v1211_v25  ;;  %vm1210_vm11 = vcmp.eq.f32.partialorder %v1209_v38, 8.507059e+37  ;;  %v5067_v25 = vld [vmem:[%s4514_s24 + $0x10] sm:$0xff] }
0x108f   :  { %v1227_v37 = vor.u32 1.1754944e-38, %v1226_v28  ;;  %vm1225_vm15 = vcmp.eq.f32.partialorder %v1224_v32, 8.507059e+37 }
0x1092   :  { %v4150_v8 = vpop.eup %4149 }
0x1093   :  { %v4152_v11 = vpop.eup %4151  ;;  %v1201_v49 = vmul.f32 %v4150_v8, %v1196_v43  ;;  %vm1206_vm7 = vweird.f32 %v4150_v8 }
0x1094   :  { %v1216_v47 = vmul.f32 %v4152_v11, %v1197_v44  ;;  %vm1207_vm10 = vmor %vm1205_vm9, %vm1206_vm7  ;;  %vm1221_vm12 = vweird.f32 %v4152_v11 }
0x1095   :  { %v1202_v40 = vsub.f32 1.0, %v1201_v49  ;;  %vm1222_vm14 = vmor %vm1220_vm13, %vm1221_vm12 }
0x1096   :  { %v1217_v51 = vsub.f32 1.0, %v1216_v47  ;;  %vm941_vm7 = vmand %vm939_vm2, %vm940_vm5 }
0x1097   :  { %v1203_v54 = vmul.f32 %v4150_v8, %v1202_v40  ;;  %v5063_v40 = vld [vmem:[%s4514_s24 + $0x18] sm:$0xff] }
0x1098   :  { %v1218_v41 = vmul.f32 %v4152_v11, %v1217_v51  ;;  %v5071_v51 = vld [vmem:[%s4514_s24 + $0x8] sm:$0xff] }
0x1099   :  { %v1204_v45 = vadd.f32 %v4150_v8, %v1203_v54 }
0x109a   :  { %v1219_v27 = vadd.f32 %v4152_v11, %v1218_v41 }
0x109b   :  { %v1208_v19 = vsel %vm1207_vm10, %v4150_v8, %v1204_v45  ;;  %vm946_vm10 = vcmp.eq.f32.partialorder %v5018_v5, 0.0 }
0x109c   :  { %v1213_v20 = vsel %vm1210_vm11, %v1212_v55, %v1208_v19  ;;  %v1223_v26 = vsel %vm1222_vm14, %v4152_v11, %v1219_v27  ;;  %v929_v27 = vand.u32 2147483647, %v5003_v62 }
0x109d   :  { %v1214_v31 = vmul.f32 %v4146_v53, %v1213_v20  ;;  %v1228_v21 = vsel %vm1225_vm15, %v1227_v37, %v1223_v26 }
0x109e   :  { %v1229_v22 = vmul.f32 %v4148_v57, %v1228_v21  ;;  %v930_v20 = vsel %vm674_vm8, %v929_v27, -inf }
0x109f   :  { %1232 = vperm.xlu2 %4070, %v1214_v31  }
0x10a7   :  { %1237 = vperm.xlu2 %4070, %v1229_v22  }
0x10f9   :  { %v1233_v10 = vpop.permute.xlu2 %1232 }
0x10fa   :  { %v1240_v56 = vmul.f32 %v1233_v10, %v4696_v60  ;;  %v944_v10 = vsel %vm917_vm6, 1.0, %v6083_v13 }
0x10fc   :  { %v1242_v2 = vsel %vm194_vm0, %v1240_v56, 0.0 }
0x10fd   :  { %v1243_v4 = vrot.slane %v1242_v2, 4 }
0x10ff   :  { %v1244_v15 = vadd.f32 %v1243_v4, %v1242_v2 }
0x1101   :  { %v1238_v16 = vpop.permute.xlu2 %1237  ;;  %v1245_v17 = vrot.slane %v1244_v15, 2 }
0x1102   :  { %v1241_v53 = vmul.f32 %v1238_v16, %v4694_v59 }
0x1103   :  { %v1246_v14 = vadd.f32 %v1245_v17, %v1244_v15 }
0x1104   :  { %v1249_v7 = vsel %vm194_vm0, %v1241_v53, 0.0 }
0x1105   :  { %v1250_v12 = vrot.slane %v1249_v7, 4  ;;  %v1247_v43 = vrot.slane %v1246_v14, 1 }
0x1107   :  { %v1251_v18 = vadd.f32 %v1250_v12, %v1249_v7  ;;  %v1248_v11 = vadd.f32 %v1247_v43, %v1246_v14 }
0x1109   :  { %v1252_v57 = vrot.slane %v1251_v18, 2 }
0x110b   :  { %v1253_v44 = vadd.f32 %v1252_v57, %v1251_v18 }
0x110d   :  { %v1254_v8 = vrot.slane %v1253_v44, 1 }
0x110f   :  { %v1255_v49 = vadd.f32 %v1254_v8, %v1253_v44 }
0x1111   :  { %v1258_v47 = vsel %vm424_vm3, %v1255_v49, %v1248_v11 }
0x1112   :  { %3917 = vmatmul.msk.f32.vlgmr.msra.gmra.mxu3 %vm194_vm0, %v1258_v47 }
0x1113   :  { %1754 = vmatpush.msra.mxu3 %v4862_v58  ;;  %v5075_v58 = vld [vmem:[%s4514_s24] sm:$0xff] }
0x1115   :  { %1755 = vmatpush.msra.mxu3 %v4866_v61 }
0x1117   :  { %1756 = vmatpush.msra.mxu3 %v4870_v50 }
0x1119   :  { %1757 = vmatpush.msra.mxu3 %v4873_v6 }
0x111a   :  { %3925 = vmatmul.msk.f32.vlgmr.msrb.gmra.mxu3 %vm194_vm0, %v5008_v39 }
0x111b   :  { %1979 = vmatpush.msrb.mxu3 %v5063_v40 }
0x111d   :  { %1980 = vmatpush.msrb.mxu3 %v5067_v25 }
0x111f   :  { %1981 = vmatpush.msrb.mxu3 %v5071_v51 }
0x1121   :  { %1982 = vmatpush.msrb.mxu3 %v5075_v58 }
0x1195   :  { %v1278_v61 = vpop.f32.mrf.mxu3 }
0x1196   :  { %v1282_v50 = vrot.slane %v1278_v61, 1  ;;  %v1283_v6 = vperm.slane %v1278_v61, 0 }
0x1198   :  { %v1284_v39 = vperm.slane %v1282_v50, 0  ;;  %1285 = vrot.lane.b32.xlu0 %v1283_v6, %s4449_s2 }
0x119a   :  { %1287 = vrot.lane.b32.xlu2 %v1284_v39, %s4449_s2 }
0x11f4   :  { %v1288_v54 = vpop.permute.xlu2 %1287 }
0x11f5   :  { %v1292_v38 = vadd.f32 %v1288_v54, %v4735_v24 }
0x11f7   :  { %4153 = vtanh.f32 %v1292_v38 }
0x11fd   :  { %v4154_v41 = vpop.eup %4153 }
0x11fe   :  { %1299 = vrot.lane.b32.xlu0 %v4154_v41, %s4448_s18 }
0x120a   :  { %v1286_v45 = vpop.permute.xlu0 %1285 }
0x120b   :  { %v1291_v55 = vadd.f32 %v1286_v45, %v4733_v23 }
0x120d   :  { %4155 = vtanh.f32 %v1291_v55 }
0x1213   :  { %v4156_v19 = vpop.eup %4155 }
0x1214   :  { %1297 = vrot.lane.b32.xlu2 %v4156_v19, %s4448_s18 }
0x123d   :  { %931 = vmax.xlane.f32.xlu2 %v930_v20 }
0x126e   :  { %v1298_v28 = vpop.permute.xlu2 %1297 }
0x126f   :  { %3918 = vmatmul.msk.f32.vlgmr.msrb.gmra.mxu0 %vm194_vm0, %v1298_v28 }
0x1270   :  { %2279 = vmatpush.msrb.mxu0 %v4900_v52  ;;  %v1300_v31 = vpop.permute.xlu0 %1299  ;;  %v951_v52 = vpop.xlane.xlu1 %950 }
0x1271   :  { %vm952_vm9 = vcmp.eq.f32.partialorder %v951_v52, 0.0 }
0x1272   :  { %2280 = vmatpush.msrb.mxu0 %v4903_v29  ;;  %vm953_vm11 = vmor %vm946_vm10, %vm952_vm9  ;;  %vm1449_vm10 = vcmp.eq.s32.totalorder %v4851_v0, 1 }
0x1274   :  { %2281 = vmatpush.msrb.mxu0 %v4907_v30 }
0x1276   :  { %2282 = vmatpush.msrb.mxu0 %v4911_v34  ;;  %v3910_v34 = vsel %vm941_vm7, 1.0, %v6083_v13 }
0x1277   :  { %3919 = vmatmul.msk.f32.gmra.mxu0 %vm194_vm0, %v1300_v31  ;;  %v945_v2 = vsel %vm441_vm4, %v944_v10, %v3910_v34 }
0x1278   :  { %v956_v4 = vsel %vm953_vm11, %v4937_v46, %v945_v2  ;;  %v969_v2 = vsel %vm441_vm4, %v4956_v35, 0 }
0x12b0   :  { %v5092_v32 = vpop.xlane.xlu2 %931 }
0x12b1   :  { %6124 = vst [vmem:[#allocation24_spill] sm:$0xff] %v5092_v32  ;;  %v958_v26 = vsel %vm957_vm1, %v5092_v32, -inf }
0x12b2   :  { %v959_v37 = vrot.slane %v958_v26, 4 }
0x12b4   :  { %v960_v21 = vmax.f32 %v958_v26, %v959_v37 }
0x12b6   :  { %v961_v29 = vrot.slane %v960_v21, 2 }
0x12b8   :  { %v962_v30 = vmax.f32 %v960_v21, %v961_v29 }
0x12ba   :  { %v963_v22 = vrot.slane %v962_v30, 1 }
0x12bc   :  { %v964_v56 = vmax.f32 %v962_v30, %v963_v22 }
0x12be   :  { %vm965_vm12 = vcmp.eq.f32.partialorder %v964_v56, 0.0 }
0x12bf   :  { %v968_v15 = vsel %vm965_vm12, 0.0, %v956_v4 }
0x12c0   :  { %v1328_v16 = vsel %vm674_vm8, %v968_v15, 0.0 }
0x12c1   :  { %1329 = vadd.xlane.f32.xlu0 %v1328_v16  ;;  %v5136_v16 = vld [vmem:[%s4464_s9] sm:$0x3] }
0x12ec   :  { %v1322_v53 = vpop.f32.mrf.mxu0 }
0x12ed   :  { %1339 = vperm.xlu1 %4072, %v1322_v53  }
0x12f4   :  { %v1325_v17 = vpop.f32.mrf.mxu0 }
0x12f5   :  { %1342 = vperm.xlu1 %4072, %v1325_v17  }
0x12fd   :  { %4075 = vset.pattern.permute.xlu1 %v4631_v3 }
0x1334   :  { %v1330_v12 = vpop.xlane.xlu0 %1329 }
0x1335   :  { %vm1331_vm6 = vcmp.gt.f32.partialorder %v1330_v12, 0.0  ;;  %v1503_v12 = vpop.f32.mrf.mxu3 }
0x1336   :  { %v1334_v18 = vsel %vm1331_vm6, %v968_v15, %v4937_v46 }
0x1337   :  { %vm1335_vm13 = vcmp.gt.f32.partialorder %v1334_v18, 0.0 }
0x135f   :  { %v1340_v7 = vpop.permute.xlu1 %1339 }
0x1360   :  { %v1344_v57 = vperm.slane %v1340_v7, %v4851_v0 }
0x1367   :  { %v1343_v14 = vpop.permute.xlu1 %1342 }
0x1368   :  { %v1345_v43 = vperm.slane %v1343_v14, %v4851_v0  ;;  %v5145_v14 = vld [vmem:[%s6110_s3] ss:$0 sm:$0xff] }
0x1369   :  { %v1504_v18 = vadd.f32 %v5145_v14, %v1503_v12 }
0x136a   :  { %v1346_v44 = vsel %vm424_vm3, %v1345_v43, %v1344_v57  ;;  %v5150_v43 = vld [vmem:[%s6112_s14 + $0x1] ss:$0 sm:$0xff] }
0x136b   :  { %v1348_v8 = vsel %vm1335_vm13, %v1346_v44, -1e+09 }
0x136c   :  { %v1349_v11 = vsel %vm674_vm8, %v1348_v8, -inf }
0x136d   :  { %1350 = vmax.xlane.f32.xlu2 %v1349_v11 }
0x13e0   :  { %v1351_v49 = vpop.xlane.xlu2 %1350 }
0x13e1   :  { %v1352_v47 = vsub.f32 %v1348_v8, %v1351_v49  ;;  %v5154_v8 = vld [vmem:[%s6112_s14] ss:$0 sm:$0xff] }
0x13e3   :  { %v1353_v61 = vmul.f32 1.442695, %v1352_v47  ;;  %v5158_v47 = vld [vmem:[%s6113_s12] ss:$0 sm:$0xff] }
0x13e5   :  { %4157 = vpow2.f32 %v1353_v61 }
0x13eb   :  { %v4158_v50 = vpop.eup %4157 }
0x13ec   :  { %v1355_v6 = vsel %vm674_vm8, %v4158_v50, 0.0 }
0x13ed   :  { %1356 = vadd.xlane.f32.xlu1 %v1355_v6  ;;  %v5167_v6 = vld [vmem:[%s6109_s29 + $0x10] sm:$0xff] }
0x1460   :  { %v1357_v39 = vpop.xlane.xlu1 %1356 }
0x1461   :  { %4159 = vrcp.f32 %v1357_v39  ;;  %v1369_v45 = vand.u32 2147483648, %v1357_v39  ;;  %v1367_v19 = vand.u32 2147483647, %v1357_v39  ;;  %vm1363_vm15 = vweird.f32 %v1357_v39 }
0x1463   :  { %v1370_v20 = vor.u32 1.1754944e-38, %v1369_v45  ;;  %vm1368_vm5 = vcmp.eq.f32.partialorder %v1367_v19, 8.507059e+37 }
0x1467   :  { %v4160_v54 = vpop.eup %4159 }
0x1468   :  { %v1359_v38 = vmul.f32 %v4160_v54, %v1357_v39  ;;  %vm1364_vm14 = vweird.f32 %v4160_v54  ;;  %v5171_v39 = vld [vmem:[%s6109_s29 + $0x8] sm:$0xff] }
0x1469   :  { %vm1365_vm2 = vmor %vm1363_vm15, %vm1364_vm14 }
0x146a   :  { %v1360_v41 = vsub.f32 1.0, %v1359_v38 }
0x146c   :  { %v1361_v55 = vmul.f32 %v4160_v54, %v1360_v41  ;;  %v5179_v41 = vld [vmem:[%s6115_s4] ss:$0 sm:$0xff] }
0x146e   :  { %v1362_v27 = vadd.f32 %v4160_v54, %v1361_v55 }
0x1470   :  { %v1366_v28 = vsel %vm1365_vm2, %v4160_v54, %v1362_v27  ;;  %v5175_v54 = vld [vmem:[%s6109_s29] sm:$0xff] }
0x1471   :  { %v1371_v31 = vsel %vm1368_vm5, %v1370_v20, %v1366_v28 }
0x1472   :  { %v1372_v26 = vmul.f32 %v4158_v50, %v1371_v31  ;;  %v5163_v50 = vld [vmem:[%s6109_s29 + $0x18] sm:$0xff] }
0x1474   :  { %v1373_v37 = vsel %vm674_vm8, %v1372_v26, -inf }
0x1475   :  { %1374 = vmax.xlane.f32.xlu0 %v1373_v37 }
0x14e8   :  { %v5116_v21 = vpop.xlane.xlu0 %1374 }
0x14e9   :  { %vm1376_vm7 = vcmp.ge.f32.partialorder %v1372_v26, %v5116_v21 }
0x14ea   :  { %v1377_v52 = vsel %vm1376_vm7, %v4949_v36, 8.0 }
0x14eb   :  { %v1378_v29 = vsel %vm674_vm8, %v1377_v52, inf }
0x14ec   :  { %1379 = vmin.xlane.f32.xlu2 %v1378_v29 }
0x155f   :  { %v1380_v30 = vpop.xlane.xlu2 %1379 }
0x1560   :  { %vm3997_vm9 = vcmp.lt.s32.totalorder %v1380_v30, 0  ;;  %v3998_v34 = vceil.f32 %v1380_v30  ;;  %v3999_v22 = vfloor.f32 %v1380_v30 }
0x1562   :  { %v4000_v10 = vsel %vm3997_vm9, %v3998_v34, %v3999_v22 }
0x1563   :  { %v5122_v56 = vcvt.f32.s32 %v4000_v10 }
0x1565   :  { %vm1384_vm11 = vcmp.eq.s32.totalorder %v4851_v0, %v5122_v56  ;;  %v5130_v4 = vsel %vm1449_vm10, %v5122_v56, %v969_v2  ;;  %vm1399_vm15 = vcmp.ne.s32.totalorder %v5122_v56, 0 }
0x1566   :  { %v5133_v15 = vsel %vm1384_vm11, 1.0, %v6083_v13 }
0x1567   :  { %v1455_v53 = vmul.f32 %v5136_v16, %v5133_v15  ;;  %v1451_v17 = vmul.f32 %v4966_v63, %v5133_v15 }
0x1569   :  { %v1456_v35 = vsel %vm674_vm8, %v1455_v53, 0.0  ;;  %v1452_v7 = vsel %vm674_vm8, %v1451_v17, 0.0  ;;  %v1387_v17 = vmul.f32 %v5133_v15, %v5018_v5 }
0x156a   :  { %1457 = vadd.xlane.f32.xlu2 %v1456_v35  ;;  %1453 = vadd.xlane.f32.xlu0 %v1452_v7 }
0x156b   :  { %v1388_v35 = vsel %vm674_vm8, %v1387_v17, 0.0 }
0x157e   :  { %1527 = vrot.lane.b32.xlu0 %v1504_v18, %s4447_s6 }
0x15dd   :  { %v1458_v57 = vpop.xlane.xlu2 %1457  ;;  %v1454_v63 = vpop.xlane.xlu0 %1453 }
0x15de   :  { %v1460_v44 = vmul.f32 %v5150_v43, %v1458_v57  ;;  %v1459_v11 = vmul.f32 %v5154_v8, %v1454_v63  ;;  %v1391_v57 = vmul.f32 %v5133_v15, %v5003_v62 }
0x15e0   :  { %v1461_v49 = vadd.f32 %v1460_v44, %v1459_v11  ;;  %v1392_v63 = vsel %vm674_vm8, %v1391_v57, 0.0  ;;  %v5241_v57 = vld [vmem:[%s6119_s22] ss:$0 sm:$0xff] }
0x15e2   :  { %v1462_v61 = vadd.f32 %v5158_v47, %v1461_v49 }
0x15e4   :  { %3924 = vmatmul.msk.f32.vlgmr.msrb.gmra.mxu1 %vm194_vm0, %v1462_v61 }
0x15e5   :  { %1959 = vmatpush.msrb.mxu1 %v5163_v50 }
0x15e7   :  { %1960 = vmatpush.msrb.mxu1 %v5167_v6 }
0x15e9   :  { %1961 = vmatpush.msrb.mxu1 %v5171_v39 }
0x15eb   :  { %1962 = vmatpush.msrb.mxu1 %v5175_v54 }
0x15f0   :  { %v1528_v10 = vpop.permute.xlu0 %1527 }
0x1661   :  { %v1483_v38 = vpop.f32.mrf.mxu1 }
0x1662   :  { %v1484_v45 = vadd.f32 %v5179_v41, %v1483_v38 }
0x1664   :  { %v1506_v55 = vadd.f32 %v1504_v18, %v1484_v45 }
0x1666   :  { %v3926_v19 = vmul.f32 -1.442695, %v1506_v55  ;;  %v1400_v55 = vsub.f32 1.0, %v5133_v15 }
0x1668   :  { %4161 = vpow2.f32 %v3926_v19 }
0x166e   :  { %v4162_v27 = vpop.eup %4161 }
0x166f   :  { %v1510_v20 = vadd.f32 1.0, %v4162_v27 }
0x1671   :  { %4163 = vrcp.f32 %v1510_v20  ;;  %v1522_v37 = vand.u32 2147483648, %v1510_v20  ;;  %v1520_v29 = vand.u32 2147483647, %v1510_v20  ;;  %vm1516_vm6 = vweird.f32 %v1510_v20 }
0x1673   :  { %v1523_v34 = vor.u32 1.1754944e-38, %v1522_v37  ;;  %vm1521_vm14 = vcmp.eq.f32.partialorder %v1520_v29, 8.507059e+37 }
0x1677   :  { %v4164_v28 = vpop.eup %4163 }
0x1678   :  { %v1512_v31 = vmul.f32 %v4164_v28, %v1510_v20  ;;  %vm1517_vm12 = vweird.f32 %v4164_v28 }
0x1679   :  { %vm1518_vm13 = vmor %vm1516_vm6, %vm1517_vm12 }
0x167a   :  { %v1513_v26 = vsub.f32 1.0, %v1512_v31  ;;  %v1401_v31 = vmul.f32 %v1400_v55, %v5003_v62 }
0x167c   :  { %v1514_v52 = vmul.f32 %v4164_v28, %v1513_v26 }
0x167e   :  { %v1515_v30 = vadd.f32 %v4164_v28, %v1514_v52  ;;  %v1409_v52 = vsel %vm441_vm4, 0.0, %v5003_v62  ;;  %v5216_v62 = vld [vmem:[%s6117_s16 + $0x18] sm:$0xff] }
0x1680   :  { %v1519_v22 = vsel %vm1518_vm13, %v4164_v28, %v1515_v30 }
0x1681   :  { %v1524_v2 = vsel %vm1521_vm14, %v1523_v34, %v1519_v22 }
0x1682   :  { %v1530_v53 = vmul.f32 %v1528_v10, %v1524_v2  ;;  %v1537_v44 = vsub.f32 1.0, %v1524_v2  ;;  %v1543_v49 = vmul.f32 %v1524_v2, %v4990_v42  ;;  %v5220_v10 = vld [vmem:[%s6117_s16 + $0x10] sm:$0xff]  ;;  %v5224_v2 = vld [vmem:[%s6117_s16 + $0x8] sm:$0xff] }
0x1684   :  { %1532 = vrot.lane.b32.xlu2 %v1530_v53, %s4447_s6  ;;  %v5228_v53 = vld [vmem:[%s6117_s16] sm:$0xff] }
0x16ad   :  { %1389 = vadd.xlane.f32.xlu2 %v1388_v35 }
0x16de   :  { %v1533_v7 = vpop.permute.xlu2 %1532 }
0x16df   :  { %v1535_v12 = vadd.f32 %v1533_v7, %v1484_v45 }
0x16e1   :  { %4165 = vtanh.f32 %v1535_v12  ;;  %v5237_v12 = vld [vmem:[%s6119_s22 + $0x1] ss:$0 sm:$0xff] }
0x16e7   :  { %v4166_v18 = vpop.eup %4165 }
0x16e8   :  { %1539 = vrot.lane.b32.xlu0 %v4166_v18, %s4448_s18 }
0x1712   :  { %1393 = vadd.xlane.f32.xlu0 %v1392_v63 }
0x1720   :  { %v1390_v38 = vpop.xlane.xlu2 %1389 }
0x175a   :  { %v1540_v11 = vpop.permute.xlu0 %1539 }
0x175b   :  { %v1542_v5 = vmul.f32 %v1540_v11, %v1537_v44 }
0x175d   :  { %v5191_v61 = vadd.f32 %v1543_v49, %v1542_v5 }
0x175f   :  { %1572 = vrot.lane.b32.xlu1 %v5191_v61, %s4448_s18 }
0x1785   :  { %v1394_v45 = vpop.xlane.xlu0 %1393 }
0x1786   :  { %v1395_v19 = vsub.f32 %v1390_v38, %v1394_v45  ;;  %v1397_v27 = vsub.f32 %v1394_v45, %v1390_v38  ;;  %v5247_v38 = vld [vmem:[%s6120_s26] ss:$0 sm:$0xff] }
0x1788   :  { %v1396_v20 = vmax.f32 %v1395_v19, 0.0  ;;  %v1398_v28 = vmax.f32 %v1397_v27, 0.0 }
0x178a   :  { %v1402_v26 = vmul.f32 %v5133_v15, %v1398_v28  ;;  %v3921_v37 = vadd.f32 -1.0, %v1396_v20  ;;  %v5233_v35 = vsel %vm1399_vm15, %v1396_v20, 1.0 }
0x178b   :  { %v1545_v7 = vperm.slane %v5233_v35, 0  ;;  %v1546_v49 = vperm.slane %v5233_v35, 1 }
0x178c   :  { %v1403_v42 = vadd.f32 %v1402_v26, %v1401_v31 }
0x178d   :  { %v1547_v63 = vmul.f32 %v5241_v57, %v1545_v7  ;;  %v1548_v55 = vmul.f32 %v5241_v57, %v1546_v49  ;;  %v5264_v7 = vld [vmem:[%s6118_s23 + $0x8] sm:$0xff] }
0x178e   :  { %v1405_v29 = vsel %vm441_vm4, %v3921_v37, %v1403_v42 }
0x178f   :  { %v5206_v30 = vsel %vm1399_vm15, %v1405_v29, %v1409_v52 }
0x1790   :  { %v1549_v15 = vperm.slane %v5206_v30, 0  ;;  %v1556_v34 = vperm.slane %v5206_v30, 1  ;;  %vm1421_vm13 = vcmp.ne.f32.partialorder %v5206_v30, 0.0  ;;  %vm1422_vm14 = vcmp.lt.f32.partialorder %v5206_v30, %v5233_v35 }
0x1792   :  { %1554 = vperm.xlu1 %4075, %v1549_v15  }
0x179a   :  { %1561 = vperm.xlu1 %4075, %v1556_v34   ;;  %v5256_v34 = vld [vmem:[%s6118_s23 + $0x18] sm:$0xff] }
0x17a2   :  { %4076 = vset.pattern.permute.xlu1 %v6081_v33 }
0x17d1   :  { %v5211_v22 = vpop.permute.xlu1 %1572 }
0x17d2   :  { %3927 = vmatmul.msk.f32.vlgmr.msra.gmra.mxu1 %vm194_vm0, %v5211_v22 }
0x17d3   :  { %2069 = vmatpush.msra.mxu1 %v5216_v62 }
0x17d5   :  { %2070 = vmatpush.msra.mxu1 %v5220_v10 }
0x17d7   :  { %2071 = vmatpush.msra.mxu1 %v5224_v2 }
0x17d9   :  { %2072 = vmatpush.msra.mxu1 %v5228_v53 }
0x1804   :  { %v1555_v17 = vpop.permute.xlu1 %1554 }
0x1805   :  { %v1563_v18 = vmul.f32 %v5237_v12, %v1555_v17  ;;  %v5260_v17 = vld [vmem:[%s6118_s23 + $0x10] sm:$0xff] }
0x1807   :  { %v1565_v11 = vadd.f32 %v1563_v18, %v1547_v63  ;;  %v5268_v63 = vld [vmem:[%s6118_s23] sm:$0xff] }
0x1809   :  { %v1567_v45 = vadd.f32 %v5247_v38, %v1565_v11 }
0x180b   :  { %v1569_v20 = vadd.f32 %v1567_v45, %v4733_v23 }
0x180c   :  { %v1562_v44 = vpop.permute.xlu1 %1561 }
0x180d   :  { %v1564_v5 = vmul.f32 %v5237_v12, %v1562_v44 }
0x180f   :  { %v1566_v19 = vadd.f32 %v1564_v5, %v1548_v55 }
0x1811   :  { %v1568_v26 = vadd.f32 %v5247_v38, %v1566_v19 }
0x1813   :  { %v1570_v52 = vadd.f32 %v1568_v26, %v4735_v24 }
0x184f   :  { %v1593_v27 = vpop.f32.mrf.mxu1 }
0x1850   :  { %v1597_v28 = vrot.slane %v1593_v27, 1  ;;  %v1598_v31 = vperm.slane %v1593_v27, 0 }
0x1852   :  { %v1602_v42 = vadd.f32 %v1598_v31, %v1569_v20  ;;  %v1599_v37 = vperm.slane %v1597_v28, 0 }
0x1854   :  { %4167 = vtanh.f32 %v1602_v42  ;;  %v1603_v29 = vadd.f32 %v1599_v37, %v1570_v52 }
0x1856   :  { %4169 = vtanh.f32 %v1603_v29 }
0x185a   :  { %v4168_v15 = vpop.eup %4167 }
0x185b   :  { %3928 = vmatmul.msk.f32.vlgmr.msrb.gmra.mxu2 %vm194_vm0, %v4168_v15 }
0x185c   :  { %2586 = vmatpush.msrb.mxu2 %v5256_v34  ;;  %v4170_v18 = vpop.eup %4169 }
0x185e   :  { %2587 = vmatpush.msrb.mxu2 %v5260_v17 }
0x1860   :  { %2588 = vmatpush.msrb.mxu2 %v5264_v7 }
0x1862   :  { %2589 = vmatpush.msrb.mxu2 %v5268_v63 }
0x1863   :  { %3929 = vmatmul.msk.f32.gmra.mxu2 %vm194_vm0, %v4170_v18 }
0x18de   :  { %v1629_v44 = vpop.f32.mrf.mxu2 }
0x18df   :  { %1638 = vperm.xlu1 %4076, %v1629_v44  }
0x18e6   :  { %v1632_v11 = vpop.f32.mrf.mxu2 }
0x18e7   :  { %1641 = vperm.xlu2 %4070, %v1632_v11  }
0x1941   :  { %v1642_v49 = vpop.permute.xlu2 %1641 }
0x1942   :  { %v1644_v45 = vperm.slane %v1642_v49, %v4851_v0 }
0x1951   :  { %v1639_v5 = vpop.permute.xlu1 %1638 }
0x1952   :  { %v1643_v55 = vperm.slane %v1639_v5, %v4851_v0 }
0x1954   :  { %v1645_v19 = vsel %vm424_vm3, %v1644_v45, %v1643_v55 }
0x1955   :  { %v1647_v27 = vsel %vm674_vm8, %v1645_v19, -inf }
0x1956   :  { %1648 = vmax.xlane.f32.xlu0 %v1647_v27 }
0x19c9   :  { %v1649_v20 = vpop.xlane.xlu0 %1648 }
0x19ca   :  { %v1651_v28 = vperm.slane %v1649_v20, 0  ;;  %v1652_v31 = vperm.slane %v1649_v20, 1 }
0x19cc   :  { %v1655_v26 = vsub.f32 %v1629_v44, %v1651_v28  ;;  %v1656_v42 = vsub.f32 %v1632_v11, %v1652_v31 }
0x19ce   :  { %v1657_v37 = vmul.f32 1.442695, %v1655_v26  ;;  %v1659_v52 = vmul.f32 1.442695, %v1656_v42 }
0x19d0   :  { %4171 = vpow2.f32 %v1657_v37 }
0x19d1   :  { %4173 = vpow2.f32 %v1659_v52 }
0x19d6   :  { %v4172_v29 = vpop.eup %4171 }
0x19d7   :  { %v4174_v15 = vpop.eup %4173  ;;  %1664 = vperm.xlu1 %4076, %v4172_v29  }
0x19d8   :  { %1667 = vperm.xlu0 %4074, %v4174_v15  }
0x1a49   :  { %v1665_v18 = vpop.permute.xlu1 %1664 }
0x1a4a   :  { %v1668_v49 = vpop.permute.xlu0 %1667  ;;  %v1669_v5 = vperm.slane %v1665_v18, %v4851_v0 }
0x1a4b   :  { %v1670_v45 = vperm.slane %v1668_v49, %v4851_v0 }
0x1a4d   :  { %v1671_v55 = vsel %vm424_vm3, %v1670_v45, %v1669_v5 }
0x1a4e   :  { %v1673_v19 = vsel %vm674_vm8, %v1671_v55, 0.0 }
0x1a4f   :  { %1674 = vadd.xlane.f32.xlu1 %v1673_v19 }
0x1ac2   :  { %v1675_v44 = vpop.xlane.xlu1 %1674 }
0x1ac3   :  { %v1677_v11 = vperm.slane %v1675_v44, 0  ;;  %v1678_v27 = vperm.slane %v1675_v44, 1 }
0x1ac5   :  { %4175 = vrcp.f32 %v1677_v11  ;;  %v1692_v52 = vand.u32 2147483648, %v1677_v11  ;;  %v1690_v49 = vand.u32 2147483647, %v1677_v11  ;;  %vm1686_vm5 = vweird.f32 %v1677_v11 }
0x1ac6   :  { %4177 = vrcp.f32 %v1678_v27  ;;  %v1707_v13 = vand.u32 2147483648, %v1678_v27  ;;  %vm1701_vm11 = vweird.f32 %v1678_v27  ;;  %v1705_v1 = vand.u32 2147483647, %v1678_v27 }
0x1ac7   :  { %v1693_v45 = vor.u32 1.1754944e-38, %v1692_v52  ;;  %vm1691_vm9 = vcmp.eq.f32.partialorder %v1690_v49, 8.507059e+37 }
0x1ac8   :  { %vm1706_vm6 = vcmp.eq.f32.partialorder %v1705_v1, 8.507059e+37 }
0x1acb   :  { %v4176_v20 = vpop.eup %4175 }
0x1acc   :  { %v4178_v28 = vpop.eup %4177  ;;  %v1682_v31 = vmul.f32 %v4176_v20, %v1677_v11  ;;  %vm1687_vm2 = vweird.f32 %v4176_v20 }
0x1acd   :  { %v1697_v26 = vmul.f32 %v4178_v28, %v1678_v27  ;;  %vm1688_vm7 = vmor %vm1686_vm5, %vm1687_vm2  ;;  %vm1702_vm10 = vweird.f32 %v4178_v28 }
0x1ace   :  { %v1683_v42 = vsub.f32 1.0, %v1682_v31  ;;  %vm1703_vm12 = vmor %vm1701_vm11, %vm1702_vm10 }
0x1acf   :  { %v1698_v37 = vsub.f32 1.0, %v1697_v26  ;;  %v1708_v26 = vor.u32 1.1754944e-38, %v1707_v13  ;;  %vm1423_vm2 = vmand %vm1421_vm13, %vm1422_vm14 }
0x1ad0   :  { %v1684_v18 = vmul.f32 %v4176_v20, %v1683_v42 }
0x1ad1   :  { %v1699_v33 = vmul.f32 %v4178_v28, %v1698_v37 }
0x1ad2   :  { %v1685_v5 = vadd.f32 %v4176_v20, %v1684_v18 }
0x1ad3   :  { %v1700_v19 = vadd.f32 %v4178_v28, %v1699_v33 }
0x1ad4   :  { %v1689_v55 = vsel %vm1688_vm7, %v4176_v20, %v1685_v5  ;;  %vm1428_vm7 = vcmp.eq.f32.partialorder %v5233_v35, 0.0 }
0x1ad5   :  { %v1694_v44 = vsel %vm1691_vm9, %v1693_v45, %v1689_v55  ;;  %v1704_v31 = vsel %vm1703_vm12, %v4178_v28, %v1700_v19 }
0x1ad6   :  { %v1695_v32 = vmul.f32 %v4172_v29, %v1694_v44  ;;  %v1709_v42 = vsel %vm1706_vm6, %v1708_v26, %v1704_v31  ;;  %v5288_v26 = vld [vmem:[%s6121_s1 + $0x18] sm:$0xff] }
0x1ad7   :  { %v1710_v37 = vmul.f32 %v4174_v15, %v1709_v42  ;;  %v5292_v42 = vld [vmem:[%s6121_s1 + $0x10] sm:$0xff] }
0x1ad8   :  { %1713 = vperm.xlu2 %4070, %v1695_v32  }
0x1ae0   :  { %1718 = vperm.xlu2 %4070, %v1710_v37   ;;  %v5296_v37 = vld [vmem:[%s6121_s1 + $0x8] sm:$0xff] }
0x1ae8   :  { %4077 = vset.pattern.permute.xlu2 %v4631_v3 }
0x1b32   :  { %v1714_v11 = vpop.permute.xlu2 %1713 }
0x1b33   :  { %v1721_v20 = vmul.f32 %v1714_v11, %v4696_v60  ;;  %v5300_v11 = vld [vmem:[%s6121_s1] sm:$0xff] }
0x1b35   :  { %v1723_v33 = vsel %vm194_vm0, %v1721_v20, 0.0 }
0x1b36   :  { %v1724_v52 = vrot.slane %v1723_v33, 4 }
0x1b38   :  { %v1725_v18 = vadd.f32 %v1724_v52, %v1723_v33 }
0x1b3a   :  { %v1719_v29 = vpop.permute.xlu2 %1718  ;;  %v1726_v32 = vrot.slane %v1725_v18, 2 }
0x1b3b   :  { %v1722_v27 = vmul.f32 %v1719_v29, %v4694_v59 }
0x1b3c   :  { %v1727_v15 = vadd.f32 %v1726_v32, %v1725_v18 }
0x1b3d   :  { %v1730_v13 = vsel %vm194_vm0, %v1722_v27, 0.0 }
0x1b3e   :  { %v1731_v1 = vrot.slane %v1730_v13, 4  ;;  %v1728_v5 = vrot.slane %v1727_v15, 1 }
0x1b40   :  { %v1732_v28 = vadd.f32 %v1731_v1, %v1730_v13  ;;  %v1729_v19 = vadd.f32 %v1728_v5, %v1727_v15  ;;  %v1411_v13 = vand.u32 2147483647, %v5206_v30  ;;  %v5330_v5 = vld [vmem:[%s6122_s28 + $0x8] sm:$0xff] }
0x1b42   :  { %v1733_v49 = vrot.slane %v1732_v28, 2  ;;  %v1412_v1 = vsel %vm674_vm8, %v1411_v13, -inf }
0x1b44   :  { %v1734_v45 = vadd.f32 %v1733_v49, %v1732_v28  ;;  %v5322_v28 = vld [vmem:[%s6122_s28 + $0x18] sm:$0xff]  ;;  %v5326_v49 = vld [vmem:[%s6122_s28 + $0x10] sm:$0xff] }
0x1b46   :  { %v1735_v55 = vrot.slane %v1734_v45, 1 }
0x1b48   :  { %v1736_v44 = vadd.f32 %v1735_v55, %v1734_v45  ;;  %v5334_v55 = vld [vmem:[%s6122_s28] sm:$0xff] }
0x1b4a   :  { %v1739_v31 = vsel %vm424_vm3, %v1736_v44, %v1729_v19 }
0x1b4b   :  { %3930 = vmatmul.msk.f32.vlgmr.msra.gmra.mxu3 %vm194_vm0, %v1739_v31 }
0x1b4c   :  { %2235 = vmatpush.msra.mxu3 %v5288_v26 }
0x1b4e   :  { %2236 = vmatpush.msra.mxu3 %v5292_v42 }
0x1b50   :  { %2237 = vmatpush.msra.mxu3 %v5296_v37 }
0x1b52   :  { %2238 = vmatpush.msra.mxu3 %v5300_v11 }
0x1b53   :  { %3938 = vmatmul.msk.f32.vlgmr.msrb.gmra.mxu3 %vm194_vm0, %v5211_v22  ;;  %v1429_v22 = vmul.f32 %v5206_v30, %v5045_v9 }
0x1b54   :  { %2460 = vmatpush.msrb.mxu3 %v5063_v40 }
0x1b55   :  { %v1430_v32 = vsel %vm674_vm8, %v1429_v22, 0.0 }
0x1b56   :  { %2461 = vmatpush.msrb.mxu3 %v5067_v25 }
0x1b58   :  { %2462 = vmatpush.msrb.mxu3 %v5071_v51 }
0x1b5a   :  { %2463 = vmatpush.msrb.mxu3 %v5075_v58 }
0x1bce   :  { %v1759_v20 = vpop.f32.mrf.mxu3 }
0x1bcf   :  { %v1763_v33 = vrot.slane %v1759_v20, 1  ;;  %v1764_v52 = vperm.slane %v1759_v20, 0 }
0x1bd1   :  { %v1765_v18 = vperm.slane %v1763_v33, 0  ;;  %1766 = vrot.lane.b32.xlu0 %v1764_v52, %s4449_s2 }
0x1bd3   :  { %1768 = vrot.lane.b32.xlu2 %v1765_v18, %s4449_s2 }
0x1c2d   :  { %v1769_v29 = vpop.permute.xlu2 %1768 }
0x1c2e   :  { %v1773_v27 = vadd.f32 %v1769_v29, %v4735_v24  ;;  %v6125_v29 = vmov 0.0  }
0x1c30   :  { %4179 = vtanh.f32 %v1773_v27  ;;  %v3923_v27 = vsel %vm1423_vm2, 1.0, %v6125_v29 }
0x1c36   :  { %v4180_v40 = vpop.eup %4179 }
0x1c37   :  { %1780 = vrot.lane.b32.xlu2 %v4180_v40, %s4448_s18 }
0x1c43   :  { %v1767_v25 = vpop.permute.xlu0 %1766 }
0x1c44   :  { %v1772_v51 = vadd.f32 %v1767_v25, %v4733_v23  ;;  %v1426_v25 = vsel %vm1399_vm15, 1.0, %v6125_v29 }
0x1c46   :  { %4181 = vtanh.f32 %v1772_v51 }
0x1c4c   :  { %v4182_v58 = vpop.eup %4181 }
0x1c4d   :  { %1778 = vrot.lane.b32.xlu0 %v4182_v58, %s4448_s18  ;;  %v1427_v58 = vsel %vm441_vm4, %v1426_v25, %v3923_v27 }
0x1c60   :  { %1431 = vadd.xlane.f32.xlu2 %v1430_v32 }
0x1c77   :  { %1413 = vmax.xlane.f32.xlu0 %v1412_v1 }
0x1c91   :  { %v1781_v45 = vpop.permute.xlu2 %1780 }
0x1cbf   :  { %v1779_v15 = vpop.permute.xlu0 %1778 }
0x1cc0   :  { %3931 = vmatmul.msk.f32.vlgmr.msra.gmra.mxu0 %vm194_vm0, %v1779_v15 }
0x1cc1   :  { %2760 = vmatpush.msra.mxu0 %v5322_v28 }
0x1cc3   :  { %2761 = vmatpush.msra.mxu0 %v5326_v49 }
0x1cc5   :  { %2762 = vmatpush.msra.mxu0 %v5330_v5 }
0x1cc7   :  { %2763 = vmatpush.msra.mxu0 %v5334_v55 }
0x1cc8   :  { %3932 = vmatmul.msk.f32.gmra.mxu0 %vm194_vm0, %v1781_v45 }
0x1cd3   :  { %v1432_v33 = vpop.xlane.xlu2 %1431 }
0x1cd4   :  { %vm1433_vm5 = vcmp.eq.f32.partialorder %v1432_v33, 0.0 }
0x1cd5   :  { %vm1434_vm9 = vmor %vm1428_vm7, %vm1433_vm5  ;;  %vm1930_vm7 = vcmp.eq.s32.totalorder %v4851_v0, 2 }
0x1cd6   :  { %v1437_v22 = vsel %vm1434_vm9, %v4937_v46, %v1427_v58 }
0x1cea   :  { %v5338_v19 = vpop.xlane.xlu0 %1413 }
0x1ceb   :  { %v1438_v44 = vsel %vm957_vm1, %v5338_v19, -inf }
0x1cec   :  { %v1439_v31 = vrot.slane %v1438_v44, 4 }
0x1cee   :  { %v1440_v20 = vmax.f32 %v1438_v44, %v1439_v31 }
0x1cf0   :  { %v1441_v52 = vrot.slane %v1440_v20, 2 }
0x1cf2   :  { %v1442_v18 = vmax.f32 %v1440_v20, %v1441_v52 }
0x1cf4   :  { %v1443_v40 = vrot.slane %v1442_v18, 1 }
0x1cf6   :  { %v1444_v51 = vmax.f32 %v1442_v18, %v1443_v40 }
0x1cf8   :  { %vm1445_vm10 = vcmp.eq.f32.partialorder %v1444_v51, 0.0 }
0x1cf9   :  { %v1448_v32 = vsel %vm1445_vm10, 0.0, %v1437_v22 }
0x1cfa   :  { %v1809_v13 = vsel %vm674_vm8, %v1448_v32, 0.0 }
0x1cfb   :  { %1810 = vadd.xlane.f32.xlu1 %v1809_v13 }
0x1d3d   :  { %v1803_v1 = vpop.f32.mrf.mxu0 }
0x1d3e   :  { %1820 = vperm.xlu1 %4076, %v1803_v1  }
0x1d45   :  { %v1806_v15 = vpop.f32.mrf.mxu0 }
0x1d46   :  { %1823 = vperm.xlu1 %4076, %v1806_v15  }
0x1d4e   :  { %4078 = vset.pattern.permute.xlu1 %v4631_v3 }
0x1d6e   :  { %v1811_v45 = vpop.xlane.xlu1 %1810 }
0x1d6f   :  { %vm1812_vm15 = vcmp.gt.f32.partialorder %v1811_v45, 0.0 }
0x1d70   :  { %v1815_v31 = vsel %vm1812_vm15, %v1448_v32, %v4937_v46 }
0x1d71   :  { %vm1816_vm11 = vcmp.gt.f32.partialorder %v1815_v31, 0.0 }
0x1db0   :  { %v1821_v56 = vpop.permute.xlu1 %1820 }
0x1db1   :  { %v1825_v20 = vperm.slane %v1821_v56, %v4851_v0 }
0x1db8   :  { %v1824_v44 = vpop.permute.xlu1 %1823 }
0x1db9   :  { %v1826_v33 = vperm.slane %v1824_v44, %v4851_v0 }
0x1dbb   :  { %v1827_v52 = vsel %vm424_vm3, %v1826_v33, %v1825_v20 }
0x1dbc   :  { %v1829_v18 = vsel %vm1816_vm11, %v1827_v52, -1e+09 }
0x1dbd   :  { %v1830_v27 = vsel %vm674_vm8, %v1829_v18, -inf }
0x1dbe   :  { %1831 = vmax.xlane.f32.xlu0 %v1830_v27 }
0x1e31   :  { %v1832_v40 = vpop.xlane.xlu0 %1831 }
0x1e32   :  { %v1833_v25 = vsub.f32 %v1829_v18, %v1832_v40 }
0x1e34   :  { %v1834_v51 = vmul.f32 1.442695, %v1833_v25 }
0x1e36   :  { %4183 = vpow2.f32 %v1834_v51 }
0x1e3c   :  { %v4184_v58 = vpop.eup %4183 }
0x1e3d   :  { %v1836_v22 = vsel %vm674_vm8, %v4184_v58, 0.0 }
0x1e3e   :  { %1837 = vadd.xlane.f32.xlu2 %v1836_v22 }
0x1eb1   :  { %v1838_v32 = vpop.xlane.xlu2 %1837 }
0x1eb2   :  { %4185 = vrcp.f32 %v1838_v32  ;;  %v1850_v45 = vand.u32 2147483648, %v1838_v32  ;;  %v1848_v44 = vand.u32 2147483647, %v1838_v32  ;;  %vm1844_vm6 = vweird.f32 %v1838_v32 }
0x1eb4   :  { %v1851_v20 = vor.u32 1.1754944e-38, %v1850_v45  ;;  %vm1849_vm14 = vcmp.eq.f32.partialorder %v1848_v44, 8.507059e+37  ;;  %v5382_v44 = vld [vmem:[%s4459_s5] sm:$0x3] }
0x1eb8   :  { %v4186_v13 = vpop.eup %4185 }
0x1eb9   :  { %v1840_v1 = vmul.f32 %v4186_v13, %v1838_v32  ;;  %vm1845_vm12 = vweird.f32 %v4186_v13 }
0x1eba   :  { %vm1846_vm13 = vmor %vm1844_vm6, %vm1845_vm12 }
0x1ebb   :  { %v1841_v15 = vsub.f32 1.0, %v1840_v1 }
0x1ebd   :  { %v1842_v56 = vmul.f32 %v4186_v13, %v1841_v15 }
0x1ebf   :  { %v1843_v31 = vadd.f32 %v4186_v13, %v1842_v56 }
0x1ec1   :  { %v1847_v33 = vsel %vm1846_vm13, %v4186_v13, %v1843_v31 }
0x1ec2   :  { %v1852_v52 = vsel %vm1849_vm14, %v1851_v20, %v1847_v33 }
0x1ec3   :  { %v1853_v18 = vmul.f32 %v4184_v58, %v1852_v52 }
0x1ec5   :  { %v1854_v27 = vsel %vm674_vm8, %v1853_v18, -inf }
0x1ec6   :  { %1855 = vmax.xlane.f32.xlu1 %v1854_v27 }
0x1f39   :  { %v5362_v40 = vpop.xlane.xlu1 %1855 }
0x1f3a   :  { %vm1857_vm2 = vcmp.ge.f32.partialorder %v1853_v18, %v5362_v40  ;;  %v1984_v18 = vpop.f32.mrf.mxu3 }
0x1f3b   :  { %v1858_v25 = vsel %vm1857_vm2, %v4949_v36, 8.0 }
0x1f3c   :  { %v1859_v51 = vsel %vm674_vm8, %v1858_v25, inf }
0x1f3d   :  { %1860 = vmin.xlane.f32.xlu0 %v1859_v51 }
0x1fb0   :  { %v1861_v22 = vpop.xlane.xlu0 %1860 }
0x1fb1   :  { %vm4002_vm5 = vcmp.lt.s32.totalorder %v1861_v22, 0  ;;  %v4003_v32 = vceil.f32 %v1861_v22  ;;  %v4004_v13 = vfloor.f32 %v1861_v22 }
0x1fb3   :  { %v4005_v58 = vsel %vm4002_vm5, %v4003_v32, %v4004_v13 }
0x1fb4   :  { %v5368_v1 = vcvt.f32.s32 %v4005_v58 }
0x1fb6   :  { %vm1865_vm9 = vcmp.eq.s32.totalorder %v4851_v0, %v5368_v1  ;;  %v5374_v15 = vsel %vm1930_vm7, %v5368_v1, %v5130_v4  ;;  %vm1880_vm6 = vcmp.ne.s32.totalorder %v5368_v1, 0 }
0x1fb7   :  { %v5377_v45 = vsel %vm1865_vm9, 1.0, %v6125_v29 }
0x1fb8   :  { %v1936_v56 = vmul.f32 %v5136_v16, %v5377_v45  ;;  %v1932_v31 = vmul.f32 %v5382_v44, %v5377_v45  ;;  %v1868_v20 = vmul.f32 %v5377_v45, %v5233_v35  ;;  %v1985_v16 = vadd.f32 %v5145_v14, %v1984_v18 }
0x1fba   :  { %v1937_v33 = vsel %vm674_vm8, %v1936_v56, 0.0  ;;  %v1933_v52 = vsel %vm674_vm8, %v1932_v31, 0.0  ;;  %v1869_v4 = vsel %vm674_vm8, %v1868_v20, 0.0 }
0x1fbb   :  { %1938 = vadd.xlane.f32.xlu0 %v1937_v33  ;;  %1934 = vadd.xlane.f32.xlu2 %v1933_v52 }
0x1fbc   :  { %1870 = vadd.xlane.f32.xlu1 %v1869_v4 }
0x1fd3   :  { %2008 = vrot.lane.b32.xlu2 %v1985_v16, %s4447_s6 }
0x202e   :  { %v1939_v27 = vpop.xlane.xlu0 %1938  ;;  %v1935_v25 = vpop.xlane.xlu2 %1934 }
0x202f   :  { %v1941_v51 = vmul.f32 %v5150_v43, %v1939_v27  ;;  %v1940_v35 = vmul.f32 %v5154_v8, %v1935_v25 }
0x2031   :  { %v1942_v22 = vadd.f32 %v1941_v51, %v1940_v35  ;;  %v1872_v51 = vmul.f32 %v5377_v45, %v5206_v30 }
0x2033   :  { %v1943_v32 = vadd.f32 %v5158_v47, %v1942_v22  ;;  %v1873_v35 = vsel %vm674_vm8, %v1872_v51, 0.0 }
0x2035   :  { %3937 = vmatmul.msk.f32.vlgmr.msrb.gmra.mxu1 %vm194_vm0, %v1943_v32 }
0x2036   :  { %2440 = vmatpush.msrb.mxu1 %v5163_v50 }
0x2038   :  { %2441 = vmatpush.msrb.mxu1 %v5167_v6 }
0x203a   :  { %2442 = vmatpush.msrb.mxu1 %v5171_v39 }
0x203c   :  { %2443 = vmatpush.msrb.mxu1 %v5175_v54 }
0x20b2   :  { %v1964_v14 = vpop.f32.mrf.mxu1 }
0x20b3   :  { %v1965_v13 = vadd.f32 %v5179_v41, %v1964_v14  ;;  %v2009_v41 = vpop.permute.xlu2 %2008 }
0x20b5   :  { %v1987_v58 = vadd.f32 %v1985_v16, %v1965_v13 }
0x20b7   :  { %v3939_v43 = vmul.f32 -1.442695, %v1987_v58 }
0x20b9   :  { %4187 = vpow2.f32 %v3939_v43 }
0x20bf   :  { %v4188_v8 = vpop.eup %4187 }
0x20c0   :  { %v1991_v56 = vadd.f32 1.0, %v4188_v8 }
0x20c2   :  { %4189 = vrcp.f32 %v1991_v56  ;;  %v2003_v33 = vand.u32 2147483648, %v1991_v56  ;;  %v2001_v6 = vand.u32 2147483647, %v1991_v56  ;;  %vm1997_vm15 = vweird.f32 %v1991_v56 }
0x20c4   :  { %v2004_v39 = vor.u32 1.1754944e-38, %v2003_v33  ;;  %vm2002_vm12 = vcmp.eq.f32.partialorder %v2001_v6, 8.507059e+37 }
0x20c8   :  { %v4190_v47 = vpop.eup %4189 }
0x20c9   :  { %v1993_v31 = vmul.f32 %v4190_v47, %v1991_v56  ;;  %vm1998_vm10 = vweird.f32 %v4190_v47  ;;  %v1881_v56 = vsub.f32 1.0, %v5377_v45 }
0x20ca   :  { %vm1999_vm11 = vmor %vm1997_vm15, %vm1998_vm10 }
0x20cb   :  { %v1994_v20 = vsub.f32 1.0, %v1993_v31 }
0x20cd   :  { %v1995_v50 = vmul.f32 %v4190_v47, %v1994_v20 }
0x20cf   :  { %v1996_v52 = vadd.f32 %v4190_v47, %v1995_v50  ;;  %v1882_v50 = vmul.f32 %v1881_v56, %v5206_v30 }
0x20d1   :  { %v2000_v54 = vsel %vm1999_vm11, %v4190_v47, %v1996_v52 }
0x20d2   :  { %v2005_v4 = vsel %vm2002_vm12, %v2004_v39, %v2000_v54  ;;  %v1890_v39 = vsel %vm441_vm4, 0.0, %v5206_v30 }
0x20d3   :  { %v2011_v18 = vmul.f32 %v2009_v41, %v2005_v4  ;;  %v2018_v22 = vsub.f32 1.0, %v2005_v4  ;;  %v2024_v14 = vmul.f32 %v2005_v4, %v5191_v61 }
0x20d5   :  { %2013 = vrot.lane.b32.xlu0 %v2011_v18, %s4447_s6 }
0x2147   :  { %v2014_v16 = vpop.permute.xlu0 %2013 }
0x2148   :  { %v2016_v27 = vadd.f32 %v2014_v16, %v1965_v13  ;;  %v1871_v13 = vpop.xlane.xlu1 %1870 }
0x214a   :  { %4191 = vtanh.f32 %v2016_v27 }
0x2150   :  { %v4192_v25 = vpop.eup %4191 }
0x2151   :  { %2020 = vrot.lane.b32.xlu0 %v4192_v25, %s4448_s18 }
0x217b   :  { %1874 = vadd.xlane.f32.xlu0 %v1873_v35 }
0x21c3   :  { %v2021_v32 = vpop.permute.xlu0 %2020 }
0x21c4   :  { %v2023_v58 = vmul.f32 %v2021_v32, %v2018_v22 }
0x21c6   :  { %v5408_v43 = vadd.f32 %v2024_v14, %v2023_v58 }
0x21c8   :  { %2053 = vrot.lane.b32.xlu2 %v5408_v43, %s4448_s18 }
0x21ee   :  { %v1875_v8 = vpop.xlane.xlu0 %1874 }
0x21ef   :  { %v1876_v47 = vsub.f32 %v1871_v13, %v1875_v8  ;;  %v1878_v31 = vsub.f32 %v1875_v8, %v1871_v13 }
0x21f1   :  { %v1877_v20 = vmax.f32 %v1876_v47, 0.0  ;;  %v1879_v33 = vmax.f32 %v1878_v31, 0.0 }
0x21f3   :  { %v1883_v6 = vmul.f32 %v5377_v45, %v1879_v33  ;;  %v3934_v61 = vadd.f32 -1.0, %v1877_v20  ;;  %v6126_v45 = vmov 0   ;;  %v5439_v30 = vsel %vm1880_vm6, %v1877_v20, 1.0 }
0x21f4   :  { %v2026_v25 = vperm.slane %v5439_v30, 0 }
0x21f5   :  { %v1884_v52 = vadd.f32 %v1883_v6, %v1882_v50 }
0x21f6   :  { %v2028_v35 = vmul.f32 %v5241_v57, %v2026_v25 }
0x21f7   :  { %v1886_v54 = vsel %vm441_vm4, %v3934_v61, %v1884_v52 }
0x21f8   :  { %v5423_v41 = vsel %vm1880_vm6, %v1886_v54, %v1890_v39 }
0x21f9   :  { %v2037_v4 = vperm.slane %v5423_v41, 1  ;;  %v2030_v18 = vperm.slane %v5423_v41, 0  ;;  %vm1902_vm11 = vcmp.ne.f32.partialorder %v5423_v41, 0.0  ;;  %vm1903_vm12 = vcmp.lt.f32.partialorder %v5423_v41, %v5439_v30 }
0x21fb   :  { %2042 = vperm.xlu1 %4078, %v2037_v4   ;;  %2035 = vperm.xlu2 %4077, %v2030_v18  }
0x2203   :  { %4079 = vset.pattern.permute.xlu2 %v6126_v45  ;;  %4080 = vset.pattern.permute.xlu1 %v6126_v45 }
0x2222   :  { %v5429_v16 = vpop.permute.xlu2 %2053 }
0x2223   :  { %3940 = vmatmul.msk.f32.vlgmr.msra.gmra.mxu1 %vm194_vm0, %v5429_v16 }
0x2224   :  { %2550 = vmatpush.msra.mxu1 %v5216_v62  ;;  %v2027_v62 = vperm.slane %v5439_v30, 1 }
0x2226   :  { %2551 = vmatpush.msra.mxu1 %v5220_v10 }
0x2228   :  { %2552 = vmatpush.msra.mxu1 %v5224_v2 }
0x222a   :  { %2553 = vmatpush.msra.mxu1 %v5228_v53  ;;  %v2029_v53 = vmul.f32 %v5241_v57, %v2027_v62 }
0x2255   :  { %v2036_v27 = vpop.permute.xlu2 %2035 }
0x2256   :  { %v2044_v51 = vmul.f32 %v5237_v12, %v2036_v27 }
0x2258   :  { %v2046_v32 = vadd.f32 %v2044_v51, %v2028_v35 }
0x225a   :  { %v2048_v2 = vadd.f32 %v5247_v38, %v2046_v32 }
0x225c   :  { %v2050_v13 = vadd.f32 %v2048_v2, %v4733_v23 }
0x226d   :  { %v2043_v22 = vpop.permute.xlu1 %2042 }
0x226e   :  { %v2045_v10 = vmul.f32 %v5237_v12, %v2043_v22 }
0x2270   :  { %v2047_v14 = vadd.f32 %v2045_v10, %v2029_v53 }
0x2272   :  { %v2049_v47 = vadd.f32 %v5247_v38, %v2047_v14 }
0x2274   :  { %v2051_v33 = vadd.f32 %v2049_v47, %v4735_v24 }
0x22a0   :  { %v2074_v58 = vpop.f32.mrf.mxu1 }
0x22a1   :  { %v2078_v8 = vrot.slane %v2074_v58, 1  ;;  %v2079_v56 = vperm.slane %v2074_v58, 0 }
0x22a3   :  { %v2083_v31 = vadd.f32 %v2079_v56, %v2050_v13  ;;  %v2080_v20 = vperm.slane %v2078_v8, 0 }
0x22a5   :  { %4193 = vtanh.f32 %v2083_v31  ;;  %v2084_v50 = vadd.f32 %v2080_v20, %v2051_v33 }
0x22a7   :  { %4195 = vtanh.f32 %v2084_v50 }
0x22ab   :  { %v4194_v6 = vpop.eup %4193 }
0x22ac   :  { %3941 = vmatmul.msk.f32.vlgmr.msra.gmra.mxu2 %vm194_vm0, %v4194_v6 }
0x22ad   :  { %3067 = vmatpush.msra.mxu2 %v5256_v34  ;;  %v4196_v12 = vpop.eup %4195 }
0x22af   :  { %3068 = vmatpush.msra.mxu2 %v5260_v17 }
0x22b1   :  { %3069 = vmatpush.msra.mxu2 %v5264_v7 }
0x22b3   :  { %3070 = vmatpush.msra.mxu2 %v5268_v63 }
0x22b4   :  { %3942 = vmatmul.msk.f32.gmra.mxu2 %vm194_vm0, %v4196_v12 }
0x232f   :  { %v2110_v57 = vpop.f32.mrf.mxu2 }
0x2330   :  { %2119 = vperm.xlu2 %4079, %v2110_v57  }
0x2337   :  { %v2113_v38 = vpop.f32.mrf.mxu2 }
0x2338   :  { %2122 = vperm.xlu2 %4079, %v2113_v38  }
0x238a   :  { %v2120_v52 = vpop.permute.xlu2 %2119 }
0x238b   :  { %v2124_v39 = vperm.slane %v2120_v52, %v4851_v0 }
0x2392   :  { %v2123_v61 = vpop.permute.xlu2 %2122 }
0x2393   :  { %v2125_v54 = vperm.slane %v2123_v61, %v4851_v0 }
0x2395   :  { %v2126_v34 = vsel %vm424_vm3, %v2125_v54, %v2124_v39 }
0x2396   :  { %v2128_v17 = vsel %vm674_vm8, %v2126_v34, -inf }
0x2397   :  { %2129 = vmax.xlane.f32.xlu2 %v2128_v17 }
0x240a   :  { %v2130_v7 = vpop.xlane.xlu2 %2129 }
0x240b   :  { %v2132_v4 = vperm.slane %v2130_v7, 0  ;;  %v2133_v63 = vperm.slane %v2130_v7, 1 }
0x240d   :  { %v2136_v18 = vsub.f32 %v2110_v57, %v2132_v4  ;;  %v2137_v25 = vsub.f32 %v2113_v38, %v2133_v63 }
0x240f   :  { %v2138_v27 = vmul.f32 1.442695, %v2136_v18  ;;  %v2140_v51 = vmul.f32 1.442695, %v2137_v25 }
0x2411   :  { %4197 = vpow2.f32 %v2138_v27 }
0x2412   :  { %4199 = vpow2.f32 %v2140_v51 }
0x2417   :  { %v4198_v35 = vpop.eup %4197 }
0x2418   :  { %2145 = vperm.xlu1 %4080, %v4198_v35   ;;  %v4200_v22 = vpop.eup %4199 }
0x2420   :  { %2148 = vperm.xlu1 %4080, %v4200_v22  }
0x248a   :  { %v2146_v32 = vpop.permute.xlu1 %2145 }
0x248b   :  { %v2150_v10 = vperm.slane %v2146_v32, %v4851_v0 }
0x2492   :  { %v2149_v62 = vpop.permute.xlu1 %2148 }
0x2493   :  { %v2151_v2 = vperm.slane %v2149_v62, %v4851_v0 }
0x2495   :  { %v2152_v53 = vsel %vm424_vm3, %v2151_v2, %v2150_v10 }
0x2496   :  { %v2154_v14 = vsel %vm674_vm8, %v2152_v53, 0.0 }
0x2497   :  { %2155 = vadd.xlane.f32.xlu0 %v2154_v14 }
0x250a   :  { %v2156_v58 = vpop.xlane.xlu0 %2155 }
0x250b   :  { %v2158_v13 = vperm.slane %v2156_v58, 0  ;;  %v2159_v8 = vperm.slane %v2156_v58, 1 }
0x250d   :  { %4201 = vrcp.f32 %v2158_v13  ;;  %v2173_v6 = vand.u32 2147483648, %v2158_v13  ;;  %v2188_v12 = vand.u32 2147483648, %v2159_v8  ;;  %v2171_v38 = vand.u32 2147483647, %v2158_v13 }
0x250e   :  { %4203 = vrcp.f32 %v2159_v8  ;;  %v2186_v61 = vand.u32 2147483647, %v2159_v8  ;;  %vm2167_vm2 = vweird.f32 %v2158_v13  ;;  %vm2182_vm5 = vweird.f32 %v2159_v8 }
0x250f   :  { %v2174_v34 = vor.u32 1.1754944e-38, %v2173_v6  ;;  %v2189_v17 = vor.u32 1.1754944e-38, %v2188_v12  ;;  %vm2172_vm10 = vcmp.eq.f32.partialorder %v2171_v38, 8.507059e+37  ;;  %v5478_v12 = vld [vmem:[%s4514_s24 + $0x18] sm:$0xff]  ;;  %v5486_v38 = vld [vmem:[%s4514_s24 + $0x8] sm:$0xff] }
0x2510   :  { %vm2187_vm15 = vcmp.eq.f32.partialorder %v2186_v61, 8.507059e+37 }
0x2513   :  { %v4202_v56 = vpop.eup %4201 }
0x2514   :  { %v4204_v47 = vpop.eup %4203  ;;  %v2163_v31 = vmul.f32 %v4202_v56, %v2158_v13  ;;  %vm2168_vm13 = vweird.f32 %v4202_v56 }
0x2515   :  { %v2178_v20 = vmul.f32 %v4204_v47, %v2159_v8  ;;  %vm2183_vm14 = vweird.f32 %v4204_v47  ;;  %vm2169_vm7 = vmor %vm2167_vm2, %vm2168_vm13 }
0x2516   :  { %v2164_v33 = vsub.f32 1.0, %v2163_v31  ;;  %vm2184_vm9 = vmor %vm2182_vm5, %vm2183_vm14  ;;  %vm1909_vm14 = vcmp.eq.f32.partialorder %v5439_v30, 0.0 }
0x2517   :  { %v2179_v50 = vsub.f32 1.0, %v2178_v20  ;;  %vm1904_vm13 = vmand %vm1902_vm11, %vm1903_vm12 }
0x2518   :  { %v2165_v57 = vmul.f32 %v4202_v56, %v2164_v33 }
0x2519   :  { %v2180_v52 = vmul.f32 %v4204_v47, %v2179_v50 }
0x251a   :  { %v2166_v39 = vadd.f32 %v4202_v56, %v2165_v57  ;;  %v5482_v57 = vld [vmem:[%s4514_s24 + $0x10] sm:$0xff] }
0x251b   :  { %v2181_v54 = vadd.f32 %v4204_v47, %v2180_v52  ;;  %v1892_v52 = vand.u32 2147483647, %v5423_v41 }
0x251c   :  { %v2170_v7 = vsel %vm2169_vm7, %v4202_v56, %v2166_v39 }
0x251d   :  { %v2185_v4 = vsel %vm2184_vm9, %v4204_v47, %v2181_v54  ;;  %v2175_v63 = vsel %vm2172_vm10, %v2174_v34, %v2170_v7  ;;  %v1893_v61 = vsel %vm674_vm8, %v1892_v52, -inf }
0x251e   :  { %v2190_v18 = vsel %vm2187_vm15, %v2189_v17, %v2185_v4  ;;  %v2176_v27 = vmul.f32 %v4198_v35, %v2175_v63  ;;  %v1910_v63 = vmul.f32 %v5423_v41, %v5045_v9 }
0x251f   :  { %v2191_v25 = vmul.f32 %v4200_v22, %v2190_v18 }
0x2520   :  { %2194 = vperm.xlu1 %4080, %v2176_v27   ;;  %v1911_v18 = vsel %vm674_vm8, %v1910_v63, 0.0 }
0x2521   :  { %2199 = vperm.xlu0 %4074, %v2191_v25  }
0x2592   :  { %v2195_v51 = vpop.permute.xlu1 %2194 }
0x2593   :  { %v2200_v32 = vpop.permute.xlu0 %2199  ;;  %v2202_v62 = vmul.f32 %v2195_v51, %v4696_v60 }
0x2594   :  { %v2203_v10 = vmul.f32 %v2200_v32, %v4694_v59 }
0x2595   :  { %v2204_v2 = vsel %vm194_vm0, %v2202_v62, 0.0 }
0x2596   :  { %v2211_v53 = vsel %vm194_vm0, %v2203_v10, 0.0  ;;  %v2205_v14 = vrot.slane %v2204_v2, 4 }
0x2597   :  { %v2212_v58 = vrot.slane %v2211_v53, 4 }
0x2598   :  { %v2206_v13 = vadd.f32 %v2205_v14, %v2204_v2  ;;  %v1907_v14 = vsel %vm1880_vm6, 1.0, %v6125_v29 }
0x2599   :  { %v2213_v8 = vadd.f32 %v2212_v58, %v2211_v53 }
0x259a   :  { %v2207_v56 = vrot.slane %v2206_v13, 2 }
0x259b   :  { %v2214_v35 = vrot.slane %v2213_v8, 2 }
0x259c   :  { %v2208_v22 = vadd.f32 %v2207_v56, %v2206_v13 }
0x259d   :  { %v2215_v47 = vadd.f32 %v2214_v35, %v2213_v8 }
0x259e   :  { %v2209_v31 = vrot.slane %v2208_v22, 1 }
0x259f   :  { %v2216_v20 = vrot.slane %v2215_v47, 1 }
0x25a0   :  { %v2210_v33 = vadd.f32 %v2209_v31, %v2208_v22 }
0x25a1   :  { %v2217_v50 = vadd.f32 %v2216_v20, %v2215_v47 }
0x25a3   :  { %v2220_v6 = vsel %vm424_vm3, %v2217_v50, %v2210_v33 }
0x25a4   :  { %3943 = vmatmul.msk.f32.vlgmr.msra.gmra.mxu3 %vm194_vm0, %v2220_v6 }
0x25a5   :  { %2716 = vmatpush.msra.mxu3 %v5288_v26  ;;  %v5490_v26 = vld [vmem:[%s4514_s24] sm:$0xff]  ;;  %s4399_s24 = scalar_lea.hbm %s4398_s17, 2 }
0x25a6   :  { %p4400_p0 = scmp.ne.s32.totalorder %s4398_s17, %s4399_s24  ;;  %p4403_p2 = scmp.lt.s32.totalorder %s4401_s10, %s4399_s24 }
0x25a7   :  { %2717 = vmatpush.msra.mxu3 %v5292_v42 }
0x25a8   :  { %p4404_p3 = por %p4403_p2, %p4402_p1 }
0x25a9   :  { %2718 = vmatpush.msra.mxu3 %v5296_v37 }
0x25aa   :  { %p4405_p4 = pnand %p4404_p3, %p4400_p0 }
0x25ab   :  { %2719 = vmatpush.msra.mxu3 %v5300_v11 }
0x25ac   :  { %3951 = vmatmul.msk.f32.vlgmr.msrb.gmra.mxu3 %vm194_vm0, %v5429_v16 }
0x25ad   :  { %2941 = vmatpush.msrb.mxu3 %v5478_v12 }
0x25af   :  { %2942 = vmatpush.msrb.mxu3 %v5482_v57 }
0x25b1   :  { %2943 = vmatpush.msrb.mxu3 %v5486_v38 }
0x25b3   :  { %2944 = vmatpush.msrb.mxu3 %v5490_v26 }
0x2627   :  { %v2240_v42 = vpop.f32.mrf.mxu3 }
0x2628   :  { %v2245_v37 = vperm.slane %v2240_v42, 0  ;;  %v2244_v11 = vrot.slane %v2240_v42, 1 }
0x262a   :  { %2247 = vrot.lane.b32.xlu1 %v2245_v37, %s4449_s2  ;;  %v2246_v16 = vperm.slane %v2244_v11, 0 }
0x2632   :  { %2249 = vrot.lane.b32.xlu1 %v2246_v16, %s4449_s2 }
0x265c   :  { %1894 = vmax.xlane.f32.xlu1 %v1893_v61 }
0x269c   :  { %v2248_v39 = vpop.permute.xlu1 %2247 }
0x269d   :  { %v2253_v54 = vadd.f32 %v2248_v39, %v4733_v23 }
0x269f   :  { %4205 = vtanh.f32 %v2253_v54 }
0x26a4   :  { %v2250_v34 = vpop.permute.xlu1 %2249 }
0x26a5   :  { %v4206_v17 = vpop.eup %4205  ;;  %v2254_v7 = vadd.f32 %v2250_v34, %v4735_v24 }
0x26a6   :  { %2259 = vrot.lane.b32.xlu2 %v4206_v17, %s4448_s18 }
0x26a7   :  { %4207 = vtanh.f32 %v2254_v7 }
0x26ad   :  { %v4208_v4 = vpop.eup %4207 }
0x26ae   :  { %2261 = vrot.lane.b32.xlu0 %v4208_v4, %s4448_s18 }
0x26cf   :  { %v5510_v51 = vpop.xlane.xlu1 %1894 }
0x26d0   :  { %6127 = vst [vmem:[#allocation25_spill] sm:$0xff] %v5510_v51  ;;  %v1919_v32 = vsel %vm957_vm1, %v5510_v51, -inf }
0x26d1   :  { %v1920_v62 = vrot.slane %v1919_v32, 4 }
0x26d3   :  { %v1921_v10 = vmax.f32 %v1919_v32, %v1920_v62 }
0x26d5   :  { %v1922_v2 = vrot.slane %v1921_v10, 2 }
0x26d7   :  { %v1923_v53 = vmax.f32 %v1921_v10, %v1922_v2 }
0x26d8   :  { %1912 = vadd.xlane.f32.xlu0 %v1911_v18 }
0x2700   :  { %v2260_v27 = vpop.permute.xlu2 %2259 }
0x2701   :  { %3944 = vmatmul.msk.f32.vlgmr.msrb.gmra.mxu0 %vm194_vm0, %v2260_v27 }
0x2702   :  { %3241 = vmatpush.msrb.mxu0 %v5322_v28  ;;  %v1924_v28 = vrot.slane %v1923_v53, 1 }
0x2704   :  { %3242 = vmatpush.msrb.mxu0 %v5326_v49  ;;  %v3936_v49 = vsel %vm1904_vm13, 1.0, %v6125_v29 }
0x2705   :  { %v1908_v58 = vsel %vm441_vm4, %v1907_v14, %v3936_v49 }
0x2706   :  { %3243 = vmatpush.msrb.mxu0 %v5330_v5  ;;  %v1925_v5 = vmax.f32 %v1923_v53, %v1924_v28 }
0x2708   :  { %3244 = vmatpush.msrb.mxu0 %v5334_v55  ;;  %vm1926_vm7 = vcmp.eq.f32.partialorder %v1925_v5, 0.0 }
0x2720   :  { %v2262_v25 = vpop.permute.xlu0 %2261 }
0x2721   :  { %3945 = vmatmul.msk.f32.gmra.mxu0 %vm194_vm0, %v2262_v25 }
0x274b   :  { %v1913_v55 = vpop.xlane.xlu0 %1912 }
0x274c   :  { %vm1914_vm2 = vcmp.eq.f32.partialorder %v1913_v55, 0.0 }
0x274d   :  { %vm1915_vm5 = vmor %vm1909_vm14, %vm1914_vm2  ;;  %vm2411_vm2 = vcmp.eq.s32.totalorder %v4851_v0, 3 }
0x274e   :  { %v1918_v13 = vsel %vm1915_vm5, %v4937_v46, %v1908_v58 }
0x274f   :  { %v1929_v8 = vsel %vm1926_vm7, 0.0, %v1918_v13 }
0x2750   :  { %v2290_v56 = vsel %vm674_vm8, %v1929_v8, 0.0 }
0x2751   :  { %2291 = vadd.xlane.f32.xlu2 %v2290_v56 }
0x277e   :  { %v2284_v35 = vpop.f32.mrf.mxu0 }
0x277f   :  { %2301 = vperm.xlu1 %4080, %v2284_v35  }
0x2787   :  { %4081 = vset.pattern.permute.xlu1 %v4631_v3 }
0x279e   :  { %v2287_v22 = vpop.f32.mrf.mxu0 }
0x279f   :  { %2304 = vperm.xlu0 %4074, %v2287_v22  }
0x27c4   :  { %v2292_v47 = vpop.xlane.xlu2 %2291 }
0x27c5   :  { %vm2293_vm9 = vcmp.gt.f32.partialorder %v2292_v47, 0.0  ;;  %v5555_v47 = vld [vmem:[%s4464_s9] sm:$0x3] }
0x27c6   :  { %v2296_v20 = vsel %vm2293_vm9, %v1929_v8, %v4937_v46 }
0x27c7   :  { %vm2297_vm6 = vcmp.gt.f32.partialorder %v2296_v20, 0.0  ;;  %v5561_v20 = vld [vmem:[%s6110_s3] ss:$0 sm:$0xff] }
0x27f1   :  { %v2302_v1 = vpop.permute.xlu1 %2301 }
0x27f2   :  { %v2306_v33 = vperm.slane %v2302_v1, %v4851_v0 }
0x2811   :  { %v2305_v31 = vpop.permute.xlu0 %2304 }
0x2812   :  { %v2307_v50 = vperm.slane %v2305_v31, %v4851_v0 }
0x2814   :  { %v2308_v6 = vsel %vm424_vm3, %v2307_v50, %v2306_v33 }
0x2815   :  { %v2310_v42 = vsel %vm2297_vm6, %v2308_v6, -1e+09  ;;  %v5566_v6 = vld [vmem:[%s6112_s14] ss:$0 sm:$0xff] }
0x2816   :  { %v2311_v37 = vsel %vm674_vm8, %v2310_v42, -inf }
0x2817   :  { %2312 = vmax.xlane.f32.xlu2 %v2311_v37  ;;  %v5570_v37 = vld [vmem:[%s6112_s14 + $0x1] ss:$0 sm:$0xff] }
0x288a   :  { %v2313_v11 = vpop.xlane.xlu2 %2312 }
0x288b   :  { %v2314_v16 = vsub.f32 %v2310_v42, %v2313_v11 }
0x288d   :  { %v2315_v52 = vmul.f32 1.442695, %v2314_v16 }
0x288f   :  { %4209 = vpow2.f32 %v2315_v52  ;;  %v5574_v52 = vld [vmem:[%s6113_s12] ss:$0 sm:$0xff] }
0x2895   :  { %v4210_v61 = vpop.eup %4209 }
0x2896   :  { %v2317_v39 = vsel %vm674_vm8, %v4210_v61, 0.0 }
0x2897   :  { %2318 = vadd.xlane.f32.xlu1 %v2317_v39  ;;  %v5579_v39 = vld [vmem:[%s6109_s29 + $0x18] sm:$0xff] }
0x290a   :  { %v2319_v54 = vpop.xlane.xlu1 %2318 }
0x290b   :  { %4211 = vrcp.f32 %v2319_v54  ;;  %v2331_v4 = vand.u32 2147483648, %v2319_v54  ;;  %v2329_v18 = vand.u32 2147483647, %v2319_v54  ;;  %vm2325_vm15 = vweird.f32 %v2319_v54 }
0x290d   :  { %v2332_v25 = vor.u32 1.1754944e-38, %v2331_v4  ;;  %vm2330_vm12 = vcmp.eq.f32.partialorder %v2329_v18, 8.507059e+37  ;;  %v5595_v4 = vld [vmem:[%s6115_s4] ss:$0 sm:$0xff] }
0x2911   :  { %v4212_v34 = vpop.eup %4211 }
0x2912   :  { %v2321_v17 = vmul.f32 %v4212_v34, %v2319_v54  ;;  %vm2326_vm10 = vweird.f32 %v4212_v34  ;;  %v5583_v54 = vld [vmem:[%s6109_s29 + $0x10] sm:$0xff] }
0x2913   :  { %vm2327_vm11 = vmor %vm2325_vm15, %vm2326_vm10 }
0x2914   :  { %v2322_v7 = vsub.f32 1.0, %v2321_v17  ;;  %v5591_v17 = vld [vmem:[%s6109_s29] sm:$0xff] }
0x2916   :  { %v2323_v63 = vmul.f32 %v4212_v34, %v2322_v7 }
0x2918   :  { %v2324_v27 = vadd.f32 %v4212_v34, %v2323_v63 }
0x291a   :  { %v2328_v32 = vsel %vm2327_vm11, %v4212_v34, %v2324_v27  ;;  %v5587_v34 = vld [vmem:[%s6109_s29 + $0x8] sm:$0xff] }
0x291b   :  { %v2333_v62 = vsel %vm2330_vm12, %v2332_v25, %v2328_v32 }
0x291c   :  { %v2334_v10 = vmul.f32 %v4210_v61, %v2333_v62 }
0x291e   :  { %v2335_v2 = vsel %vm674_vm8, %v2334_v10, -inf }
0x291f   :  { %2336 = vmax.xlane.f32.xlu0 %v2335_v2 }
0x2992   :  { %v5534_v53 = vpop.xlane.xlu0 %2336 }
0x2993   :  { %6128 = vst [vmem:[#allocation26_spill] sm:$0xff] %v5534_v53  ;;  %vm2338_vm13 = vcmp.ge.f32.partialorder %v2334_v10, %v5534_v53 }
0x2994   :  { %v2339_v28 = vsel %vm2338_vm13, %v4949_v36, 8.0 }
0x2995   :  { %v2340_v49 = vsel %vm674_vm8, %v2339_v28, inf }
0x2996   :  { %2341 = vmin.xlane.f32.xlu2 %v2340_v49 }
0x2a09   :  { %v2342_v5 = vpop.xlane.xlu2 %2341 }
0x2a0a   :  { %vm4007_vm14 = vcmp.lt.s32.totalorder %v2342_v5, 0  ;;  %v4008_v55 = vceil.f32 %v2342_v5  ;;  %v4009_v14 = vfloor.f32 %v2342_v5 }
0x2a0c   :  { %v4010_v58 = vsel %vm4007_vm14, %v4008_v55, %v4009_v14 }
0x2a0d   :  { %v5540_v13 = vcvt.f32.s32 %v4010_v58 }
0x2a0f   :  { %vm2346_vm5 = vcmp.eq.s32.totalorder %v4851_v0, %v5540_v13  ;;  %v5546_v8 = vsel %vm2411_vm2, %v5540_v13, %v5374_v15  ;;  %v2465_v15 = vpop.f32.mrf.mxu3  ;;  %vm2361_vm15 = vcmp.ne.s32.totalorder %v5540_v13, 0  ;;  %v4373_v13 = vld [vmem:[%s6122_s28 + $0x8] sm:$0xff] }
0x2a10   :  { %v5549_v56 = vsel %vm2346_vm5, 1.0, %v6125_v29  ;;  %v2466_v33 = vadd.f32 %v5561_v20, %v2465_v15 }
0x2a11   :  { %v2413_v35 = vmul.f32 %v5382_v44, %v5549_v56  ;;  %v2417_v1 = vmul.f32 %v5555_v47, %v5549_v56 }
0x2a13   :  { %v2414_v22 = vsel %vm674_vm8, %v2413_v35, 0.0  ;;  %v2418_v31 = vsel %vm674_vm8, %v2417_v1, 0.0 }
0x2a14   :  { %2415 = vadd.xlane.f32.xlu2 %v2414_v22 }
0x2a1c   :  { %2419 = vadd.xlane.f32.xlu2 %v2418_v31 }
0x2a34   :  { %2489 = vrot.lane.b32.xlu2 %v2466_v33, %s4447_s6 }
0x2a87   :  { %v2416_v44 = vpop.xlane.xlu2 %2415 }
0x2a88   :  { %v2421_v42 = vmul.f32 %v5566_v6, %v2416_v44  ;;  %v2353_v44 = vmul.f32 %v5549_v56, %v5423_v41 }
0x2a8f   :  { %v2420_v50 = vpop.xlane.xlu2 %2419 }
0x2a90   :  { %v2422_v11 = vmul.f32 %v5570_v37, %v2420_v50  ;;  %v2354_v50 = vsel %vm674_vm8, %v2353_v44, 0.0 }
0x2a92   :  { %v2423_v16 = vadd.f32 %v2422_v11, %v2421_v42 }
0x2a94   :  { %v2424_v61 = vadd.f32 %v5574_v52, %v2423_v16 }
0x2a96   :  { %3950 = vmatmul.msk.f32.vlgmr.msrb.gmra.mxu1 %vm194_vm0, %v2424_v61 }
0x2a97   :  { %2921 = vmatpush.msrb.mxu1 %v5579_v39  ;;  %v2490_v35 = vpop.permute.xlu2 %2489 }
0x2a99   :  { %2922 = vmatpush.msrb.mxu1 %v5583_v54 }
0x2a9b   :  { %2923 = vmatpush.msrb.mxu1 %v5587_v34 }
0x2a9d   :  { %2924 = vmatpush.msrb.mxu1 %v5591_v17 }
0x2b13   :  { %v2445_v7 = vpop.f32.mrf.mxu1 }
0x2b14   :  { %v2446_v63 = vadd.f32 %v5595_v4, %v2445_v7 }
0x2b16   :  { %v2468_v18 = vadd.f32 %v2466_v33, %v2446_v63 }
0x2b18   :  { %v3952_v27 = vmul.f32 -1.442695, %v2468_v18 }
0x2b1a   :  { %4213 = vpow2.f32 %v3952_v27 }
0x2b20   :  { %v4214_v25 = vpop.eup %4213 }
0x2b21   :  { %v2472_v32 = vadd.f32 1.0, %v4214_v25  ;;  %v5616_v25 = vld [vmem:[%s6117_s16 + $0x18] sm:$0xff] }
0x2b23   :  { %4215 = vrcp.f32 %v2472_v32  ;;  %v2484_v28 = vand.u32 2147483648, %v2472_v32  ;;  %v2482_v5 = vand.u32 2147483647, %v2472_v32  ;;  %vm2478_vm9 = vweird.f32 %v2472_v32 }
0x2b25   :  { %v2485_v14 = vor.u32 1.1754944e-38, %v2484_v28  ;;  %vm2483_vm10 = vcmp.eq.f32.partialorder %v2482_v5, 8.507059e+37 }
0x2b29   :  { %v4216_v62 = vpop.eup %4215 }
0x2b2a   :  { %v2474_v10 = vmul.f32 %v4216_v62, %v2472_v32  ;;  %vm2479_vm7 = vweird.f32 %v4216_v62  ;;  %v5624_v32 = vld [vmem:[%s6117_s16 + $0x8] sm:$0xff] }
0x2b2b   :  { %vm2480_vm6 = vmor %vm2478_vm9, %vm2479_vm7 }
0x2b2c   :  { %v2475_v2 = vsub.f32 1.0, %v2474_v10 }
0x2b2e   :  { %v2476_v49 = vmul.f32 %v4216_v62, %v2475_v2  ;;  %v2362_v2 = vsub.f32 1.0, %v5549_v56 }
0x2b30   :  { %v2477_v55 = vadd.f32 %v4216_v62, %v2476_v49 }
0x2b32   :  { %v2481_v58 = vsel %vm2480_vm6, %v4216_v62, %v2477_v55 }
0x2b33   :  { %v2486_v22 = vsel %vm2483_vm10, %v2485_v14, %v2481_v58  ;;  %v2363_v14 = vmul.f32 %v2362_v2, %v5423_v41 }
0x2b34   :  { %v2492_v1 = vmul.f32 %v2490_v35, %v2486_v22  ;;  %v2499_v42 = vsub.f32 1.0, %v2486_v22  ;;  %v2505_v16 = vmul.f32 %v2486_v22, %v5408_v43  ;;  %v5620_v43 = vld [vmem:[%s6117_s16 + $0x10] sm:$0xff] }
0x2b36   :  { %2494 = vrot.lane.b32.xlu1 %v2492_v1, %s4447_s6  ;;  %v2371_v1 = vsel %vm441_vm4, 0.0, %v5423_v41 }
0x2ba8   :  { %v2495_v31 = vpop.permute.xlu1 %2494 }
0x2ba9   :  { %v2497_v15 = vadd.f32 %v2495_v31, %v2446_v63  ;;  %v2349_v63 = vmul.f32 %v5549_v56, %v5439_v30  ;;  %v5628_v30 = vld [vmem:[%s6117_s16] sm:$0xff] }
0x2bab   :  { %4217 = vtanh.f32 %v2497_v15  ;;  %v2350_v18 = vsel %vm674_vm8, %v2349_v63, 0.0 }
0x2bb1   :  { %v4218_v33 = vpop.eup %4217 }
0x2bb2   :  { %2501 = vrot.lane.b32.xlu0 %v4218_v33, %s4448_s18 }
0x2bdc   :  { %2355 = vadd.xlane.f32.xlu0 %v2354_v50 }
0x2c24   :  { %v2502_v11 = vpop.permute.xlu0 %2501 }
0x2c25   :  { %v2504_v61 = vmul.f32 %v2502_v11, %v2499_v42  ;;  %v5653_v42 = vld [vmem:[%s6119_s22] ss:$0 sm:$0xff] }
0x2c27   :  { %v5604_v7 = vadd.f32 %v2505_v16, %v2504_v61  ;;  %v5657_v16 = vld [vmem:[%s6119_s22 + $0x1] ss:$0 sm:$0xff] }
0x2c29   :  { %2534 = vrot.lane.b32.xlu2 %v5604_v7, %s4448_s18 }
0x2c4f   :  { %v2356_v62 = vpop.xlane.xlu0 %2355 }
0x2c52   :  { %2351 = vadd.xlane.f32.xlu2 %v2350_v18 }
0x2c83   :  { %v5611_v27 = vpop.permute.xlu2 %2534 }
0x2c84   :  { %3953 = vmatmul.msk.f32.vlgmr.msra.gmra.mxu1 %vm194_vm0, %v5611_v27 }
0x2c85   :  { %3031 = vmatpush.msra.mxu1 %v5616_v25 }
0x2c87   :  { %3032 = vmatpush.msra.mxu1 %v5620_v43 }
0x2c89   :  { %3033 = vmatpush.msra.mxu1 %v5624_v32 }
0x2c8b   :  { %3034 = vmatpush.msra.mxu1 %v5628_v30 }
0x2cc5   :  { %v2352_v10 = vpop.xlane.xlu2 %2351 }
0x2cc6   :  { %v2357_v28 = vsub.f32 %v2352_v10, %v2356_v62  ;;  %v2359_v49 = vsub.f32 %v2356_v62, %v2352_v10  ;;  %v5661_v62 = vld [vmem:[%s6120_s26] ss:$0 sm:$0xff] }
0x2cc8   :  { %v2358_v5 = vmax.f32 %v2357_v28, 0.0  ;;  %v2360_v55 = vmax.f32 %v2359_v49, 0.0 }
0x2cca   :  { %v2364_v58 = vmul.f32 %v5549_v56, %v2360_v55  ;;  %v3947_v22 = vadd.f32 -1.0, %v2358_v5  ;;  %v5649_v44 = vsel %vm2361_vm15, %v2358_v5, 1.0 }
0x2ccb   :  { %v2507_v41 = vperm.slane %v5649_v44, 0  ;;  %v2508_v2 = vperm.slane %v5649_v44, 1 }
0x2ccc   :  { %v2365_v35 = vadd.f32 %v2364_v58, %v2363_v14 }
0x2ccd   :  { %v2509_v11 = vmul.f32 %v5653_v42, %v2507_v41  ;;  %v2510_v14 = vmul.f32 %v5653_v42, %v2508_v2 }
0x2cce   :  { %v2367_v31 = vsel %vm441_vm4, %v3947_v22, %v2365_v35 }
0x2ccf   :  { %v5642_v15 = vsel %vm2361_vm15, %v2367_v31, %v2371_v1 }
0x2cd0   :  { %v2511_v33 = vperm.slane %v5642_v15, 0  ;;  %v2518_v56 = vperm.slane %v5642_v15, 1  ;;  %vm2383_vm6 = vcmp.ne.f32.partialorder %v5642_v15, 0.0  ;;  %vm2384_vm10 = vcmp.lt.f32.partialorder %v5642_v15, %v5649_v44 }
0x2cd2   :  { %2516 = vperm.xlu1 %4081, %v2511_v33  }
0x2cda   :  { %2523 = vperm.xlu1 %4081, %v2518_v56  }
0x2ce2   :  { %4082 = vset.pattern.permute.xlu1 %v6126_v45 }
0x2d01   :  { %v2555_v18 = vpop.f32.mrf.mxu1 }
0x2d02   :  { %v2560_v28 = vperm.slane %v2555_v18, 0  ;;  %v2559_v35 = vrot.slane %v2555_v18, 1  ;;  %v4366_v18 = vld [vmem:[%s6118_s23] sm:$0xff] }
0x2d04   :  { %v2561_v31 = vperm.slane %v2559_v35, 0 }
0x2d44   :  { %v2517_v50 = vpop.permute.xlu1 %2516 }
0x2d45   :  { %v2525_v61 = vmul.f32 %v5657_v16, %v2517_v50  ;;  %v4363_v50 = vld [vmem:[%s6118_s23 + $0x18] sm:$0xff] }
0x2d47   :  { %v2527_v63 = vadd.f32 %v2525_v61, %v2509_v11  ;;  %v4364_v11 = vld [vmem:[%s6118_s23 + $0x10] sm:$0xff]  ;;  %v4365_v61 = vld [vmem:[%s6118_s23 + $0x8] sm:$0xff] }
0x2d49   :  { %v2529_v10 = vadd.f32 %v5661_v62, %v2527_v63 }
0x2d4b   :  { %v2531_v49 = vadd.f32 %v2529_v10, %v4733_v23 }
0x2d4c   :  { %v2524_v5 = vpop.permute.xlu1 %2523 }
0x2d4d   :  { %v2564_v55 = vadd.f32 %v2560_v28, %v2531_v49  ;;  %v2526_v58 = vmul.f32 %v5657_v16, %v2524_v5 }
0x2d4f   :  { %4219 = vtanh.f32 %v2564_v55  ;;  %v2528_v22 = vadd.f32 %v2526_v58, %v2510_v14 }
0x2d51   :  { %v2530_v1 = vadd.f32 %v5661_v62, %v2528_v22 }
0x2d53   :  { %v2532_v33 = vadd.f32 %v2530_v1, %v4735_v24 }
0x2d55   :  { %v4220_v56 = vpop.eup %4219  ;;  %v2565_v41 = vadd.f32 %v2561_v31, %v2532_v33 }
0x2d56   :  { %3954 = vmatmul.msk.f32.vlgmr.msrb.gmra.mxu2 %vm194_vm0, %v4220_v56 }
0x2d57   :  { %4221 = vtanh.f32 %v2565_v41  ;;  %3548 = vmatpush.msrb.mxu2 %v4363_v50 }
0x2d59   :  { %3549 = vmatpush.msrb.mxu2 %v4364_v11 }
0x2d5b   :  { %3550 = vmatpush.msrb.mxu2 %v4365_v61 }
0x2d5d   :  { %v4222_v63 = vpop.eup %4221  ;;  %3551 = vmatpush.msrb.mxu2 %v4366_v18 }
0x2d5e   :  { %3955 = vmatmul.msk.f32.gmra.mxu2 %vm194_vm0, %v4222_v63 }
0x2dd9   :  { %v2591_v10 = vpop.f32.mrf.mxu2 }
0x2dda   :  { %2600 = vperm.xlu1 %4082, %v2591_v10  }
0x2de1   :  { %v2594_v2 = vpop.f32.mrf.mxu2 }
0x2de2   :  { %2603 = vperm.xlu1 %4082, %v2594_v2  }
0x2e4c   :  { %v2601_v28 = vpop.permute.xlu1 %2600 }
0x2e4d   :  { %v2605_v5 = vperm.slane %v2601_v28, %v4851_v0 }
0x2e54   :  { %v2604_v49 = vpop.permute.xlu1 %2603 }
0x2e55   :  { %v2606_v55 = vperm.slane %v2604_v49, %v4851_v0 }
0x2e57   :  { %v2607_v14 = vsel %vm424_vm3, %v2606_v55, %v2605_v5 }
0x2e58   :  { %v2609_v58 = vsel %vm674_vm8, %v2607_v14, -inf }
0x2e59   :  { %2610 = vmax.xlane.f32.xlu1 %v2609_v58 }
0x2ecc   :  { %v2611_v35 = vpop.xlane.xlu1 %2610 }
0x2ecd   :  { %v2613_v22 = vperm.slane %v2611_v35, 0  ;;  %v2614_v1 = vperm.slane %v2611_v35, 1 }
0x2ecf   :  { %v2617_v31 = vsub.f32 %v2591_v10, %v2613_v22  ;;  %v2618_v33 = vsub.f32 %v2594_v2, %v2614_v1  ;;  %v2373_v10 = vand.u32 2147483647, %v5642_v15 }
0x2ed1   :  { %v2619_v56 = vmul.f32 1.442695, %v2617_v31  ;;  %v2621_v41 = vmul.f32 1.442695, %v2618_v33  ;;  %v2374_v2 = vsel %vm674_vm8, %v2373_v10, -inf }
0x2ed3   :  { %4223 = vpow2.f32 %v2619_v56 }
0x2ed4   :  { %4225 = vpow2.f32 %v2621_v41 }
0x2ed9   :  { %v4224_v50 = vpop.eup %4223 }
0x2eda   :  { %v4226_v11 = vpop.eup %4225  ;;  %2626 = vperm.xlu2 %4079, %v4224_v50  }
0x2edb   :  { %2629 = vperm.xlu0 %4074, %v4226_v11  }
0x2f34   :  { %v2627_v61 = vpop.permute.xlu2 %2626 }
0x2f35   :  { %v2631_v18 = vperm.slane %v2627_v61, %v4851_v0 }
0x2f4d   :  { %v2630_v63 = vpop.permute.xlu0 %2629 }
0x2f4e   :  { %v2632_v28 = vperm.slane %v2630_v63, %v4851_v0 }
0x2f50   :  { %v2633_v49 = vsel %vm424_vm3, %v2632_v28, %v2631_v18 }
0x2f51   :  { %v2635_v5 = vsel %vm674_vm8, %v2633_v49, 0.0 }
0x2f52   :  { %2636 = vadd.xlane.f32.xlu2 %v2635_v5 }
0x2f5a   :  { %2375 = vmax.xlane.f32.xlu2 %v2374_v2 }
0x2fc5   :  { %v2637_v55 = vpop.xlane.xlu2 %2636 }
0x2fc6   :  { %v2639_v14 = vperm.slane %v2637_v55, 0  ;;  %v2640_v58 = vperm.slane %v2637_v55, 1 }
0x2fc8   :  { %4227 = vrcp.f32 %v2639_v14  ;;  %v2654_v41 = vand.u32 2147483648, %v2639_v14  ;;  %v2652_v63 = vand.u32 2147483647, %v2639_v14  ;;  %vm2648_vm12 = vweird.f32 %v2639_v14 }
0x2fc9   :  { %4229 = vrcp.f32 %v2640_v58  ;;  %v2669_v55 = vand.u32 2147483648, %v2640_v58  ;;  %vm2663_vm5 = vweird.f32 %v2640_v58  ;;  %v2667_v51 = vand.u32 2147483647, %v2640_v58 }
0x2fca   :  { %v2655_v49 = vor.u32 1.1754944e-38, %v2654_v41  ;;  %vm2653_vm14 = vcmp.eq.f32.partialorder %v2652_v63, 8.507059e+37 }
0x2fcb   :  { %vm2668_vm9 = vcmp.eq.f32.partialorder %v2667_v51, 8.507059e+37 }
0x2fce   :  { %v4228_v35 = vpop.eup %4227 }
0x2fcf   :  { %v4230_v22 = vpop.eup %4229  ;;  %v2644_v1 = vmul.f32 %v4228_v35, %v2639_v14  ;;  %vm2649_vm11 = vweird.f32 %v4228_v35 }
0x2fd0   :  { %v2659_v31 = vmul.f32 %v4230_v22, %v2640_v58  ;;  %vm2650_vm13 = vmor %vm2648_vm12, %vm2649_vm11  ;;  %vm2664_vm2 = vweird.f32 %v4230_v22 }
0x2fd1   :  { %v2645_v33 = vsub.f32 1.0, %v2644_v1  ;;  %vm2665_vm7 = vmor %vm2663_vm5, %vm2664_vm2 }
0x2fd2   :  { %v2660_v56 = vsub.f32 1.0, %v2659_v31  ;;  %v2670_v31 = vor.u32 1.1754944e-38, %v2669_v55  ;;  %vm2385_vm11 = vmand %vm2383_vm6, %vm2384_vm10 }
0x2fd3   :  { %v2646_v61 = vmul.f32 %v4228_v35, %v2645_v33 }
0x2fd4   :  { %v2661_v18 = vmul.f32 %v4230_v22, %v2660_v56 }
0x2fd5   :  { %v2647_v28 = vadd.f32 %v4228_v35, %v2646_v61 }
0x2fd6   :  { %v2662_v10 = vadd.f32 %v4230_v22, %v2661_v18 }
0x2fd7   :  { %v2651_v5 = vsel %vm2650_vm13, %v4228_v35, %v2647_v28  ;;  %vm2390_vm13 = vcmp.eq.f32.partialorder %v5649_v44, 0.0 }
0x2fd8   :  { %v2656_v2 = vsel %vm2653_vm14, %v2655_v49, %v2651_v5  ;;  %v2666_v1 = vsel %vm2665_vm7, %v4230_v22, %v2662_v10 }
0x2fd9   :  { %v2657_v53 = vmul.f32 %v4224_v50, %v2656_v2  ;;  %v2671_v33 = vsel %vm2668_vm9, %v2670_v31, %v2666_v1  ;;  %v5693_v31 = vld [vmem:[%s6121_s1 + $0x18] sm:$0xff] }
0x2fda   :  { %v2672_v56 = vmul.f32 %v4226_v11, %v2671_v33  ;;  %v5697_v33 = vld [vmem:[%s6121_s1 + $0x10] sm:$0xff] }
0x2fdb   :  { %2675 = vperm.xlu0 %4074, %v2657_v53  }
0x2fe3   :  { %2680 = vperm.xlu0 %4074, %v2672_v56   ;;  %v5701_v56 = vld [vmem:[%s6121_s1 + $0x8] sm:$0xff] }
0x304d   :  { %v2676_v14 = vpop.permute.xlu0 %2675 }
0x304e   :  { %v2683_v41 = vmul.f32 %v2676_v14, %v4696_v60  ;;  %v5705_v14 = vld [vmem:[%s6121_s1] sm:$0xff] }
0x3050   :  { %v2685_v35 = vsel %vm194_vm0, %v2683_v41, 0.0 }
0x3051   :  { %v2686_v61 = vrot.slane %v2685_v35, 4 }
0x3053   :  { %v2687_v63 = vadd.f32 %v2686_v61, %v2685_v35 }
0x3055   :  { %v2681_v18 = vpop.permute.xlu0 %2680  ;;  %v2688_v58 = vrot.slane %v2687_v63, 2 }
0x3056   :  { %v2684_v50 = vmul.f32 %v2681_v18, %v4694_v59  ;;  %v2391_v18 = vmul.f32 %v5642_v15, %v5045_v9 }
0x3057   :  { %v2689_v22 = vadd.f32 %v2688_v58, %v2687_v63 }
0x3058   :  { %v2692_v53 = vsel %vm194_vm0, %v2684_v50, 0.0 }
0x3059   :  { %v2693_v51 = vrot.slane %v2692_v53, 4  ;;  %v2690_v49 = vrot.slane %v2689_v22, 1 }
0x305b   :  { %v2694_v11 = vadd.f32 %v2693_v51, %v2692_v53  ;;  %v2691_v2 = vadd.f32 %v2690_v49, %v2689_v22  ;;  %v5723_v53 = vpop.xlane.xlu2 %2375 }
0x305c   :  { %v2400_v51 = vsel %vm957_vm1, %v5723_v53, -inf }
0x305d   :  { %v2695_v28 = vrot.slane %v2694_v11, 2  ;;  %v2401_v22 = vrot.slane %v2400_v51, 4 }
0x305f   :  { %v2696_v5 = vadd.f32 %v2695_v28, %v2694_v11  ;;  %v2402_v11 = vmax.f32 %v2400_v51, %v2401_v22 }
0x3061   :  { %v2697_v10 = vrot.slane %v2696_v5, 1  ;;  %v2403_v28 = vrot.slane %v2402_v11, 2 }
0x3063   :  { %v2698_v55 = vadd.f32 %v2697_v10, %v2696_v5  ;;  %v2404_v49 = vmax.f32 %v2402_v11, %v2403_v28 }
0x3065   :  { %v2701_v1 = vsel %vm424_vm3, %v2698_v55, %v2691_v2  ;;  %v2405_v10 = vrot.slane %v2404_v49, 1  ;;  %v3949_v2 = vsel %vm2385_vm11, 1.0, %v6125_v29  ;;  %v2388_v55 = vsel %vm2361_vm15, 1.0, %v6125_v29 }
0x3066   :  { %3956 = vmatmul.msk.f32.vlgmr.msra.gmra.mxu3 %vm194_vm0, %v2701_v1 }
0x3067   :  { %3197 = vmatpush.msra.mxu3 %v5693_v31  ;;  %v2406_v1 = vmax.f32 %v2404_v49, %v2405_v10 }
0x3069   :  { %3198 = vmatpush.msra.mxu3 %v5697_v33  ;;  %vm2407_vm2 = vcmp.eq.f32.partialorder %v2406_v1, 0.0 }
0x306b   :  { %3199 = vmatpush.msra.mxu3 %v5701_v56 }
0x306d   :  { %3200 = vmatpush.msra.mxu3 %v5705_v14 }
0x306e   :  { %3964 = vmatmul.msk.f32.vlgmr.msrb.gmra.mxu3 %vm194_vm0, %v5611_v27  ;;  %v2392_v27 = vsel %vm674_vm8, %v2391_v18, 0.0 }
0x306f   :  { %3422 = vmatpush.msrb.mxu3 %v5478_v12 }
0x3071   :  { %3423 = vmatpush.msrb.mxu3 %v5482_v57 }
0x3073   :  { %3424 = vmatpush.msrb.mxu3 %v5486_v38 }
0x3075   :  { %3425 = vmatpush.msrb.mxu3 %v5490_v26 }
0x30e9   :  { %v2721_v41 = vpop.f32.mrf.mxu3 }
0x30ea   :  { %v2725_v35 = vrot.slane %v2721_v41, 1  ;;  %v2726_v61 = vperm.slane %v2721_v41, 0  ;;  %v2389_v41 = vsel %vm441_vm4, %v2388_v55, %v3949_v2 }
0x30ec   :  { %v2727_v63 = vperm.slane %v2725_v35, 0  ;;  %2728 = vrot.lane.b32.xlu1 %v2726_v61, %s4449_s2 }
0x30ee   :  { %2730 = vrot.lane.b32.xlu0 %v2727_v63, %s4449_s2 }
0x3116   :  { %2393 = vadd.xlane.f32.xlu1 %v2392_v27  ;;  %v4371_v27 = vld [vmem:[%s6122_s28 + $0x18] sm:$0xff] }
0x315e   :  { %v2729_v12 = vpop.permute.xlu1 %2728 }
0x315f   :  { %v2734_v57 = vadd.f32 %v2729_v12, %v4733_v23  ;;  %v4372_v12 = vld [vmem:[%s6122_s28 + $0x10] sm:$0xff] }
0x3160   :  { %v2731_v38 = vpop.permute.xlu0 %2730 }
0x3161   :  { %4231 = vtanh.f32 %v2734_v57  ;;  %v2735_v26 = vadd.f32 %v2731_v38, %v4735_v24  ;;  %v4374_v38 = vld [vmem:[%s6122_s28] sm:$0xff] }
0x3163   :  { %4233 = vtanh.f32 %v2735_v26 }
0x3167   :  { %v4232_v50 = vpop.eup %4231 }
0x3168   :  { %2740 = vrot.lane.b32.xlu0 %v4232_v50, %s4448_s18 }
0x3169   :  { %v4234_v58 = vpop.eup %4233 }
0x3170   :  { %2742 = vrot.lane.b32.xlu0 %v4234_v58, %s4448_s18 }
0x3189   :  { %v2394_v5 = vpop.xlane.xlu1 %2393 }
0x318a   :  { %vm2395_vm12 = vcmp.eq.f32.partialorder %v2394_v5, 0.0 }
0x318b   :  { %vm2396_vm14 = vmor %vm2390_vm13, %vm2395_vm12  ;;  %vm2892_vm13 = vcmp.eq.s32.totalorder %v4851_v0, 4 }
0x318c   :  { %v2399_v35 = vsel %vm2396_vm14, %v4937_v46, %v2389_v41 }
0x318d   :  { %v2410_v61 = vsel %vm2407_vm2, 0.0, %v2399_v35 }
0x318e   :  { %v2771_v63 = vsel %vm674_vm8, %v2410_v61, 0.0 }
0x319a   :  { %2772 = vadd.xlane.f32.xlu0 %v2771_v63 }
0x31da   :  { %v2741_v18 = vpop.permute.xlu0 %2740 }
0x31db   :  { %3957 = vmatmul.msk.f32.vlgmr.msra.gmra.mxu0 %vm194_vm0, %v2741_v18 }
0x31dc   :  { %3722 = vmatpush.msra.mxu0 %v4371_v27 }
0x31de   :  { %3723 = vmatpush.msra.mxu0 %v4372_v12 }
0x31e0   :  { %3724 = vmatpush.msra.mxu0 %v4373_v13 }
0x31e2   :  { %v2743_v57 = vpop.permute.xlu0 %2742  ;;  %3725 = vmatpush.msra.mxu0 %v4374_v38 }
0x31e3   :  { %3958 = vmatmul.msk.f32.gmra.mxu0 %vm194_vm0, %v2743_v57 }
0x320d   :  { %v2773_v51 = vpop.xlane.xlu0 %2772 }
0x320e   :  { %vm2774_vm15 = vcmp.gt.f32.partialorder %v2773_v51, 0.0 }
0x320f   :  { %v2777_v22 = vsel %vm2774_vm15, %v2410_v61, %v4937_v46 }
0x3210   :  { %vm2778_vm5 = vcmp.gt.f32.partialorder %v2777_v22, 0.0 }
0x3258   :  { %v2765_v26 = vpop.f32.mrf.mxu0 }
0x3259   :  { %2782 = vperm.xlu2 %4079, %v2765_v26  }
0x3260   :  { %v2768_v50 = vpop.f32.mrf.mxu0 }
0x3261   :  { %2785 = vperm.xlu2 %4079, %v2768_v50  }
0x3269   :  { %4083 = vset.pattern.permute.xlu2 %v4631_v3 }
0x32b3   :  { %v2783_v58 = vpop.permute.xlu2 %2782 }
0x32b4   :  { %v2787_v28 = vperm.slane %v2783_v58, %v4851_v0 }
0x32bb   :  { %v2786_v11 = vpop.permute.xlu2 %2785 }
0x32bc   :  { %v2788_v49 = vperm.slane %v2786_v11, %v4851_v0 }
0x32be   :  { %v2789_v5 = vsel %vm424_vm3, %v2788_v49, %v2787_v28 }
0x32bf   :  { %v2791_v10 = vsel %vm2778_vm5, %v2789_v5, -1e+09 }
0x32c0   :  { %v2792_v2 = vsel %vm674_vm8, %v2791_v10, -inf }
0x32c1   :  { %2793 = vmax.xlane.f32.xlu2 %v2792_v2 }
0x3334   :  { %v2794_v55 = vpop.xlane.xlu2 %2793 }
0x3335   :  { %v2795_v1 = vsub.f32 %v2791_v10, %v2794_v55 }
0x3337   :  { %v2796_v41 = vmul.f32 1.442695, %v2795_v1 }
0x3339   :  { %4235 = vpow2.f32 %v2796_v41 }
0x333f   :  { %v4236_v35 = vpop.eup %4235 }
0x3340   :  { %v2798_v63 = vsel %vm674_vm8, %v4236_v35, 0.0 }
0x3341   :  { %2799 = vadd.xlane.f32.xlu1 %v2798_v63 }
0x33b4   :  { %v2800_v61 = vpop.xlane.xlu1 %2799 }
0x33b5   :  { %4237 = vrcp.f32 %v2800_v61  ;;  %v2812_v13 = vand.u32 2147483648, %v2800_v61  ;;  %v2810_v38 = vand.u32 2147483647, %v2800_v61  ;;  %vm2806_vm9 = vweird.f32 %v2800_v61 }
0x33b7   :  { %v2813_v50 = vor.u32 1.1754944e-38, %v2812_v13  ;;  %vm2811_vm10 = vcmp.eq.f32.partialorder %v2810_v38, 8.507059e+37 }
0x33bb   :  { %v4238_v18 = vpop.eup %4237 }
0x33bc   :  { %v2802_v27 = vmul.f32 %v4238_v18, %v2800_v61  ;;  %vm2807_vm7 = vweird.f32 %v4238_v18 }
0x33bd   :  { %vm2808_vm6 = vmor %vm2806_vm9, %vm2807_vm7 }
0x33be   :  { %v2803_v12 = vsub.f32 1.0, %v2802_v27 }
0x33c0   :  { %v2804_v57 = vmul.f32 %v4238_v18, %v2803_v12 }
0x33c2   :  { %v2805_v26 = vadd.f32 %v4238_v18, %v2804_v57  ;;  %v2946_v57 = vpop.f32.mrf.mxu3 }
0x33c4   :  { %v2809_v58 = vsel %vm2808_vm6, %v4238_v18, %v2805_v26  ;;  %v5773_v18 = vld [vmem:[%s4459_s5] sm:$0x3]  ;;  %s4450_s5 = smov [#allocation3]  }
0x33c5   :  { %v2814_v51 = vsel %vm2811_vm10, %v2813_v50, %v2809_v58 }
0x33c6   :  { %v2815_v22 = vmul.f32 %v4236_v35, %v2814_v51 }
0x33c8   :  { %v2816_v11 = vsel %vm674_vm8, %v2815_v22, -inf }
0x33c9   :  { %2817 = vmax.xlane.f32.xlu0 %v2816_v11 }
0x343c   :  { %v5753_v28 = vpop.xlane.xlu0 %2817 }
0x343d   :  { %vm2819_vm11 = vcmp.ge.f32.partialorder %v2815_v22, %v5753_v28 }
0x343e   :  { %v2820_v49 = vsel %vm2819_vm11, %v4949_v36, 8.0 }
0x343f   :  { %v2821_v5 = vsel %vm674_vm8, %v2820_v49, inf }
0x3440   :  { %2822 = vmin.xlane.f32.xlu1 %v2821_v5 }
0x34b3   :  { %v2823_v10 = vpop.xlane.xlu1 %2822 }
0x34b4   :  { %vm4012_vm12 = vcmp.lt.s32.totalorder %v2823_v10, 0  ;;  %v4013_v2 = vceil.f32 %v2823_v10  ;;  %v4014_v55 = vfloor.f32 %v2823_v10 }
0x34b6   :  { %v4015_v1 = vsel %vm4012_vm12, %v4013_v2, %v4014_v55 }
0x34b7   :  { %v5759_v41 = vcvt.f32.s32 %v4015_v1 }
0x34b9   :  { %vm2827_vm14 = vcmp.eq.s32.totalorder %v4851_v0, %v5759_v41  ;;  %v5765_v35 = vsel %vm2892_vm13, %v5759_v41, %v5546_v8  ;;  %v2947_v8 = vadd.f32 %v5561_v20, %v2946_v57  ;;  %vm2842_vm9 = vcmp.ne.s32.totalorder %v5759_v41, 0 }
0x34ba   :  { %v5768_v63 = vsel %vm2827_vm14, 1.0, %v6125_v29 }
0x34bb   :  { %v2898_v61 = vmul.f32 %v5555_v47, %v5768_v63  ;;  %v2894_v27 = vmul.f32 %v5773_v18, %v5768_v63 }
0x34bd   :  { %v2899_v12 = vsel %vm674_vm8, %v2898_v61, 0.0  ;;  %v2895_v13 = vsel %vm674_vm8, %v2894_v27, 0.0  ;;  %v2834_v27 = vmul.f32 %v5768_v63, %v5642_v15 }
0x34be   :  { %2900 = vadd.xlane.f32.xlu1 %v2899_v12  ;;  %2896 = vadd.xlane.f32.xlu0 %v2895_v13 }
0x34bf   :  { %v2835_v12 = vsel %vm674_vm8, %v2834_v27, 0.0 }
0x34d2   :  { %2970 = vrot.lane.b32.xlu0 %v2947_v8, %s4447_s6 }
0x3531   :  { %v2901_v38 = vpop.xlane.xlu1 %2900  ;;  %v2897_v26 = vpop.xlane.xlu0 %2896 }
0x3532   :  { %v2903_v47 = vmul.f32 %v5570_v37, %v2901_v38  ;;  %v2902_v50 = vmul.f32 %v5566_v6, %v2897_v26  ;;  %v2830_v38 = vmul.f32 %v5768_v63, %v5649_v44 }
0x3534   :  { %v2904_v58 = vadd.f32 %v2903_v47, %v2902_v50  ;;  %v2831_v26 = vsel %vm674_vm8, %v2830_v38, 0.0 }
0x3536   :  { %v2905_v51 = vadd.f32 %v5574_v52, %v2904_v58 }
0x3538   :  { %3963 = vmatmul.msk.f32.vlgmr.msrb.gmra.mxu1 %vm194_vm0, %v2905_v51 }
0x3539   :  { %3402 = vmatpush.msrb.mxu1 %v5579_v39 }
0x353b   :  { %3403 = vmatpush.msrb.mxu1 %v5583_v54 }
0x353d   :  { %3404 = vmatpush.msrb.mxu1 %v5587_v34 }
0x353f   :  { %3405 = vmatpush.msrb.mxu1 %v5591_v17 }
0x35b5   :  { %v2926_v20 = vpop.f32.mrf.mxu1 }
0x35b6   :  { %v2927_v22 = vadd.f32 %v5595_v4, %v2926_v20  ;;  %v2971_v4 = vpop.permute.xlu0 %2970 }
0x35b8   :  { %v2949_v11 = vadd.f32 %v2947_v8, %v2927_v22 }
0x35ba   :  { %v3965_v37 = vmul.f32 -1.442695, %v2949_v11 }
0x35bc   :  { %4239 = vpow2.f32 %v3965_v37  ;;  %v2843_v37 = vsub.f32 1.0, %v5768_v63 }
0x35c2   :  { %v4240_v6 = vpop.eup %4239 }
0x35c3   :  { %v2953_v49 = vadd.f32 1.0, %v4240_v6 }
0x35c5   :  { %4241 = vrcp.f32 %v2953_v49  ;;  %v2965_v2 = vand.u32 2147483648, %v2953_v49  ;;  %v2963_v54 = vand.u32 2147483647, %v2953_v49  ;;  %vm2959_vm15 = vweird.f32 %v2953_v49 }
0x35c7   :  { %v2966_v34 = vor.u32 1.1754944e-38, %v2965_v2  ;;  %vm2964_vm7 = vcmp.eq.f32.partialorder %v2963_v54, 8.507059e+37 }
0x35cb   :  { %v4242_v52 = vpop.eup %4241 }
0x35cc   :  { %v2955_v5 = vmul.f32 %v4242_v52, %v2953_v49  ;;  %vm2960_vm2 = vweird.f32 %v4242_v52 }
0x35cd   :  { %vm2961_vm5 = vmor %vm2959_vm15, %vm2960_vm2 }
0x35ce   :  { %v2956_v10 = vsub.f32 1.0, %v2955_v5  ;;  %v2844_v5 = vmul.f32 %v2843_v37, %v5642_v15 }
0x35d0   :  { %v2957_v39 = vmul.f32 %v4242_v52, %v2956_v10 }
0x35d2   :  { %v2958_v55 = vadd.f32 %v4242_v52, %v2957_v39  ;;  %v2852_v39 = vsel %vm441_vm4, 0.0, %v5642_v15 }
0x35d4   :  { %v2962_v17 = vsel %vm2961_vm5, %v4242_v52, %v2958_v55 }
0x35d5   :  { %v2967_v1 = vsel %vm2964_vm7, %v2966_v34, %v2962_v17 }
0x35d6   :  { %v2973_v61 = vmul.f32 %v2971_v4, %v2967_v1  ;;  %v2980_v47 = vsub.f32 1.0, %v2967_v1  ;;  %v2986_v58 = vmul.f32 %v2967_v1, %v5604_v7 }
0x35d8   :  { %2975 = vrot.lane.b32.xlu1 %v2973_v61, %s4447_s6 }
0x3602   :  { %2836 = vadd.xlane.f32.xlu1 %v2835_v12 }
0x364a   :  { %v2976_v13 = vpop.permute.xlu1 %2975 }
0x364b   :  { %v2978_v57 = vadd.f32 %v2976_v13, %v2927_v22 }
0x364d   :  { %4243 = vtanh.f32 %v2978_v57 }
0x3653   :  { %v4244_v8 = vpop.eup %4243 }
0x3654   :  { %2982 = vrot.lane.b32.xlu0 %v4244_v8, %s4448_s18 }
0x3675   :  { %v2837_v22 = vpop.xlane.xlu1 %2836 }
0x367e   :  { %2832 = vadd.xlane.f32.xlu0 %v2831_v26 }
0x36c6   :  { %v2983_v50 = vpop.permute.xlu0 %2982 }
0x36c7   :  { %v2985_v51 = vmul.f32 %v2983_v50, %v2980_v47 }
0x36c9   :  { %v5799_v20 = vadd.f32 %v2986_v58, %v2985_v51 }
0x36cb   :  { %3015 = vrot.lane.b32.xlu2 %v5799_v20, %s4448_s18 }
0x36f1   :  { %v2833_v11 = vpop.xlane.xlu0 %2832 }
0x36f2   :  { %v2838_v6 = vsub.f32 %v2833_v11, %v2837_v22  ;;  %v2840_v49 = vsub.f32 %v2837_v22, %v2833_v11 }
0x36f4   :  { %v2839_v44 = vmax.f32 %v2838_v6, 0.0  ;;  %v2841_v52 = vmax.f32 %v2840_v49, 0.0 }
0x36f6   :  { %v2845_v10 = vmul.f32 %v5768_v63, %v2841_v52  ;;  %v3960_v7 = vadd.f32 -1.0, %v2839_v44  ;;  %v5829_v4 = vsel %vm2842_vm9, %v2839_v44, 1.0 }
0x36f7   :  { %v2988_v1 = vperm.slane %v5829_v4, 0 }
0x36f8   :  { %v2846_v2 = vadd.f32 %v2845_v10, %v2844_v5 }
0x36f9   :  { %v2990_v27 = vmul.f32 %v5653_v42, %v2988_v1 }
0x36fa   :  { %v2848_v54 = vsel %vm441_vm4, %v3960_v7, %v2846_v2 }
0x36fb   :  { %v5814_v55 = vsel %vm2842_vm9, %v2848_v54, %v2852_v39 }
0x36fc   :  { %v2992_v34 = vperm.slane %v5814_v55, 0  ;;  %v2999_v63 = vperm.slane %v5814_v55, 1  ;;  %vm2864_vm5 = vcmp.ne.f32.partialorder %v5814_v55, 0.0  ;;  %vm2865_vm7 = vcmp.lt.f32.partialorder %v5814_v55, %v5829_v4 }
0x36fe   :  { %2997 = vperm.xlu2 %4083, %v2992_v34  }
0x3706   :  { %3004 = vperm.xlu2 %4083, %v2999_v63  }
0x370e   :  { %4084 = vset.pattern.permute.xlu2 %v6126_v45 }
0x3725   :  { %v5819_v17 = vpop.permute.xlu2 %3015 }
0x3726   :  { %3966 = vmatmul.msk.f32.vlgmr.msra.gmra.mxu1 %vm194_vm0, %v5819_v17 }
0x3727   :  { %3512 = vmatpush.msra.mxu1 %v5616_v25  ;;  %v2989_v25 = vperm.slane %v5829_v4, 1 }
0x3729   :  { %3513 = vmatpush.msra.mxu1 %v5620_v43 }
0x372b   :  { %3514 = vmatpush.msra.mxu1 %v5624_v32 }
0x372d   :  { %3515 = vmatpush.msra.mxu1 %v5628_v30  ;;  %v2991_v30 = vmul.f32 %v5653_v42, %v2989_v25 }
0x3758   :  { %v2998_v15 = vpop.permute.xlu2 %2997 }
0x3759   :  { %v3006_v61 = vmul.f32 %v5657_v16, %v2998_v15 }
0x375b   :  { %v3008_v13 = vadd.f32 %v3006_v61, %v2990_v27 }
0x375d   :  { %v3010_v32 = vadd.f32 %v5661_v62, %v3008_v13 }
0x375f   :  { %v3012_v38 = vadd.f32 %v3010_v32, %v4733_v23 }
0x3760   :  { %v3005_v12 = vpop.permute.xlu2 %3004 }
0x3761   :  { %v3007_v43 = vmul.f32 %v5657_v16, %v3005_v12 }
0x3763   :  { %v3009_v57 = vadd.f32 %v3007_v43, %v2991_v30 }
0x3765   :  { %v3011_v50 = vadd.f32 %v5661_v62, %v3009_v57 }
0x3767   :  { %v3013_v22 = vadd.f32 %v3011_v50, %v4735_v24 }
0x37a3   :  { %v3036_v8 = vpop.f32.mrf.mxu1 }
0x37a4   :  { %v3040_v26 = vrot.slane %v3036_v8, 1  ;;  %v3041_v47 = vperm.slane %v3036_v8, 0 }
0x37a6   :  { %v3045_v58 = vadd.f32 %v3041_v47, %v3012_v38  ;;  %v3042_v51 = vperm.slane %v3040_v26, 0 }
0x37a8   :  { %4245 = vtanh.f32 %v3045_v58  ;;  %v3046_v11 = vadd.f32 %v3042_v51, %v3013_v22 }
0x37aa   :  { %4247 = vtanh.f32 %v3046_v11 }
0x37ae   :  { %v4246_v37 = vpop.eup %4245 }
0x37af   :  { %3967 = vmatmul.msk.f32.vlgmr.msra.gmra.mxu2 %vm194_vm0, %v4246_v37 }
0x37b0   :  { %v4248_v16 = vpop.eup %4247 }
0x37b7   :  { %3968 = vmatmul.msk.f32.gmra.mxu2 %vm194_vm0, %v4248_v16 }
0x3832   :  { %v3072_v42 = vpop.f32.mrf.mxu2 }
0x3833   :  { %3081 = vperm.xlu2 %4084, %v3072_v42  }
0x383a   :  { %v3075_v6 = vpop.f32.mrf.mxu2 }
0x383b   :  { %3084 = vperm.xlu2 %4084, %v3075_v6  }
0x388d   :  { %v3082_v49 = vpop.permute.xlu2 %3081 }
0x388e   :  { %v3086_v62 = vperm.slane %v3082_v49, %v4851_v0 }
0x3895   :  { %v3085_v44 = vpop.permute.xlu2 %3084 }
0x3896   :  { %v3087_v52 = vperm.slane %v3085_v44, %v4851_v0 }
0x3898   :  { %v3088_v5 = vsel %vm424_vm3, %v3087_v52, %v3086_v62 }
0x3899   :  { %v3090_v10 = vsel %vm674_vm8, %v3088_v5, -inf }
0x389a   :  { %3091 = vmax.xlane.f32.xlu0 %v3090_v10 }
0x390d   :  { %v3092_v2 = vpop.xlane.xlu0 %3091 }
0x390e   :  { %v3094_v7 = vperm.slane %v3092_v2, 0  ;;  %v3095_v39 = vperm.slane %v3092_v2, 1 }
0x3910   :  { %v3098_v54 = vsub.f32 %v3072_v42, %v3094_v7  ;;  %v3099_v34 = vsub.f32 %v3075_v6, %v3095_v39 }
0x3912   :  { %v3100_v63 = vmul.f32 1.442695, %v3098_v54  ;;  %v3102_v15 = vmul.f32 1.442695, %v3099_v34 }
0x3914   :  { %4249 = vpow2.f32 %v3100_v63 }
0x3915   :  { %4251 = vpow2.f32 %v3102_v15 }
0x391a   :  { %v4250_v1 = vpop.eup %4249 }
0x391b   :  { %v4252_v61 = vpop.eup %4251  ;;  %3107 = vperm.xlu1 %4082, %v4250_v1  }
0x391c   :  { %3110 = vperm.xlu2 %4084, %v4252_v61  }
0x3976   :  { %v3111_v27 = vpop.permute.xlu2 %3110 }
0x3977   :  { %v3113_v13 = vperm.slane %v3111_v27, %v4851_v0 }
0x398d   :  { %v3108_v12 = vpop.permute.xlu1 %3107 }
0x398e   :  { %v3112_v25 = vperm.slane %v3108_v12, %v4851_v0 }
0x3990   :  { %v3114_v43 = vsel %vm424_vm3, %v3113_v13, %v3112_v25 }
0x3991   :  { %v3116_v32 = vsel %vm674_vm8, %v3114_v43, 0.0 }
0x3992   :  { %3117 = vadd.xlane.f32.xlu0 %v3116_v32 }
0x3a05   :  { %v3118_v30 = vpop.xlane.xlu0 %3117 }
0x3a06   :  { %v3120_v57 = vperm.slane %v3118_v30, 0  ;;  %v3121_v8 = vperm.slane %v3118_v30, 1 }
0x3a08   :  { %4253 = vrcp.f32 %v3120_v57  ;;  %v3135_v22 = vand.u32 2147483648, %v3120_v57  ;;  %v3150_v37 = vand.u32 2147483648, %v3121_v8  ;;  %v3133_v16 = vand.u32 2147483647, %v3120_v57 }
0x3a09   :  { %4255 = vrcp.f32 %v3121_v8  ;;  %v3148_v6 = vand.u32 2147483647, %v3121_v8  ;;  %vm3129_vm11 = vweird.f32 %v3120_v57  ;;  %vm3144_vm12 = vweird.f32 %v3121_v8 }
0x3a0a   :  { %v3136_v62 = vor.u32 1.1754944e-38, %v3135_v22  ;;  %v3151_v52 = vor.u32 1.1754944e-38, %v3150_v37  ;;  %vm3134_vm2 = vcmp.eq.f32.partialorder %v3133_v16, 8.507059e+37  ;;  %v2854_v16 = vand.u32 2147483647, %v5814_v55 }
0x3a0b   :  { %vm3149_vm15 = vcmp.eq.f32.partialorder %v3148_v6, 8.507059e+37 }
0x3a0e   :  { %v4254_v38 = vpop.eup %4253 }
0x3a0f   :  { %v4256_v26 = vpop.eup %4255  ;;  %v3125_v47 = vmul.f32 %v4254_v38, %v3120_v57  ;;  %vm3130_vm6 = vweird.f32 %v4254_v38 }
0x3a10   :  { %v3140_v50 = vmul.f32 %v4256_v26, %v3121_v8  ;;  %vm3145_vm10 = vweird.f32 %v4256_v26  ;;  %vm3131_vm13 = vmor %vm3129_vm11, %vm3130_vm6 }
0x3a11   :  { %v3126_v58 = vsub.f32 1.0, %v3125_v47  ;;  %vm3146_vm14 = vmor %vm3144_vm12, %vm3145_vm10  ;;  %vm2871_vm10 = vcmp.eq.f32.partialorder %v5829_v4, 0.0 }
0x3a12   :  { %v3141_v51 = vsub.f32 1.0, %v3140_v50  ;;  %vm2866_vm6 = vmand %vm2864_vm5, %vm2865_vm7 }
0x3a13   :  { %v3127_v11 = vmul.f32 %v4254_v38, %v3126_v58 }
0x3a14   :  { %v3142_v42 = vmul.f32 %v4256_v26, %v3141_v51 }
0x3a15   :  { %v3128_v49 = vadd.f32 %v4254_v38, %v3127_v11 }
0x3a16   :  { %v3143_v44 = vadd.f32 %v4256_v26, %v3142_v42 }
0x3a17   :  { %v3132_v5 = vsel %vm3131_vm13, %v4254_v38, %v3128_v49  ;;  %v2872_v49 = vmul.f32 %v5814_v55, %v5045_v9 }
0x3a18   :  { %v3147_v10 = vsel %vm3146_vm14, %v4256_v26, %v3143_v44  ;;  %v3137_v2 = vsel %vm3134_vm2, %v3136_v62, %v3132_v5 }
0x3a19   :  { %v3152_v7 = vsel %vm3149_vm15, %v3151_v52, %v3147_v10  ;;  %v3138_v39 = vmul.f32 %v4250_v1, %v3137_v2  ;;  %v2873_v44 = vsel %vm674_vm8, %v2872_v49, 0.0 }
0x3a1a   :  { %v3153_v54 = vmul.f32 %v4252_v61, %v3152_v7 }
0x3a1b   :  { %3156 = vperm.xlu2 %4084, %v3138_v39  }
0x3a1c   :  { %3161 = vperm.xlu0 %4074, %v3153_v54  }
0x3a75   :  { %v3157_v34 = vpop.permute.xlu2 %3156 }
0x3a76   :  { %v3164_v63 = vmul.f32 %v3157_v34, %v4696_v60 }
0x3a78   :  { %v3166_v15 = vsel %vm194_vm0, %v3164_v63, 0.0  ;;  %v3962_v63 = vsel %vm2866_vm6, 1.0, %v6125_v29 }
0x3a79   :  { %v3167_v27 = vrot.slane %v3166_v15, 4 }
0x3a7b   :  { %v3168_v12 = vadd.f32 %v3167_v27, %v3166_v15 }
0x3a7d   :  { %v3169_v43 = vrot.slane %v3168_v12, 2 }
0x3a7f   :  { %v3170_v57 = vadd.f32 %v3169_v43, %v3168_v12  ;;  %v2869_v12 = vsel %vm2842_vm9, 1.0, %v6125_v29 }
0x3a81   :  { %v3171_v61 = vrot.slane %v3170_v57, 1 }
0x3a83   :  { %v3172_v47 = vadd.f32 %v3171_v61, %v3170_v57 }
0x3a8e   :  { %v3162_v13 = vpop.permute.xlu0 %3161 }
0x3a8f   :  { %v3165_v25 = vmul.f32 %v3162_v13, %v4694_v59  ;;  %v2870_v13 = vsel %vm441_vm4, %v2869_v12, %v3962_v63 }
0x3a91   :  { %v3173_v32 = vsel %vm194_vm0, %v3165_v25, 0.0 }
0x3a92   :  { %v3174_v30 = vrot.slane %v3173_v32, 4 }
0x3a94   :  { %v3175_v8 = vadd.f32 %v3174_v30, %v3173_v32 }
0x3a96   :  { %v3176_v1 = vrot.slane %v3175_v8, 2 }
0x3a98   :  { %v3177_v38 = vadd.f32 %v3176_v1, %v3175_v8 }
0x3a9a   :  { %v3178_v26 = vrot.slane %v3177_v38, 1 }
0x3a9c   :  { %v3179_v50 = vadd.f32 %v3178_v26, %v3177_v38 }
0x3a9e   :  { %v3182_v58 = vsel %vm424_vm3, %v3179_v50, %v3172_v47 }
0x3a9f   :  { %3969 = vmatmul.msk.f32.vlgmr.msra.gmra.mxu3 %vm194_vm0, %v3182_v58 }
0x3aa0   :  { %3678 = vmatpush.msra.mxu3 %v5693_v31  ;;  %v2855_v31 = vsel %vm674_vm8, %v2854_v16, -inf }
0x3aa2   :  { %3679 = vmatpush.msra.mxu3 %v5697_v33 }
0x3aa4   :  { %3680 = vmatpush.msra.mxu3 %v5701_v56 }
0x3aa6   :  { %3681 = vmatpush.msra.mxu3 %v5705_v14 }
0x3aa7   :  { %3977 = vmatmul.msk.f32.vlgmr.msrb.gmra.mxu3 %vm194_vm0, %v5819_v17 }
0x3b22   :  { %v3202_v51 = vpop.f32.mrf.mxu3 }
0x3b23   :  { %v3206_v22 = vrot.slane %v3202_v51, 1  ;;  %v3207_v11 = vperm.slane %v3202_v51, 0 }
0x3b25   :  { %v3208_v37 = vperm.slane %v3206_v22, 0  ;;  %3209 = vrot.lane.b32.xlu2 %v3207_v11, %s4449_s2 }
0x3b27   :  { %3211 = vrot.lane.b32.xlu1 %v3208_v37, %s4449_s2 }
0x3b51   :  { %2856 = vmax.xlane.f32.xlu1 %v2855_v31 }
0x3b7f   :  { %v3210_v33 = vpop.permute.xlu2 %3209 }
0x3b80   :  { %v3215_v56 = vadd.f32 %v3210_v33, %v4733_v23 }
0x3b82   :  { %4257 = vtanh.f32 %v3215_v56 }
0x3b88   :  { %v4258_v14 = vpop.eup %4257 }
0x3b89   :  { %3221 = vrot.lane.b32.xlu2 %v4258_v14, %s4448_s18 }
0x3b99   :  { %v3212_v17 = vpop.permute.xlu1 %3211 }
0x3b9a   :  { %v3216_v42 = vadd.f32 %v3212_v17, %v4735_v24 }
0x3b9c   :  { %4259 = vtanh.f32 %v3216_v42 }
0x3ba2   :  { %v4260_v6 = vpop.eup %4259 }
0x3ba3   :  { %3223 = vrot.lane.b32.xlu0 %v4260_v6, %s4448_s18 }
0x3bb2   :  { %2874 = vadd.xlane.f32.xlu2 %v2873_v44 }
0x3bc4   :  { %v5875_v52 = vpop.xlane.xlu1 %2856 }
0x3bc5   :  { %v2881_v5 = vsel %vm957_vm1, %v5875_v52, -inf }
0x3bc6   :  { %v2882_v10 = vrot.slane %v2881_v5, 4 }
0x3bc8   :  { %v2883_v2 = vmax.f32 %v2881_v5, %v2882_v10 }
0x3bca   :  { %v2884_v39 = vrot.slane %v2883_v2, 2 }
0x3bcc   :  { %v2885_v54 = vmax.f32 %v2883_v2, %v2884_v39 }
0x3bce   :  { %v2886_v34 = vrot.slane %v2885_v54, 1 }
0x3bd0   :  { %v2887_v15 = vmax.f32 %v2885_v54, %v2886_v34 }
0x3bd2   :  { %vm2888_vm13 = vcmp.eq.f32.partialorder %v2887_v15, 0.0 }
0x3be3   :  { %v3222_v62 = vpop.permute.xlu2 %3221 }
0x3be4   :  { %3970 = vmatmul.msk.f32.vlgmr.msrb.gmra.mxu0 %vm194_vm0, %v3222_v62 }
0x3c15   :  { %v3224_v7 = vpop.permute.xlu0 %3223 }
0x3c16   :  { %3971 = vmatmul.msk.f32.gmra.mxu0 %vm194_vm0, %v3224_v7 }
0x3c25   :  { %v2875_v27 = vpop.xlane.xlu2 %2874 }
0x3c26   :  { %vm2876_vm11 = vcmp.eq.f32.partialorder %v2875_v27, 0.0 }
0x3c27   :  { %vm2877_vm12 = vmor %vm2871_vm10, %vm2876_vm11  ;;  %vm3373_vm11 = vcmp.eq.s32.totalorder %v4851_v0, 5 }
0x3c28   :  { %v2880_v25 = vsel %vm2877_vm12, %v4937_v46, %v2870_v13 }
0x3c29   :  { %v2891_v43 = vsel %vm2888_vm13, 0.0, %v2880_v25  ;;  %v4376_v25 = vld [vmem:[%s4464_s9] sm:$0x3]  ;;  %s3835_s9 = sshll.u32 %s4450_s5, 4  ;;  %s3836_s9 = int_to_ptr.vmem [resolvable:$true] %s3835_s9 }
0x3c2a   :  { %v3252_v32 = vsel %vm674_vm8, %v2891_v43, 0.0 }
0x3c2b   :  { %3253 = vadd.xlane.f32.xlu0 %v3252_v32 }
0x3c61   :  { %v3246_v30 = vpop.f32.mrf.mxu0 }
0x3c62   :  { %3263 = vperm.xlu1 %4082, %v3246_v30  }
0x3c6a   :  { %4085 = vset.pattern.permute.xlu1 %v4631_v3 }
0x3c93   :  { %v3249_v57 = vpop.f32.mrf.mxu0 }
0x3c94   :  { %3266 = vperm.xlu2 %4084, %v3249_v57  }
0x3c9c   :  { %4086 = vset.pattern.permute.xlu2 %v4631_v3 }
0x3c9e   :  { %v3254_v41 = vpop.xlane.xlu0 %3253 }
0x3c9f   :  { %vm3255_vm9 = vcmp.gt.f32.partialorder %v3254_v41, 0.0 }
0x3ca0   :  { %v3258_v1 = vsel %vm3255_vm9, %v2891_v43, %v4937_v46 }
0x3ca1   :  { %vm3259_vm14 = vcmp.gt.f32.partialorder %v3258_v1, 0.0  ;;  %v4377_v1 = vld [vmem:[%s6110_s3] ss:$0 sm:$0xff] }
0x3cd4   :  { %v3264_v8 = vpop.permute.xlu1 %3263 }
0x3cd5   :  { %v3268_v38 = vperm.slane %v3264_v8, %v4851_v0  ;;  %v3427_v8 = vpop.f32.mrf.mxu3 }
0x3cee   :  { %v3267_v61 = vpop.permute.xlu2 %3266 }
0x3cef   :  { %v3269_v26 = vperm.slane %v3267_v61, %v4851_v0  ;;  %v3428_v61 = vadd.f32 %v4377_v1, %v3427_v8 }
0x3cf1   :  { %v3270_v47 = vsel %vm424_vm3, %v3269_v26, %v3268_v38  ;;  %v4378_v26 = vld [vmem:[%s6112_s14 + $0x1] ss:$0 sm:$0xff] }
0x3cf2   :  { %v3272_v50 = vsel %vm3259_vm14, %v3270_v47, -1e+09  ;;  %v4379_v47 = vld [vmem:[%s6112_s14] ss:$0 sm:$0xff] }
0x3cf3   :  { %v3273_v58 = vsel %vm674_vm8, %v3272_v50, -inf }
0x3cf4   :  { %3274 = vmax.xlane.f32.xlu0 %v3273_v58 }
0x3d67   :  { %v3275_v51 = vpop.xlane.xlu0 %3274 }
0x3d68   :  { %v3276_v22 = vsub.f32 %v3272_v50, %v3275_v51  ;;  %v4380_v51 = vld [vmem:[%s6113_s12] ss:$0 sm:$0xff] }
0x3d6a   :  { %v3277_v3 = vmul.f32 1.442695, %v3276_v22 }
0x3d6c   :  { %4261 = vpow2.f32 %v3277_v3 }
0x3d72   :  { %v4262_v11 = vpop.eup %4261 }
0x3d73   :  { %v3279_v37 = vsel %vm674_vm8, %v4262_v11, 0.0 }
0x3d74   :  { %3280 = vadd.xlane.f32.xlu0 %v3279_v37 }
0x3de7   :  { %v3281_v16 = vpop.xlane.xlu0 %3280 }
0x3de8   :  { %4263 = vrcp.f32 %v3281_v16  ;;  %v3293_v14 = vand.u32 2147483648, %v3281_v16  ;;  %v3291_v42 = vand.u32 2147483647, %v3281_v16  ;;  %vm3287_vm15 = vweird.f32 %v3281_v16 }
0x3dea   :  { %v3294_v49 = vor.u32 1.1754944e-38, %v3293_v14  ;;  %vm3292_vm7 = vcmp.eq.f32.partialorder %v3291_v42, 8.507059e+37 }
0x3dee   :  { %v4264_v31 = vpop.eup %4263 }
0x3def   :  { %v3283_v33 = vmul.f32 %v4264_v31, %v3281_v16  ;;  %vm3288_vm2 = vweird.f32 %v4264_v31 }
0x3df0   :  { %vm3289_vm5 = vmor %vm3287_vm15, %vm3288_vm2 }
0x3df1   :  { %v3284_v56 = vsub.f32 1.0, %v3283_v33 }
0x3df3   :  { %v3285_v17 = vmul.f32 %v4264_v31, %v3284_v56 }
0x3df5   :  { %v3286_v6 = vadd.f32 %v4264_v31, %v3285_v17 }
0x3df7   :  { %v3290_v44 = vsel %vm3289_vm5, %v4264_v31, %v3286_v6 }
0x3df8   :  { %v3295_v62 = vsel %vm3292_vm7, %v3294_v49, %v3290_v44 }
0x3df9   :  { %v3296_v5 = vmul.f32 %v4262_v11, %v3295_v62  ;;  %v4381_v11 = vld [vmem:[%s6115_s4] ss:$0 sm:$0xff] }
0x3dfb   :  { %v3297_v10 = vsel %vm674_vm8, %v3296_v5, -inf }
0x3dfc   :  { %3298 = vmax.xlane.f32.xlu0 %v3297_v10 }
0x3e6f   :  { %v5901_v2 = vpop.xlane.xlu0 %3298 }
0x3e70   :  { %vm3300_vm6 = vcmp.ge.f32.partialorder %v3296_v5, %v5901_v2 }
0x3e71   :  { %v3301_v7 = vsel %vm3300_vm6, %v4949_v36, 8.0 }
0x3e72   :  { %v3302_v39 = vsel %vm674_vm8, %v3301_v7, inf }
0x3e73   :  { %3303 = vmin.xlane.f32.xlu1 %v3302_v39 }
0x3ee6   :  { %v3304_v54 = vpop.xlane.xlu1 %3303 }
0x3ee7   :  { %vm4017_vm10 = vcmp.lt.s32.totalorder %v3304_v54, 0  ;;  %v4018_v34 = vceil.f32 %v3304_v54  ;;  %v4019_v63 = vfloor.f32 %v3304_v54 }
0x3ee9   :  { %v4020_v15 = vsel %vm4017_vm10, %v4018_v34, %v4019_v63 }
0x3eea   :  { %v5907_v27 = vcvt.f32.s32 %v4020_v15 }
0x3eec   :  { %vm3308_vm12 = vcmp.eq.s32.totalorder %v4851_v0, %v5907_v27  ;;  %v5913_v12 = vsel %vm3373_vm11, %v5907_v27, %v5765_v35  ;;  %vm3323_vm15 = vcmp.ne.s32.totalorder %v5907_v27, 0 }
0x3eed   :  { %v5916_v13 = vsel %vm3308_vm12, 1.0, %v6125_v29 }
0x3eee   :  { %v3379_v43 = vmul.f32 %v4376_v25, %v5916_v13  ;;  %v3375_v32 = vmul.f32 %v5773_v18, %v5916_v13  ;;  %v3311_v30 = vmul.f32 %v5916_v13, %v5829_v4 }
0x3ef0   :  { %v3380_v57 = vsel %vm674_vm8, %v3379_v43, 0.0  ;;  %v3376_v41 = vsel %vm674_vm8, %v3375_v32, 0.0  ;;  %v3312_v35 = vsel %vm674_vm8, %v3311_v30, 0.0 }
0x3ef1   :  { %3381 = vadd.xlane.f32.xlu0 %v3380_v57  ;;  %3377 = vadd.xlane.f32.xlu2 %v3376_v41  ;;  %v3315_v41 = vmul.f32 %v5916_v13, %v5814_v55 }
0x3ef2   :  { %3313 = vadd.xlane.f32.xlu1 %v3312_v35 }
0x3ef3   :  { %v3316_v35 = vsel %vm674_vm8, %v3315_v41, 0.0 }
0x3f05   :  { %3451 = vrot.lane.b32.xlu0 %v3428_v61, %s4447_s6 }
0x3f64   :  { %v3382_v18 = vpop.xlane.xlu0 %3381  ;;  %v3378_v38 = vpop.xlane.xlu2 %3377 }
0x3f65   :  { %v3384_v4 = vmul.f32 %v4378_v26, %v3382_v18  ;;  %v3383_v50 = vmul.f32 %v4379_v47, %v3378_v38  ;;  %v3314_v1 = vpop.xlane.xlu1 %3313  ;;  %v3324_v18 = vsub.f32 1.0, %v5916_v13 }
0x3f67   :  { %v3385_v58 = vadd.f32 %v3384_v4, %v3383_v50  ;;  %v3325_v47 = vmul.f32 %v3324_v18, %v5814_v55 }
0x3f69   :  { %v3386_v22 = vadd.f32 %v4380_v51, %v3385_v58 }
0x3f6b   :  { %3976 = vmatmul.msk.f32.vlgmr.msrb.gmra.mxu1 %vm194_vm0, %v3386_v22  ;;  %v3333_v22 = vsel %vm441_vm4, 0.0, %v5814_v55 }
0x3f77   :  { %v3452_v7 = vpop.permute.xlu0 %3451 }
0x3fe8   :  { %v3407_v3 = vpop.f32.mrf.mxu1 }
0x3fe9   :  { %v3408_v37 = vadd.f32 %v4381_v11, %v3407_v3 }
0x3feb   :  { %v3430_v16 = vadd.f32 %v3428_v61, %v3408_v37 }
0x3fed   :  { %v3978_v31 = vmul.f32 -1.442695, %v3430_v16 }
0x3fef   :  { %4265 = vpow2.f32 %v3978_v31 }
0x3ff5   :  { %v4266_v33 = vpop.eup %4265 }
0x3ff6   :  { %v3434_v56 = vadd.f32 1.0, %v4266_v33 }
0x3ff8   :  { %4267 = vrcp.f32 %v3434_v56  ;;  %v3446_v6 = vand.u32 2147483648, %v3434_v56  ;;  %v3444_v44 = vand.u32 2147483647, %v3434_v56  ;;  %vm3440_vm9 = vweird.f32 %v3434_v56 }
0x3ffa   :  { %v3447_v5 = vor.u32 1.1754944e-38, %v3446_v6  ;;  %vm3445_vm2 = vcmp.eq.f32.partialorder %v3444_v44, 8.507059e+37 }
0x3ffe   :  { %v4268_v14 = vpop.eup %4267 }
0x3fff   :  { %v3436_v17 = vmul.f32 %v4268_v14, %v3434_v56  ;;  %vm3441_vm13 = vweird.f32 %v4268_v14  ;;  %v4382_v56 = vld [vmem:[%s6119_s22 + $0x1] ss:$0 sm:$0xff] }
0x4000   :  { %vm3442_vm14 = vmor %vm3440_vm9, %vm3441_vm13 }
0x4001   :  { %v3437_v42 = vsub.f32 1.0, %v3436_v17 }
0x4003   :  { %v3438_v49 = vmul.f32 %v4268_v14, %v3437_v42  ;;  %v4383_v42 = vld [vmem:[%s6119_s22] ss:$0 sm:$0xff] }
0x4005   :  { %v3439_v62 = vadd.f32 %v4268_v14, %v3438_v49 }
0x4007   :  { %v3443_v10 = vsel %vm3442_vm14, %v4268_v14, %v3439_v62 }
0x4008   :  { %v3448_v39 = vsel %vm3445_vm2, %v3447_v5, %v3443_v10 }
0x4009   :  { %v3454_v54 = vmul.f32 %v3452_v7, %v3448_v39  ;;  %v3461_v25 = vsub.f32 1.0, %v3448_v39  ;;  %v3467_v32 = vmul.f32 %v3448_v39, %v5799_v20 }
0x400b   :  { %3456 = vrot.lane.b32.xlu0 %v3454_v54, %s4447_s6 }
0x407d   :  { %v3457_v34 = vpop.permute.xlu0 %3456 }
0x407e   :  { %v3459_v63 = vadd.f32 %v3457_v34, %v3408_v37 }
0x4080   :  { %4269 = vtanh.f32 %v3459_v63 }
0x4086   :  { %v4270_v15 = vpop.eup %4269 }
0x4087   :  { %3463 = vrot.lane.b32.xlu2 %v4270_v15, %s4448_s18 }
0x40e1   :  { %v3464_v43 = vpop.permute.xlu2 %3463 }
0x40e2   :  { %v3466_v30 = vmul.f32 %v3464_v43, %v3461_v25 }
0x40e4   :  { %v3468_v57 = vadd.f32 %v3467_v32, %v3466_v30 }
0x40e6   :  { %3496 = vrot.lane.b32.xlu0 %v3468_v57, %s4448_s18 }
0x4110   :  { %3317 = vadd.xlane.f32.xlu0 %v3316_v35 }
0x4158   :  { %v3497_v8 = vpop.permute.xlu0 %3496 }
0x4159   :  { %3979 = vmatmul.msk.f32.vlgmr.msra.gmra.mxu1 %vm194_vm0, %v3497_v8 }
0x4183   :  { %v3318_v61 = vpop.xlane.xlu0 %3317 }
0x4184   :  { %v3319_v38 = vsub.f32 %v3314_v1, %v3318_v61  ;;  %v3321_v26 = vsub.f32 %v3318_v61, %v3314_v1 }
0x4186   :  { %v3320_v20 = vmax.f32 %v3319_v38, 0.0  ;;  %v3322_v4 = vmax.f32 %v3321_v26, 0.0 }
0x4188   :  { %v3326_v50 = vmul.f32 %v5916_v13, %v3322_v4  ;;  %v3973_v51 = vadd.f32 -1.0, %v3320_v20  ;;  %v5961_v55 = vsel %vm3323_vm15, %v3320_v20, 1.0 }
0x4189   :  { %v3470_v31 = vperm.slane %v5961_v55, 1  ;;  %v3469_v33 = vperm.slane %v5961_v55, 0 }
0x418a   :  { %v3327_v58 = vadd.f32 %v3326_v50, %v3325_v47 }
0x418b   :  { %v3472_v6 = vmul.f32 %v4383_v42, %v3470_v31  ;;  %v3471_v49 = vmul.f32 %v4383_v42, %v3469_v33 }
0x418c   :  { %v3329_v3 = vsel %vm441_vm4, %v3973_v51, %v3327_v58 }
0x418d   :  { %v5953_v11 = vsel %vm3323_vm15, %v3329_v3, %v3333_v22 }
0x418e   :  { %v3480_v37 = vperm.slane %v5953_v11, 1  ;;  %v3473_v13 = vperm.slane %v5953_v11, 0  ;;  %vm3345_vm14 = vcmp.ne.f32.partialorder %v5953_v11, 0.0  ;;  %vm3346_vm2 = vcmp.lt.f32.partialorder %v5953_v11, %v5961_v55 }
0x4190   :  { %3485 = vperm.xlu2 %4086, %v3480_v37   ;;  %3478 = vperm.xlu1 %4085, %v3473_v13  }
0x4198   :  { %4087 = vset.pattern.permute.xlu2 %v6126_v45  ;;  %4088 = vset.pattern.permute.xlu1 %v6126_v45  ;;  %v4384_v45 = vld [vmem:[%s6120_s26] ss:$0 sm:$0xff] }
0x41d6   :  { %v3517_v10 = vpop.f32.mrf.mxu1 }
0x41d7   :  { %v3522_v39 = vperm.slane %v3517_v10, 0  ;;  %v3521_v63 = vrot.slane %v3517_v10, 1 }
0x41d9   :  { %v3523_v43 = vperm.slane %v3521_v63, 0 }
0x41ea   :  { %v3486_v16 = vpop.permute.xlu2 %3485 }
0x41eb   :  { %v3488_v14 = vmul.f32 %v4382_v56, %v3486_v16 }
0x41ed   :  { %v3490_v62 = vadd.f32 %v3488_v14, %v3472_v6 }
0x41ef   :  { %v3492_v54 = vadd.f32 %v4384_v45, %v3490_v62 }
0x41f1   :  { %v3494_v25 = vadd.f32 %v3492_v54, %v4735_v24 }
0x41f3   :  { %v3527_v32 = vadd.f32 %v3523_v43, %v3494_v25 }
0x4202   :  { %v3479_v17 = vpop.permute.xlu1 %3478 }
0x4203   :  { %v3487_v44 = vmul.f32 %v4382_v56, %v3479_v17 }
0x4205   :  { %v3489_v5 = vadd.f32 %v3487_v44, %v3471_v49 }
0x4207   :  { %v3491_v7 = vadd.f32 %v4384_v45, %v3489_v5 }
0x4209   :  { %v3493_v34 = vadd.f32 %v3491_v7, %v4733_v23 }
0x420b   :  { %v3526_v15 = vadd.f32 %v3522_v39, %v3493_v34 }
0x420d   :  { %4271 = vtanh.f32 %v3526_v15 }
0x420e   :  { %4273 = vtanh.f32 %v3527_v32 }
0x4213   :  { %v4272_v30 = vpop.eup %4271 }
0x4214   :  { %3980 = vmatmul.msk.f32.vlgmr.msrb.gmra.mxu2 %vm194_vm0, %v4272_v30  ;;  %v4274_v57 = vpop.eup %4273 }
0x421c   :  { %3981 = vmatmul.msk.f32.gmra.mxu2 %vm194_vm0, %v4274_v57 }
0x4297   :  { %v3553_v41 = vpop.f32.mrf.mxu2 }
0x4298   :  { %3562 = vperm.xlu2 %4087, %v3553_v41  }
0x429f   :  { %v3556_v35 = vpop.f32.mrf.mxu2 }
0x42a0   :  { %3565 = vperm.xlu1 %4088, %v3556_v35  }
0x42f2   :  { %v3563_v8 = vpop.permute.xlu2 %3562 }
0x42f3   :  { %v3567_v61 = vperm.slane %v3563_v8, %v4851_v0 }
0x4312   :  { %v3566_v1 = vpop.permute.xlu1 %3565 }
0x4313   :  { %v3568_v18 = vperm.slane %v3566_v1, %v4851_v0 }
0x4315   :  { %v3569_v38 = vsel %vm424_vm3, %v3568_v18, %v3567_v61 }
0x4316   :  { %v3571_v26 = vsel %vm674_vm8, %v3569_v38, -inf }
0x4317   :  { %3572 = vmax.xlane.f32.xlu2 %v3571_v26 }
0x438a   :  { %v3573_v20 = vpop.xlane.xlu2 %3572 }
0x438b   :  { %v3575_v4 = vperm.slane %v3573_v20, 0  ;;  %v3576_v47 = vperm.slane %v3573_v20, 1 }
0x438d   :  { %v3579_v50 = vsub.f32 %v3553_v41, %v3575_v4  ;;  %v3580_v51 = vsub.f32 %v3556_v35, %v3576_v47 }
0x438f   :  { %v3581_v58 = vmul.f32 1.442695, %v3579_v50  ;;  %v3583_v22 = vmul.f32 1.442695, %v3580_v51 }
0x4391   :  { %4275 = vpow2.f32 %v3581_v58 }
0x4392   :  { %4277 = vpow2.f32 %v3583_v22 }
0x4397   :  { %v4276_v3 = vpop.eup %4275 }
0x4398   :  { %3588 = vperm.xlu1 %4088, %v4276_v3   ;;  %v4278_v37 = vpop.eup %4277 }
0x43a0   :  { %3591 = vperm.xlu1 %4088, %v4278_v37  }
0x440a   :  { %v3589_v13 = vpop.permute.xlu1 %3588 }
0x440b   :  { %v3593_v31 = vperm.slane %v3589_v13, %v4851_v0 }
0x4412   :  { %v3592_v16 = vpop.permute.xlu1 %3591 }
0x4413   :  { %v3594_v33 = vperm.slane %v3592_v16, %v4851_v0 }
0x4415   :  { %v3595_v56 = vsel %vm424_vm3, %v3594_v33, %v3593_v31 }
0x4416   :  { %v3597_v14 = vsel %vm674_vm8, %v3595_v56, 0.0 }
0x4417   :  { %3598 = vadd.xlane.f32.xlu0 %v3597_v14 }
0x448a   :  { %v3599_v17 = vpop.xlane.xlu0 %3598 }
0x448b   :  { %v3601_v42 = vperm.slane %v3599_v17, 0  ;;  %v3602_v6 = vperm.slane %v3599_v17, 1 }
0x448d   :  { %4279 = vrcp.f32 %v3601_v42  ;;  %v3616_v7 = vand.u32 2147483648, %v3601_v42  ;;  %v3631_v54 = vand.u32 2147483648, %v3602_v6  ;;  %v3614_v34 = vand.u32 2147483647, %v3601_v42 }
0x448e   :  { %4281 = vrcp.f32 %v3602_v6  ;;  %v3629_v15 = vand.u32 2147483647, %v3602_v6  ;;  %vm3610_vm6 = vweird.f32 %v3601_v42  ;;  %vm3625_vm10 = vweird.f32 %v3602_v6 }
0x448f   :  { %v3617_v32 = vor.u32 1.1754944e-38, %v3616_v7  ;;  %v3632_v30 = vor.u32 1.1754944e-38, %v3631_v54  ;;  %vm3615_vm13 = vcmp.eq.f32.partialorder %v3614_v34, 8.507059e+37  ;;  %v3353_v54 = vmul.f32 %v5953_v11, %v5045_v9 }
0x4490   :  { %vm3630_vm9 = vcmp.eq.f32.partialorder %v3629_v15, 8.507059e+37 }
0x4491   :  { %v3354_v34 = vsel %vm674_vm8, %v3353_v54, 0.0 }
0x4493   :  { %v4280_v49 = vpop.eup %4279 }
0x4494   :  { %v4282_v44 = vpop.eup %4281  ;;  %v3606_v62 = vmul.f32 %v4280_v49, %v3601_v42  ;;  %vm3611_vm5 = vweird.f32 %v4280_v49 }
0x4495   :  { %v3621_v5 = vmul.f32 %v4282_v44, %v3602_v6  ;;  %vm3626_vm7 = vweird.f32 %v4282_v44  ;;  %vm3612_vm11 = vmor %vm3610_vm6, %vm3611_vm5 }
0x4496   :  { %v3607_v10 = vsub.f32 1.0, %v3606_v62  ;;  %vm3627_vm12 = vmor %vm3625_vm10, %vm3626_vm7 }
0x4497   :  { %v3622_v45 = vsub.f32 1.0, %v3621_v5  ;;  %vm3347_vm5 = vmand %vm3345_vm14, %vm3346_vm2  ;;  %vm3825_vm2 = vcmp.eq.s32.totalorder %v4851_v0, 6 }
0x4498   :  { %v3608_v39 = vmul.f32 %v4280_v49, %v3607_v10 }
0x4499   :  { %v3623_v63 = vmul.f32 %v4282_v44, %v3622_v45 }
0x449a   :  { %v3609_v25 = vadd.f32 %v4280_v49, %v3608_v39 }
0x449b   :  { %v3624_v43 = vadd.f32 %v4282_v44, %v3623_v63 }
0x449c   :  { %v3613_v57 = vsel %vm3612_vm11, %v4280_v49, %v3609_v25  ;;  %v3335_v49 = vand.u32 2147483647, %v5953_v11 }
0x449d   :  { %v3628_v41 = vsel %vm3627_vm12, %v4282_v44, %v3624_v43  ;;  %v3618_v35 = vsel %vm3615_vm13, %v3617_v32, %v3613_v57  ;;  %v3975_v57 = vsel %vm3347_vm5, 1.0, %v6125_v29  ;;  %vm3827_vm5 = vcmask 50176  }
0x449e   :  { %v3633_v8 = vsel %vm3630_vm9, %v3632_v30, %v3628_v41  ;;  %v3619_v1 = vmul.f32 %v4276_v3, %v3618_v35  ;;  %v3336_v44 = vsel %vm674_vm8, %v3335_v49, -inf }
0x449f   :  { %v3634_v61 = vmul.f32 %v4278_v37, %v3633_v8  ;;  %v3350_v8 = vsel %vm3323_vm15, 1.0, %v6125_v29 }
0x44a0   :  { %3637 = vperm.xlu1 %4088, %v3619_v1   ;;  %v3351_v1 = vsel %vm441_vm4, %v3350_v8, %v3975_v57 }
0x44a1   :  { %3642 = vperm.xlu0 %4074, %v3634_v61  }
0x4512   :  { %v3638_v18 = vpop.permute.xlu1 %3637 }
0x4513   :  { %v3643_v38 = vpop.permute.xlu0 %3642  ;;  %v3645_v26 = vmul.f32 %v3638_v18, %v4696_v60 }
0x4514   :  { %v3646_v20 = vmul.f32 %v3643_v38, %v4694_v59 }
0x4515   :  { %v3647_v4 = vsel %vm194_vm0, %v3645_v26, 0.0 }
0x4516   :  { %v3654_v47 = vsel %vm194_vm0, %v3646_v20, 0.0  ;;  %v3648_v50 = vrot.slane %v3647_v4, 4 }
0x4517   :  { %v3655_v58 = vrot.slane %v3654_v47, 4 }
0x4518   :  { %v3649_v51 = vadd.f32 %v3648_v50, %v3647_v4 }
0x4519   :  { %v3656_v22 = vadd.f32 %v3655_v58, %v3654_v47 }
0x451a   :  { %v3650_v13 = vrot.slane %v3649_v51, 2 }
0x451b   :  { %v3657_v16 = vrot.slane %v3656_v22, 2 }
0x451c   :  { %v3651_v3 = vadd.f32 %v3650_v13, %v3649_v51 }
0x451d   :  { %v3658_v37 = vadd.f32 %v3657_v16, %v3656_v22 }
0x451e   :  { %v3652_v31 = vrot.slane %v3651_v3, 1 }
0x451f   :  { %v3659_v33 = vrot.slane %v3658_v37, 1 }
0x4520   :  { %v3653_v56 = vadd.f32 %v3652_v31, %v3651_v3 }
0x4521   :  { %v3660_v14 = vadd.f32 %v3659_v33, %v3658_v37 }
0x4523   :  { %v3663_v60 = vsel %vm424_vm3, %v3660_v14, %v3653_v56 }
0x4524   :  { %3982 = vmatmul.msk.f32.vlgmr.msra.gmra.mxu3 %vm194_vm0, %v3663_v60 }
0x45a7   :  { %v3683_v59 = vpop.f32.mrf.mxu3 }
0x45a8   :  { %v3688_v17 = vperm.slane %v3683_v59, 0  ;;  %v3687_v42 = vrot.slane %v3683_v59, 1 }
0x45aa   :  { %3690 = vrot.lane.b32.xlu1 %v3688_v17, %s4449_s2  ;;  %v3689_v6 = vperm.slane %v3687_v42, 0 }
0x45b2   :  { %3692 = vrot.lane.b32.xlu1 %v3689_v6, %s4449_s2 }
0x45dc   :  { %3337 = vmax.xlane.f32.xlu1 %v3336_v44 }
0x461c   :  { %v3691_v62 = vpop.permute.xlu1 %3690 }
0x461d   :  { %v3696_v5 = vadd.f32 %v3691_v62, %v4733_v23 }
0x461f   :  { %4283 = vtanh.f32 %v3696_v5 }
0x4624   :  { %v3693_v10 = vpop.permute.xlu1 %3692 }
0x4625   :  { %v4284_v45 = vpop.eup %4283  ;;  %v3697_v7 = vadd.f32 %v3693_v10, %v4735_v24 }
0x4626   :  { %3702 = vrot.lane.b32.xlu0 %v4284_v45, %s4448_s18 }
0x4627   :  { %4285 = vtanh.f32 %v3697_v7 }
0x462d   :  { %v4286_v39 = vpop.eup %4285 }
0x462e   :  { %3704 = vrot.lane.b32.xlu2 %v4286_v39, %s4448_s18 }
0x464f   :  { %v5999_v15 = vpop.xlane.xlu1 %3337 }
0x4650   :  { %3355 = vadd.xlane.f32.xlu0 %v3354_v34  ;;  %v3362_v24 = vsel %vm957_vm1, %v5999_v15, -inf }
0x4651   :  { %v3363_v25 = vrot.slane %v3362_v24, 4 }
0x4653   :  { %v3364_v43 = vmax.f32 %v3362_v24, %v3363_v25 }
0x4655   :  { %v3365_v32 = vrot.slane %v3364_v43, 2 }
0x4657   :  { %v3366_v30 = vmax.f32 %v3364_v43, %v3365_v32 }
0x4659   :  { %v3367_v9 = vrot.slane %v3366_v30, 1 }
0x465b   :  { %v3368_v41 = vmax.f32 %v3366_v30, %v3367_v9 }
0x465d   :  { %vm3369_vm6 = vcmp.eq.f32.partialorder %v3368_v41, 0.0 }
0x4688   :  { %v3705_v23 = vpop.permute.xlu2 %3704 }
0x4698   :  { %v3703_v63 = vpop.permute.xlu0 %3702 }
0x4699   :  { %3983 = vmatmul.msk.f32.vlgmr.msra.gmra.mxu0 %vm194_vm0, %v3703_v63 }
0x46a1   :  { %3984 = vmatmul.msk.f32.gmra.mxu0 %vm194_vm0, %v3705_v23  ;;  %vm3352_vm0 = vcmp.eq.f32.partialorder %v5961_v55, 0.0 }
0x46c3   :  { %v3356_v35 = vpop.xlane.xlu0 %3355 }
0x46c4   :  { %vm3357_vm7 = vcmp.eq.f32.partialorder %v3356_v35, 0.0 }
0x46c5   :  { %vm3358_vm1 = vmor %vm3352_vm0, %vm3357_vm7 }
0x46c6   :  { %v3361_v61 = vsel %vm3358_vm1, %v4937_v46, %v3351_v1 }
0x46c7   :  { %v3372_v18 = vsel %vm3369_vm6, 0.0, %v3361_v61 }
0x46c8   :  { %v3733_v38 = vsel %vm674_vm8, %v3372_v18, 0.0 }
0x46c9   :  { %3734 = vadd.xlane.f32.xlu2 %v3733_v38 }
0x4716   :  { %v3727_v26 = vpop.f32.mrf.mxu0 }
0x4717   :  { %3744 = vperm.xlu1 %4088, %v3727_v26  }
0x471e   :  { %v3730_v20 = vpop.f32.mrf.mxu0 }
0x471f   :  { %3747 = vperm.xlu0 %4074, %v3730_v20  }
0x473c   :  { %v3735_v4 = vpop.xlane.xlu2 %3734 }
0x473d   :  { %vm3736_vm10 = vcmp.gt.f32.partialorder %v3735_v4, 0.0 }
0x473e   :  { %v3739_v27 = vsel %vm3736_vm10, %v3372_v18, %v4937_v46 }
0x473f   :  { %vm3740_vm15 = vcmp.gt.f32.partialorder %v3739_v27, 0.0 }
0x4789   :  { %v3745_v47 = vpop.permute.xlu1 %3744 }
0x478a   :  { %v3749_v58 = vperm.slane %v3745_v47, %v4851_v0  ;;  %v3811_v47 = vsel %vm441_vm4, 0.0, %v5953_v11 }
0x4791   :  { %v3748_v50 = vpop.permute.xlu0 %3747 }
0x4792   :  { %v3750_v51 = vperm.slane %v3748_v50, %v4851_v0 }
0x4794   :  { %v3751_v22 = vsel %vm424_vm3, %v3750_v51, %v3749_v58 }
0x4795   :  { %v3753_v13 = vsel %vm3740_vm15, %v3751_v22, -1e+09 }
0x4796   :  { %v3754_v16 = vsel %vm674_vm8, %v3753_v13, -inf }
0x4797   :  { %3755 = vmax.xlane.f32.xlu2 %v3754_v16 }
0x480a   :  { %v3756_v3 = vpop.xlane.xlu2 %3755 }
0x480b   :  { %v3757_v37 = vsub.f32 %v3753_v13, %v3756_v3 }
0x480d   :  { %v3758_v31 = vmul.f32 1.442695, %v3757_v37 }
0x480f   :  { %4287 = vpow2.f32 %v3758_v31 }
0x4815   :  { %v4288_v33 = vpop.eup %4287 }
0x4816   :  { %v3760_v56 = vsel %vm674_vm8, %v4288_v33, 0.0 }
0x4817   :  { %3761 = vadd.xlane.f32.xlu0 %v3760_v56 }
0x488a   :  { %v3762_v46 = vpop.xlane.xlu0 %3761 }
0x488b   :  { %4289 = vrcp.f32 %v3762_v46  ;;  %v3774_v17 = vand.u32 2147483648, %v3762_v46  ;;  %v3772_v6 = vand.u32 2147483647, %v3762_v46  ;;  %vm3768_vm11 = vweird.f32 %v3762_v46 }
0x488d   :  { %v3775_v44 = vor.u32 1.1754944e-38, %v3774_v17  ;;  %vm3773_vm13 = vcmp.eq.f32.partialorder %v3772_v6, 8.507059e+37 }
0x4891   :  { %v4290_v14 = vpop.eup %4289 }
0x4892   :  { %v3764_v60 = vmul.f32 %v4290_v14, %v3762_v46  ;;  %vm3769_vm3 = vweird.f32 %v4290_v14 }
0x4893   :  { %vm3770_vm12 = vmor %vm3768_vm11, %vm3769_vm3 }
0x4894   :  { %v3765_v59 = vsub.f32 1.0, %v3764_v60 }
0x4896   :  { %v3766_v42 = vmul.f32 %v4290_v14, %v3765_v59 }
0x4898   :  { %v3767_v49 = vadd.f32 %v4290_v14, %v3766_v42 }
0x489a   :  { %v3771_v62 = vsel %vm3770_vm12, %v4290_v14, %v3767_v49 }
0x489b   :  { %v3776_v5 = vsel %vm3773_vm13, %v3775_v44, %v3771_v62 }
0x489c   :  { %v3777_v10 = vmul.f32 %v4288_v33, %v3776_v5 }
0x489e   :  { %v3778_v45 = vsel %vm674_vm8, %v3777_v10, -inf }
0x489f   :  { %3779 = vmax.xlane.f32.xlu1 %v3778_v45 }
0x4912   :  { %v6022_v7 = vpop.xlane.xlu1 %3779 }
0x4913   :  { %vm3781_vm9 = vcmp.ge.f32.partialorder %v3777_v10, %v6022_v7 }
0x4914   :  { %v3782_v39 = vsel %vm3781_vm9, %v4949_v36, 8.0 }
0x4915   :  { %v3783_v54 = vsel %vm674_vm8, %v3782_v39, inf }
0x4916   :  { %3784 = vmin.xlane.f32.xlu2 %v3783_v54 }
0x4989   :  { %v3785_v34 = vpop.xlane.xlu2 %3784 }
0x498a   :  { %vm4022_vm14 = vcmp.lt.s32.totalorder %v3785_v34, 0  ;;  %v4023_v63 = vceil.f32 %v3785_v34  ;;  %v4024_v23 = vfloor.f32 %v3785_v34 }
0x498c   :  { %v4025_v24 = vsel %vm4022_vm14, %v4023_v63, %v4024_v23 }
0x498d   :  { %v4026_v25 = vcvt.f32.s32 %v4025_v24 }
0x498f   :  { %vm3789_vm0 = vcmp.eq.s32.totalorder %v4851_v0, %v4026_v25  ;;  %v3826_v43 = vsel %vm3825_vm2, %v4026_v25, %v5913_v12  ;;  %vm3804_vm7 = vcmp.ne.s32.totalorder %v4026_v25, 0 }
0x4990   :  { %v3985_v32 = vsel %vm3789_vm0, 1.0, %v6125_v29  ;;  %3828 = vst.msk [vmem:[#allocation3] sm:$0x3] %vm3827_vm5, %v3826_v43 }
0x4991   :  { %v3792_v36 = vmul.f32 %v3985_v32, %v5961_v55  ;;  %v3796_v9 = vmul.f32 %v3985_v32, %v5953_v11  ;;  %v3805_v8 = vsub.f32 1.0, %v3985_v32 }
0x4993   :  { %v3793_v30 = vsel %vm674_vm8, %v3792_v36, 0.0  ;;  %v3797_v57 = vsel %vm674_vm8, %v3796_v9, 0.0  ;;  %v3806_v38 = vmul.f32 %v3805_v8, %v5953_v11 }
0x4994   :  { %3794 = vadd.xlane.f32.xlu2 %v3793_v30 }
0x499c   :  { %3798 = vadd.xlane.f32.xlu2 %v3797_v57 }
0x4a07   :  { %v3795_v41 = vpop.xlane.xlu2 %3794 }
0x4a0f   :  { %v3799_v35 = vpop.xlane.xlu2 %3798 }
0x4a10   :  { %v3800_v1 = vsub.f32 %v3795_v41, %v3799_v35  ;;  %v3802_v61 = vsub.f32 %v3799_v35, %v3795_v41 }
0x4a12   :  { %v3801_v12 = vmax.f32 %v3800_v1, 0.0  ;;  %v3803_v18 = vmax.f32 %v3802_v61, 0.0 }
0x4a14   :  { %v3807_v26 = vmul.f32 %v3985_v32, %v3803_v18  ;;  %v3986_v20 = vadd.f32 -1.0, %v3801_v12 }
0x4a16   :  { %v3808_v55 = vadd.f32 %v3807_v26, %v3806_v38 }
0x4a18   :  { %v3810_v4 = vsel %vm441_vm4, %v3986_v20, %v3808_v55 }
0x4a19   :  { %v3814_v27 = vsel %vm3804_vm7, %v3810_v4, %v3811_v47 }
0x4a1a   :  { %v3815_v50 = vand.u32 2147483647, %v3814_v27 }
0x4a1b   :  { %4408 = shalt.err (!%p4405_p4)
}
0x4a1c   :  { %3840 = dma.vmem_to_hbm [thread:$0]  %s3836_s9, 32, %s3838_s13, [#allocation4]   ;;  %v3816_v0 = vsel %vm674_vm8, %v3815_v50, -inf  ;;  %vm427_vm4 = vcmask 156672   ;;  %4291 = vlog2.f32 %v5116_v21  ;;  %v6129_v58 = vld [vmem:[#allocation23_spill] sm:$0xff]  ;;  %vm1415_vm1 = vcmp.eq.f32.partialorder %v5338_v19, 0.0 }
0x4a1d   :  { %3817 = vmax.xlane.f32.xlu2 %v3816_v0  ;;  %v428_v11 = vsel %vm427_vm4, %v4767_v48, 0.0  ;;  %4293 = vlog2.f32 %v6129_v58  ;;  %v6130_v51 = vld [vmem:[#allocation24_spill] sm:$0xff]  ;;  %v6131_v22 = vld [vmem:[#allocation25_spill] sm:$0xff]  ;;  %v3922_v13 = vsel %vm1415_vm1, 1.0, %v6125_v29  ;;  %v6132_v16 = vld [vmem:[#allocation26_spill] sm:$0xff]  ;;  %vm2377_vm8 = vcmp.eq.f32.partialorder %v5723_v53, 0.0 }
0x4a1e   :  { %4295 = vlog2.f32 %v5362_v40  ;;  %vm933_vm6 = vcmp.eq.f32.partialorder %v6130_v51, 0.0  ;;  %vm1896_vm10 = vcmp.eq.f32.partialorder %v6131_v22, 0.0  ;;  %v1418_v37 = vsub.f32 1.0, %v3922_v13  ;;  %v431_v39 = vld [vmem:[#allocation2] sm:$0x1] }
0x4a1f   :  { %4297 = vlog2.f32 %v6132_v16  ;;  %v3909_v3 = vsel %vm933_vm6, 1.0, %v6125_v29  ;;  %v3935_v21 = vsel %vm1896_vm10, 1.0, %v6125_v29  ;;  %vm2858_vm15 = vcmp.eq.f32.partialorder %v5875_v52, 0.0 }
0x4a20   :  { %4299 = vlog2.f32 %v5753_v28  ;;  %v3948_v31 = vsel %vm2377_vm8, 1.0, %v6125_v29  ;;  %v936_v33 = vsub.f32 1.0, %v3909_v3  ;;  %v1899_v46 = vsub.f32 1.0, %v3935_v21 }
0x4a21   :  { %4301 = vlog2.f32 %v5901_v2  ;;  %vm3339_vm3 = vcmp.eq.f32.partialorder %v5999_v15, 0.0  ;;  %v3961_v14 = vsel %vm2858_vm15, 1.0, %v6125_v29  ;;  %v2380_v17 = vsub.f32 1.0, %v3948_v31 }
0x4a22   :  { %v4292_v48 = vpop.eup %4291  ;;  %v3974_v52 = vsel %vm3339_vm3, 1.0, %v6125_v29  ;;  %4303 = vlog2.f32 %v6022_v7  ;;  %v2861_v44 = vsub.f32 1.0, %v3961_v14  ;;  %v432_v7 = vmul.f32 8.0, %v431_v39 }
0x4a23   :  { %v4294_v19 = vpop.eup %4293  ;;  %v1383_v56 = vmul.f32 0.6931472, %v4292_v48  ;;  %v3342_v45 = vsub.f32 1.0, %v3974_v52  ;;  %vm437_vm12 = vcmask 1024  }
0x4a24   :  { %v4296_v40 = vpop.eup %4295  ;;  %v901_v60 = vmul.f32 0.6931472, %v4294_v19  ;;  %v434_v35 = vperm.slane %v432_v7, 0 }
0x4a25   :  { %429 = vadd.xlane.f32.xlu2 %v428_v11  ;;  %v4298_v53 = vpop.eup %4297  ;;  %v1419_v59 = vmul.f32 %v1418_v37, %v1383_v56  ;;  %v1864_v28 = vmul.f32 0.6931472, %v4296_v40 }
0x4a26   :  { %v4300_v42 = vpop.eup %4299  ;;  %v937_v6 = vmul.f32 %v936_v33, %v901_v60  ;;  %v2345_v2 = vmul.f32 0.6931472, %v4298_v53 }
0x4a27   :  { %v1900_v49 = vmul.f32 %v1899_v46, %v1864_v28  ;;  %v4302_v62 = vpop.eup %4301  ;;  %v2826_v15 = vmul.f32 0.6931472, %v4300_v42 }
0x4a28   :  { %v1420_v5 = vadd.f32 %v1419_v59, %v937_v6  ;;  %v2381_v10 = vmul.f32 %v2380_v17, %v2345_v2  ;;  %v3307_v63 = vmul.f32 0.6931472, %v4302_v62  ;;  %v4304_v23 = vpop.eup %4303 }
0x4a29   :  { %v2862_v34 = vmul.f32 %v2861_v44, %v2826_v15  ;;  %v3788_v30 = vmul.f32 0.6931472, %v4304_v23 }
0x4a2a   :  { %v1901_v54 = vadd.f32 %v1900_v49, %v1420_v5  ;;  %v3343_v43 = vmul.f32 %v3342_v45, %v3307_v63 }
0x4a2c   :  { %v2382_v25 = vadd.f32 %v2381_v10, %v1901_v54 }
0x4a2e   :  { %v2863_v36 = vadd.f32 %v2862_v34, %v2382_v25 }
0x4a30   :  { %v3344_v57 = vadd.f32 %v3343_v43, %v2863_v36 }
0x4a90   :  { %v3818_v24 = vpop.xlane.xlu2 %3817 }
0x4a91   :  { %vm3819_vm11 = vcmp.eq.f32.partialorder %v3818_v24, 0.0 }
0x4a92   :  { %v3987_v32 = vsel %vm3819_vm11, 1.0, %v6125_v29 }
0x4a93   :  { %v3822_v9 = vsub.f32 1.0, %v3987_v32 }
0x4a95   :  { %v3823_v41 = vmul.f32 %v3822_v9, %v3788_v30 }
0x4a97   :  { %v3824_v8 = vadd.f32 %v3823_v41, %v3344_v57 }
0x4a98   :  { %v430_v1 = vpop.xlane.xlu2 %429 }
0x4a99   :  { %v436_v61 = vadd.f32 %v434_v35, %v430_v1  ;;  %3829 = vst.msk [vmem:[%s4622_s27] sm:$0x3] %vm437_vm12, %v3824_v8 }
0x4a9b   :  { %438 = vst.msk [vmem:[%s4627_s30] sm:$0x3] %vm437_vm12, %v436_v61 }
0x4a9c   :  { %4409 = dma.done.wait [#allocation4], 32  }
0x4a9d   :  { %4410 = vsyncadd [#allocation4], 4294967264 }
0x4a9e   :  { %3853 = vsyncpa [#allocation4], 1 }

</bundles_post_ra>
